<compile_context>
chip_gen: v5e
topology: v5e:2x2
jax: 0.10.0
libtpu: 0.0.40
codegen_flags: <defaults>
</compile_context>

<pallas_src>
import functools
import math

import jax
import jax.numpy as jnp
from jax import lax
from jax.experimental import pallas as pl
from jax.experimental.pallas import tpu as pltpu


# ---------------------------------------------------------------------------
# In-kernel math helpers.
# ---------------------------------------------------------------------------
# XLA-style float32 rational approximation of erf (matches erf-based GELU
# within f32 precision).
_ERF_ALPHA = (-2.72614225801306e-10, 2.77068142495902e-08, -2.10102402082508e-06,
              -5.69250639462346e-05, -7.34990630326855e-04, -2.95459980854025e-03,
              -1.60960333262415e-02)
_ERF_BETA = (-1.45660718464996e-05, -2.13374055278905e-04, -1.68282697438203e-03,
             -7.37332916720468e-03, -1.42647390514189e-02)


def _erf(x):
    x = jnp.clip(x, -4.0, 4.0)
    x2 = x * x
    p = jnp.full_like(x2, _ERF_ALPHA[0])
    for c in _ERF_ALPHA[1:]:
        p = p * x2 + c
    q = jnp.full_like(x2, _ERF_BETA[0])
    for c in _ERF_BETA[1:]:
        q = q * x2 + c
    # EUP approximate reciprocal + one Newton step (~full f32 precision)
    # instead of a VALU-hogging full-precision divide.
    r = pl.reciprocal(q, approx=True)
    r = r * (2.0 - q * r)
    return x * p * r


def _gelu_exact(x):
    return 0.5 * x * (1.0 + _erf(x * 0.7071067811865476))


# ---------------------------------------------------------------------------
# The GatedAttentionUnit kernel (one batch tile per grid step).
# ---------------------------------------------------------------------------
def _gau_kernel(x_ref, row_ref, col_ref, seg_ref, segt_ref, agg_ref,
                w1_dw, w1_pw, w2_dw, w2_pw, wo_dw, owc_pw,
                out_ref, *, k, H, W, num_groups):
    C, N = x_ref.shape            # N = b_tile * H * W  (lane-fused batch)
    out_c = out_ref.shape[0]
    b_tile = seg_ref.shape[1]
    HW = H * W
    gs = C // num_groups
    inv_n = 1.0 / (gs * HW)

    x = x_ref[...].astype(jnp.float32)   # (C, N) lane-dense slab
    row = row_ref[...]                   # (1, N) int32 : pixel row within image
    col = col_ref[...]                   # (1, N) int32 : pixel col within image
    seg = seg_ref[...]                   # (N, b_tile) image-membership (f32)
    segt = segt_ref[...]                 # (b_tile, N) transpose of seg
    agg = agg_ref[...]                   # (C, C)      group-membership (f32)

    # ---- boundary masks, cached per (sy, sx) and shared by every branch.
    mask_cache = {}

    def get_mask(sy, sx):
        key = (sy, sx)
        if key not in mask_cache:
            mask_cache[key] = ((row + sy >= 0) & (row + sy < H) &
                               (col + sx >= 0) & (col + sx < W))
        return mask_cache[key]

    # ---- shifted + masked taps of a feature slab, cached per (sy, sx).
    #      (x's taps are shared between the 3x3 w1 and 5x5 w2 depthwise convs.)
    def make_tap_getter(feats):
        cache = {}

        def tap(sy, sx):
            key = (sy, sx)
            if key not in cache:
                d = sy * W + sx
                if d == 0:
                    cache[key] = feats
                else:
                    cache[key] = jnp.where(get_mask(sy, sx),
                                           pltpu.roll(feats, shift=(-d) % N,
                                                      axis=1),
                                           0.0)
            return cache[key]
        return tap

    # ---- kk x kk depthwise conv on the flattened (C, N) slab.
    #      dw_ref is packed as [weights (kk*kk) | dw_b | gn_w | gn_b].
    def depthwise(tap, dw_ref, kk, pad):
        wts = dw_ref[...]
        acc = None
        for dy in range(kk):
            for dx in range(kk):
                sy, sx = dy - pad, dx - pad
                idx = dy * kk + dx
                contrib = tap(sy, sx) * wts[:, idx:idx + 1]
                acc = contrib if acc is None else acc + contrib
        kk2 = kk * kk
        bias = wts[:, kk2:kk2 + 1]
        gn_w = wts[:, kk2 + 1:kk2 + 2]
        gn_b = wts[:, kk2 + 2:kk2 + 3]
        return acc + bias, gn_w, gn_b

    # ---- GroupNorm(num_groups) with lane-fused batch:
    #      one segment-moment matmul, one group-aggregation matmul,
    #      one broadcast matmul. No per-channel loops.
    def group_norm(y, gn_w, gn_b):
        mom = jnp.dot(jnp.concatenate([y, y * y], axis=0), seg,
                      preferred_element_type=jnp.float32)        # (2C, b)
        ch = jnp.concatenate([mom[:C], mom[C:]], axis=1)         # (C, 2b)
        grp = jnp.dot(agg, ch, preferred_element_type=jnp.float32)
        mean = grp[:, :b_tile] * inv_n                           # (C, b)
        var = grp[:, b_tile:] * inv_n - mean * mean              # biased (PT GN)
        rstd = lax.rsqrt(var + 1e-5)
        scale = rstd * gn_w                                      # (C, b)
        shift = gn_b - mean * scale
        full = jnp.dot(jnp.concatenate([scale, shift], axis=0), segt,
                       preferred_element_type=jnp.float32)        # (2C, N)
        return y * full[:C] + full[C:]

    # ---- 1x1 conv == MXU matmul contracting over channels.
    #      pw_ref packed as [W | b].
    def pointwise(y, pw_ref):
        w = pw_ref[...]
        return (jnp.dot(w[:, :-1], y, preferred_element_type=jnp.float32)
                + w[:, -1:])

    x_tap = make_tap_getter(x)

    # w1: DepthWiseConv2d(in_c, in_c, k, padding=k//2) -> Sigmoid
    y1, g1w, g1b = depthwise(x_tap, w1_dw, k, k // 2)
    h1 = jax.nn.sigmoid(pointwise(group_norm(y1, g1w, g1b), w1_pw))

    # w2: DepthWiseConv2d(in_c, in_c, k+2, padding=(k+2)//2) -> GELU
    y2, g2w, g2b = depthwise(x_tap, w2_dw, k + 2, (k + 2) // 2)
    h2 = _gelu_exact(pointwise(group_norm(y2, g2w, g2b), w2_pw))

    # wo: DepthWiseConv2d(in_c, out_c, k) (module default padding=1) -> GELU
    g = h1 * h2
    g_tap = make_tap_getter(g)
    yo, gow, gob = depthwise(g_tap, wo_dw, k, 1)
    yo = group_norm(yo, gow, gob)

    # Fused wo-pointwise + cw 1x1 conv: one block-diagonal MXU call.
    # owc_pw: (2*out_c, 2C+1) = [[W_o, 0, b_o], [0, W_cw, b_cw]]
    stacked = jnp.concatenate([yo, x], axis=0)                   # (2C, N)
    w = owc_pw[...]
    z = (jnp.dot(w[:, :-1], stacked, preferred_element_type=jnp.float32)
         + w[:, -1:])                                            # (2*out_c, N)
    ho = _gelu_exact(z[:out_c])
    cw = z[out_c:]

    out_ref[...] = (ho + cw).astype(out_ref.dtype)


def _zero_index_map(*_, ndim):
    return (0,) * ndim


def gated_attention_unit(x, flat_params, c_out, kernel_size=3, num_groups=4,
                         b_tile=None):
    B, C, H, W = x.shape
    assert C % num_groups == 0
    # The wo branch uses the module's default padding=1; spatial size is only
    # preserved (and the kernel shape-correct) for kernel_size == 3.
    assert kernel_size == 3
    HW = H * W
    if b_tile is None:
        b_tile = B                 # fuse the whole batch into the lane axis
    assert B % b_tile == 0
    nt = B // b_tile
    N = b_tile * HW

    # Lane-fused layout: (num_tiles, C, b_tile*HW); image b occupies lanes
    # [b*HW, (b+1)*HW).  Last dim is a multiple of 128 -> lane-dense stores.
    x_flat = (x.reshape(nt, b_tile, C, HW)
               .transpose(0, 2, 1, 3)
               .reshape(nt, C, N))

    pos = jnp.arange(HW, dtype=jnp.int32)
    row_idx = jnp.tile(pos // W, (b_tile,)).reshape(1, N)
    col_idx = jnp.tile(pos % W, (b_tile,)).reshape(1, N)
    seg = (jnp.arange(N, dtype=jnp.int32)[:, None] // HW
           == jnp.arange(b_tile, dtype=jnp.int32)[None, :]).astype(jnp.float32)
    segt = seg.T
    gs = C // num_groups
    chan = jnp.arange(C, dtype=jnp.int32)
    agg = (chan[:, None] // gs == chan[None, :] // gs).astype(jnp.float32)
    const_inputs = [row_idx, col_idx, seg, segt, agg]

    kern = functools.partial(_gau_kernel, k=kernel_size, H=H, W=W,
                             num_groups=num_groups)

    def full_spec(a):
        return pl.BlockSpec(a.shape,
                            functools.partial(_zero_index_map, ndim=a.ndim))

    in_specs = ([pl.BlockSpec((None, C, N), lambda t: (t, 0, 0))]
                + [full_spec(a) for a in const_inputs]
                + [full_spec(p) for p in flat_params])

    out = pl.pallas_call(
        kern,
        out_shape=jax.ShapeDtypeStruct((nt, c_out, N), x.dtype),
        grid_spec=pltpu.PrefetchScalarGridSpec(
            num_scalar_prefetch=0,
            grid=(nt,),
            in_specs=in_specs,
            out_specs=pl.BlockSpec((None, c_out, N), lambda t: (t, 0, 0)),
        ),
        compiler_params=pltpu.CompilerParams(
            dimension_semantics=("parallel",)),
    )(x_flat, *const_inputs, *flat_params)

    return (out.reshape(nt, c_out, b_tile, HW)
               .transpose(0, 2, 1, 3)
               .reshape(B, c_out, H, W))


# ---------------------------------------------------------------------------
# Deterministic parameter construction (synthetic; no checkpoint loading).
# ---------------------------------------------------------------------------
def init_params(in_c, out_c, kernel_size):
    key = jax.random.PRNGKey(0)
    keys = iter(jax.random.split(key, 32))

    def rnd(shape, scale):
        return scale * jax.random.normal(next(keys), shape, jnp.float32)

    def branch(k, co):
        return dict(
            dw_w=rnd((in_c, 1, k, k), 1.0 / math.sqrt(k * k)),
            dw_b=rnd((in_c,), 0.1),
            gn_w=1.0 + rnd((in_c,), 0.1),
            gn_b=rnd((in_c,), 0.1),
            pw_w=rnd((co, in_c, 1, 1), 1.0 / math.sqrt(in_c)),
            pw_b=rnd((co,), 0.1),
        )

    return dict(
        w1=branch(kernel_size, in_c),
        w2=branch(kernel_size + 2, in_c),
        wo=branch(kernel_size, out_c),
        cw_w=rnd((out_c, in_c, 1, 1), 1.0 / math.sqrt(in_c)),
        cw_b=rnd((out_c,), 0.1),
    )


def flatten_for_kernel(p, kernel_size):
    """Pack the ~20 small parameter arrays into 6 slabs."""
    def dw_slab(b, k):
        in_c = b['dw_w'].shape[0]
        return jnp.concatenate([b['dw_w'].reshape(in_c, k * k),
                                b['dw_b'].reshape(in_c, 1),
                                b['gn_w'].reshape(in_c, 1),
                                b['gn_b'].reshape(in_c, 1)], axis=1)

    def pw_slab(b):
        return jnp.concatenate([b['pw_w'][:, :, 0, 0],
                                b['pw_b'].reshape(-1, 1)], axis=1)

    # Fused wo-pointwise + cw 1x1 conv: block-diagonal weight + biases.
    wo_w = p['wo']['pw_w'][:, :, 0, 0]
    wo_b = p['wo']['pw_b'].reshape(-1, 1)
    cw_w = p['cw_w'][:, :, 0, 0]
    cw_b = p['cw_b'].reshape(-1, 1)
    out_c, in_c = wo_w.shape
    z = jnp.zeros((out_c, in_c), jnp.float32)
    owc = jnp.concatenate([
        jnp.concatenate([wo_w, z, wo_b], axis=1),
        jnp.concatenate([z, cw_w, cw_b], axis=1)], axis=0)  # (2*out_c, 2C+1)

    return [dw_slab(p['w1'], kernel_size), pw_slab(p['w1']),
            dw_slab(p['w2'], kernel_size + 2), pw_slab(p['w2']),
            dw_slab(p['wo'], kernel_size), owc]


# ---------------------------------------------------------------------------
# Pure-JAX reference (mirrors the PyTorch module) for a numerical check.
# ---------------------------------------------------------------------------
def _ref_dwsep(x, b, k, pad):
    C = x.shape[1]
    y = lax.conv_general_dilated(
        x, b['dw_w'], (1, 1), [(pad, pad), (pad, pad)],
        dimension_numbers=('NCHW', 'OIHW', 'NCHW'), feature_group_count=C)
    y = y + b['dw_b'][None, :, None, None]
    B_, C_, H_, W_ = y.shape
    yg = y.reshape(B_, 4, C_ // 4, H_, W_)
    mean = yg.mean(axis=(2, 3, 4), keepdims=True)
    var = yg.var(axis=(2, 3, 4), keepdims=True)
    yn = ((yg - mean) * lax.rsqrt(var + 1e-5)).reshape(B_, C_, H_, W_)
    yn = yn * b['gn_w'][None, :, None, None] + b['gn_b'][None, :, None, None]
    z = jnp.einsum('bchw,oc->bohw', yn, b['pw_w'][:, :, 0, 0])
    return z + b['pw_b'][None, :, None, None]


def ref_forward(x, p, k):
    gelu = lambda t: jax.nn.gelu(t, approximate=False)
    x1 = jax.nn.sigmoid(_ref_dwsep(x, p['w1'], k, k // 2))
    x2 = gelu(_ref_dwsep(x, p['w2'], k + 2, (k + 2) // 2))
    ho = gelu(_ref_dwsep(x1 * x2, p['wo'], k, 1))
    cw = (jnp.einsum('bchw,oc->bohw', x, p['cw_w'][:, :, 0, 0])
          + p['cw_b'][None, :, None, None])
    return ho + cw


if __name__ == "__main__":
    B, C_in, C_out, H, W = 2, 4, 8, 16, 16
    kernel_size = 3

    params = init_params(C_in, C_out, kernel_size)
    x = jax.random.normal(jax.random.PRNGKey(0), (B, C_in, H, W), jnp.float32)

    flat = flatten_for_kernel(params, kernel_size)
    out = gated_attention_unit(x, flat, C_out, kernel_size)
    out = jax.block_until_ready(out)

    ref = ref_forward(x, params, kernel_size)
    err = float(jnp.max(jnp.abs(out - ref)))
    assert out.shape == (B, C_out, H, W)
    assert err < 2e-3, f"max abs err {err}"
    print("KERNEL_OK")
</pallas_src>

<mosaic_0001>
module attributes {stable_mosaic.version = 11 : i64} {
  func.func @_gau_kernel(%arg0: i32, %arg1: memref<1x4x512xf32, #tpu.memory_space<vmem>>, %arg2: memref<1x512xi32, #tpu.memory_space<vmem>>, %arg3: memref<1x512xi32, #tpu.memory_space<vmem>>, %arg4: memref<512x2xf32, #tpu.memory_space<vmem>>, %arg5: memref<2x512xf32, #tpu.memory_space<vmem>>, %arg6: memref<4x4xf32, #tpu.memory_space<vmem>>, %arg7: memref<4x12xf32, #tpu.memory_space<vmem>>, %arg8: memref<4x5xf32, #tpu.memory_space<vmem>>, %arg9: memref<4x28xf32, #tpu.memory_space<vmem>>, %arg10: memref<4x5xf32, #tpu.memory_space<vmem>>, %arg11: memref<4x12xf32, #tpu.memory_space<vmem>>, %arg12: memref<16x9xf32, #tpu.memory_space<vmem>>, %arg13: memref<1x8x512xf32, #tpu.memory_space<vmem>>) attributes {dimension_semantics = [#tpu.dimension_semantics<parallel>], iteration_bounds = array<i64: 1>, scalar_prefetch = 0 : i64, scratch_operands = 0 : i64, tpu.core_type = #tpu.core_type<tc>, window_params = [{transform_indices = @transform_0, window_bounds = array<i64: 1, 4, 512>}, {pipeline_mode = #tpu.pipeline_mode<synchronous>, transform_indices = @transform_1, window_bounds = array<i64: 1, 512>}, {pipeline_mode = #tpu.pipeline_mode<synchronous>, transform_indices = @transform_2, window_bounds = array<i64: 1, 512>}, {pipeline_mode = #tpu.pipeline_mode<synchronous>, transform_indices = @transform_3, window_bounds = array<i64: 512, 2>}, {pipeline_mode = #tpu.pipeline_mode<synchronous>, transform_indices = @transform_4, window_bounds = array<i64: 2, 512>}, {pipeline_mode = #tpu.pipeline_mode<synchronous>, transform_indices = @transform_5, window_bounds = array<i64: 4, 4>}, {pipeline_mode = #tpu.pipeline_mode<synchronous>, transform_indices = @transform_6, window_bounds = array<i64: 4, 12>}, {pipeline_mode = #tpu.pipeline_mode<synchronous>, transform_indices = @transform_7, window_bounds = array<i64: 4, 5>}, {pipeline_mode = #tpu.pipeline_mode<synchronous>, transform_indices = @transform_8, window_bounds = array<i64: 4, 28>}, {pipeline_mode = #tpu.pipeline_mode<synchronous>, transform_indices = @transform_9, window_bounds = array<i64: 4, 5>}, {pipeline_mode = #tpu.pipeline_mode<synchronous>, transform_indices = @transform_10, window_bounds = array<i64: 4, 12>}, {pipeline_mode = #tpu.pipeline_mode<synchronous>, transform_indices = @transform_11, window_bounds = array<i64: 16, 9>}, {transform_indices = @transform_12, window_bounds = array<i64: 1, 8, 512>}]} {
    %c0 = arith.constant 0 : index
    %c0_0 = arith.constant 0 : index
    %c0_1 = arith.constant 0 : index
    %0 = vector.load %arg1[%c0, %c0_0, %c0_1] : memref<1x4x512xf32, #tpu.memory_space<vmem>>, vector<1x4x512xf32>
    %1 = vector.shape_cast %0 : vector<1x4x512xf32> to vector<4x512xf32>
    %c0_2 = arith.constant 0 : index
    %c0_3 = arith.constant 0 : index
    %2 = vector.load %arg2[%c0_2, %c0_3] : memref<1x512xi32, #tpu.memory_space<vmem>>, vector<1x512xi32>
    %c0_4 = arith.constant 0 : index
    %c0_5 = arith.constant 0 : index
    %3 = vector.load %arg3[%c0_4, %c0_5] : memref<1x512xi32, #tpu.memory_space<vmem>>, vector<1x512xi32>
    %c0_6 = arith.constant 0 : index
    %c0_7 = arith.constant 0 : index
    %4 = vector.load %arg4[%c0_6, %c0_7] : memref<512x2xf32, #tpu.memory_space<vmem>>, vector<512x2xf32>
    %c0_8 = arith.constant 0 : index
    %c0_9 = arith.constant 0 : index
    %5 = vector.load %arg5[%c0_8, %c0_9] : memref<2x512xf32, #tpu.memory_space<vmem>>, vector<2x512xf32>
    %c0_10 = arith.constant 0 : index
    %c0_11 = arith.constant 0 : index
    %6 = vector.load %arg6[%c0_10, %c0_11] : memref<4x4xf32, #tpu.memory_space<vmem>>, vector<4x4xf32>
    %c0_12 = arith.constant 0 : index
    %c0_13 = arith.constant 0 : index
    %7 = vector.load %arg7[%c0_12, %c0_13] : memref<4x12xf32, #tpu.memory_space<vmem>>, vector<4x12xf32>
    %c-1_i32 = arith.constant -1 : i32
    %8 = vector.broadcast %c-1_i32 : i32 to vector<1x512xi32>
    %9 = arith.addi %2, %8 : vector<1x512xi32>
    %c0_i32 = arith.constant 0 : i32
    %10 = vector.broadcast %c0_i32 : i32 to vector<1x512xi32>
    %11 = arith.cmpi sge, %9, %10 : vector<1x512xi32>
    %c-1_i32_14 = arith.constant -1 : i32
    %12 = vector.broadcast %c-1_i32_14 : i32 to vector<1x512xi32>
    %13 = arith.addi %2, %12 : vector<1x512xi32>
    %c16_i32 = arith.constant 16 : i32
    %14 = vector.broadcast %c16_i32 : i32 to vector<1x512xi32>
    %15 = arith.cmpi slt, %13, %14 : vector<1x512xi32>
    %16 = arith.andi %11, %15 : vector<1x512xi1>
    %c-1_i32_15 = arith.constant -1 : i32
    %17 = vector.broadcast %c-1_i32_15 : i32 to vector<1x512xi32>
    %18 = arith.addi %3, %17 : vector<1x512xi32>
    %c0_i32_16 = arith.constant 0 : i32
    %19 = vector.broadcast %c0_i32_16 : i32 to vector<1x512xi32>
    %20 = arith.cmpi sge, %18, %19 : vector<1x512xi32>
    %21 = arith.andi %16, %20 : vector<1x512xi1>
    %c-1_i32_17 = arith.constant -1 : i32
    %22 = vector.broadcast %c-1_i32_17 : i32 to vector<1x512xi32>
    %23 = arith.addi %3, %22 : vector<1x512xi32>
    %c16_i32_18 = arith.constant 16 : i32
    %24 = vector.broadcast %c16_i32_18 : i32 to vector<1x512xi32>
    %25 = arith.cmpi slt, %23, %24 : vector<1x512xi32>
    %26 = arith.andi %21, %25 : vector<1x512xi1>
    %c17_i32 = arith.constant 17 : i32
    %27 = tpu.dynamic_rotate %1 by %c17_i32 dim 1 : vector<4x512xf32>, i32 -> vector<4x512xf32>
    %cst = arith.constant 0.000000e+00 : f32
    %28 = vector.shape_cast %26 : vector<1x512xi1> to vector<1x512xi1>
    %29 = vector.broadcast %28 : vector<1x512xi1> to vector<4x512xi1>
    %30 = vector.broadcast %cst : f32 to vector<4x512xf32>
    %31 = arith.select %29, %27, %30 : vector<4x512xi1>, vector<4x512xf32>
    %32 = vector.extract_strided_slice %7 {offsets = [0, 0], sizes = [4, 1], strides = [1, 1]} : vector<4x12xf32> to vector<4x1xf32>
    %33 = vector.broadcast %32 : vector<4x1xf32> to vector<4x512xf32>
    %34 = arith.mulf %31, %33 : vector<4x512xf32>
    %c-1_i32_19 = arith.constant -1 : i32
    %35 = vector.broadcast %c-1_i32_19 : i32 to vector<1x512xi32>
    %36 = arith.addi %2, %35 : vector<1x512xi32>
    %c0_i32_20 = arith.constant 0 : i32
    %37 = vector.broadcast %c0_i32_20 : i32 to vector<1x512xi32>
    %38 = arith.cmpi sge, %36, %37 : vector<1x512xi32>
    %c-1_i32_21 = arith.constant -1 : i32
    %39 = vector.broadcast %c-1_i32_21 : i32 to vector<1x512xi32>
    %40 = arith.addi %2, %39 : vector<1x512xi32>
    %c16_i32_22 = arith.constant 16 : i32
    %41 = vector.broadcast %c16_i32_22 : i32 to vector<1x512xi32>
    %42 = arith.cmpi slt, %40, %41 : vector<1x512xi32>
    %43 = arith.andi %38, %42 : vector<1x512xi1>
    %c0_i32_23 = arith.constant 0 : i32
    %44 = vector.broadcast %c0_i32_23 : i32 to vector<1x512xi32>
    %45 = arith.addi %3, %44 : vector<1x512xi32>
    %c0_i32_24 = arith.constant 0 : i32
    %46 = vector.broadcast %c0_i32_24 : i32 to vector<1x512xi32>
    %47 = arith.cmpi sge, %45, %46 : vector<1x512xi32>
    %48 = arith.andi %43, %47 : vector<1x512xi1>
    %c0_i32_25 = arith.constant 0 : i32
    %49 = vector.broadcast %c0_i32_25 : i32 to vector<1x512xi32>
    %50 = arith.addi %3, %49 : vector<1x512xi32>
    %c16_i32_26 = arith.constant 16 : i32
    %51 = vector.broadcast %c16_i32_26 : i32 to vector<1x512xi32>
    %52 = arith.cmpi slt, %50, %51 : vector<1x512xi32>
    %53 = arith.andi %48, %52 : vector<1x512xi1>
    %c16_i32_27 = arith.constant 16 : i32
    %54 = tpu.dynamic_rotate %1 by %c16_i32_27 dim 1 : vector<4x512xf32>, i32 -> vector<4x512xf32>
    %cst_28 = arith.constant 0.000000e+00 : f32
    %55 = vector.shape_cast %53 : vector<1x512xi1> to vector<1x512xi1>
    %56 = vector.broadcast %55 : vector<1x512xi1> to vector<4x512xi1>
    %57 = vector.broadcast %cst_28 : f32 to vector<4x512xf32>
    %58 = arith.select %56, %54, %57 : vector<4x512xi1>, vector<4x512xf32>
    %59 = vector.extract_strided_slice %7 {offsets = [0, 1], sizes = [4, 1], strides = [1, 1]} : vector<4x12xf32> to vector<4x1xf32>
    %60 = vector.broadcast %59 : vector<4x1xf32> to vector<4x512xf32>
    %61 = arith.mulf %58, %60 : vector<4x512xf32>
    %62 = arith.addf %34, %61 : vector<4x512xf32>
    %c-1_i32_29 = arith.constant -1 : i32
    %63 = vector.broadcast %c-1_i32_29 : i32 to vector<1x512xi32>
    %64 = arith.addi %2, %63 : vector<1x512xi32>
    %c0_i32_30 = arith.constant 0 : i32
    %65 = vector.broadcast %c0_i32_30 : i32 to vector<1x512xi32>
    %66 = arith.cmpi sge, %64, %65 : vector<1x512xi32>
    %c-1_i32_31 = arith.constant -1 : i32
    %67 = vector.broadcast %c-1_i32_31 : i32 to vector<1x512xi32>
    %68 = arith.addi %2, %67 : vector<1x512xi32>
    %c16_i32_32 = arith.constant 16 : i32
    %69 = vector.broadcast %c16_i32_32 : i32 to vector<1x512xi32>
    %70 = arith.cmpi slt, %68, %69 : vector<1x512xi32>
    %71 = arith.andi %66, %70 : vector<1x512xi1>
    %c1_i32 = arith.constant 1 : i32
    %72 = vector.broadcast %c1_i32 : i32 to vector<1x512xi32>
    %73 = arith.addi %3, %72 : vector<1x512xi32>
    %c0_i32_33 = arith.constant 0 : i32
    %74 = vector.broadcast %c0_i32_33 : i32 to vector<1x512xi32>
    %75 = arith.cmpi sge, %73, %74 : vector<1x512xi32>
    %76 = arith.andi %71, %75 : vector<1x512xi1>
    %c1_i32_34 = arith.constant 1 : i32
    %77 = vector.broadcast %c1_i32_34 : i32 to vector<1x512xi32>
    %78 = arith.addi %3, %77 : vector<1x512xi32>
    %c16_i32_35 = arith.constant 16 : i32
    %79 = vector.broadcast %c16_i32_35 : i32 to vector<1x512xi32>
    %80 = arith.cmpi slt, %78, %79 : vector<1x512xi32>
    %81 = arith.andi %76, %80 : vector<1x512xi1>
    %c15_i32 = arith.constant 15 : i32
    %82 = tpu.dynamic_rotate %1 by %c15_i32 dim 1 : vector<4x512xf32>, i32 -> vector<4x512xf32>
    %cst_36 = arith.constant 0.000000e+00 : f32
    %83 = vector.shape_cast %81 : vector<1x512xi1> to vector<1x512xi1>
    %84 = vector.broadcast %83 : vector<1x512xi1> to vector<4x512xi1>
    %85 = vector.broadcast %cst_36 : f32 to vector<4x512xf32>
    %86 = arith.select %84, %82, %85 : vector<4x512xi1>, vector<4x512xf32>
    %87 = vector.extract_strided_slice %7 {offsets = [0, 2], sizes = [4, 1], strides = [1, 1]} : vector<4x12xf32> to vector<4x1xf32>
    %88 = vector.broadcast %87 : vector<4x1xf32> to vector<4x512xf32>
    %89 = arith.mulf %86, %88 : vector<4x512xf32>
    %90 = arith.addf %62, %89 : vector<4x512xf32>
    %c0_i32_37 = arith.constant 0 : i32
    %91 = vector.broadcast %c0_i32_37 : i32 to vector<1x512xi32>
    %92 = arith.addi %2, %91 : vector<1x512xi32>
    %c0_i32_38 = arith.constant 0 : i32
    %93 = vector.broadcast %c0_i32_38 : i32 to vector<1x512xi32>
    %94 = arith.cmpi sge, %92, %93 : vector<1x512xi32>
    %c0_i32_39 = arith.constant 0 : i32
    %95 = vector.broadcast %c0_i32_39 : i32 to vector<1x512xi32>
    %96 = arith.addi %2, %95 : vector<1x512xi32>
    %c16_i32_40 = arith.constant 16 : i32
    %97 = vector.broadcast %c16_i32_40 : i32 to vector<1x512xi32>
    %98 = arith.cmpi slt, %96, %97 : vector<1x512xi32>
    %99 = arith.andi %94, %98 : vector<1x512xi1>
    %c-1_i32_41 = arith.constant -1 : i32
    %100 = vector.broadcast %c-1_i32_41 : i32 to vector<1x512xi32>
    %101 = arith.addi %3, %100 : vector<1x512xi32>
    %c0_i32_42 = arith.constant 0 : i32
    %102 = vector.broadcast %c0_i32_42 : i32 to vector<1x512xi32>
    %103 = arith.cmpi sge, %101, %102 : vector<1x512xi32>
    %104 = arith.andi %99, %103 : vector<1x512xi1>
    %c-1_i32_43 = arith.constant -1 : i32
    %105 = vector.broadcast %c-1_i32_43 : i32 to vector<1x512xi32>
    %106 = arith.addi %3, %105 : vector<1x512xi32>
    %c16_i32_44 = arith.constant 16 : i32
    %107 = vector.broadcast %c16_i32_44 : i32 to vector<1x512xi32>
    %108 = arith.cmpi slt, %106, %107 : vector<1x512xi32>
    %109 = arith.andi %104, %108 : vector<1x512xi1>
    %c1_i32_45 = arith.constant 1 : i32
    %110 = tpu.dynamic_rotate %1 by %c1_i32_45 dim 1 : vector<4x512xf32>, i32 -> vector<4x512xf32>
    %cst_46 = arith.constant 0.000000e+00 : f32
    %111 = vector.shape_cast %109 : vector<1x512xi1> to vector<1x512xi1>
    %112 = vector.broadcast %111 : vector<1x512xi1> to vector<4x512xi1>
    %113 = vector.broadcast %cst_46 : f32 to vector<4x512xf32>
    %114 = arith.select %112, %110, %113 : vector<4x512xi1>, vector<4x512xf32>
    %115 = vector.extract_strided_slice %7 {offsets = [0, 3], sizes = [4, 1], strides = [1, 1]} : vector<4x12xf32> to vector<4x1xf32>
    %116 = vector.broadcast %115 : vector<4x1xf32> to vector<4x512xf32>
    %117 = arith.mulf %114, %116 : vector<4x512xf32>
    %118 = arith.addf %90, %117 : vector<4x512xf32>
    %119 = vector.extract_strided_slice %7 {offsets = [0, 4], sizes = [4, 1], strides = [1, 1]} : vector<4x12xf32> to vector<4x1xf32>
    %120 = vector.broadcast %119 : vector<4x1xf32> to vector<4x512xf32>
    %121 = arith.mulf %1, %120 : vector<4x512xf32>
    %122 = arith.addf %118, %121 : vector<4x512xf32>
    %c0_i32_47 = arith.constant 0 : i32
    %123 = vector.broadcast %c0_i32_47 : i32 to vector<1x512xi32>
    %124 = arith.addi %2, %123 : vector<1x512xi32>
    %c0_i32_48 = arith.constant 0 : i32
    %125 = vector.broadcast %c0_i32_48 : i32 to vector<1x512xi32>
    %126 = arith.cmpi sge, %124, %125 : vector<1x512xi32>
    %c0_i32_49 = arith.constant 0 : i32
    %127 = vector.broadcast %c0_i32_49 : i32 to vector<1x512xi32>
    %128 = arith.addi %2, %127 : vector<1x512xi32>
    %c16_i32_50 = arith.constant 16 : i32
    %129 = vector.broadcast %c16_i32_50 : i32 to vector<1x512xi32>
    %130 = arith.cmpi slt, %128, %129 : vector<1x512xi32>
    %131 = arith.andi %126, %130 : vector<1x512xi1>
    %c1_i32_51 = arith.constant 1 : i32
    %132 = vector.broadcast %c1_i32_51 : i32 to vector<1x512xi32>
    %133 = arith.addi %3, %132 : vector<1x512xi32>
    %c0_i32_52 = arith.constant 0 : i32
    %134 = vector.broadcast %c0_i32_52 : i32 to vector<1x512xi32>
    %135 = arith.cmpi sge, %133, %134 : vector<1x512xi32>
    %136 = arith.andi %131, %135 : vector<1x512xi1>
    %c1_i32_53 = arith.constant 1 : i32
    %137 = vector.broadcast %c1_i32_53 : i32 to vector<1x512xi32>
    %138 = arith.addi %3, %137 : vector<1x512xi32>
    %c16_i32_54 = arith.constant 16 : i32
    %139 = vector.broadcast %c16_i32_54 : i32 to vector<1x512xi32>
    %140 = arith.cmpi slt, %138, %139 : vector<1x512xi32>
    %141 = arith.andi %136, %140 : vector<1x512xi1>
    %c511_i32 = arith.constant 511 : i32
    %142 = tpu.dynamic_rotate %1 by %c511_i32 dim 1 : vector<4x512xf32>, i32 -> vector<4x512xf32>
    %cst_55 = arith.constant 0.000000e+00 : f32
    %143 = vector.shape_cast %141 : vector<1x512xi1> to vector<1x512xi1>
    %144 = vector.broadcast %143 : vector<1x512xi1> to vector<4x512xi1>
    %145 = vector.broadcast %cst_55 : f32 to vector<4x512xf32>
    %146 = arith.select %144, %142, %145 : vector<4x512xi1>, vector<4x512xf32>
    %147 = vector.extract_strided_slice %7 {offsets = [0, 5], sizes = [4, 1], strides = [1, 1]} : vector<4x12xf32> to vector<4x1xf32>
    %148 = vector.broadcast %147 : vector<4x1xf32> to vector<4x512xf32>
    %149 = arith.mulf %146, %148 : vector<4x512xf32>
    %150 = arith.addf %122, %149 : vector<4x512xf32>
    %c1_i32_56 = arith.constant 1 : i32
    %151 = vector.broadcast %c1_i32_56 : i32 to vector<1x512xi32>
    %152 = arith.addi %2, %151 : vector<1x512xi32>
    %c0_i32_57 = arith.constant 0 : i32
    %153 = vector.broadcast %c0_i32_57 : i32 to vector<1x512xi32>
    %154 = arith.cmpi sge, %152, %153 : vector<1x512xi32>
    %c1_i32_58 = arith.constant 1 : i32
    %155 = vector.broadcast %c1_i32_58 : i32 to vector<1x512xi32>
    %156 = arith.addi %2, %155 : vector<1x512xi32>
    %c16_i32_59 = arith.constant 16 : i32
    %157 = vector.broadcast %c16_i32_59 : i32 to vector<1x512xi32>
    %158 = arith.cmpi slt, %156, %157 : vector<1x512xi32>
    %159 = arith.andi %154, %158 : vector<1x512xi1>
    %c-1_i32_60 = arith.constant -1 : i32
    %160 = vector.broadcast %c-1_i32_60 : i32 to vector<1x512xi32>
    %161 = arith.addi %3, %160 : vector<1x512xi32>
    %c0_i32_61 = arith.constant 0 : i32
    %162 = vector.broadcast %c0_i32_61 : i32 to vector<1x512xi32>
    %163 = arith.cmpi sge, %161, %162 : vector<1x512xi32>
    %164 = arith.andi %159, %163 : vector<1x512xi1>
    %c-1_i32_62 = arith.constant -1 : i32
    %165 = vector.broadcast %c-1_i32_62 : i32 to vector<1x512xi32>
    %166 = arith.addi %3, %165 : vector<1x512xi32>
    %c16_i32_63 = arith.constant 16 : i32
    %167 = vector.broadcast %c16_i32_63 : i32 to vector<1x512xi32>
    %168 = arith.cmpi slt, %166, %167 : vector<1x512xi32>
    %169 = arith.andi %164, %168 : vector<1x512xi1>
    %c497_i32 = arith.constant 497 : i32
    %170 = tpu.dynamic_rotate %1 by %c497_i32 dim 1 : vector<4x512xf32>, i32 -> vector<4x512xf32>
    %cst_64 = arith.constant 0.000000e+00 : f32
    %171 = vector.shape_cast %169 : vector<1x512xi1> to vector<1x512xi1>
    %172 = vector.broadcast %171 : vector<1x512xi1> to vector<4x512xi1>
    %173 = vector.broadcast %cst_64 : f32 to vector<4x512xf32>
    %174 = arith.select %172, %170, %173 : vector<4x512xi1>, vector<4x512xf32>
    %175 = vector.extract_strided_slice %7 {offsets = [0, 6], sizes = [4, 1], strides = [1, 1]} : vector<4x12xf32> to vector<4x1xf32>
    %176 = vector.broadcast %175 : vector<4x1xf32> to vector<4x512xf32>
    %177 = arith.mulf %174, %176 : vector<4x512xf32>
    %178 = arith.addf %150, %177 : vector<4x512xf32>
    %c1_i32_65 = arith.constant 1 : i32
    %179 = vector.broadcast %c1_i32_65 : i32 to vector<1x512xi32>
    %180 = arith.addi %2, %179 : vector<1x512xi32>
    %c0_i32_66 = arith.constant 0 : i32
    %181 = vector.broadcast %c0_i32_66 : i32 to vector<1x512xi32>
    %182 = arith.cmpi sge, %180, %181 : vector<1x512xi32>
    %c1_i32_67 = arith.constant 1 : i32
    %183 = vector.broadcast %c1_i32_67 : i32 to vector<1x512xi32>
    %184 = arith.addi %2, %183 : vector<1x512xi32>
    %c16_i32_68 = arith.constant 16 : i32
    %185 = vector.broadcast %c16_i32_68 : i32 to vector<1x512xi32>
    %186 = arith.cmpi slt, %184, %185 : vector<1x512xi32>
    %187 = arith.andi %182, %186 : vector<1x512xi1>
    %c0_i32_69 = arith.constant 0 : i32
    %188 = vector.broadcast %c0_i32_69 : i32 to vector<1x512xi32>
    %189 = arith.addi %3, %188 : vector<1x512xi32>
    %c0_i32_70 = arith.constant 0 : i32
    %190 = vector.broadcast %c0_i32_70 : i32 to vector<1x512xi32>
    %191 = arith.cmpi sge, %189, %190 : vector<1x512xi32>
    %192 = arith.andi %187, %191 : vector<1x512xi1>
    %c0_i32_71 = arith.constant 0 : i32
    %193 = vector.broadcast %c0_i32_71 : i32 to vector<1x512xi32>
    %194 = arith.addi %3, %193 : vector<1x512xi32>
    %c16_i32_72 = arith.constant 16 : i32
    %195 = vector.broadcast %c16_i32_72 : i32 to vector<1x512xi32>
    %196 = arith.cmpi slt, %194, %195 : vector<1x512xi32>
    %197 = arith.andi %192, %196 : vector<1x512xi1>
    %c496_i32 = arith.constant 496 : i32
    %198 = tpu.dynamic_rotate %1 by %c496_i32 dim 1 : vector<4x512xf32>, i32 -> vector<4x512xf32>
    %cst_73 = arith.constant 0.000000e+00 : f32
    %199 = vector.shape_cast %197 : vector<1x512xi1> to vector<1x512xi1>
    %200 = vector.broadcast %199 : vector<1x512xi1> to vector<4x512xi1>
    %201 = vector.broadcast %cst_73 : f32 to vector<4x512xf32>
    %202 = arith.select %200, %198, %201 : vector<4x512xi1>, vector<4x512xf32>
    %203 = vector.extract_strided_slice %7 {offsets = [0, 7], sizes = [4, 1], strides = [1, 1]} : vector<4x12xf32> to vector<4x1xf32>
    %204 = vector.broadcast %203 : vector<4x1xf32> to vector<4x512xf32>
    %205 = arith.mulf %202, %204 : vector<4x512xf32>
    %206 = arith.addf %178, %205 : vector<4x512xf32>
    %c1_i32_74 = arith.constant 1 : i32
    %207 = vector.broadcast %c1_i32_74 : i32 to vector<1x512xi32>
    %208 = arith.addi %2, %207 : vector<1x512xi32>
    %c0_i32_75 = arith.constant 0 : i32
    %209 = vector.broadcast %c0_i32_75 : i32 to vector<1x512xi32>
    %210 = arith.cmpi sge, %208, %209 : vector<1x512xi32>
    %c1_i32_76 = arith.constant 1 : i32
    %211 = vector.broadcast %c1_i32_76 : i32 to vector<1x512xi32>
    %212 = arith.addi %2, %211 : vector<1x512xi32>
    %c16_i32_77 = arith.constant 16 : i32
    %213 = vector.broadcast %c16_i32_77 : i32 to vector<1x512xi32>
    %214 = arith.cmpi slt, %212, %213 : vector<1x512xi32>
    %215 = arith.andi %210, %214 : vector<1x512xi1>
    %c1_i32_78 = arith.constant 1 : i32
    %216 = vector.broadcast %c1_i32_78 : i32 to vector<1x512xi32>
    %217 = arith.addi %3, %216 : vector<1x512xi32>
    %c0_i32_79 = arith.constant 0 : i32
    %218 = vector.broadcast %c0_i32_79 : i32 to vector<1x512xi32>
    %219 = arith.cmpi sge, %217, %218 : vector<1x512xi32>
    %220 = arith.andi %215, %219 : vector<1x512xi1>
    %c1_i32_80 = arith.constant 1 : i32
    %221 = vector.broadcast %c1_i32_80 : i32 to vector<1x512xi32>
    %222 = arith.addi %3, %221 : vector<1x512xi32>
    %c16_i32_81 = arith.constant 16 : i32
    %223 = vector.broadcast %c16_i32_81 : i32 to vector<1x512xi32>
    %224 = arith.cmpi slt, %222, %223 : vector<1x512xi32>
    %225 = arith.andi %220, %224 : vector<1x512xi1>
    %c495_i32 = arith.constant 495 : i32
    %226 = tpu.dynamic_rotate %1 by %c495_i32 dim 1 : vector<4x512xf32>, i32 -> vector<4x512xf32>
    %cst_82 = arith.constant 0.000000e+00 : f32
    %227 = vector.shape_cast %225 : vector<1x512xi1> to vector<1x512xi1>
    %228 = vector.broadcast %227 : vector<1x512xi1> to vector<4x512xi1>
    %229 = vector.broadcast %cst_82 : f32 to vector<4x512xf32>
    %230 = arith.select %228, %226, %229 : vector<4x512xi1>, vector<4x512xf32>
    %231 = vector.extract_strided_slice %7 {offsets = [0, 8], sizes = [4, 1], strides = [1, 1]} : vector<4x12xf32> to vector<4x1xf32>
    %232 = vector.broadcast %231 : vector<4x1xf32> to vector<4x512xf32>
    %233 = arith.mulf %230, %232 : vector<4x512xf32>
    %234 = arith.addf %206, %233 : vector<4x512xf32>
    %235 = vector.extract_strided_slice %7 {offsets = [0, 9], sizes = [4, 1], strides = [1, 1]} : vector<4x12xf32> to vector<4x1xf32>
    %236 = vector.extract_strided_slice %7 {offsets = [0, 10], sizes = [4, 1], strides = [1, 1]} : vector<4x12xf32> to vector<4x1xf32>
    %237 = vector.extract_strided_slice %7 {offsets = [0, 11], sizes = [4, 1], strides = [1, 1]} : vector<4x12xf32> to vector<4x1xf32>
    %238 = vector.broadcast %235 : vector<4x1xf32> to vector<4x512xf32>
    %239 = arith.addf %234, %238 : vector<4x512xf32>
    %240 = arith.mulf %239, %239 : vector<4x512xf32>
    %241 = tpu.concatenate %239, %240 in 0 : vector<4x512xf32>, vector<4x512xf32> -> vector<8x512xf32>
    %cst_83 = arith.constant dense<0.000000e+00> : vector<8x2xf32>
    %242 = tpu.matmul %241, %4, %cst_83 {dimension_numbers = #tpu.dot_dimension_numbers<[1], [0], [0], [1], [0, 0, 1, 1], [], []>} : vector<8x512xf32>, vector<512x2xf32>, vector<8x2xf32> -> vector<8x2xf32>
    %243 = vector.extract_strided_slice %242 {offsets = [0, 0], sizes = [4, 2], strides = [1, 1]} : vector<8x2xf32> to vector<4x2xf32>
    %244 = vector.extract_strided_slice %242 {offsets = [4, 0], sizes = [4, 2], strides = [1, 1]} : vector<8x2xf32> to vector<4x2xf32>
    %245 = tpu.concatenate %243, %244 in 1 : vector<4x2xf32>, vector<4x2xf32> -> vector<4x4xf32>
    %cst_84 = arith.constant dense<0.000000e+00> : vector<4x4xf32>
    %246 = tpu.matmul %6, %245, %cst_84 {dimension_numbers = #tpu.dot_dimension_numbers<[1], [0], [0], [1], [0, 0, 1, 1], [], []>} : vector<4x4xf32>, vector<4x4xf32>, vector<4x4xf32> -> vector<4x4xf32>
    %247 = vector.extract_strided_slice %246 {offsets = [0, 0], sizes = [4, 2], strides = [1, 1]} : vector<4x4xf32> to vector<4x2xf32>
    %cst_85 = arith.constant 3.906250e-03 : f32
    %248 = vector.broadcast %cst_85 : f32 to vector<4x2xf32>
    %249 = arith.mulf %247, %248 : vector<4x2xf32>
    %250 = vector.extract_strided_slice %246 {offsets = [0, 2], sizes = [4, 2], strides = [1, 1]} : vector<4x4xf32> to vector<4x2xf32>
    %cst_86 = arith.constant 3.906250e-03 : f32
    %251 = vector.broadcast %cst_86 : f32 to vector<4x2xf32>
    %252 = arith.mulf %250, %251 : vector<4x2xf32>
    %253 = arith.mulf %249, %249 : vector<4x2xf32>
    %254 = arith.subf %252, %253 : vector<4x2xf32>
    %cst_87 = arith.constant 9.99999974E-6 : f32
    %255 = vector.broadcast %cst_87 : f32 to vector<4x2xf32>
    %256 = arith.addf %254, %255 : vector<4x2xf32>
    %257 = math.rsqrt %256 : vector<4x2xf32>
    %258 = vector.broadcast %236 : vector<4x1xf32> to vector<4x2xf32>
    %259 = arith.mulf %257, %258 : vector<4x2xf32>
    %260 = arith.mulf %249, %259 : vector<4x2xf32>
    %261 = vector.broadcast %237 : vector<4x1xf32> to vector<4x2xf32>
    %262 = arith.subf %261, %260 : vector<4x2xf32>
    %263 = tpu.concatenate %259, %262 in 0 : vector<4x2xf32>, vector<4x2xf32> -> vector<8x2xf32>
    %cst_88 = arith.constant dense<0.000000e+00> : vector<8x512xf32>
    %264 = tpu.matmul %263, %5, %cst_88 {dimension_numbers = #tpu.dot_dimension_numbers<[1], [0], [0], [1], [0, 0, 1, 1], [], []>} : vector<8x2xf32>, vector<2x512xf32>, vector<8x512xf32> -> vector<8x512xf32>
    %265 = vector.extract_strided_slice %264 {offsets = [0, 0], sizes = [4, 512], strides = [1, 1]} : vector<8x512xf32> to vector<4x512xf32>
    %266 = arith.mulf %239, %265 : vector<4x512xf32>
    %267 = vector.extract_strided_slice %264 {offsets = [4, 0], sizes = [4, 512], strides = [1, 1]} : vector<8x512xf32> to vector<4x512xf32>
    %268 = arith.addf %266, %267 : vector<4x512xf32>
    %c0_89 = arith.constant 0 : index
    %c0_90 = arith.constant 0 : index
    %269 = vector.load %arg8[%c0_89, %c0_90] : memref<4x5xf32, #tpu.memory_space<vmem>>, vector<4x5xf32>
    %270 = vector.extract_strided_slice %269 {offsets = [0, 0], sizes = [4, 4], strides = [1, 1]} : vector<4x5xf32> to vector<4x4xf32>
    %cst_91 = arith.constant dense<0.000000e+00> : vector<4x512xf32>
    %271 = tpu.matmul %270, %268, %cst_91 {dimension_numbers = #tpu.dot_dimension_numbers<[1], [0], [0], [1], [0, 0, 1, 1], [], []>} : vector<4x4xf32>, vector<4x512xf32>, vector<4x512xf32> -> vector<4x512xf32>
    %272 = vector.extract_strided_slice %269 {offsets = [0, 4], sizes = [4, 1], strides = [1, 1]} : vector<4x5xf32> to vector<4x1xf32>
    %273 = vector.broadcast %272 : vector<4x1xf32> to vector<4x512xf32>
    %274 = arith.addf %271, %273 : vector<4x512xf32>
    %275 = arith.negf %274 : vector<4x512xf32>
    %276 = math.exp %275 : vector<4x512xf32>
    %cst_92 = arith.constant 1.000000e+00 : f32
    %277 = vector.broadcast %cst_92 : f32 to vector<4x512xf32>
    %278 = arith.addf %277, %276 : vector<4x512xf32>
    %279 = arith.divf %277, %278 : vector<4x512xf32>
    %c0_93 = arith.constant 0 : index
    %c0_94 = arith.constant 0 : index
    %280 = vector.load %arg9[%c0_93, %c0_94] : memref<4x28xf32, #tpu.memory_space<vmem>>, vector<4x28xf32>
    %c-2_i32 = arith.constant -2 : i32
    %281 = vector.broadcast %c-2_i32 : i32 to vector<1x512xi32>
    %282 = arith.addi %2, %281 : vector<1x512xi32>
    %c0_i32_95 = arith.constant 0 : i32
    %283 = vector.broadcast %c0_i32_95 : i32 to vector<1x512xi32>
    %284 = arith.cmpi sge, %282, %283 : vector<1x512xi32>
    %c-2_i32_96 = arith.constant -2 : i32
    %285 = vector.broadcast %c-2_i32_96 : i32 to vector<1x512xi32>
    %286 = arith.addi %2, %285 : vector<1x512xi32>
    %c16_i32_97 = arith.constant 16 : i32
    %287 = vector.broadcast %c16_i32_97 : i32 to vector<1x512xi32>
    %288 = arith.cmpi slt, %286, %287 : vector<1x512xi32>
    %289 = arith.andi %284, %288 : vector<1x512xi1>
    %c-2_i32_98 = arith.constant -2 : i32
    %290 = vector.broadcast %c-2_i32_98 : i32 to vector<1x512xi32>
    %291 = arith.addi %3, %290 : vector<1x512xi32>
    %c0_i32_99 = arith.constant 0 : i32
    %292 = vector.broadcast %c0_i32_99 : i32 to vector<1x512xi32>
    %293 = arith.cmpi sge, %291, %292 : vector<1x512xi32>
    %294 = arith.andi %289, %293 : vector<1x512xi1>
    %c-2_i32_100 = arith.constant -2 : i32
    %295 = vector.broadcast %c-2_i32_100 : i32 to vector<1x512xi32>
    %296 = arith.addi %3, %295 : vector<1x512xi32>
    %c16_i32_101 = arith.constant 16 : i32
    %297 = vector.broadcast %c16_i32_101 : i32 to vector<1x512xi32>
    %298 = arith.cmpi slt, %296, %297 : vector<1x512xi32>
    %299 = arith.andi %294, %298 : vector<1x512xi1>
    %c34_i32 = arith.constant 34 : i32
    %300 = tpu.dynamic_rotate %1 by %c34_i32 dim 1 : vector<4x512xf32>, i32 -> vector<4x512xf32>
    %cst_102 = arith.constant 0.000000e+00 : f32
    %301 = vector.shape_cast %299 : vector<1x512xi1> to vector<1x512xi1>
    %302 = vector.broadcast %301 : vector<1x512xi1> to vector<4x512xi1>
    %303 = vector.broadcast %cst_102 : f32 to vector<4x512xf32>
    %304 = arith.select %302, %300, %303 : vector<4x512xi1>, vector<4x512xf32>
    %305 = vector.extract_strided_slice %280 {offsets = [0, 0], sizes = [4, 1], strides = [1, 1]} : vector<4x28xf32> to vector<4x1xf32>
    %306 = vector.broadcast %305 : vector<4x1xf32> to vector<4x512xf32>
    %307 = arith.mulf %304, %306 : vector<4x512xf32>
    %c-2_i32_103 = arith.constant -2 : i32
    %308 = vector.broadcast %c-2_i32_103 : i32 to vector<1x512xi32>
    %309 = arith.addi %2, %308 : vector<1x512xi32>
    %c0_i32_104 = arith.constant 0 : i32
    %310 = vector.broadcast %c0_i32_104 : i32 to vector<1x512xi32>
    %311 = arith.cmpi sge, %309, %310 : vector<1x512xi32>
    %c-2_i32_105 = arith.constant -2 : i32
    %312 = vector.broadcast %c-2_i32_105 : i32 to vector<1x512xi32>
    %313 = arith.addi %2, %312 : vector<1x512xi32>
    %c16_i32_106 = arith.constant 16 : i32
    %314 = vector.broadcast %c16_i32_106 : i32 to vector<1x512xi32>
    %315 = arith.cmpi slt, %313, %314 : vector<1x512xi32>
    %316 = arith.andi %311, %315 : vector<1x512xi1>
    %c-1_i32_107 = arith.constant -1 : i32
    %317 = vector.broadcast %c-1_i32_107 : i32 to vector<1x512xi32>
    %318 = arith.addi %3, %317 : vector<1x512xi32>
    %c0_i32_108 = arith.constant 0 : i32
    %319 = vector.broadcast %c0_i32_108 : i32 to vector<1x512xi32>
    %320 = arith.cmpi sge, %318, %319 : vector<1x512xi32>
    %321 = arith.andi %316, %320 : vector<1x512xi1>
    %c-1_i32_109 = arith.constant -1 : i32
    %322 = vector.broadcast %c-1_i32_109 : i32 to vector<1x512xi32>
    %323 = arith.addi %3, %322 : vector<1x512xi32>
    %c16_i32_110 = arith.constant 16 : i32
    %324 = vector.broadcast %c16_i32_110 : i32 to vector<1x512xi32>
    %325 = arith.cmpi slt, %323, %324 : vector<1x512xi32>
    %326 = arith.andi %321, %325 : vector<1x512xi1>
    %c33_i32 = arith.constant 33 : i32
    %327 = tpu.dynamic_rotate %1 by %c33_i32 dim 1 : vector<4x512xf32>, i32 -> vector<4x512xf32>
    %cst_111 = arith.constant 0.000000e+00 : f32
    %328 = vector.shape_cast %326 : vector<1x512xi1> to vector<1x512xi1>
    %329 = vector.broadcast %328 : vector<1x512xi1> to vector<4x512xi1>
    %330 = vector.broadcast %cst_111 : f32 to vector<4x512xf32>
    %331 = arith.select %329, %327, %330 : vector<4x512xi1>, vector<4x512xf32>
    %332 = vector.extract_strided_slice %280 {offsets = [0, 1], sizes = [4, 1], strides = [1, 1]} : vector<4x28xf32> to vector<4x1xf32>
    %333 = vector.broadcast %332 : vector<4x1xf32> to vector<4x512xf32>
    %334 = arith.mulf %331, %333 : vector<4x512xf32>
    %335 = arith.addf %307, %334 : vector<4x512xf32>
    %c-2_i32_112 = arith.constant -2 : i32
    %336 = vector.broadcast %c-2_i32_112 : i32 to vector<1x512xi32>
    %337 = arith.addi %2, %336 : vector<1x512xi32>
    %c0_i32_113 = arith.constant 0 : i32
    %338 = vector.broadcast %c0_i32_113 : i32 to vector<1x512xi32>
    %339 = arith.cmpi sge, %337, %338 : vector<1x512xi32>
    %c-2_i32_114 = arith.constant -2 : i32
    %340 = vector.broadcast %c-2_i32_114 : i32 to vector<1x512xi32>
    %341 = arith.addi %2, %340 : vector<1x512xi32>
    %c16_i32_115 = arith.constant 16 : i32
    %342 = vector.broadcast %c16_i32_115 : i32 to vector<1x512xi32>
    %343 = arith.cmpi slt, %341, %342 : vector<1x512xi32>
    %344 = arith.andi %339, %343 : vector<1x512xi1>
    %c0_i32_116 = arith.constant 0 : i32
    %345 = vector.broadcast %c0_i32_116 : i32 to vector<1x512xi32>
    %346 = arith.addi %3, %345 : vector<1x512xi32>
    %c0_i32_117 = arith.constant 0 : i32
    %347 = vector.broadcast %c0_i32_117 : i32 to vector<1x512xi32>
    %348 = arith.cmpi sge, %346, %347 : vector<1x512xi32>
    %349 = arith.andi %344, %348 : vector<1x512xi1>
    %c0_i32_118 = arith.constant 0 : i32
    %350 = vector.broadcast %c0_i32_118 : i32 to vector<1x512xi32>
    %351 = arith.addi %3, %350 : vector<1x512xi32>
    %c16_i32_119 = arith.constant 16 : i32
    %352 = vector.broadcast %c16_i32_119 : i32 to vector<1x512xi32>
    %353 = arith.cmpi slt, %351, %352 : vector<1x512xi32>
    %354 = arith.andi %349, %353 : vector<1x512xi1>
    %c32_i32 = arith.constant 32 : i32
    %355 = tpu.dynamic_rotate %1 by %c32_i32 dim 1 : vector<4x512xf32>, i32 -> vector<4x512xf32>
    %cst_120 = arith.constant 0.000000e+00 : f32
    %356 = vector.shape_cast %354 : vector<1x512xi1> to vector<1x512xi1>
    %357 = vector.broadcast %356 : vector<1x512xi1> to vector<4x512xi1>
    %358 = vector.broadcast %cst_120 : f32 to vector<4x512xf32>
    %359 = arith.select %357, %355, %358 : vector<4x512xi1>, vector<4x512xf32>
    %360 = vector.extract_strided_slice %280 {offsets = [0, 2], sizes = [4, 1], strides = [1, 1]} : vector<4x28xf32> to vector<4x1xf32>
    %361 = vector.broadcast %360 : vector<4x1xf32> to vector<4x512xf32>
    %362 = arith.mulf %359, %361 : vector<4x512xf32>
    %363 = arith.addf %335, %362 : vector<4x512xf32>
    %c-2_i32_121 = arith.constant -2 : i32
    %364 = vector.broadcast %c-2_i32_121 : i32 to vector<1x512xi32>
    %365 = arith.addi %2, %364 : vector<1x512xi32>
    %c0_i32_122 = arith.constant 0 : i32
    %366 = vector.broadcast %c0_i32_122 : i32 to vector<1x512xi32>
    %367 = arith.cmpi sge, %365, %366 : vector<1x512xi32>
    %c-2_i32_123 = arith.constant -2 : i32
    %368 = vector.broadcast %c-2_i32_123 : i32 to vector<1x512xi32>
    %369 = arith.addi %2, %368 : vector<1x512xi32>
    %c16_i32_124 = arith.constant 16 : i32
    %370 = vector.broadcast %c16_i32_124 : i32 to vector<1x512xi32>
    %371 = arith.cmpi slt, %369, %370 : vector<1x512xi32>
    %372 = arith.andi %367, %371 : vector<1x512xi1>
    %c1_i32_125 = arith.constant 1 : i32
    %373 = vector.broadcast %c1_i32_125 : i32 to vector<1x512xi32>
    %374 = arith.addi %3, %373 : vector<1x512xi32>
    %c0_i32_126 = arith.constant 0 : i32
    %375 = vector.broadcast %c0_i32_126 : i32 to vector<1x512xi32>
    %376 = arith.cmpi sge, %374, %375 : vector<1x512xi32>
    %377 = arith.andi %372, %376 : vector<1x512xi1>
    %c1_i32_127 = arith.constant 1 : i32
    %378 = vector.broadcast %c1_i32_127 : i32 to vector<1x512xi32>
    %379 = arith.addi %3, %378 : vector<1x512xi32>
    %c16_i32_128 = arith.constant 16 : i32
    %380 = vector.broadcast %c16_i32_128 : i32 to vector<1x512xi32>
    %381 = arith.cmpi slt, %379, %380 : vector<1x512xi32>
    %382 = arith.andi %377, %381 : vector<1x512xi1>
    %c31_i32 = arith.constant 31 : i32
    %383 = tpu.dynamic_rotate %1 by %c31_i32 dim 1 : vector<4x512xf32>, i32 -> vector<4x512xf32>
    %cst_129 = arith.constant 0.000000e+00 : f32
    %384 = vector.shape_cast %382 : vector<1x512xi1> to vector<1x512xi1>
    %385 = vector.broadcast %384 : vector<1x512xi1> to vector<4x512xi1>
    %386 = vector.broadcast %cst_129 : f32 to vector<4x512xf32>
    %387 = arith.select %385, %383, %386 : vector<4x512xi1>, vector<4x512xf32>
    %388 = vector.extract_strided_slice %280 {offsets = [0, 3], sizes = [4, 1], strides = [1, 1]} : vector<4x28xf32> to vector<4x1xf32>
    %389 = vector.broadcast %388 : vector<4x1xf32> to vector<4x512xf32>
    %390 = arith.mulf %387, %389 : vector<4x512xf32>
    %391 = arith.addf %363, %390 : vector<4x512xf32>
    %c-2_i32_130 = arith.constant -2 : i32
    %392 = vector.broadcast %c-2_i32_130 : i32 to vector<1x512xi32>
    %393 = arith.addi %2, %392 : vector<1x512xi32>
    %c0_i32_131 = arith.constant 0 : i32
    %394 = vector.broadcast %c0_i32_131 : i32 to vector<1x512xi32>
    %395 = arith.cmpi sge, %393, %394 : vector<1x512xi32>
    %c-2_i32_132 = arith.constant -2 : i32
    %396 = vector.broadcast %c-2_i32_132 : i32 to vector<1x512xi32>
    %397 = arith.addi %2, %396 : vector<1x512xi32>
    %c16_i32_133 = arith.constant 16 : i32
    %398 = vector.broadcast %c16_i32_133 : i32 to vector<1x512xi32>
    %399 = arith.cmpi slt, %397, %398 : vector<1x512xi32>
    %400 = arith.andi %395, %399 : vector<1x512xi1>
    %c2_i32 = arith.constant 2 : i32
    %401 = vector.broadcast %c2_i32 : i32 to vector<1x512xi32>
    %402 = arith.addi %3, %401 : vector<1x512xi32>
    %c0_i32_134 = arith.constant 0 : i32
    %403 = vector.broadcast %c0_i32_134 : i32 to vector<1x512xi32>
    %404 = arith.cmpi sge, %402, %403 : vector<1x512xi32>
    %405 = arith.andi %400, %404 : vector<1x512xi1>
    %c2_i32_135 = arith.constant 2 : i32
    %406 = vector.broadcast %c2_i32_135 : i32 to vector<1x512xi32>
    %407 = arith.addi %3, %406 : vector<1x512xi32>
    %c16_i32_136 = arith.constant 16 : i32
    %408 = vector.broadcast %c16_i32_136 : i32 to vector<1x512xi32>
    %409 = arith.cmpi slt, %407, %408 : vector<1x512xi32>
    %410 = arith.andi %405, %409 : vector<1x512xi1>
    %c30_i32 = arith.constant 30 : i32
    %411 = tpu.dynamic_rotate %1 by %c30_i32 dim 1 : vector<4x512xf32>, i32 -> vector<4x512xf32>
    %cst_137 = arith.constant 0.000000e+00 : f32
    %412 = vector.shape_cast %410 : vector<1x512xi1> to vector<1x512xi1>
    %413 = vector.broadcast %412 : vector<1x512xi1> to vector<4x512xi1>
    %414 = vector.broadcast %cst_137 : f32 to vector<4x512xf32>
    %415 = arith.select %413, %411, %414 : vector<4x512xi1>, vector<4x512xf32>
    %416 = vector.extract_strided_slice %280 {offsets = [0, 4], sizes = [4, 1], strides = [1, 1]} : vector<4x28xf32> to vector<4x1xf32>
    %417 = vector.broadcast %416 : vector<4x1xf32> to vector<4x512xf32>
    %418 = arith.mulf %415, %417 : vector<4x512xf32>
    %419 = arith.addf %391, %418 : vector<4x512xf32>
    %c-1_i32_138 = arith.constant -1 : i32
    %420 = vector.broadcast %c-1_i32_138 : i32 to vector<1x512xi32>
    %421 = arith.addi %2, %420 : vector<1x512xi32>
    %c0_i32_139 = arith.constant 0 : i32
    %422 = vector.broadcast %c0_i32_139 : i32 to vector<1x512xi32>
    %423 = arith.cmpi sge, %421, %422 : vector<1x512xi32>
    %c-1_i32_140 = arith.constant -1 : i32
    %424 = vector.broadcast %c-1_i32_140 : i32 to vector<1x512xi32>
    %425 = arith.addi %2, %424 : vector<1x512xi32>
    %c16_i32_141 = arith.constant 16 : i32
    %426 = vector.broadcast %c16_i32_141 : i32 to vector<1x512xi32>
    %427 = arith.cmpi slt, %425, %426 : vector<1x512xi32>
    %428 = arith.andi %423, %427 : vector<1x512xi1>
    %c-2_i32_142 = arith.constant -2 : i32
    %429 = vector.broadcast %c-2_i32_142 : i32 to vector<1x512xi32>
    %430 = arith.addi %3, %429 : vector<1x512xi32>
    %c0_i32_143 = arith.constant 0 : i32
    %431 = vector.broadcast %c0_i32_143 : i32 to vector<1x512xi32>
    %432 = arith.cmpi sge, %430, %431 : vector<1x512xi32>
    %433 = arith.andi %428, %432 : vector<1x512xi1>
    %c-2_i32_144 = arith.constant -2 : i32
    %434 = vector.broadcast %c-2_i32_144 : i32 to vector<1x512xi32>
    %435 = arith.addi %3, %434 : vector<1x512xi32>
    %c16_i32_145 = arith.constant 16 : i32
    %436 = vector.broadcast %c16_i32_145 : i32 to vector<1x512xi32>
    %437 = arith.cmpi slt, %435, %436 : vector<1x512xi32>
    %438 = arith.andi %433, %437 : vector<1x512xi1>
    %c18_i32 = arith.constant 18 : i32
    %439 = tpu.dynamic_rotate %1 by %c18_i32 dim 1 : vector<4x512xf32>, i32 -> vector<4x512xf32>
    %cst_146 = arith.constant 0.000000e+00 : f32
    %440 = vector.shape_cast %438 : vector<1x512xi1> to vector<1x512xi1>
    %441 = vector.broadcast %440 : vector<1x512xi1> to vector<4x512xi1>
    %442 = vector.broadcast %cst_146 : f32 to vector<4x512xf32>
    %443 = arith.select %441, %439, %442 : vector<4x512xi1>, vector<4x512xf32>
    %444 = vector.extract_strided_slice %280 {offsets = [0, 5], sizes = [4, 1], strides = [1, 1]} : vector<4x28xf32> to vector<4x1xf32>
    %445 = vector.broadcast %444 : vector<4x1xf32> to vector<4x512xf32>
    %446 = arith.mulf %443, %445 : vector<4x512xf32>
    %447 = arith.addf %419, %446 : vector<4x512xf32>
    %448 = vector.extract_strided_slice %280 {offsets = [0, 6], sizes = [4, 1], strides = [1, 1]} : vector<4x28xf32> to vector<4x1xf32>
    %449 = vector.broadcast %448 : vector<4x1xf32> to vector<4x512xf32>
    %450 = arith.mulf %31, %449 : vector<4x512xf32>
    %451 = arith.addf %447, %450 : vector<4x512xf32>
    %452 = vector.extract_strided_slice %280 {offsets = [0, 7], sizes = [4, 1], strides = [1, 1]} : vector<4x28xf32> to vector<4x1xf32>
    %453 = vector.broadcast %452 : vector<4x1xf32> to vector<4x512xf32>
    %454 = arith.mulf %58, %453 : vector<4x512xf32>
    %455 = arith.addf %451, %454 : vector<4x512xf32>
    %456 = vector.extract_strided_slice %280 {offsets = [0, 8], sizes = [4, 1], strides = [1, 1]} : vector<4x28xf32> to vector<4x1xf32>
    %457 = vector.broadcast %456 : vector<4x1xf32> to vector<4x512xf32>
    %458 = arith.mulf %86, %457 : vector<4x512xf32>
    %459 = arith.addf %455, %458 : vector<4x512xf32>
    %c-1_i32_147 = arith.constant -1 : i32
    %460 = vector.broadcast %c-1_i32_147 : i32 to vector<1x512xi32>
    %461 = arith.addi %2, %460 : vector<1x512xi32>
    %c0_i32_148 = arith.constant 0 : i32
    %462 = vector.broadcast %c0_i32_148 : i32 to vector<1x512xi32>
    %463 = arith.cmpi sge, %461, %462 : vector<1x512xi32>
    %c-1_i32_149 = arith.constant -1 : i32
    %464 = vector.broadcast %c-1_i32_149 : i32 to vector<1x512xi32>
    %465 = arith.addi %2, %464 : vector<1x512xi32>
    %c16_i32_150 = arith.constant 16 : i32
    %466 = vector.broadcast %c16_i32_150 : i32 to vector<1x512xi32>
    %467 = arith.cmpi slt, %465, %466 : vector<1x512xi32>
    %468 = arith.andi %463, %467 : vector<1x512xi1>
    %c2_i32_151 = arith.constant 2 : i32
    %469 = vector.broadcast %c2_i32_151 : i32 to vector<1x512xi32>
    %470 = arith.addi %3, %469 : vector<1x512xi32>
    %c0_i32_152 = arith.constant 0 : i32
    %471 = vector.broadcast %c0_i32_152 : i32 to vector<1x512xi32>
    %472 = arith.cmpi sge, %470, %471 : vector<1x512xi32>
    %473 = arith.andi %468, %472 : vector<1x512xi1>
    %c2_i32_153 = arith.constant 2 : i32
    %474 = vector.broadcast %c2_i32_153 : i32 to vector<1x512xi32>
    %475 = arith.addi %3, %474 : vector<1x512xi32>
    %c16_i32_154 = arith.constant 16 : i32
    %476 = vector.broadcast %c16_i32_154 : i32 to vector<1x512xi32>
    %477 = arith.cmpi slt, %475, %476 : vector<1x512xi32>
    %478 = arith.andi %473, %477 : vector<1x512xi1>
    %c14_i32 = arith.constant 14 : i32
    %479 = tpu.dynamic_rotate %1 by %c14_i32 dim 1 : vector<4x512xf32>, i32 -> vector<4x512xf32>
    %cst_155 = arith.constant 0.000000e+00 : f32
    %480 = vector.shape_cast %478 : vector<1x512xi1> to vector<1x512xi1>
    %481 = vector.broadcast %480 : vector<1x512xi1> to vector<4x512xi1>
    %482 = vector.broadcast %cst_155 : f32 to vector<4x512xf32>
    %483 = arith.select %481, %479, %482 : vector<4x512xi1>, vector<4x512xf32>
    %484 = vector.extract_strided_slice %280 {offsets = [0, 9], sizes = [4, 1], strides = [1, 1]} : vector<4x28xf32> to vector<4x1xf32>
    %485 = vector.broadcast %484 : vector<4x1xf32> to vector<4x512xf32>
    %486 = arith.mulf %483, %485 : vector<4x512xf32>
    %487 = arith.addf %459, %486 : vector<4x512xf32>
    %c0_i32_156 = arith.constant 0 : i32
    %488 = vector.broadcast %c0_i32_156 : i32 to vector<1x512xi32>
    %489 = arith.addi %2, %488 : vector<1x512xi32>
    %c0_i32_157 = arith.constant 0 : i32
    %490 = vector.broadcast %c0_i32_157 : i32 to vector<1x512xi32>
    %491 = arith.cmpi sge, %489, %490 : vector<1x512xi32>
    %c0_i32_158 = arith.constant 0 : i32
    %492 = vector.broadcast %c0_i32_158 : i32 to vector<1x512xi32>
    %493 = arith.addi %2, %492 : vector<1x512xi32>
    %c16_i32_159 = arith.constant 16 : i32
    %494 = vector.broadcast %c16_i32_159 : i32 to vector<1x512xi32>
    %495 = arith.cmpi slt, %493, %494 : vector<1x512xi32>
    %496 = arith.andi %491, %495 : vector<1x512xi1>
    %c-2_i32_160 = arith.constant -2 : i32
    %497 = vector.broadcast %c-2_i32_160 : i32 to vector<1x512xi32>
    %498 = arith.addi %3, %497 : vector<1x512xi32>
    %c0_i32_161 = arith.constant 0 : i32
    %499 = vector.broadcast %c0_i32_161 : i32 to vector<1x512xi32>
    %500 = arith.cmpi sge, %498, %499 : vector<1x512xi32>
    %501 = arith.andi %496, %500 : vector<1x512xi1>
    %c-2_i32_162 = arith.constant -2 : i32
    %502 = vector.broadcast %c-2_i32_162 : i32 to vector<1x512xi32>
    %503 = arith.addi %3, %502 : vector<1x512xi32>
    %c16_i32_163 = arith.constant 16 : i32
    %504 = vector.broadcast %c16_i32_163 : i32 to vector<1x512xi32>
    %505 = arith.cmpi slt, %503, %504 : vector<1x512xi32>
    %506 = arith.andi %501, %505 : vector<1x512xi1>
    %c2_i32_164 = arith.constant 2 : i32
    %507 = tpu.dynamic_rotate %1 by %c2_i32_164 dim 1 : vector<4x512xf32>, i32 -> vector<4x512xf32>
    %cst_165 = arith.constant 0.000000e+00 : f32
    %508 = vector.shape_cast %506 : vector<1x512xi1> to vector<1x512xi1>
    %509 = vector.broadcast %508 : vector<1x512xi1> to vector<4x512xi1>
    %510 = vector.broadcast %cst_165 : f32 to vector<4x512xf32>
    %511 = arith.select %509, %507, %510 : vector<4x512xi1>, vector<4x512xf32>
    %512 = vector.extract_strided_slice %280 {offsets = [0, 10], sizes = [4, 1], strides = [1, 1]} : vector<4x28xf32> to vector<4x1xf32>
    %513 = vector.broadcast %512 : vector<4x1xf32> to vector<4x512xf32>
    %514 = arith.mulf %511, %513 : vector<4x512xf32>
    %515 = arith.addf %487, %514 : vector<4x512xf32>
    %516 = vector.extract_strided_slice %280 {offsets = [0, 11], sizes = [4, 1], strides = [1, 1]} : vector<4x28xf32> to vector<4x1xf32>
    %517 = vector.broadcast %516 : vector<4x1xf32> to vector<4x512xf32>
    %518 = arith.mulf %114, %517 : vector<4x512xf32>
    %519 = arith.addf %515, %518 : vector<4x512xf32>
    %520 = vector.extract_strided_slice %280 {offsets = [0, 12], sizes = [4, 1], strides = [1, 1]} : vector<4x28xf32> to vector<4x1xf32>
    %521 = vector.broadcast %520 : vector<4x1xf32> to vector<4x512xf32>
    %522 = arith.mulf %1, %521 : vector<4x512xf32>
    %523 = arith.addf %519, %522 : vector<4x512xf32>
    %524 = vector.extract_strided_slice %280 {offsets = [0, 13], sizes = [4, 1], strides = [1, 1]} : vector<4x28xf32> to vector<4x1xf32>
    %525 = vector.broadcast %524 : vector<4x1xf32> to vector<4x512xf32>
    %526 = arith.mulf %146, %525 : vector<4x512xf32>
    %527 = arith.addf %523, %526 : vector<4x512xf32>
    %c0_i32_166 = arith.constant 0 : i32
    %528 = vector.broadcast %c0_i32_166 : i32 to vector<1x512xi32>
    %529 = arith.addi %2, %528 : vector<1x512xi32>
    %c0_i32_167 = arith.constant 0 : i32
    %530 = vector.broadcast %c0_i32_167 : i32 to vector<1x512xi32>
    %531 = arith.cmpi sge, %529, %530 : vector<1x512xi32>
    %c0_i32_168 = arith.constant 0 : i32
    %532 = vector.broadcast %c0_i32_168 : i32 to vector<1x512xi32>
    %533 = arith.addi %2, %532 : vector<1x512xi32>
    %c16_i32_169 = arith.constant 16 : i32
    %534 = vector.broadcast %c16_i32_169 : i32 to vector<1x512xi32>
    %535 = arith.cmpi slt, %533, %534 : vector<1x512xi32>
    %536 = arith.andi %531, %535 : vector<1x512xi1>
    %c2_i32_170 = arith.constant 2 : i32
    %537 = vector.broadcast %c2_i32_170 : i32 to vector<1x512xi32>
    %538 = arith.addi %3, %537 : vector<1x512xi32>
    %c0_i32_171 = arith.constant 0 : i32
    %539 = vector.broadcast %c0_i32_171 : i32 to vector<1x512xi32>
    %540 = arith.cmpi sge, %538, %539 : vector<1x512xi32>
    %541 = arith.andi %536, %540 : vector<1x512xi1>
    %c2_i32_172 = arith.constant 2 : i32
    %542 = vector.broadcast %c2_i32_172 : i32 to vector<1x512xi32>
    %543 = arith.addi %3, %542 : vector<1x512xi32>
    %c16_i32_173 = arith.constant 16 : i32
    %544 = vector.broadcast %c16_i32_173 : i32 to vector<1x512xi32>
    %545 = arith.cmpi slt, %543, %544 : vector<1x512xi32>
    %546 = arith.andi %541, %545 : vector<1x512xi1>
    %c510_i32 = arith.constant 510 : i32
    %547 = tpu.dynamic_rotate %1 by %c510_i32 dim 1 : vector<4x512xf32>, i32 -> vector<4x512xf32>
    %cst_174 = arith.constant 0.000000e+00 : f32
    %548 = vector.shape_cast %546 : vector<1x512xi1> to vector<1x512xi1>
    %549 = vector.broadcast %548 : vector<1x512xi1> to vector<4x512xi1>
    %550 = vector.broadcast %cst_174 : f32 to vector<4x512xf32>
    %551 = arith.select %549, %547, %550 : vector<4x512xi1>, vector<4x512xf32>
    %552 = vector.extract_strided_slice %280 {offsets = [0, 14], sizes = [4, 1], strides = [1, 1]} : vector<4x28xf32> to vector<4x1xf32>
    %553 = vector.broadcast %552 : vector<4x1xf32> to vector<4x512xf32>
    %554 = arith.mulf %551, %553 : vector<4x512xf32>
    %555 = arith.addf %527, %554 : vector<4x512xf32>
    %c1_i32_175 = arith.constant 1 : i32
    %556 = vector.broadcast %c1_i32_175 : i32 to vector<1x512xi32>
    %557 = arith.addi %2, %556 : vector<1x512xi32>
    %c0_i32_176 = arith.constant 0 : i32
    %558 = vector.broadcast %c0_i32_176 : i32 to vector<1x512xi32>
    %559 = arith.cmpi sge, %557, %558 : vector<1x512xi32>
    %c1_i32_177 = arith.constant 1 : i32
    %560 = vector.broadcast %c1_i32_177 : i32 to vector<1x512xi32>
    %561 = arith.addi %2, %560 : vector<1x512xi32>
    %c16_i32_178 = arith.constant 16 : i32
    %562 = vector.broadcast %c16_i32_178 : i32 to vector<1x512xi32>
    %563 = arith.cmpi slt, %561, %562 : vector<1x512xi32>
    %564 = arith.andi %559, %563 : vector<1x512xi1>
    %c-2_i32_179 = arith.constant -2 : i32
    %565 = vector.broadcast %c-2_i32_179 : i32 to vector<1x512xi32>
    %566 = arith.addi %3, %565 : vector<1x512xi32>
    %c0_i32_180 = arith.constant 0 : i32
    %567 = vector.broadcast %c0_i32_180 : i32 to vector<1x512xi32>
    %568 = arith.cmpi sge, %566, %567 : vector<1x512xi32>
    %569 = arith.andi %564, %568 : vector<1x512xi1>
    %c-2_i32_181 = arith.constant -2 : i32
    %570 = vector.broadcast %c-2_i32_181 : i32 to vector<1x512xi32>
    %571 = arith.addi %3, %570 : vector<1x512xi32>
    %c16_i32_182 = arith.constant 16 : i32
    %572 = vector.broadcast %c16_i32_182 : i32 to vector<1x512xi32>
    %573 = arith.cmpi slt, %571, %572 : vector<1x512xi32>
    %574 = arith.andi %569, %573 : vector<1x512xi1>
    %c498_i32 = arith.constant 498 : i32
    %575 = tpu.dynamic_rotate %1 by %c498_i32 dim 1 : vector<4x512xf32>, i32 -> vector<4x512xf32>
    %cst_183 = arith.constant 0.000000e+00 : f32
    %576 = vector.shape_cast %574 : vector<1x512xi1> to vector<1x512xi1>
    %577 = vector.broadcast %576 : vector<1x512xi1> to vector<4x512xi1>
    %578 = vector.broadcast %cst_183 : f32 to vector<4x512xf32>
    %579 = arith.select %577, %575, %578 : vector<4x512xi1>, vector<4x512xf32>
    %580 = vector.extract_strided_slice %280 {offsets = [0, 15], sizes = [4, 1], strides = [1, 1]} : vector<4x28xf32> to vector<4x1xf32>
    %581 = vector.broadcast %580 : vector<4x1xf32> to vector<4x512xf32>
    %582 = arith.mulf %579, %581 : vector<4x512xf32>
    %583 = arith.addf %555, %582 : vector<4x512xf32>
    %584 = vector.extract_strided_slice %280 {offsets = [0, 16], sizes = [4, 1], strides = [1, 1]} : vector<4x28xf32> to vector<4x1xf32>
    %585 = vector.broadcast %584 : vector<4x1xf32> to vector<4x512xf32>
    %586 = arith.mulf %174, %585 : vector<4x512xf32>
    %587 = arith.addf %583, %586 : vector<4x512xf32>
    %588 = vector.extract_strided_slice %280 {offsets = [0, 17], sizes = [4, 1], strides = [1, 1]} : vector<4x28xf32> to vector<4x1xf32>
    %589 = vector.broadcast %588 : vector<4x1xf32> to vector<4x512xf32>
    %590 = arith.mulf %202, %589 : vector<4x512xf32>
    %591 = arith.addf %587, %590 : vector<4x512xf32>
    %592 = vector.extract_strided_slice %280 {offsets = [0, 18], sizes = [4, 1], strides = [1, 1]} : vector<4x28xf32> to vector<4x1xf32>
    %593 = vector.broadcast %592 : vector<4x1xf32> to vector<4x512xf32>
    %594 = arith.mulf %230, %593 : vector<4x512xf32>
    %595 = arith.addf %591, %594 : vector<4x512xf32>
    %c1_i32_184 = arith.constant 1 : i32
    %596 = vector.broadcast %c1_i32_184 : i32 to vector<1x512xi32>
    %597 = arith.addi %2, %596 : vector<1x512xi32>
    %c0_i32_185 = arith.constant 0 : i32
    %598 = vector.broadcast %c0_i32_185 : i32 to vector<1x512xi32>
    %599 = arith.cmpi sge, %597, %598 : vector<1x512xi32>
    %c1_i32_186 = arith.constant 1 : i32
    %600 = vector.broadcast %c1_i32_186 : i32 to vector<1x512xi32>
    %601 = arith.addi %2, %600 : vector<1x512xi32>
    %c16_i32_187 = arith.constant 16 : i32
    %602 = vector.broadcast %c16_i32_187 : i32 to vector<1x512xi32>
    %603 = arith.cmpi slt, %601, %602 : vector<1x512xi32>
    %604 = arith.andi %599, %603 : vector<1x512xi1>
    %c2_i32_188 = arith.constant 2 : i32
    %605 = vector.broadcast %c2_i32_188 : i32 to vector<1x512xi32>
    %606 = arith.addi %3, %605 : vector<1x512xi32>
    %c0_i32_189 = arith.constant 0 : i32
    %607 = vector.broadcast %c0_i32_189 : i32 to vector<1x512xi32>
    %608 = arith.cmpi sge, %606, %607 : vector<1x512xi32>
    %609 = arith.andi %604, %608 : vector<1x512xi1>
    %c2_i32_190 = arith.constant 2 : i32
    %610 = vector.broadcast %c2_i32_190 : i32 to vector<1x512xi32>
    %611 = arith.addi %3, %610 : vector<1x512xi32>
    %c16_i32_191 = arith.constant 16 : i32
    %612 = vector.broadcast %c16_i32_191 : i32 to vector<1x512xi32>
    %613 = arith.cmpi slt, %611, %612 : vector<1x512xi32>
    %614 = arith.andi %609, %613 : vector<1x512xi1>
    %c494_i32 = arith.constant 494 : i32
    %615 = tpu.dynamic_rotate %1 by %c494_i32 dim 1 : vector<4x512xf32>, i32 -> vector<4x512xf32>
    %cst_192 = arith.constant 0.000000e+00 : f32
    %616 = vector.shape_cast %614 : vector<1x512xi1> to vector<1x512xi1>
    %617 = vector.broadcast %616 : vector<1x512xi1> to vector<4x512xi1>
    %618 = vector.broadcast %cst_192 : f32 to vector<4x512xf32>
    %619 = arith.select %617, %615, %618 : vector<4x512xi1>, vector<4x512xf32>
    %620 = vector.extract_strided_slice %280 {offsets = [0, 19], sizes = [4, 1], strides = [1, 1]} : vector<4x28xf32> to vector<4x1xf32>
    %621 = vector.broadcast %620 : vector<4x1xf32> to vector<4x512xf32>
    %622 = arith.mulf %619, %621 : vector<4x512xf32>
    %623 = arith.addf %595, %622 : vector<4x512xf32>
    %c2_i32_193 = arith.constant 2 : i32
    %624 = vector.broadcast %c2_i32_193 : i32 to vector<1x512xi32>
    %625 = arith.addi %2, %624 : vector<1x512xi32>
    %c0_i32_194 = arith.constant 0 : i32
    %626 = vector.broadcast %c0_i32_194 : i32 to vector<1x512xi32>
    %627 = arith.cmpi sge, %625, %626 : vector<1x512xi32>
    %c2_i32_195 = arith.constant 2 : i32
    %628 = vector.broadcast %c2_i32_195 : i32 to vector<1x512xi32>
    %629 = arith.addi %2, %628 : vector<1x512xi32>
    %c16_i32_196 = arith.constant 16 : i32
    %630 = vector.broadcast %c16_i32_196 : i32 to vector<1x512xi32>
    %631 = arith.cmpi slt, %629, %630 : vector<1x512xi32>
    %632 = arith.andi %627, %631 : vector<1x512xi1>
    %c-2_i32_197 = arith.constant -2 : i32
    %633 = vector.broadcast %c-2_i32_197 : i32 to vector<1x512xi32>
    %634 = arith.addi %3, %633 : vector<1x512xi32>
    %c0_i32_198 = arith.constant 0 : i32
    %635 = vector.broadcast %c0_i32_198 : i32 to vector<1x512xi32>
    %636 = arith.cmpi sge, %634, %635 : vector<1x512xi32>
    %637 = arith.andi %632, %636 : vector<1x512xi1>
    %c-2_i32_199 = arith.constant -2 : i32
    %638 = vector.broadcast %c-2_i32_199 : i32 to vector<1x512xi32>
    %639 = arith.addi %3, %638 : vector<1x512xi32>
    %c16_i32_200 = arith.constant 16 : i32
    %640 = vector.broadcast %c16_i32_200 : i32 to vector<1x512xi32>
    %641 = arith.cmpi slt, %639, %640 : vector<1x512xi32>
    %642 = arith.andi %637, %641 : vector<1x512xi1>
    %c482_i32 = arith.constant 482 : i32
    %643 = tpu.dynamic_rotate %1 by %c482_i32 dim 1 : vector<4x512xf32>, i32 -> vector<4x512xf32>
    %cst_201 = arith.constant 0.000000e+00 : f32
    %644 = vector.shape_cast %642 : vector<1x512xi1> to vector<1x512xi1>
    %645 = vector.broadcast %644 : vector<1x512xi1> to vector<4x512xi1>
    %646 = vector.broadcast %cst_201 : f32 to vector<4x512xf32>
    %647 = arith.select %645, %643, %646 : vector<4x512xi1>, vector<4x512xf32>
    %648 = vector.extract_strided_slice %280 {offsets = [0, 20], sizes = [4, 1], strides = [1, 1]} : vector<4x28xf32> to vector<4x1xf32>
    %649 = vector.broadcast %648 : vector<4x1xf32> to vector<4x512xf32>
    %650 = arith.mulf %647, %649 : vector<4x512xf32>
    %651 = arith.addf %623, %650 : vector<4x512xf32>
    %c2_i32_202 = arith.constant 2 : i32
    %652 = vector.broadcast %c2_i32_202 : i32 to vector<1x512xi32>
    %653 = arith.addi %2, %652 : vector<1x512xi32>
    %c0_i32_203 = arith.constant 0 : i32
    %654 = vector.broadcast %c0_i32_203 : i32 to vector<1x512xi32>
    %655 = arith.cmpi sge, %653, %654 : vector<1x512xi32>
    %c2_i32_204 = arith.constant 2 : i32
    %656 = vector.broadcast %c2_i32_204 : i32 to vector<1x512xi32>
    %657 = arith.addi %2, %656 : vector<1x512xi32>
    %c16_i32_205 = arith.constant 16 : i32
    %658 = vector.broadcast %c16_i32_205 : i32 to vector<1x512xi32>
    %659 = arith.cmpi slt, %657, %658 : vector<1x512xi32>
    %660 = arith.andi %655, %659 : vector<1x512xi1>
    %c-1_i32_206 = arith.constant -1 : i32
    %661 = vector.broadcast %c-1_i32_206 : i32 to vector<1x512xi32>
    %662 = arith.addi %3, %661 : vector<1x512xi32>
    %c0_i32_207 = arith.constant 0 : i32
    %663 = vector.broadcast %c0_i32_207 : i32 to vector<1x512xi32>
    %664 = arith.cmpi sge, %662, %663 : vector<1x512xi32>
    %665 = arith.andi %660, %664 : vector<1x512xi1>
    %c-1_i32_208 = arith.constant -1 : i32
    %666 = vector.broadcast %c-1_i32_208 : i32 to vector<1x512xi32>
    %667 = arith.addi %3, %666 : vector<1x512xi32>
    %c16_i32_209 = arith.constant 16 : i32
    %668 = vector.broadcast %c16_i32_209 : i32 to vector<1x512xi32>
    %669 = arith.cmpi slt, %667, %668 : vector<1x512xi32>
    %670 = arith.andi %665, %669 : vector<1x512xi1>
    %c481_i32 = arith.constant 481 : i32
    %671 = tpu.dynamic_rotate %1 by %c481_i32 dim 1 : vector<4x512xf32>, i32 -> vector<4x512xf32>
    %cst_210 = arith.constant 0.000000e+00 : f32
    %672 = vector.shape_cast %670 : vector<1x512xi1> to vector<1x512xi1>
    %673 = vector.broadcast %672 : vector<1x512xi1> to vector<4x512xi1>
    %674 = vector.broadcast %cst_210 : f32 to vector<4x512xf32>
    %675 = arith.select %673, %671, %674 : vector<4x512xi1>, vector<4x512xf32>
    %676 = vector.extract_strided_slice %280 {offsets = [0, 21], sizes = [4, 1], strides = [1, 1]} : vector<4x28xf32> to vector<4x1xf32>
    %677 = vector.broadcast %676 : vector<4x1xf32> to vector<4x512xf32>
    %678 = arith.mulf %675, %677 : vector<4x512xf32>
    %679 = arith.addf %651, %678 : vector<4x512xf32>
    %c2_i32_211 = arith.constant 2 : i32
    %680 = vector.broadcast %c2_i32_211 : i32 to vector<1x512xi32>
    %681 = arith.addi %2, %680 : vector<1x512xi32>
    %c0_i32_212 = arith.constant 0 : i32
    %682 = vector.broadcast %c0_i32_212 : i32 to vector<1x512xi32>
    %683 = arith.cmpi sge, %681, %682 : vector<1x512xi32>
    %c2_i32_213 = arith.constant 2 : i32
    %684 = vector.broadcast %c2_i32_213 : i32 to vector<1x512xi32>
    %685 = arith.addi %2, %684 : vector<1x512xi32>
    %c16_i32_214 = arith.constant 16 : i32
    %686 = vector.broadcast %c16_i32_214 : i32 to vector<1x512xi32>
    %687 = arith.cmpi slt, %685, %686 : vector<1x512xi32>
    %688 = arith.andi %683, %687 : vector<1x512xi1>
    %c0_i32_215 = arith.constant 0 : i32
    %689 = vector.broadcast %c0_i32_215 : i32 to vector<1x512xi32>
    %690 = arith.addi %3, %689 : vector<1x512xi32>
    %c0_i32_216 = arith.constant 0 : i32
    %691 = vector.broadcast %c0_i32_216 : i32 to vector<1x512xi32>
    %692 = arith.cmpi sge, %690, %691 : vector<1x512xi32>
    %693 = arith.andi %688, %692 : vector<1x512xi1>
    %c0_i32_217 = arith.constant 0 : i32
    %694 = vector.broadcast %c0_i32_217 : i32 to vector<1x512xi32>
    %695 = arith.addi %3, %694 : vector<1x512xi32>
    %c16_i32_218 = arith.constant 16 : i32
    %696 = vector.broadcast %c16_i32_218 : i32 to vector<1x512xi32>
    %697 = arith.cmpi slt, %695, %696 : vector<1x512xi32>
    %698 = arith.andi %693, %697 : vector<1x512xi1>
    %c480_i32 = arith.constant 480 : i32
    %699 = tpu.dynamic_rotate %1 by %c480_i32 dim 1 : vector<4x512xf32>, i32 -> vector<4x512xf32>
    %cst_219 = arith.constant 0.000000e+00 : f32
    %700 = vector.shape_cast %698 : vector<1x512xi1> to vector<1x512xi1>
    %701 = vector.broadcast %700 : vector<1x512xi1> to vector<4x512xi1>
    %702 = vector.broadcast %cst_219 : f32 to vector<4x512xf32>
    %703 = arith.select %701, %699, %702 : vector<4x512xi1>, vector<4x512xf32>
    %704 = vector.extract_strided_slice %280 {offsets = [0, 22], sizes = [4, 1], strides = [1, 1]} : vector<4x28xf32> to vector<4x1xf32>
    %705 = vector.broadcast %704 : vector<4x1xf32> to vector<4x512xf32>
    %706 = arith.mulf %703, %705 : vector<4x512xf32>
    %707 = arith.addf %679, %706 : vector<4x512xf32>
    %c2_i32_220 = arith.constant 2 : i32
    %708 = vector.broadcast %c2_i32_220 : i32 to vector<1x512xi32>
    %709 = arith.addi %2, %708 : vector<1x512xi32>
    %c0_i32_221 = arith.constant 0 : i32
    %710 = vector.broadcast %c0_i32_221 : i32 to vector<1x512xi32>
    %711 = arith.cmpi sge, %709, %710 : vector<1x512xi32>
    %c2_i32_222 = arith.constant 2 : i32
    %712 = vector.broadcast %c2_i32_222 : i32 to vector<1x512xi32>
    %713 = arith.addi %2, %712 : vector<1x512xi32>
    %c16_i32_223 = arith.constant 16 : i32
    %714 = vector.broadcast %c16_i32_223 : i32 to vector<1x512xi32>
    %715 = arith.cmpi slt, %713, %714 : vector<1x512xi32>
    %716 = arith.andi %711, %715 : vector<1x512xi1>
    %c1_i32_224 = arith.constant 1 : i32
    %717 = vector.broadcast %c1_i32_224 : i32 to vector<1x512xi32>
    %718 = arith.addi %3, %717 : vector<1x512xi32>
    %c0_i32_225 = arith.constant 0 : i32
    %719 = vector.broadcast %c0_i32_225 : i32 to vector<1x512xi32>
    %720 = arith.cmpi sge, %718, %719 : vector<1x512xi32>
    %721 = arith.andi %716, %720 : vector<1x512xi1>
    %c1_i32_226 = arith.constant 1 : i32
    %722 = vector.broadcast %c1_i32_226 : i32 to vector<1x512xi32>
    %723 = arith.addi %3, %722 : vector<1x512xi32>
    %c16_i32_227 = arith.constant 16 : i32
    %724 = vector.broadcast %c16_i32_227 : i32 to vector<1x512xi32>
    %725 = arith.cmpi slt, %723, %724 : vector<1x512xi32>
    %726 = arith.andi %721, %725 : vector<1x512xi1>
    %c479_i32 = arith.constant 479 : i32
    %727 = tpu.dynamic_rotate %1 by %c479_i32 dim 1 : vector<4x512xf32>, i32 -> vector<4x512xf32>
    %cst_228 = arith.constant 0.000000e+00 : f32
    %728 = vector.shape_cast %726 : vector<1x512xi1> to vector<1x512xi1>
    %729 = vector.broadcast %728 : vector<1x512xi1> to vector<4x512xi1>
    %730 = vector.broadcast %cst_228 : f32 to vector<4x512xf32>
    %731 = arith.select %729, %727, %730 : vector<4x512xi1>, vector<4x512xf32>
    %732 = vector.extract_strided_slice %280 {offsets = [0, 23], sizes = [4, 1], strides = [1, 1]} : vector<4x28xf32> to vector<4x1xf32>
    %733 = vector.broadcast %732 : vector<4x1xf32> to vector<4x512xf32>
    %734 = arith.mulf %731, %733 : vector<4x512xf32>
    %735 = arith.addf %707, %734 : vector<4x512xf32>
    %c2_i32_229 = arith.constant 2 : i32
    %736 = vector.broadcast %c2_i32_229 : i32 to vector<1x512xi32>
    %737 = arith.addi %2, %736 : vector<1x512xi32>
    %c0_i32_230 = arith.constant 0 : i32
    %738 = vector.broadcast %c0_i32_230 : i32 to vector<1x512xi32>
    %739 = arith.cmpi sge, %737, %738 : vector<1x512xi32>
    %c2_i32_231 = arith.constant 2 : i32
    %740 = vector.broadcast %c2_i32_231 : i32 to vector<1x512xi32>
    %741 = arith.addi %2, %740 : vector<1x512xi32>
    %c16_i32_232 = arith.constant 16 : i32
    %742 = vector.broadcast %c16_i32_232 : i32 to vector<1x512xi32>
    %743 = arith.cmpi slt, %741, %742 : vector<1x512xi32>
    %744 = arith.andi %739, %743 : vector<1x512xi1>
    %c2_i32_233 = arith.constant 2 : i32
    %745 = vector.broadcast %c2_i32_233 : i32 to vector<1x512xi32>
    %746 = arith.addi %3, %745 : vector<1x512xi32>
    %c0_i32_234 = arith.constant 0 : i32
    %747 = vector.broadcast %c0_i32_234 : i32 to vector<1x512xi32>
    %748 = arith.cmpi sge, %746, %747 : vector<1x512xi32>
    %749 = arith.andi %744, %748 : vector<1x512xi1>
    %c2_i32_235 = arith.constant 2 : i32
    %750 = vector.broadcast %c2_i32_235 : i32 to vector<1x512xi32>
    %751 = arith.addi %3, %750 : vector<1x512xi32>
    %c16_i32_236 = arith.constant 16 : i32
    %752 = vector.broadcast %c16_i32_236 : i32 to vector<1x512xi32>
    %753 = arith.cmpi slt, %751, %752 : vector<1x512xi32>
    %754 = arith.andi %749, %753 : vector<1x512xi1>
    %c478_i32 = arith.constant 478 : i32
    %755 = tpu.dynamic_rotate %1 by %c478_i32 dim 1 : vector<4x512xf32>, i32 -> vector<4x512xf32>
    %cst_237 = arith.constant 0.000000e+00 : f32
    %756 = vector.shape_cast %754 : vector<1x512xi1> to vector<1x512xi1>
    %757 = vector.broadcast %756 : vector<1x512xi1> to vector<4x512xi1>
    %758 = vector.broadcast %cst_237 : f32 to vector<4x512xf32>
    %759 = arith.select %757, %755, %758 : vector<4x512xi1>, vector<4x512xf32>
    %760 = vector.extract_strided_slice %280 {offsets = [0, 24], sizes = [4, 1], strides = [1, 1]} : vector<4x28xf32> to vector<4x1xf32>
    %761 = vector.broadcast %760 : vector<4x1xf32> to vector<4x512xf32>
    %762 = arith.mulf %759, %761 : vector<4x512xf32>
    %763 = arith.addf %735, %762 : vector<4x512xf32>
    %764 = vector.extract_strided_slice %280 {offsets = [0, 25], sizes = [4, 1], strides = [1, 1]} : vector<4x28xf32> to vector<4x1xf32>
    %765 = vector.extract_strided_slice %280 {offsets = [0, 26], sizes = [4, 1], strides = [1, 1]} : vector<4x28xf32> to vector<4x1xf32>
    %766 = vector.extract_strided_slice %280 {offsets = [0, 27], sizes = [4, 1], strides = [1, 1]} : vector<4x28xf32> to vector<4x1xf32>
    %767 = vector.broadcast %764 : vector<4x1xf32> to vector<4x512xf32>
    %768 = arith.addf %763, %767 : vector<4x512xf32>
    %769 = arith.mulf %768, %768 : vector<4x512xf32>
    %770 = tpu.concatenate %768, %769 in 0 : vector<4x512xf32>, vector<4x512xf32> -> vector<8x512xf32>
    %cst_238 = arith.constant dense<0.000000e+00> : vector<8x2xf32>
    %771 = tpu.matmul %770, %4, %cst_238 {dimension_numbers = #tpu.dot_dimension_numbers<[1], [0], [0], [1], [0, 0, 1, 1], [], []>} : vector<8x512xf32>, vector<512x2xf32>, vector<8x2xf32> -> vector<8x2xf32>
    %772 = vector.extract_strided_slice %771 {offsets = [0, 0], sizes = [4, 2], strides = [1, 1]} : vector<8x2xf32> to vector<4x2xf32>
    %773 = vector.extract_strided_slice %771 {offsets = [4, 0], sizes = [4, 2], strides = [1, 1]} : vector<8x2xf32> to vector<4x2xf32>
    %774 = tpu.concatenate %772, %773 in 1 : vector<4x2xf32>, vector<4x2xf32> -> vector<4x4xf32>
    %cst_239 = arith.constant dense<0.000000e+00> : vector<4x4xf32>
    %775 = tpu.matmul %6, %774, %cst_239 {dimension_numbers = #tpu.dot_dimension_numbers<[1], [0], [0], [1], [0, 0, 1, 1], [], []>} : vector<4x4xf32>, vector<4x4xf32>, vector<4x4xf32> -> vector<4x4xf32>
    %776 = vector.extract_strided_slice %775 {offsets = [0, 0], sizes = [4, 2], strides = [1, 1]} : vector<4x4xf32> to vector<4x2xf32>
    %cst_240 = arith.constant 3.906250e-03 : f32
    %777 = vector.broadcast %cst_240 : f32 to vector<4x2xf32>
    %778 = arith.mulf %776, %777 : vector<4x2xf32>
    %779 = vector.extract_strided_slice %775 {offsets = [0, 2], sizes = [4, 2], strides = [1, 1]} : vector<4x4xf32> to vector<4x2xf32>
    %cst_241 = arith.constant 3.906250e-03 : f32
    %780 = vector.broadcast %cst_241 : f32 to vector<4x2xf32>
    %781 = arith.mulf %779, %780 : vector<4x2xf32>
    %782 = arith.mulf %778, %778 : vector<4x2xf32>
    %783 = arith.subf %781, %782 : vector<4x2xf32>
    %cst_242 = arith.constant 9.99999974E-6 : f32
    %784 = vector.broadcast %cst_242 : f32 to vector<4x2xf32>
    %785 = arith.addf %783, %784 : vector<4x2xf32>
    %786 = math.rsqrt %785 : vector<4x2xf32>
    %787 = vector.broadcast %765 : vector<4x1xf32> to vector<4x2xf32>
    %788 = arith.mulf %786, %787 : vector<4x2xf32>
    %789 = arith.mulf %778, %788 : vector<4x2xf32>
    %790 = vector.broadcast %766 : vector<4x1xf32> to vector<4x2xf32>
    %791 = arith.subf %790, %789 : vector<4x2xf32>
    %792 = tpu.concatenate %788, %791 in 0 : vector<4x2xf32>, vector<4x2xf32> -> vector<8x2xf32>
    %cst_243 = arith.constant dense<0.000000e+00> : vector<8x512xf32>
    %793 = tpu.matmul %792, %5, %cst_243 {dimension_numbers = #tpu.dot_dimension_numbers<[1], [0], [0], [1], [0, 0, 1, 1], [], []>} : vector<8x2xf32>, vector<2x512xf32>, vector<8x512xf32> -> vector<8x512xf32>
    %794 = vector.extract_strided_slice %793 {offsets = [0, 0], sizes = [4, 512], strides = [1, 1]} : vector<8x512xf32> to vector<4x512xf32>
    %795 = arith.mulf %768, %794 : vector<4x512xf32>
    %796 = vector.extract_strided_slice %793 {offsets = [4, 0], sizes = [4, 512], strides = [1, 1]} : vector<8x512xf32> to vector<4x512xf32>
    %797 = arith.addf %795, %796 : vector<4x512xf32>
    %c0_244 = arith.constant 0 : index
    %c0_245 = arith.constant 0 : index
    %798 = vector.load %arg10[%c0_244, %c0_245] : memref<4x5xf32, #tpu.memory_space<vmem>>, vector<4x5xf32>
    %799 = vector.extract_strided_slice %798 {offsets = [0, 0], sizes = [4, 4], strides = [1, 1]} : vector<4x5xf32> to vector<4x4xf32>
    %cst_246 = arith.constant dense<0.000000e+00> : vector<4x512xf32>
    %800 = tpu.matmul %799, %797, %cst_246 {dimension_numbers = #tpu.dot_dimension_numbers<[1], [0], [0], [1], [0, 0, 1, 1], [], []>} : vector<4x4xf32>, vector<4x512xf32>, vector<4x512xf32> -> vector<4x512xf32>
    %801 = vector.extract_strided_slice %798 {offsets = [0, 4], sizes = [4, 1], strides = [1, 1]} : vector<4x5xf32> to vector<4x1xf32>
    %802 = vector.broadcast %801 : vector<4x1xf32> to vector<4x512xf32>
    %803 = arith.addf %800, %802 : vector<4x512xf32>
    %cst_247 = arith.constant 5.000000e-01 : f32
    %804 = vector.broadcast %cst_247 : f32 to vector<4x512xf32>
    %805 = arith.mulf %804, %803 : vector<4x512xf32>
    %cst_248 = arith.constant 0.707106769 : f32
    %806 = vector.broadcast %cst_248 : f32 to vector<4x512xf32>
    %807 = arith.mulf %803, %806 : vector<4x512xf32>
    %cst_249 = arith.constant -4.000000e+00 : f32
    %cst_250 = arith.constant 4.000000e+00 : f32
    %808 = vector.broadcast %cst_249 : f32 to vector<4x512xf32>
    %809 = arith.maximumf %808, %807 : vector<4x512xf32>
    %810 = vector.broadcast %cst_250 : f32 to vector<4x512xf32>
    %811 = arith.minimumf %810, %809 : vector<4x512xf32>
    %812 = arith.mulf %811, %811 : vector<4x512xf32>
    %cst_251 = arith.constant -2.72614237E-10 : f32
    %813 = vector.broadcast %cst_251 : f32 to vector<4x512xf32>
    %814 = arith.mulf %813, %812 : vector<4x512xf32>
    %cst_252 = arith.constant 2.77068146E-8 : f32
    %815 = vector.broadcast %cst_252 : f32 to vector<4x512xf32>
    %816 = arith.addf %814, %815 : vector<4x512xf32>
    %817 = arith.mulf %816, %812 : vector<4x512xf32>
    %cst_253 = arith.constant -2.10102394E-6 : f32
    %818 = vector.broadcast %cst_253 : f32 to vector<4x512xf32>
    %819 = arith.addf %817, %818 : vector<4x512xf32>
    %820 = arith.mulf %819, %812 : vector<4x512xf32>
    %cst_254 = arith.constant -5.69250624E-5 : f32
    %821 = vector.broadcast %cst_254 : f32 to vector<4x512xf32>
    %822 = arith.addf %820, %821 : vector<4x512xf32>
    %823 = arith.mulf %822, %812 : vector<4x512xf32>
    %cst_255 = arith.constant -7.34990637E-4 : f32
    %824 = vector.broadcast %cst_255 : f32 to vector<4x512xf32>
    %825 = arith.addf %823, %824 : vector<4x512xf32>
    %826 = arith.mulf %825, %812 : vector<4x512xf32>
    %cst_256 = arith.constant -2.954600e-03 : f32
    %827 = vector.broadcast %cst_256 : f32 to vector<4x512xf32>
    %828 = arith.addf %826, %827 : vector<4x512xf32>
    %829 = arith.mulf %828, %812 : vector<4x512xf32>
    %cst_257 = arith.constant -0.0160960332 : f32
    %830 = vector.broadcast %cst_257 : f32 to vector<4x512xf32>
    %831 = arith.addf %829, %830 : vector<4x512xf32>
    %cst_258 = arith.constant -1.45660715E-5 : f32
    %832 = vector.broadcast %cst_258 : f32 to vector<4x512xf32>
    %833 = arith.mulf %832, %812 : vector<4x512xf32>
    %cst_259 = arith.constant -2.13374049E-4 : f32
    %834 = vector.broadcast %cst_259 : f32 to vector<4x512xf32>
    %835 = arith.addf %833, %834 : vector<4x512xf32>
    %836 = arith.mulf %835, %812 : vector<4x512xf32>
    %cst_260 = arith.constant -0.00168282702 : f32
    %837 = vector.broadcast %cst_260 : f32 to vector<4x512xf32>
    %838 = arith.addf %836, %837 : vector<4x512xf32>
    %839 = arith.mulf %838, %812 : vector<4x512xf32>
    %cst_261 = arith.constant -0.00737332925 : f32
    %840 = vector.broadcast %cst_261 : f32 to vector<4x512xf32>
    %841 = arith.addf %839, %840 : vector<4x512xf32>
    %842 = arith.mulf %841, %812 : vector<4x512xf32>
    %cst_262 = arith.constant -0.0142647391 : f32
    %843 = vector.broadcast %cst_262 : f32 to vector<4x512xf32>
    %844 = arith.addf %842, %843 : vector<4x512xf32>
    %845 = tpu.reciprocal %844 {approx = true} : vector<4x512xf32> -> vector<4x512xf32>
    %846 = arith.mulf %844, %845 : vector<4x512xf32>
    %cst_263 = arith.constant 2.000000e+00 : f32
    %847 = vector.broadcast %cst_263 : f32 to vector<4x512xf32>
    %848 = arith.subf %847, %846 : vector<4x512xf32>
    %849 = arith.mulf %845, %848 : vector<4x512xf32>
    %850 = arith.mulf %811, %831 : vector<4x512xf32>
    %851 = arith.mulf %850, %849 : vector<4x512xf32>
    %cst_264 = arith.constant 1.000000e+00 : f32
    %852 = vector.broadcast %cst_264 : f32 to vector<4x512xf32>
    %853 = arith.addf %852, %851 : vector<4x512xf32>
    %854 = arith.mulf %805, %853 : vector<4x512xf32>
    %855 = arith.mulf %279, %854 : vector<4x512xf32>
    %c0_265 = arith.constant 0 : index
    %c0_266 = arith.constant 0 : index
    %856 = vector.load %arg11[%c0_265, %c0_266] : memref<4x12xf32, #tpu.memory_space<vmem>>, vector<4x12xf32>
    %c17_i32_267 = arith.constant 17 : i32
    %857 = tpu.dynamic_rotate %855 by %c17_i32_267 dim 1 : vector<4x512xf32>, i32 -> vector<4x512xf32>
    %cst_268 = arith.constant 0.000000e+00 : f32
    %858 = vector.shape_cast %26 : vector<1x512xi1> to vector<1x512xi1>
    %859 = vector.broadcast %858 : vector<1x512xi1> to vector<4x512xi1>
    %860 = vector.broadcast %cst_268 : f32 to vector<4x512xf32>
    %861 = arith.select %859, %857, %860 : vector<4x512xi1>, vector<4x512xf32>
    %862 = vector.extract_strided_slice %856 {offsets = [0, 0], sizes = [4, 1], strides = [1, 1]} : vector<4x12xf32> to vector<4x1xf32>
    %863 = vector.broadcast %862 : vector<4x1xf32> to vector<4x512xf32>
    %864 = arith.mulf %861, %863 : vector<4x512xf32>
    %c16_i32_269 = arith.constant 16 : i32
    %865 = tpu.dynamic_rotate %855 by %c16_i32_269 dim 1 : vector<4x512xf32>, i32 -> vector<4x512xf32>
    %cst_270 = arith.constant 0.000000e+00 : f32
    %866 = vector.shape_cast %53 : vector<1x512xi1> to vector<1x512xi1>
    %867 = vector.broadcast %866 : vector<1x512xi1> to vector<4x512xi1>
    %868 = vector.broadcast %cst_270 : f32 to vector<4x512xf32>
    %869 = arith.select %867, %865, %868 : vector<4x512xi1>, vector<4x512xf32>
    %870 = vector.extract_strided_slice %856 {offsets = [0, 1], sizes = [4, 1], strides = [1, 1]} : vector<4x12xf32> to vector<4x1xf32>
    %871 = vector.broadcast %870 : vector<4x1xf32> to vector<4x512xf32>
    %872 = arith.mulf %869, %871 : vector<4x512xf32>
    %873 = arith.addf %864, %872 : vector<4x512xf32>
    %c15_i32_271 = arith.constant 15 : i32
    %874 = tpu.dynamic_rotate %855 by %c15_i32_271 dim 1 : vector<4x512xf32>, i32 -> vector<4x512xf32>
    %cst_272 = arith.constant 0.000000e+00 : f32
    %875 = vector.shape_cast %81 : vector<1x512xi1> to vector<1x512xi1>
    %876 = vector.broadcast %875 : vector<1x512xi1> to vector<4x512xi1>
    %877 = vector.broadcast %cst_272 : f32 to vector<4x512xf32>
    %878 = arith.select %876, %874, %877 : vector<4x512xi1>, vector<4x512xf32>
    %879 = vector.extract_strided_slice %856 {offsets = [0, 2], sizes = [4, 1], strides = [1, 1]} : vector<4x12xf32> to vector<4x1xf32>
    %880 = vector.broadcast %879 : vector<4x1xf32> to vector<4x512xf32>
    %881 = arith.mulf %878, %880 : vector<4x512xf32>
    %882 = arith.addf %873, %881 : vector<4x512xf32>
    %c1_i32_273 = arith.constant 1 : i32
    %883 = tpu.dynamic_rotate %855 by %c1_i32_273 dim 1 : vector<4x512xf32>, i32 -> vector<4x512xf32>
    %cst_274 = arith.constant 0.000000e+00 : f32
    %884 = vector.shape_cast %109 : vector<1x512xi1> to vector<1x512xi1>
    %885 = vector.broadcast %884 : vector<1x512xi1> to vector<4x512xi1>
    %886 = vector.broadcast %cst_274 : f32 to vector<4x512xf32>
    %887 = arith.select %885, %883, %886 : vector<4x512xi1>, vector<4x512xf32>
    %888 = vector.extract_strided_slice %856 {offsets = [0, 3], sizes = [4, 1], strides = [1, 1]} : vector<4x12xf32> to vector<4x1xf32>
    %889 = vector.broadcast %888 : vector<4x1xf32> to vector<4x512xf32>
    %890 = arith.mulf %887, %889 : vector<4x512xf32>
    %891 = arith.addf %882, %890 : vector<4x512xf32>
    %892 = vector.extract_strided_slice %856 {offsets = [0, 4], sizes = [4, 1], strides = [1, 1]} : vector<4x12xf32> to vector<4x1xf32>
    %893 = vector.broadcast %892 : vector<4x1xf32> to vector<4x512xf32>
    %894 = arith.mulf %855, %893 : vector<4x512xf32>
    %895 = arith.addf %891, %894 : vector<4x512xf32>
    %c511_i32_275 = arith.constant 511 : i32
    %896 = tpu.dynamic_rotate %855 by %c511_i32_275 dim 1 : vector<4x512xf32>, i32 -> vector<4x512xf32>
    %cst_276 = arith.constant 0.000000e+00 : f32
    %897 = vector.shape_cast %141 : vector<1x512xi1> to vector<1x512xi1>
    %898 = vector.broadcast %897 : vector<1x512xi1> to vector<4x512xi1>
    %899 = vector.broadcast %cst_276 : f32 to vector<4x512xf32>
    %900 = arith.select %898, %896, %899 : vector<4x512xi1>, vector<4x512xf32>
    %901 = vector.extract_strided_slice %856 {offsets = [0, 5], sizes = [4, 1], strides = [1, 1]} : vector<4x12xf32> to vector<4x1xf32>
    %902 = vector.broadcast %901 : vector<4x1xf32> to vector<4x512xf32>
    %903 = arith.mulf %900, %902 : vector<4x512xf32>
    %904 = arith.addf %895, %903 : vector<4x512xf32>
    %c497_i32_277 = arith.constant 497 : i32
    %905 = tpu.dynamic_rotate %855 by %c497_i32_277 dim 1 : vector<4x512xf32>, i32 -> vector<4x512xf32>
    %cst_278 = arith.constant 0.000000e+00 : f32
    %906 = vector.shape_cast %169 : vector<1x512xi1> to vector<1x512xi1>
    %907 = vector.broadcast %906 : vector<1x512xi1> to vector<4x512xi1>
    %908 = vector.broadcast %cst_278 : f32 to vector<4x512xf32>
    %909 = arith.select %907, %905, %908 : vector<4x512xi1>, vector<4x512xf32>
    %910 = vector.extract_strided_slice %856 {offsets = [0, 6], sizes = [4, 1], strides = [1, 1]} : vector<4x12xf32> to vector<4x1xf32>
    %911 = vector.broadcast %910 : vector<4x1xf32> to vector<4x512xf32>
    %912 = arith.mulf %909, %911 : vector<4x512xf32>
    %913 = arith.addf %904, %912 : vector<4x512xf32>
    %c496_i32_279 = arith.constant 496 : i32
    %914 = tpu.dynamic_rotate %855 by %c496_i32_279 dim 1 : vector<4x512xf32>, i32 -> vector<4x512xf32>
    %cst_280 = arith.constant 0.000000e+00 : f32
    %915 = vector.shape_cast %197 : vector<1x512xi1> to vector<1x512xi1>
    %916 = vector.broadcast %915 : vector<1x512xi1> to vector<4x512xi1>
    %917 = vector.broadcast %cst_280 : f32 to vector<4x512xf32>
    %918 = arith.select %916, %914, %917 : vector<4x512xi1>, vector<4x512xf32>
    %919 = vector.extract_strided_slice %856 {offsets = [0, 7], sizes = [4, 1], strides = [1, 1]} : vector<4x12xf32> to vector<4x1xf32>
    %920 = vector.broadcast %919 : vector<4x1xf32> to vector<4x512xf32>
    %921 = arith.mulf %918, %920 : vector<4x512xf32>
    %922 = arith.addf %913, %921 : vector<4x512xf32>
    %c495_i32_281 = arith.constant 495 : i32
    %923 = tpu.dynamic_rotate %855 by %c495_i32_281 dim 1 : vector<4x512xf32>, i32 -> vector<4x512xf32>
    %cst_282 = arith.constant 0.000000e+00 : f32
    %924 = vector.shape_cast %225 : vector<1x512xi1> to vector<1x512xi1>
    %925 = vector.broadcast %924 : vector<1x512xi1> to vector<4x512xi1>
    %926 = vector.broadcast %cst_282 : f32 to vector<4x512xf32>
    %927 = arith.select %925, %923, %926 : vector<4x512xi1>, vector<4x512xf32>
    %928 = vector.extract_strided_slice %856 {offsets = [0, 8], sizes = [4, 1], strides = [1, 1]} : vector<4x12xf32> to vector<4x1xf32>
    %929 = vector.broadcast %928 : vector<4x1xf32> to vector<4x512xf32>
    %930 = arith.mulf %927, %929 : vector<4x512xf32>
    %931 = arith.addf %922, %930 : vector<4x512xf32>
    %932 = vector.extract_strided_slice %856 {offsets = [0, 9], sizes = [4, 1], strides = [1, 1]} : vector<4x12xf32> to vector<4x1xf32>
    %933 = vector.extract_strided_slice %856 {offsets = [0, 10], sizes = [4, 1], strides = [1, 1]} : vector<4x12xf32> to vector<4x1xf32>
    %934 = vector.extract_strided_slice %856 {offsets = [0, 11], sizes = [4, 1], strides = [1, 1]} : vector<4x12xf32> to vector<4x1xf32>
    %935 = vector.broadcast %932 : vector<4x1xf32> to vector<4x512xf32>
    %936 = arith.addf %931, %935 : vector<4x512xf32>
    %937 = arith.mulf %936, %936 : vector<4x512xf32>
    %938 = tpu.concatenate %936, %937 in 0 : vector<4x512xf32>, vector<4x512xf32> -> vector<8x512xf32>
    %cst_283 = arith.constant dense<0.000000e+00> : vector<8x2xf32>
    %939 = tpu.matmul %938, %4, %cst_283 {dimension_numbers = #tpu.dot_dimension_numbers<[1], [0], [0], [1], [0, 0, 1, 1], [], []>} : vector<8x512xf32>, vector<512x2xf32>, vector<8x2xf32> -> vector<8x2xf32>
    %940 = vector.extract_strided_slice %939 {offsets = [0, 0], sizes = [4, 2], strides = [1, 1]} : vector<8x2xf32> to vector<4x2xf32>
    %941 = vector.extract_strided_slice %939 {offsets = [4, 0], sizes = [4, 2], strides = [1, 1]} : vector<8x2xf32> to vector<4x2xf32>
    %942 = tpu.concatenate %940, %941 in 1 : vector<4x2xf32>, vector<4x2xf32> -> vector<4x4xf32>
    %cst_284 = arith.constant dense<0.000000e+00> : vector<4x4xf32>
    %943 = tpu.matmul %6, %942, %cst_284 {dimension_numbers = #tpu.dot_dimension_numbers<[1], [0], [0], [1], [0, 0, 1, 1], [], []>} : vector<4x4xf32>, vector<4x4xf32>, vector<4x4xf32> -> vector<4x4xf32>
    %944 = vector.extract_strided_slice %943 {offsets = [0, 0], sizes = [4, 2], strides = [1, 1]} : vector<4x4xf32> to vector<4x2xf32>
    %cst_285 = arith.constant 3.906250e-03 : f32
    %945 = vector.broadcast %cst_285 : f32 to vector<4x2xf32>
    %946 = arith.mulf %944, %945 : vector<4x2xf32>
    %947 = vector.extract_strided_slice %943 {offsets = [0, 2], sizes = [4, 2], strides = [1, 1]} : vector<4x4xf32> to vector<4x2xf32>
    %cst_286 = arith.constant 3.906250e-03 : f32
    %948 = vector.broadcast %cst_286 : f32 to vector<4x2xf32>
    %949 = arith.mulf %947, %948 : vector<4x2xf32>
    %950 = arith.mulf %946, %946 : vector<4x2xf32>
    %951 = arith.subf %949, %950 : vector<4x2xf32>
    %cst_287 = arith.constant 9.99999974E-6 : f32
    %952 = vector.broadcast %cst_287 : f32 to vector<4x2xf32>
    %953 = arith.addf %951, %952 : vector<4x2xf32>
    %954 = math.rsqrt %953 : vector<4x2xf32>
    %955 = vector.broadcast %933 : vector<4x1xf32> to vector<4x2xf32>
    %956 = arith.mulf %954, %955 : vector<4x2xf32>
    %957 = arith.mulf %946, %956 : vector<4x2xf32>
    %958 = vector.broadcast %934 : vector<4x1xf32> to vector<4x2xf32>
    %959 = arith.subf %958, %957 : vector<4x2xf32>
    %960 = tpu.concatenate %956, %959 in 0 : vector<4x2xf32>, vector<4x2xf32> -> vector<8x2xf32>
    %cst_288 = arith.constant dense<0.000000e+00> : vector<8x512xf32>
    %961 = tpu.matmul %960, %5, %cst_288 {dimension_numbers = #tpu.dot_dimension_numbers<[1], [0], [0], [1], [0, 0, 1, 1], [], []>} : vector<8x2xf32>, vector<2x512xf32>, vector<8x512xf32> -> vector<8x512xf32>
    %962 = vector.extract_strided_slice %961 {offsets = [0, 0], sizes = [4, 512], strides = [1, 1]} : vector<8x512xf32> to vector<4x512xf32>
    %963 = arith.mulf %936, %962 : vector<4x512xf32>
    %964 = vector.extract_strided_slice %961 {offsets = [4, 0], sizes = [4, 512], strides = [1, 1]} : vector<8x512xf32> to vector<4x512xf32>
    %965 = arith.addf %963, %964 : vector<4x512xf32>
    %966 = tpu.concatenate %965, %1 in 0 : vector<4x512xf32>, vector<4x512xf32> -> vector<8x512xf32>
    %c0_289 = arith.constant 0 : index
    %c0_290 = arith.constant 0 : index
    %967 = vector.load %arg12[%c0_289, %c0_290] : memref<16x9xf32, #tpu.memory_space<vmem>>, vector<16x9xf32>
    %968 = vector.extract_strided_slice %967 {offsets = [0, 0], sizes = [16, 8], strides = [1, 1]} : vector<16x9xf32> to vector<16x8xf32>
    %cst_291 = arith.constant dense<0.000000e+00> : vector<16x512xf32>
    %969 = tpu.matmul %968, %966, %cst_291 {dimension_numbers = #tpu.dot_dimension_numbers<[1], [0], [0], [1], [0, 0, 1, 1], [], []>} : vector<16x8xf32>, vector<8x512xf32>, vector<16x512xf32> -> vector<16x512xf32>
    %970 = vector.extract_strided_slice %967 {offsets = [0, 8], sizes = [16, 1], strides = [1, 1]} : vector<16x9xf32> to vector<16x1xf32>
    %971 = vector.broadcast %970 : vector<16x1xf32> to vector<16x512xf32>
    %972 = arith.addf %969, %971 : vector<16x512xf32>
    %973 = vector.extract_strided_slice %972 {offsets = [0, 0], sizes = [8, 512], strides = [1, 1]} : vector<16x512xf32> to vector<8x512xf32>
    %cst_292 = arith.constant 5.000000e-01 : f32
    %974 = vector.broadcast %cst_292 : f32 to vector<8x512xf32>
    %975 = arith.mulf %974, %973 : vector<8x512xf32>
    %cst_293 = arith.constant 0.707106769 : f32
    %976 = vector.broadcast %cst_293 : f32 to vector<8x512xf32>
    %977 = arith.mulf %973, %976 : vector<8x512xf32>
    %cst_294 = arith.constant -4.000000e+00 : f32
    %cst_295 = arith.constant 4.000000e+00 : f32
    %978 = vector.broadcast %cst_294 : f32 to vector<8x512xf32>
    %979 = arith.maximumf %978, %977 : vector<8x512xf32>
    %980 = vector.broadcast %cst_295 : f32 to vector<8x512xf32>
    %981 = arith.minimumf %980, %979 : vector<8x512xf32>
    %982 = arith.mulf %981, %981 : vector<8x512xf32>
    %cst_296 = arith.constant -2.72614237E-10 : f32
    %983 = vector.broadcast %cst_296 : f32 to vector<8x512xf32>
    %984 = arith.mulf %983, %982 : vector<8x512xf32>
    %cst_297 = arith.constant 2.77068146E-8 : f32
    %985 = vector.broadcast %cst_297 : f32 to vector<8x512xf32>
    %986 = arith.addf %984, %985 : vector<8x512xf32>
    %987 = arith.mulf %986, %982 : vector<8x512xf32>
    %cst_298 = arith.constant -2.10102394E-6 : f32
    %988 = vector.broadcast %cst_298 : f32 to vector<8x512xf32>
    %989 = arith.addf %987, %988 : vector<8x512xf32>
    %990 = arith.mulf %989, %982 : vector<8x512xf32>
    %cst_299 = arith.constant -5.69250624E-5 : f32
    %991 = vector.broadcast %cst_299 : f32 to vector<8x512xf32>
    %992 = arith.addf %990, %991 : vector<8x512xf32>
    %993 = arith.mulf %992, %982 : vector<8x512xf32>
    %cst_300 = arith.constant -7.34990637E-4 : f32
    %994 = vector.broadcast %cst_300 : f32 to vector<8x512xf32>
    %995 = arith.addf %993, %994 : vector<8x512xf32>
    %996 = arith.mulf %995, %982 : vector<8x512xf32>
    %cst_301 = arith.constant -2.954600e-03 : f32
    %997 = vector.broadcast %cst_301 : f32 to vector<8x512xf32>
    %998 = arith.addf %996, %997 : vector<8x512xf32>
    %999 = arith.mulf %998, %982 : vector<8x512xf32>
    %cst_302 = arith.constant -0.0160960332 : f32
    %1000 = vector.broadcast %cst_302 : f32 to vector<8x512xf32>
    %1001 = arith.addf %999, %1000 : vector<8x512xf32>
    %cst_303 = arith.constant -1.45660715E-5 : f32
    %1002 = vector.broadcast %cst_303 : f32 to vector<8x512xf32>
    %1003 = arith.mulf %1002, %982 : vector<8x512xf32>
    %cst_304 = arith.constant -2.13374049E-4 : f32
    %1004 = vector.broadcast %cst_304 : f32 to vector<8x512xf32>
    %1005 = arith.addf %1003, %1004 : vector<8x512xf32>
    %1006 = arith.mulf %1005, %982 : vector<8x512xf32>
    %cst_305 = arith.constant -0.00168282702 : f32
    %1007 = vector.broadcast %cst_305 : f32 to vector<8x512xf32>
    %1008 = arith.addf %1006, %1007 : vector<8x512xf32>
    %1009 = arith.mulf %1008, %982 : vector<8x512xf32>
    %cst_306 = arith.constant -0.00737332925 : f32
    %1010 = vector.broadcast %cst_306 : f32 to vector<8x512xf32>
    %1011 = arith.addf %1009, %1010 : vector<8x512xf32>
    %1012 = arith.mulf %1011, %982 : vector<8x512xf32>
    %cst_307 = arith.constant -0.0142647391 : f32
    %1013 = vector.broadcast %cst_307 : f32 to vector<8x512xf32>
    %1014 = arith.addf %1012, %1013 : vector<8x512xf32>
    %1015 = tpu.reciprocal %1014 {approx = true} : vector<8x512xf32> -> vector<8x512xf32>
    %1016 = arith.mulf %1014, %1015 : vector<8x512xf32>
    %cst_308 = arith.constant 2.000000e+00 : f32
    %1017 = vector.broadcast %cst_308 : f32 to vector<8x512xf32>
    %1018 = arith.subf %1017, %1016 : vector<8x512xf32>
    %1019 = arith.mulf %1015, %1018 : vector<8x512xf32>
    %1020 = arith.mulf %981, %1001 : vector<8x512xf32>
    %1021 = arith.mulf %1020, %1019 : vector<8x512xf32>
    %cst_309 = arith.constant 1.000000e+00 : f32
    %1022 = vector.broadcast %cst_309 : f32 to vector<8x512xf32>
    %1023 = arith.addf %1022, %1021 : vector<8x512xf32>
    %1024 = arith.mulf %975, %1023 : vector<8x512xf32>
    %1025 = vector.extract_strided_slice %972 {offsets = [8, 0], sizes = [8, 512], strides = [1, 1]} : vector<16x512xf32> to vector<8x512xf32>
    %1026 = arith.addf %1024, %1025 : vector<8x512xf32>
    %c0_310 = arith.constant 0 : index
    %c0_311 = arith.constant 0 : index
    %c0_312 = arith.constant 0 : index
    %1027 = vector.load %arg13[%c0_310, %c0_311, %c0_312] : memref<1x8x512xf32, #tpu.memory_space<vmem>>, vector<1x8x512xf32>
    %1028 = vector.shape_cast %1027 : vector<1x8x512xf32> to vector<8x512xf32>
    %1029 = vector.shape_cast %1026 : vector<8x512xf32> to vector<1x8x512xf32>
    tpu.vector_store %arg13[%c0_310, %c0_311, %c0_312], %1029 {strides = array<i32>} : memref<1x8x512xf32, #tpu.memory_space<vmem>>, vector<1x8x512xf32>,
    return
  }
  func.func @transform_0(%arg0: i32) -> (i32, i32, i32) {
    %c0_i32 = arith.constant 0 : i32
    %c0_i32_0 = arith.constant 0 : i32
    %c0_i32_1 = arith.constant 0 : i32
    return %arg0, %c0_i32, %c0_i32_0 : i32, i32, i32
  }
  func.func @transform_1(%arg0: i32) -> (i32, i32) {
    %c0_i32 = arith.constant 0 : i32
    %c0_i32_0 = arith.constant 0 : i32
    %c0_i32_1 = arith.constant 0 : i32
    return %c0_i32, %c0_i32_0 : i32, i32
  }
  func.func @transform_2(%arg0: i32) -> (i32, i32) {
    %c0_i32 = arith.constant 0 : i32
    %c0_i32_0 = arith.constant 0 : i32
    %c0_i32_1 = arith.constant 0 : i32
    return %c0_i32, %c0_i32_0 : i32, i32
  }
  func.func @transform_3(%arg0: i32) -> (i32, i32) {
    %c0_i32 = arith.constant 0 : i32
    %c0_i32_0 = arith.constant 0 : i32
    %c0_i32_1 = arith.constant 0 : i32
    return %c0_i32, %c0_i32_0 : i32, i32
  }
  func.func @transform_4(%arg0: i32) -> (i32, i32) {
    %c0_i32 = arith.constant 0 : i32
    %c0_i32_0 = arith.constant 0 : i32
    %c0_i32_1 = arith.constant 0 : i32
    return %c0_i32, %c0_i32_0 : i32, i32
  }
  func.func @transform_5(%arg0: i32) -> (i32, i32) {
    %c0_i32 = arith.constant 0 : i32
    %c0_i32_0 = arith.constant 0 : i32
    %c0_i32_1 = arith.constant 0 : i32
    return %c0_i32, %c0_i32_0 : i32, i32
  }
  func.func @transform_6(%arg0: i32) -> (i32, i32) {
    %c0_i32 = arith.constant 0 : i32
    %c0_i32_0 = arith.constant 0 : i32
    %c0_i32_1 = arith.constant 0 : i32
    return %c0_i32, %c0_i32_0 : i32, i32
  }
  func.func @transform_7(%arg0: i32) -> (i32, i32) {
    %c0_i32 = arith.constant 0 : i32
    %c0_i32_0 = arith.constant 0 : i32
    %c0_i32_1 = arith.constant 0 : i32
    return %c0_i32, %c0_i32_0 : i32, i32
  }
  func.func @transform_8(%arg0: i32) -> (i32, i32) {
    %c0_i32 = arith.constant 0 : i32
    %c0_i32_0 = arith.constant 0 : i32
    %c0_i32_1 = arith.constant 0 : i32
    return %c0_i32, %c0_i32_0 : i32, i32
  }
  func.func @transform_9(%arg0: i32) -> (i32, i32) {
    %c0_i32 = arith.constant 0 : i32
    %c0_i32_0 = arith.constant 0 : i32
    %c0_i32_1 = arith.constant 0 : i32
    return %c0_i32, %c0_i32_0 : i32, i32
  }
  func.func @transform_10(%arg0: i32) -> (i32, i32) {
    %c0_i32 = arith.constant 0 : i32
    %c0_i32_0 = arith.constant 0 : i32
    %c0_i32_1 = arith.constant 0 : i32
    return %c0_i32, %c0_i32_0 : i32, i32
  }
  func.func @transform_11(%arg0: i32) -> (i32, i32) {
    %c0_i32 = arith.constant 0 : i32
    %c0_i32_0 = arith.constant 0 : i32
    %c0_i32_1 = arith.constant 0 : i32
    return %c0_i32, %c0_i32_0 : i32, i32
  }
  func.func @transform_12(%arg0: i32) -> (i32, i32, i32) {
    %c0_i32 = arith.constant 0 : i32
    %c0_i32_0 = arith.constant 0 : i32
    %c0_i32_1 = arith.constant 0 : i32
    return %arg0, %c0_i32, %c0_i32_0 : i32, i32, i32
  }
}

</mosaic_0001>

<bundles_post_ra>
// kernel: tpu_custom_call.1
= control target key start
LH: loop header
LB: loop body
LE: loop exit
PB: predicated region body
PF: predicated region fallthrough
CT: control target
= control target key end

     0   :  { %v7319_v3 = vmov 4   ;;  %v7308_v4 = vmov 1   ;;  %s7294_s0 = inlined_call_operand.vmem [shape: f32[1,4,512], index: 0, kind: input, shape index: {}]   ;;  %s7295_s1 = inlined_call_operand.vmem [shape: s32[1,512], index: 1, kind: input, shape index: {}]   ;;  %s7296_s2 = inlined_call_operand.vmem [shape: s32[1,512], index: 2, kind: input, shape index: {}]   ;;  %s7297_s3 = inlined_call_operand.vmem [shape: f32[512,2], index: 3, kind: input, shape index: {}]   ;;  %s7298_s4 = inlined_call_operand.vmem [shape: f32[2,512], index: 4, kind: input, shape index: {}]   ;;  %s7299_s5 = inlined_call_operand.vmem [shape: f32[4,4], index: 5, kind: input, shape index: {}]   ;;  %s7300_s6 = inlined_call_operand.vmem [shape: f32[4,12], index: 6, kind: input, shape index: {}]   ;;  %s7301_s7 = inlined_call_operand.vmem [shape: f32[4,5], index: 7, kind: input, shape index: {}]   ;;  %s7302_s8 = inlined_call_operand.vmem [shape: f32[4,28], index: 8, kind: input, shape index: {}]   ;;  %s7303_s9 = inlined_call_operand.vmem [shape: f32[4,5], index: 9, kind: input, shape index: {}]   ;;  %s7304_s10 = inlined_call_operand.vmem [shape: f32[4,12], index: 10, kind: input, shape index: {}]   ;;  %s7305_s11 = inlined_call_operand.vmem [shape: f32[16,9], index: 11, kind: input, shape index: {}]   ;;  %s7306_s12 = inlined_call_operand.hbm [shape: f32[1,8,512], index: 12, kind: output, shape index: {}]  }
   0x1   :  { %v3772_v0 = vld [vmem:[%s7300_s6] sm:$0xf]  ;;  %v3777_v1 = vld [vmem:[%s7294_s0 + $0x8] sm:$0xff]  ;;  %3456 = vset.pattern.permute.xlu0 %v7319_v3  ;;  %3458 = vset.pattern.permute.xlu2 %v7308_v4 }
   0x2   :  { %7503 = vst [vmem:[#allocation5_spill] sm:$0xff] %v3777_v1  ;;  %v3782_v2 = vld [vmem:[%s7294_s0] sm:$0xff]  ;;  %334 = vperm.xlu0 %3456, %v3772_v0  }
   0x3   :  { %7504 = vst [vmem:[#allocation6_spill] sm:$0xff] %v3782_v2 }
   0x4   :  { %126 = vst [vmem:[#allocation1 + $0x10] ss:$2 sm:$0xff] %v3777_v1 }
   0x5   :  { %124 = vst [vmem:[#allocation1] ss:$2 sm:$0xff] %v3782_v2 }
   0x6   :  { %17 = vsyncpa [#allocation3], 0  ;;  %v7321_v5 = vmov 0   ;;  %s3653_s0 = smov 17   ;;  %s3654_s27 = smov 16   ;;  %v7316_v16 = vmov 2   ;;  %v143_v50 = vlaneseq }
   0x7   :  { %3469 = vset.pattern.permute.xlu1 %v7321_v5  ;;  %s3656_s28 = smov 15   ;;  %v7313_v19 = vmov 3   ;;  %s3658_s29 = smov 1   ;;  %v7329_v22 = vmov 5   ;;  %v7311_v24 = vmov 6   ;;  %v7309_v26 = vmov 7  }
   0x8   :  { %v7325_v27 = vmov 8   ;;  %v7323_v29 = vmov 10   ;;  %v3836_v31 = vld [vmem:[%s7295_s1] sm:$0xf]  ;;  %v3664_v32 = vmov 839922192  }
   0x9   :  { %v3838_v33 = vunpack.c.l.s4 %v3664_v32  ;;  %v3665_v34 = vmov 12   ;;  %v3843_v35 = vld [vmem:[%s7302_s8] sm:$0xf]  ;;  %v113_v37 = vadd.s32 4294967295, %v3836_v31  ;;  %v7507_v43 = vmov 0  ;;  %s7389_s18 = smov 127  }
   0xa   :  { %3457 = vset.pattern.permute.xlu0 %v7321_v5  ;;  %v3849_v36 = vld [vmem:[%s7296_s2] sm:$0xf]  ;;  %vm279_vm13 = vcmp.ge.s32.totalorder %v3836_v31, 0  ;;  %vm280_vm14 = vcmp.lt.s32.totalorder %v3836_v31, 16  ;;  %v3910_v56 = vand.u32 127, %v143_v50  ;;  %v7512_v63 = vmov 0 }
   0xb   :  { %v129_v6 = vld.sshfl [vmem:[#allocation1 + $0x10] sm:$0xff pattern:$0x75316420]  ;;  %v130_v7 = vld.sshfl [vmem:[#allocation1 + $0x18] sm:$0xff pattern:$0x75316420]  ;;  %v7327_v38 = vunpack.c.0.s8 %v3838_v33 }
   0xc   :  { %139 = vrot.lane.b32.xlu1 %v129_v6, %s3653_s0  ;;  %v128_v8 = vld.sshfl [vmem:[#allocation1 + $0x8] sm:$0xff pattern:$0x75316420]  ;;  %v127_v9 = vld.sshfl [vmem:[#allocation1] sm:$0xff pattern:$0x75316420]  ;;  %141 = vrot.lane.b32.xlu2 %v130_v7, %s3653_s0 }
   0xd   :  { %137 = vrot.lane.b32.xlu0 %v128_v8, %s3653_s0  ;;  %176 = vst [vmem:[#allocation1] ss:$2 sm:$0xff] %v3782_v2  ;;  %v3854_v39 = vadd.s32 4294967295, %v3849_v36  ;;  %vm114_vm0 = vcmp.ge.s32.totalorder %v113_v37, 0  ;;  %vm115_vm1 = vcmp.lt.s32.totalorder %v113_v37, 16  ;;  %v3869_v46 = vadd.s32 1, %v3849_v36 }
   0xe   :  { %178 = vst [vmem:[#allocation1 + $0x10] ss:$2 sm:$0xff] %v3777_v1  ;;  %vm3860_vm2 = vmand %vm114_vm0, %vm115_vm1  ;;  %vm7315_vm6 = vcmp.ge.s32.totalorder %v3849_v36, 0  ;;  %vm7307_vm10 = vcmp.lt.s32.totalorder %v3849_v36, 16  ;;  %s7377_s19 = smov 113   ;;  %s3670_s22 = smov 34  }
   0xf   :  { %7505 = vst [vmem:[#allocation7_spill] sm:$0xff] %v3849_v36  ;;  %v7508_v43 = vsel %vm3860_vm2, 4294967295, %v7507_v43  ;;  %vm7331_vm3 = vcmp.ge.s32.totalorder %v3854_v39, 0  ;;  %vm7318_vm5 = vcmp.lt.s32.totalorder %v3854_v39, 16  ;;  %vm7332_vm8 = vcmp.ge.s32.totalorder %v3869_v46, 0  ;;  %vm173_vm9 = vmand %vm3860_vm2, %vm7315_vm6  ;;  %s7365_s23 = smov 111  }
  0x10   :  { %7506 = vst [vmem:[#allocation8_spill] sm:$0xff] %v3854_v39  ;;  %vm119_vm4 = vmand %vm3860_vm2, %vm7331_vm3  ;;  %vm7328_vm12 = vcmp.lt.s32.totalorder %v3869_v46, 16  ;;  %vm7335_vm6 = vcmp.lt.s32.totalorder %v3910_v56, 1  ;;  %s3672_s24 = smov 31   ;;  %s3673_s25 = smov 33  }
  0x11   :  { %7509 = vst [vmem:[#allocation9_spill] sm:$0xff] %v7508_v43  ;;  %vm121_vm7 = vmand %vm119_vm4, %vm7318_vm5  ;;  %vm7337_vm4 = vcmp.lt.s32.totalorder %v3910_v56, 17  ;;  %s3674_s26 = smov 30   ;;  %s3675_s30 = smov 18   ;;  %v71_v43 = vld [vmem:[%s7297_s3 + $0xc8] sm:$0xff] }
  0x12   :  { %7510 = vst [vmem:[#allocation10_spill] sm:$0xff] %v3869_v46  ;;  %v3890_v51 = vsel %vm121_vm7, 1, %v7321_v5  ;;  %vm227_vm11 = vmand %vm3860_vm2, %vm7332_vm8  ;;  %vm7343_vm7 = vcmp.lt.s32.totalorder %v3910_v56, 16  ;;  %s3676_s15 = smov 2   ;;  %s3677_s14 = smov 126  }
  0x13   :  { %vm175_vm15 = vmand %vm173_vm9, %vm7307_vm10  ;;  %7511 = vst [vmem:[#allocation11_spill] sm:$0xff] %v3910_v56  ;;  %v154_v58 = vperm.slane %v3890_v51, 3  ;;  %v153_v59 = vperm.slane %v3890_v51, 2  ;;  %s3680_s16 = smov 32   ;;  %s3690_s20 = smov 97  }
  0x14   :  { %v180_v10 = vld.sshfl [vmem:[#allocation1 + $0x8] sm:$0xff pattern:$0x75316420]  ;;  %v179_v11 = vld.sshfl [vmem:[#allocation1] sm:$0xff pattern:$0x75316420]  ;;  %214 = vperm.xlu2 %3458, %v3772_v0   ;;  %vm229_vm0 = vmand %vm227_vm11, %vm7328_vm12 }
  0x15   :  { %189 = vrot.lane.b32.xlu1 %v180_v10, %s3654_s27  ;;  %230 = vst [vmem:[#allocation1] ss:$2 sm:$0xff] %v3782_v2  ;;  %165 = vperm.xlu0 %3457, %v3772_v0   ;;  %v182_v12 = vld.sshfl [vmem:[#allocation1 + $0x18] sm:$0xff pattern:$0x75316420]  ;;  %v3920_v60 = vsel %vm175_vm15, 1, %v7321_v5  ;;  %vm3930_vm1 = vmand %vm279_vm13, %vm280_vm14 }
  0x16   :  { %v181_v13 = vld.sshfl [vmem:[#allocation1 + $0x10] sm:$0xff pattern:$0x75316420]  ;;  %v7513_v63 = vsel %vm3930_vm1, 4294967295, %v7512_v63  ;;  %v3935_v6 = vsel %vm229_vm0, 1, %v7321_v5  ;;  %v203_v7 = vperm.slane %v3920_v60, 2  ;;  %vm282_vm9 = vmand %vm3930_vm1, %vm7331_vm3 }
  0x17   :  { %232 = vst [vmem:[#allocation1 + $0x10] ss:$2 sm:$0xff] %v3777_v1  ;;  %v204_v8 = vperm.slane %v3920_v60, 3  ;;  %vm3945_vm11 = vcmp.eq.s32.totalorder %v154_v58, 1  ;;  %vm3949_vm13 = vcmp.eq.s32.totalorder %v153_v59, 1  ;;  %v7518_v10 = vmov 0  ;;  %vm3960_vm15 = vmand %vm282_vm9, %vm7318_vm5 }
  0x18   :  { %7514 = vst [vmem:[#allocation12_spill] sm:$0xff] %v7513_v63  ;;  %v7519_v10 = vsel %vm3949_vm13, 4294967295, %v7518_v10  ;;  %vm7334_vm14 = vcmp.lt.s32.totalorder %v3910_v56, 15  ;;  %vm3968_vm0 = vcmp.eq.s32.totalorder %v203_v7, 1  ;;  %v61_v63 = vld [vmem:[%s7297_s3 + $0x78] sm:$0xff]  ;;  %s3693_s21 = smov 95  }
  0x19   :  { %7520 = vst [vmem:[#allocation14_spill] sm:$0xff] %v7519_v10  ;;  %vm3978_vm9 = vcmp.eq.s32.totalorder %v204_v8, 1  ;;  %597 = vmatpush.msra.mxu0 %v61_v63  ;;  %v85_v63 = vld [vmem:[%s7297_s3 + $0x138] sm:$0xff] }
  0x1c   :  { %191 = vrot.lane.b32.xlu2 %v181_v13, %s3654_s27  ;;  %v234_v14 = vld.sshfl [vmem:[#allocation1 + $0x8] sm:$0xff pattern:$0x75316420]  ;;  %v233_v15 = vld.sshfl [vmem:[#allocation1] sm:$0xff pattern:$0x75316420] }
  0x1d   :  { %193 = vrot.lane.b32.xlu1 %v182_v12, %s3654_s27  ;;  %135 = vrot.lane.b32.xlu0 %v127_v9, %s3653_s0  ;;  %284 = vst [vmem:[#allocation1] ss:$2 sm:$0xff] %v3782_v2  ;;  %v7515_v9 = vmov 0 }
  0x1e   :  { %3459 = vset.pattern.permute.xlu0 %v7316_v16  ;;  %v235_v17 = vld.sshfl [vmem:[#allocation1 + $0x10] sm:$0xff pattern:$0x75316420]  ;;  %v236_v18 = vld.sshfl [vmem:[#allocation1 + $0x18] sm:$0xff pattern:$0x75316420] }
  0x1f   :  { %286 = vst [vmem:[#allocation1 + $0x10] ss:$2 sm:$0xff] %v3777_v1  ;;  %v7516_v9 = vsel %vm3945_vm11, 4294967295, %v7515_v9 }
  0x20   :  { %7517 = vst [vmem:[#allocation13_spill] sm:$0xff] %v7516_v9 }
  0x24   :  { %245 = vrot.lane.b32.xlu2 %v235_v17, %s3656_s28  ;;  %v288_v21 = vld.sshfl [vmem:[#allocation1 + $0x8] sm:$0xff pattern:$0x75316420]  ;;  %v287_v25 = vld.sshfl [vmem:[#allocation1] sm:$0xff pattern:$0x75316420] }
  0x25   :  { %243 = vrot.lane.b32.xlu1 %v234_v14, %s3656_s28  ;;  %268 = vperm.xlu0 %3459, %v3772_v0  }
  0x26   :  { %v289_v20 = vld.sshfl [vmem:[#allocation1 + $0x10] sm:$0xff pattern:$0x75316420]  ;;  %v290_v23 = vld.sshfl [vmem:[#allocation1 + $0x18] sm:$0xff pattern:$0x75316420] }
  0x2c   :  { %247 = vrot.lane.b32.xlu2 %v236_v18, %s3656_s28 }
  0x2d   :  { %187 = vrot.lane.b32.xlu1 %v179_v11, %s3654_s27  ;;  %3460 = vset.pattern.permute.xlu0 %v7313_v19  ;;  %v258_v11 = vperm.slane %v3935_v6, 3 }
  0x2e   :  { %322 = vperm.xlu0 %3460, %v3772_v0  }
  0x2f   :  { %vm3994_vm10 = vcmp.eq.s32.totalorder %v258_v11, 1  ;;  %v7536_v11 = vmov 0 }
  0x34   :  { %299 = vrot.lane.b32.xlu2 %v289_v20, %s3658_s29 }
  0x35   :  { %297 = vrot.lane.b32.xlu1 %v288_v21, %s3658_s29  ;;  %v7523_v21 = vmov 0 }
  0x36   :  { %3461 = vset.pattern.permute.xlu0 %v7329_v22  ;;  %v7524_v21 = vsel %vm3968_vm0, 4294967295, %v7523_v21  ;;  %v7545_v22 = vmov 0 }
  0x37   :  { %400 = vperm.xlu0 %3461, %v3772_v0   ;;  %7525 = vst [vmem:[#allocation15_spill] sm:$0xff] %v7524_v21  ;;  %v7570_v21 = vmov 0 }
  0x3c   :  { %301 = vrot.lane.b32.xlu2 %v290_v23, %s3658_s29 }
  0x3d   :  { %241 = vrot.lane.b32.xlu1 %v233_v15, %s3656_s28 }
  0x3f   :  { %3462 = vset.pattern.permute.xlu0 %v7311_v24 }
  0x40   :  { %455 = vperm.xlu0 %3462, %v3772_v0  }
  0x45   :  { %295 = vrot.lane.b32.xlu1 %v287_v25, %s3658_s29  ;;  %v7526_v25 = vmov 0 }
  0x46   :  { %v7527_v25 = vsel %vm3978_vm9, 4294967295, %v7526_v25 }
  0x47   :  { %7528 = vst [vmem:[#allocation16_spill] sm:$0xff] %v7527_v25 }
  0x48   :  { %3463 = vset.pattern.permute.xlu0 %v7309_v26 }
  0x49   :  { %506 = vperm.xlu0 %3463, %v3772_v0  }
  0x51   :  { %3464 = vset.pattern.permute.xlu0 %v7325_v27 }
  0x52   :  { %557 = vperm.xlu0 %3464, %v3772_v0  }
  0x5a   :  { %3466 = vset.pattern.permute.xlu0 %v7323_v29  ;;  %v201_v29 = vperm.slane %v3920_v60, 0 }
  0x5b   :  { %730 = vperm.xlu0 %3466, %v3772_v0  }
  0x5c   :  { %vm4106_vm8 = vcmp.eq.s32.totalorder %v201_v29, 1 }
  0x63   :  { %3468 = vset.pattern.permute.xlu0 %v3665_v34 }
  0x64   :  { %1511 = vperm.xlu0 %3468, %v3843_v35  }
  0x66   :  { %v3827_v28 = vpop.permute.xlu2 %141 }
  0x6c   :  { %3470 = vset.pattern.permute.xlu0 %v7308_v4 }
  0x6e   :  { %v3831_v30 = vpop.permute.xlu2 %214 }
  0x74   :  { %v335_v41 = vpop.permute.xlu0 %334 }
  0x75   :  { %v339_v42 = vperm.slane %v335_v41, %v7327_v38 }
  0x76   :  { %v3856_v40 = vpop.permute.xlu2 %191 }
  0x77   :  { %v341_v44 = vmul.f32 %v339_v42, %v3782_v2  ;;  %v342_v45 = vmul.f32 %v339_v42, %v3777_v1  ;;  %v257_v42 = vperm.slane %v3935_v6, 2 }
  0x79   :  { %345 = vst [vmem:[#allocation1] ss:$2 sm:$0xff] %v341_v44  ;;  %v7530_v44 = vmov 0 }
  0x7a   :  { %347 = vst [vmem:[#allocation1 + $0x10] ss:$2 sm:$0xff] %v342_v45  ;;  %v7531_v44 = vsel %vm3994_vm10, 4294967295, %v7530_v44 }
  0x7b   :  { %7532 = vst [vmem:[#allocation18_spill] sm:$0xff] %v7531_v44 }
  0x7e   :  { %v140_v47 = vpop.permute.xlu1 %139  ;;  %v3876_v48 = vpop.permute.xlu2 %245 }
  0x7f   :  { %v3881_v49 = vpop.permute.xlu0 %137  ;;  %v146_v14 = vsel %vm7337_vm4, %v140_v47, %v3827_v28 }
  0x80   :  { %v3899_v52 = vld.sshfl [vmem:[#allocation1] sm:$0xff pattern:$0x75316420]  ;;  %v3901_v53 = vld.sshfl [vmem:[#allocation1 + $0x8] sm:$0xff pattern:$0x75316420]  ;;  %v147_v20 = vsel %vm7337_vm4, %v3881_v49, %v140_v47 }
  0x81   :  { %v3903_v54 = vld.sshfl [vmem:[#allocation1 + $0x10] sm:$0xff pattern:$0x75316420]  ;;  %v3905_v55 = vld.sshfl [vmem:[#allocation1 + $0x18] sm:$0xff pattern:$0x75316420] }
  0x82   :  { %362 = vst [vmem:[#allocation1] ss:$2 sm:$0xff] %v3782_v2  ;;  %v3987_v34 = vsel %vm3945_vm11, %v146_v14, 0.0  ;;  %v4005_v47 = vsel %vm3960_vm15, 1, %v7321_v5  ;;  %v4009_v50 = vsel %vm3949_vm13, %v147_v20, 0.0  ;;  %vm4027_vm15 = vcmp.eq.s32.totalorder %v257_v42, 1 }
  0x83   :  { %364 = vst [vmem:[#allocation1 + $0x10] ss:$2 sm:$0xff] %v3777_v1  ;;  %v7537_v11 = vsel %vm4027_vm15, 4294967295, %v7536_v11  ;;  %v312_v18 = vperm.slane %v4005_v47, 3  ;;  %v151_v5 = vperm.slane %v3890_v51, 0  ;;  %v311_v27 = vperm.slane %v4005_v47, 2 }
  0x84   :  { %7529 = vst [vmem:[#allocation17_spill] sm:$0xff] %v3987_v34 }
  0x85   :  { %7533 = vst [vmem:[#allocation19_spill] sm:$0xff] %v4009_v50  ;;  %vm4063_vm5 = vcmp.eq.s32.totalorder %v312_v18, 1  ;;  %vm4094_vm12 = vcmp.eq.s32.totalorder %v151_v5, 1  ;;  %v7557_v5 = vmov 0 }
  0x86   :  { %v3915_v57 = vpop.permute.xlu2 %247  ;;  %7538 = vst [vmem:[#allocation22_spill] sm:$0xff] %v7537_v11  ;;  %v7546_v22 = vsel %vm4094_vm12, 4294967295, %v7545_v22  ;;  %v7551_v11 = vmov 0 }
  0x87   :  { %v3922_v61 = vpop.permute.xlu1 %189  ;;  %v3924_v62 = vpop.permute.xlu0 %165  ;;  %v250_v59 = vsel %vm7334_vm14, %v3876_v48, %v3915_v57  ;;  %7547 = vst [vmem:[#allocation27_spill] sm:$0xff] %v7546_v22  ;;  %v7552_v11 = vsel %vm4106_vm8, 4294967295, %v7551_v11 }
  0x88   :  { %v197_v23 = vsel %vm7343_vm7, %v3922_v61, %v3856_v40  ;;  %v171_v7 = vmul.f32 %v3924_v62, %v3987_v34  ;;  %7553 = vst [vmem:[#allocation29_spill] sm:$0xff] %v7552_v11 }
  0x89   :  { %v365_v12 = vld.sshfl [vmem:[#allocation1] sm:$0xff pattern:$0x75316420]  ;;  %v366_v13 = vld.sshfl [vmem:[#allocation1 + $0x8] sm:$0xff pattern:$0x75316420] }
  0x8a   :  { %v367_v15 = vld.sshfl [vmem:[#allocation1 + $0x10] sm:$0xff pattern:$0x75316420]  ;;  %v368_v17 = vld.sshfl [vmem:[#allocation1 + $0x18] sm:$0xff pattern:$0x75316420] }
  0x8b   :  { %417 = vst [vmem:[#allocation1] ss:$2 sm:$0xff] %v3782_v2  ;;  %377 = vrot.lane.b32.xlu2 %v367_v15, %s7389_s18  ;;  %379 = vrot.lane.b32.xlu1 %v368_v17, %s7389_s18  ;;  %v4013_v58 = vsel %vm3968_vm0, %v197_v23, 0.0  ;;  %v170_v15 = vmul.f32 %v3924_v62, %v4009_v50  ;;  %v4037_v17 = vsel %vm3994_vm10, %v250_v59, 0.0  ;;  %vm7612_vm0 = vcmp.ge.s32.totalorder %v3849_v36, 0 }
  0x8c   :  { %419 = vst [vmem:[#allocation1 + $0x10] ss:$2 sm:$0xff] %v3777_v1  ;;  %v219_v14 = vmul.f32 %v3831_v30, %v4013_v58 }
  0x8d   :  { %7534 = vst [vmem:[#allocation20_spill] sm:$0xff] %v4013_v58 }
  0x8e   :  { %v3982_v32 = vpop.permute.xlu2 %299  ;;  %7539 = vst [vmem:[#allocation23_spill] sm:$0xff] %v4037_v17  ;;  %v223_v59 = vadd.f32 %v219_v14, %v170_v15  ;;  %v7541_v14 = vmov 0 }
  0x8f   :  { %v3989_v37 = vpop.permute.xlu1 %193  ;;  %v3991_v41 = vpop.permute.xlu0 %135  ;;  %v7542_v14 = vsel %vm4063_vm5, 4294967295, %v7541_v14 }
  0x90   :  { %v196_v45 = vsel %vm7343_vm7, %v3856_v40, %v3989_v37  ;;  %7543 = vst [vmem:[#allocation25_spill] sm:$0xff] %v7542_v14  ;;  %v148_v29 = vsel %vm7337_vm4, %v3991_v41, %v3881_v49 }
  0x91   :  { %v4021_v40 = vsel %vm3978_vm9, %v196_v45, 0.0 }
  0x92   :  { %7535 = vst [vmem:[#allocation21_spill] sm:$0xff] %v4021_v40  ;;  %v220_v8 = vmul.f32 %v3831_v30, %v4021_v40  ;;  %v421_v20 = vld.sshfl [vmem:[#allocation1 + $0x8] sm:$0xff pattern:$0x75316420]  ;;  %v7599_v40 = vmov 0 }
  0x93   :  { %v420_v23 = vld.sshfl [vmem:[#allocation1] sm:$0xff pattern:$0x75316420]  ;;  %375 = vrot.lane.b32.xlu1 %v366_v13, %s7389_s18  ;;  %373 = vrot.lane.b32.xlu2 %v365_v12, %s7389_s18  ;;  %v422_v42 = vld.sshfl [vmem:[#allocation1 + $0x10] sm:$0xff pattern:$0x75316420] }
  0x94   :  { %v224_v45 = vadd.f32 %v220_v8, %v171_v7  ;;  %v423_v4 = vld.sshfl [vmem:[#allocation1 + $0x18] sm:$0xff pattern:$0x75316420]  ;;  %468 = vst [vmem:[#allocation1] ss:$2 sm:$0xff] %v3782_v2  ;;  %s3687_s18 = smov 98  }
  0x95   :  { %470 = vst [vmem:[#allocation1 + $0x10] ss:$2 sm:$0xff] %v3777_v1 }
  0x96   :  { %v4042_v26 = vpop.permute.xlu2 %301 }
  0x97   :  { %v4044_v24 = vpop.permute.xlu1 %243  ;;  %v4046_v19 = vpop.permute.xlu0 %268 }
  0x98   :  { %v251_v13 = vsel %vm7334_vm14, %v4044_v24, %v3876_v48  ;;  %v274_v12 = vmul.f32 %v4046_v19, %v4037_v17  ;;  %v304_v48 = vsel %vm7335_vm6, %v3982_v32, %v4042_v26  ;;  %vm4114_vm6 = vcmp.eq.s32.totalorder %v311_v27, 1 }
  0x99   :  { %v4059_v7 = vsel %vm4027_vm15, %v251_v13, 0.0  ;;  %v4073_v3 = vsel %vm4063_vm5, %v304_v48, 0.0  ;;  %v7558_v5 = vsel %vm4114_vm6, 4294967295, %v7557_v5 }
  0x9a   :  { %7540 = vst [vmem:[#allocation24_spill] sm:$0xff] %v4059_v7  ;;  %v273_v8 = vmul.f32 %v4046_v19, %v4059_v7  ;;  %v278_v16 = vadd.f32 %v274_v12, %v224_v45 }
  0x9b   :  { %7544 = vst [vmem:[#allocation26_spill] sm:$0xff] %v4073_v3  ;;  %432 = vrot.lane.b32.xlu1 %v422_v42, %s7377_s19  ;;  %434 = vrot.lane.b32.xlu2 %v423_v4, %s7377_s19  ;;  %v4078_v12 = vld.sshfl [vmem:[#allocation1 + $0x8] sm:$0xff pattern:$0x75316420]  ;;  %v202_v42 = vperm.slane %v3920_v60, 1  ;;  %v7548_v60 = vmov 0 }
  0x9c   :  { %v277_v15 = vadd.f32 %v273_v8, %v223_v59  ;;  %v473_v45 = vld.sshfl [vmem:[#allocation1 + $0x10] sm:$0xff pattern:$0x75316420]  ;;  %v474_v18 = vld.sshfl [vmem:[#allocation1 + $0x18] sm:$0xff pattern:$0x75316420] }
  0x9d   :  { %521 = vst [vmem:[#allocation1 + $0x10] ss:$2 sm:$0xff] %v3777_v1  ;;  %v152_v59 = vperm.slane %v3890_v51, 1  ;;  %v4084_v48 = vld.sshfl [vmem:[#allocation1] sm:$0xff pattern:$0x75316420]  ;;  %v149_v51 = vsel %vm7337_vm4, %v3827_v28, %v3991_v41 }
  0x9e   :  { %519 = vst [vmem:[#allocation1] ss:$2 sm:$0xff] %v3782_v2  ;;  %vm4110_vm14 = vcmp.eq.s32.totalorder %v202_v42, 1  ;;  %v4121_v28 = vld [vmem:[%s7298_s4] sm:$0xff]  ;;  %v4141_v10 = vsel %vm4094_vm12, %v149_v51, 0.0  ;;  %vm7562_vm4 = vcmp.lt.s32.totalorder %v3910_v56, 1 }
  0x9f   :  { %v188_v13 = vpop.permute.xlu1 %187  ;;  %vm4102_vm3 = vcmp.eq.s32.totalorder %v152_v59, 1  ;;  %7559 = vst [vmem:[#allocation31_spill] sm:$0xff] %v7558_v5  ;;  %s7375_s4 = smov 112  }
  0xa0   :  { %v4082_v8 = vpop.permute.xlu0 %322  ;;  %v7549_v60 = vsel %vm4102_vm3, 4294967295, %v7548_v60  ;;  %7560 = vst [vmem:[#allocation32_spill] sm:$0xff] %v4121_v28  ;;  %v198_v59 = vsel %vm7343_vm7, %v188_v13, %v3922_v61  ;;  %v199_v27 = vsel %vm7343_vm7, %v3989_v37, %v188_v13 }
  0xa1   :  { %v328_v4 = vmul.f32 %v4082_v8, %v4073_v3  ;;  %7550 = vst [vmem:[#allocation28_spill] sm:$0xff] %v7549_v60  ;;  %v4157_v13 = vsel %vm4106_vm8, %v199_v27, 0.0  ;;  %v4161_v51 = vsel %vm4110_vm14, %v198_v59, 0.0  ;;  %v256_v60 = vperm.slane %v3935_v6, 1 }
  0xa2   :  { %7561 = vst [vmem:[#allocation33_spill] sm:$0xff] %v4141_v10  ;;  %v168_v27 = vmul.f32 %v3924_v62, %v4141_v10  ;;  %vm7681_vm8 = vcmp.lt.s32.totalorder %v3910_v56, 111 }
  0xa3   :  { %v4092_v38 = vadd.f32 %v328_v4, %v278_v16  ;;  %v7554_v16 = vmov 0  ;;  %430 = vrot.lane.b32.xlu1 %v421_v20, %s7377_s19  ;;  %428 = vrot.lane.b32.xlu2 %v420_v23, %s7377_s19  ;;  %v7338_v20 = vmov 9   ;;  %v4153_v23 = vsel %vm4102_vm3, %v148_v29, 0.0  ;;  %7564 = vst [vmem:[#allocation35_spill] sm:$0xff] %v4157_v13  ;;  %s3694_s19 = smov 96  }
  0xa4   :  { %v7555_v16 = vsel %vm4110_vm14, 4294967295, %v7554_v16  ;;  %v4135_v42 = vld.sshfl [vmem:[#allocation1 + $0x10] sm:$0xff pattern:$0x75316420]  ;;  %3465 = vset.pattern.permute.xlu2 %v7338_v20  ;;  %7563 = vst [vmem:[#allocation34_spill] sm:$0xff] %v4153_v23  ;;  %v255_v29 = vperm.slane %v3935_v6, 0  ;;  %v169_v59 = vmul.f32 %v3924_v62, %v4153_v23 }
  0xa5   :  { %7556 = vst [vmem:[#allocation30_spill] sm:$0xff] %v7555_v16  ;;  %v4137_v4 = vld.sshfl [vmem:[#allocation1 + $0x18] sm:$0xff pattern:$0x75316420]  ;;  %v217_v16 = vmul.f32 %v3831_v30, %v4157_v13  ;;  %v7567_v6 = vmov 0  ;;  %vm4188_vm7 = vcmp.eq.s32.totalorder %v256_v60, 1 }
  0xa6   :  { %v4146_v41 = vld.sshfl [vmem:[#allocation1] sm:$0xff pattern:$0x75316420]  ;;  %v4148_v37 = vld.sshfl [vmem:[#allocation1 + $0x8] sm:$0xff pattern:$0x75316420] }
  0xa7   :  { %v298_v49 = vpop.permute.xlu1 %297  ;;  %7565 = vst [vmem:[#allocation36_spill] sm:$0xff] %v4161_v51  ;;  %v7571_v21 = vsel %vm4188_vm7, 4294967295, %v7570_v21  ;;  %v221_v11 = vadd.f32 %v217_v16, %v168_v27  ;;  %vm7573_vm14 = vcmp.lt.s32.totalorder %v3910_v56, 15  ;;  %v99_v13 = vld [vmem:[%s7297_s3 + $0x1a8] sm:$0xff] }
  0xa8   :  { %v305_v61 = vsel %vm7562_vm4, %v298_v49, %v3982_v32  ;;  %754 = vst [vmem:[#allocation1] ss:$4 sm:$0xff] %v4121_v28  ;;  %vm4184_vm4 = vcmp.eq.s32.totalorder %v255_v29, 1  ;;  %vm7574_vm3 = vmmov %vm7573_vm14 }
  0xa9   :  { %v4165_v32 = vsel %vm4114_vm6, %v305_v61, 0.0  ;;  %v218_v61 = vmul.f32 %v3831_v30, %v4161_v51  ;;  %v7568_v6 = vsel %vm4184_vm4, 4294967295, %v7567_v6  ;;  %7572 = vst [vmem:[#allocation39_spill] sm:$0xff] %v7571_v21  ;;  %v95_v51 = vld [vmem:[%s7297_s3 + $0x188] sm:$0xff] }
  0xaa   :  { %7566 = vst [vmem:[#allocation37_spill] sm:$0xff] %v4165_v32  ;;  %v327_v20 = vmul.f32 %v4082_v8, %v4165_v32 }
  0xab   :  { %483 = vrot.lane.b32.xlu1 %v473_v45, %s7375_s4  ;;  %485 = vrot.lane.b32.xlu2 %v474_v18, %s7375_s4  ;;  %7569 = vst [vmem:[#allocation38_spill] sm:$0xff] %v7568_v6  ;;  %v222_v22 = vadd.f32 %v218_v61, %v169_v59 }
  0xac   :  { %v4180_v5 = vadd.f32 %v327_v20, %v277_v15  ;;  %v309_v20 = vperm.slane %v4005_v47, 0 }
  0xaf   :  { %v242_v62 = vpop.permute.xlu1 %241  ;;  %v4198_v45 = vld.sshfl [vmem:[#allocation1 + $0x10] sm:$0xff pattern:$0x73625140]  ;;  %v4200_v18 = vld.sshfl [vmem:[#allocation1 + $0x18] sm:$0xff pattern:$0x73625140] }
  0xb0   :  { %v252_v30 = vsel %vm7573_vm14, %v242_v62, %v4044_v24  ;;  %v253_v15 = vsel %vm7574_vm3, %v3915_v57, %v242_v62  ;;  %7575 = vst [vmem:[#allocation40_spill] sm:$0xff] %v4198_v45  ;;  %v310_v24 = vperm.slane %v4005_v47, 1  ;;  %v4217_v27 = vld.sshfl [vmem:[#allocation1] sm:$0xff pattern:$0x73625140]  ;;  %vm4226_vm3 = vcmp.eq.s32.totalorder %v309_v20, 1 }
  0xb1   :  { %7576 = vst [vmem:[#allocation41_spill] sm:$0xff] %v4200_v18  ;;  %v4204_v60 = vsel %vm4184_vm4, %v253_v15, 0.0  ;;  %v4208_v16 = vsel %vm4188_vm7, %v252_v30, 0.0  ;;  %v4219_v59 = vld.sshfl [vmem:[#allocation1 + $0x8] sm:$0xff pattern:$0x73625140] }
  0xb2   :  { %7577 = vst [vmem:[#allocation42_spill] sm:$0xff] %v4204_v60  ;;  %v271_v57 = vmul.f32 %v4046_v19, %v4204_v60  ;;  %v272_v29 = vmul.f32 %v4046_v19, %v4208_v16  ;;  %v7581_v47 = vmov 0  ;;  %vm4230_vm14 = vcmp.eq.s32.totalorder %v310_v24, 1  ;;  %v104_v60 = vld [vmem:[%s7297_s3 + $0x1d0] sm:$0xff] }
  0xb3   :  { %7578 = vst [vmem:[#allocation43_spill] sm:$0xff] %v4208_v16  ;;  %481 = vrot.lane.b32.xlu1 %v4078_v12, %s7375_s4  ;;  %479 = vrot.lane.b32.xlu2 %v4084_v48, %s7375_s4  ;;  %v7582_v47 = vsel %vm4226_vm3, 4294967295, %v7581_v47  ;;  %v7584_v19 = vmov 0  ;;  %vm7587_vm7 = vcmp.lt.s32.totalorder %v3910_v56, 1  ;;  %v89_v16 = vld [vmem:[%s7297_s3 + $0x158] sm:$0xff]  ;;  %vm7609_vm4 = vcmp.lt.s32.totalorder %v3854_v39, 16 }
  0xb4   :  { %1058 = vst [vmem:[#allocation1 + $0x10] ss:$2 sm:$0xff] %v3777_v1  ;;  %v275_v61 = vadd.f32 %v271_v57, %v221_v11  ;;  %v276_v62 = vadd.f32 %v272_v29, %v222_v22  ;;  %v7585_v19 = vsel %vm4230_vm14, 4294967295, %v7584_v19  ;;  %vm7588_vm15 = vmmov %vm7587_vm7  ;;  %v4260_v29 = vpop.permute.xlu0 %400  ;;  %s3696_s4 = smov 94  }
  0xb5   :  { %7579 = vst [vmem:[#allocation44_spill] sm:$0xff] %v4217_v27 }
  0xb6   :  { %7580 = vst [vmem:[#allocation45_spill] sm:$0xff] %v4219_v59 }
  0xb7   :  { %1056 = vst [vmem:[#allocation1] ss:$2 sm:$0xff] %v3782_v2  ;;  %v296_v30 = vpop.permute.xlu1 %295 }
  0xb8   :  { %7583 = vst [vmem:[#allocation46_spill] sm:$0xff] %v7582_v47  ;;  %v306_v15 = vsel %vm7587_vm7, %v296_v30, %v298_v49  ;;  %v307_v22 = vsel %vm7588_vm15, %v4042_v26, %v296_v30 }
  0xb9   :  { %7586 = vst [vmem:[#allocation47_spill] sm:$0xff] %v7585_v19  ;;  %v4243_v48 = vsel %vm4226_vm3, %v307_v22, 0.0  ;;  %v4247_v20 = vsel %vm4230_vm14, %v306_v15, 0.0  ;;  %vm7602_vm3 = vcmp.ge.s32.totalorder %v3869_v46, 0 }
  0xba   :  { %7589 = vst [vmem:[#allocation48_spill] sm:$0xff] %v4243_v48  ;;  %v325_v49 = vmul.f32 %v4082_v8, %v4243_v48  ;;  %v326_v26 = vmul.f32 %v4082_v8, %v4247_v20 }
  0xbb   :  { %v1061_v11 = vld.sshfl [vmem:[#allocation1 + $0x10] sm:$0xff pattern:$0x75316420]  ;;  %v4239_v12 = vld.sshfl [vmem:[#allocation1 + $0x18] sm:$0xff pattern:$0x75316420]  ;;  %534 = vrot.lane.b32.xlu1 %v4135_v42, %s7365_s23  ;;  %536 = vrot.lane.b32.xlu2 %v4137_v4, %s7365_s23 }
  0xbc   :  { %7590 = vst [vmem:[#allocation49_spill] sm:$0xff] %v4247_v20  ;;  %1071 = vrot.lane.b32.xlu0 %v1061_v11, %s3670_s22  ;;  %v4262_v30 = vadd.f32 %v325_v49, %v275_v61  ;;  %v4264_v15 = vadd.f32 %v326_v26, %v276_v62  ;;  %v4279_v62 = vpop.permute.xlu0 %455  ;;  %v7591_v49 = vmov 5  }
  0xbd   :  { %1106 = vst [vmem:[#allocation1 + $0x10] ss:$2 sm:$0xff] %v3777_v1 }
  0xbe   :  { %v4255_v24 = vld.sshfl [vmem:[#allocation1] sm:$0xff pattern:$0x75316420]  ;;  %v4257_v57 = vld.sshfl [vmem:[#allocation1 + $0x8] sm:$0xff pattern:$0x75316420] }
  0xbf   :  { %1104 = vst [vmem:[#allocation1] ss:$2 sm:$0xff] %v3782_v2 }
  0xc3   :  { %532 = vrot.lane.b32.xlu1 %v4148_v37, %s7365_s23  ;;  %530 = vrot.lane.b32.xlu2 %v4146_v41, %s7365_s23 }
  0xc4   :  { %v4270_v8 = vld.sshfl [vmem:[#allocation1 + $0x10] sm:$0xff pattern:$0x75316420]  ;;  %v1110_v22 = vld.sshfl [vmem:[#allocation1 + $0x18] sm:$0xff pattern:$0x75316420]  ;;  %1142 = vperm.xlu0 %3470, %v3843_v35   ;;  %v4296_v47 = vpop.permute.xlu0 %506 }
  0xc5   :  { %1157 = vst [vmem:[#allocation1 + $0x10] ss:$2 sm:$0xff] %v3777_v1 }
  0xc6   :  { %v4274_v11 = vld.sshfl [vmem:[#allocation1] sm:$0xff pattern:$0x75316420]  ;;  %v4276_v61 = vld.sshfl [vmem:[#allocation1 + $0x8] sm:$0xff pattern:$0x75316420] }
  0xc7   :  { %1155 = vst [vmem:[#allocation1] ss:$2 sm:$0xff] %v3782_v2 }
  0xcb   :  { %569 = vperm.xlu2 %3465, %v3772_v0  }
  0xcc   :  { %v4285_v42 = vld.sshfl [vmem:[#allocation1 + $0x10] sm:$0xff pattern:$0x75316420]  ;;  %v4287_v4 = vld.sshfl [vmem:[#allocation1 + $0x18] sm:$0xff pattern:$0x75316420]  ;;  %3474 = vset.pattern.permute.xlu0 %v7591_v49  ;;  %v4308_v14 = vpop.permute.xlu0 %557 }
  0xcd   :  { %1208 = vst [vmem:[#allocation1 + $0x10] ss:$2 sm:$0xff] %v3777_v1 }
  0xce   :  { %v4291_v26 = vld.sshfl [vmem:[#allocation1] sm:$0xff pattern:$0x75316420]  ;;  %v4293_v19 = vld.sshfl [vmem:[#allocation1 + $0x8] sm:$0xff pattern:$0x75316420] }
  0xcf   :  { %1206 = vst [vmem:[#allocation1] ss:$2 sm:$0xff] %v3782_v2 }
  0xd4   :  { %v4299_v37 = vld.sshfl [vmem:[#allocation1 + $0x10] sm:$0xff pattern:$0x75316420]  ;;  %v4301_v41 = vld.sshfl [vmem:[#allocation1 + $0x18] sm:$0xff pattern:$0x75316420]  ;;  %v4317_v49 = vpop.permute.xlu0 %730 }
  0xd5   :  { %1262 = vst [vmem:[#allocation1 + $0x10] ss:$2 sm:$0xff] %v3777_v1 }
  0xd6   :  { %v1209_v21 = vld.sshfl [vmem:[#allocation1] sm:$0xff pattern:$0x75316420]  ;;  %v4304_v6 = vld.sshfl [vmem:[#allocation1 + $0x8] sm:$0xff pattern:$0x75316420] }
  0xd7   :  { %1217 = vrot.lane.b32.xlu0 %v1209_v21, %s3672_s24  ;;  %1260 = vst [vmem:[#allocation1] ss:$2 sm:$0xff] %v3782_v2 }
  0xdc   :  { %v1265_v25 = vld.sshfl [vmem:[#allocation1 + $0x10] sm:$0xff pattern:$0x75316420]  ;;  %v4310_v44 = vld.sshfl [vmem:[#allocation1 + $0x18] sm:$0xff pattern:$0x75316420]  ;;  %v1512_v32 = vpop.permute.xlu0 %1511 }
  0xdd   :  { %1313 = vst [vmem:[#allocation1 + $0x10] ss:$2 sm:$0xff] %v3777_v1  ;;  %v3678_v1 = vmov 14  }
  0xde   :  { %v1263_v0 = vld.sshfl [vmem:[#allocation1] sm:$0xff pattern:$0x75316420]  ;;  %v4313_v9 = vld.sshfl [vmem:[#allocation1 + $0x8] sm:$0xff pattern:$0x75316420] }
  0xdf   :  { %1121 = vrot.lane.b32.xlu0 %v1110_v22, %s3673_s25  ;;  %1311 = vst [vmem:[#allocation1] ss:$2 sm:$0xff] %v3782_v2  ;;  %v7593_v22 = vunpack.c.0.s8 %v3838_v33  ;;  %v108_v33 = vld [vmem:[%s7297_s3 + $0x1f0] sm:$0xff] }
  0xe1   :  { %v4333_v18 = vperm.slane %v1512_v32, %v7593_v22  ;;  %v107_v32 = vld [vmem:[%s7297_s3 + $0x1e8] sm:$0xff] }
  0xe3   :  { %7594 = vst [vmem:[#allocation51_spill] sm:$0xff] %v4333_v18 }
  0xe5   :  { %v4323_v3 = vpop.permute.xlu2 %377 }
  0xe6   :  { %v1315_v21 = vld.sshfl [vmem:[#allocation1 + $0x8] sm:$0xff pattern:$0x75316420]  ;;  %v4319_v28 = vld.sshfl [vmem:[#allocation1] sm:$0xff pattern:$0x75316420] }
  0xe7   :  { %1271 = vrot.lane.b32.xlu0 %v1263_v0, %s3674_s26  ;;  %1398 = vst [vmem:[#allocation1] ss:$2 sm:$0xff] %v3782_v2  ;;  %v1518_v0 = vmul.f32 %v4333_v18, %v3782_v2 }
  0xed   :  { %v4337_v45 = vpop.permute.xlu2 %373 }
  0xee   :  { %v4325_v20 = vld.sshfl [vmem:[#allocation1] sm:$0xff pattern:$0x75316420]  ;;  %v4327_v48 = vld.sshfl [vmem:[#allocation1 + $0x8] sm:$0xff pattern:$0x75316420] }
  0xef   :  { %7592 = vst [vmem:[#allocation50_spill] sm:$0xff] %v4325_v20  ;;  %1275 = vrot.lane.b32.xlu0 %v1265_v25, %s3674_s26  ;;  %v109_v25 = vld [vmem:[%s7297_s3 + $0x1f8] sm:$0xff] }
  0xf0   :  { %1449 = vst [vmem:[#allocation1] ss:$2 sm:$0xff] %v3782_v2  ;;  %657 = vmatpush.msra.mxu3 %v109_v25  ;;  %v411_v25 = vadd.s32 1, %v3836_v31 }
  0xf2   :  { %658 = vmatpush.msra.mxu3 %v108_v33  ;;  %v105_v33 = vld [vmem:[%s7297_s3 + $0x1d8] sm:$0xff]  ;;  %vm412_vm7 = vcmp.ge.s32.totalorder %v411_v25, 0  ;;  %vm413_vm15 = vcmp.lt.s32.totalorder %v411_v25, 16 }
  0xf3   :  { %vm4384_vm14 = vmand %vm412_vm7, %vm413_vm15  ;;  %v101_v25 = vld [vmem:[%s7297_s3 + $0x1b8] sm:$0xff] }
  0xf4   :  { %659 = vmatpush.msra.mxu3 %v107_v32  ;;  %v93_v32 = vld [vmem:[%s7297_s3 + $0x178] sm:$0xff]  ;;  %v7600_v40 = vsel %vm4384_vm14, 4294967295, %v7599_v40  ;;  %vm4401_vm7 = vmand %vm3930_vm1, %vm7602_vm3  ;;  %vm7605_vm3 = vcmp.ge.s32.totalorder %v3854_v39, 0 }
  0xf5   :  { %v4351_v22 = vpop.permute.xlu2 %434  ;;  %637 = vmatpush.msra.mxu2 %v93_v32  ;;  %7601 = vst [vmem:[#allocation55_spill] sm:$0xff] %v7600_v40  ;;  %vm4424_vm15 = vmand %vm4384_vm14, %vm7605_vm3  ;;  %vm7608_vm3 = vcmp.lt.s32.totalorder %v3869_v46, 16  ;;  %v60_v32 = vld [vmem:[%s7297_s3 + $0x70] sm:$0xff] }
  0xf6   :  { %vm361_vm6 = vmand %vm4401_vm7, %vm7608_vm3  ;;  %598 = vmatpush.msra.mxu0 %v60_v32  ;;  %v96_v32 = vld [vmem:[%s7297_s3 + $0x190] sm:$0xff] }
  0xf7   :  { %v4339_v59 = vld.sshfl [vmem:[#allocation1 + $0x8] sm:$0xff pattern:$0x75316420]  ;;  %v1452_v27 = vld.sshfl [vmem:[#allocation1] sm:$0xff pattern:$0x75316420]  ;;  %1324 = vrot.lane.b32.xlu0 %v1315_v21, %s3675_s30  ;;  %vm4451_vm13 = vmand %vm4424_vm15, %vm7609_vm4 }
  0xf8   :  { %7595 = vst [vmem:[#allocation52_spill] sm:$0xff] %v4339_v59  ;;  %v106_v21 = vld [vmem:[%s7297_s3 + $0x1e0] sm:$0xff]  ;;  %vm4460_vm7 = vmand %vm4384_vm14, %vm7612_vm0  ;;  %vm7418_vm4 = vcmp.lt.s32.totalorder %v3910_v56, 127  ;;  %vm7618_vm15 = vcmp.ge.s32.totalorder %v3869_v46, 0 }
  0xf9   :  { %1522 = vst [vmem:[#allocation1] ss:$2 sm:$0xff] %v1518_v0  ;;  %660 = vmatpush.msra.mxu3 %v106_v21  ;;  %vm4526_vm3 = vmand %vm4384_vm14, %vm7618_vm15  ;;  %vm7410_vm15 = vcmp.lt.s32.totalorder %v3910_v56, 112 }
  0xfb   :  { %661 = vmatpush.msra.mxu3 %v105_v33  ;;  %v102_v33 = vld [vmem:[%s7297_s3 + $0x1c0] sm:$0xff] }
  0xfd   :  { %v4375_v21 = vpop.permute.xlu1 %379  ;;  %v4377_v31 = vpop.permute.xlu2 %428  ;;  %662 = vmatpush.msra.mxu3 %v104_v60  ;;  %v92_v60 = vld [vmem:[%s7297_s3 + $0x170] sm:$0xff] }
  0xfe   :  { %638 = vmatpush.msra.mxu2 %v92_v60  ;;  %v77_v60 = vld [vmem:[%s7297_s3 + $0xf8] sm:$0xff] }
  0xff   :  { %1349 = vperm.xlu0 %3474, %v3843_v35   ;;  %617 = vmatpush.msra.mxu1 %v77_v60  ;;  %v7616_v60 = vmov 0  }
 0x100   :  { %v4356_v0 = vld.sshfl [vmem:[#allocation1] sm:$0xff pattern:$0x75316420]  ;;  %v4358_v17 = vld.sshfl [vmem:[#allocation1 + $0x8] sm:$0xff pattern:$0x75316420] }
 0x101   :  { %7596 = vst [vmem:[#allocation53_spill] sm:$0xff] %v4356_v0  ;;  %v7598_v0 = vmov 8  }
 0x102   :  { %7597 = vst [vmem:[#allocation54_spill] sm:$0xff] %v4358_v17  ;;  %v103_v17 = vld [vmem:[%s7297_s3 + $0x1c8] sm:$0xff] }
 0x103   :  { %1551 = vst [vmem:[#allocation1] ss:$2 sm:$0xff] %v3782_v2  ;;  %663 = vmatpush.msra.mxu3 %v103_v17  ;;  %v91_v17 = vld [vmem:[%s7297_s3 + $0x168] sm:$0xff] }
 0x104   :  { %639 = vmatpush.msra.mxu2 %v91_v17  ;;  %v98_v17 = vld [vmem:[%s7297_s3 + $0x1a0] sm:$0xff] }
 0x105   :  { %664 = vmatpush.msra.mxu3 %v102_v33  ;;  %v100_v33 = vld [vmem:[%s7297_s3 + $0x1b0] sm:$0xff]  ;;  %v4428_v34 = vpop.permute.xlu1 %375  ;;  %v4430_v10 = vpop.permute.xlu2 %485 }
 0x107   :  { %3477 = vset.pattern.permute.xlu0 %v7598_v0  ;;  %665 = vmatpush.msra.mxu3 %v101_v25  ;;  %v90_v0 = vld [vmem:[%s7297_s3 + $0x160] sm:$0xff]  ;;  %v4475_v25 = vsel %vm361_vm6, 1, %v7616_v60  ;;  %vm7617_vm6 = vcmp.lt.s32.totalorder %v3849_v36, 16 }
 0x108   :  { %1385 = vperm.xlu0 %3477, %v3843_v35   ;;  %640 = vmatpush.msra.mxu2 %v90_v0  ;;  %v7615_v0 = vmov 10   ;;  %v390_v50 = vperm.slane %v4475_v25, 3  ;;  %vm467_vm0 = vmand %vm4460_vm7, %vm7617_vm6  ;;  %vm7624_vm7 = vcmp.lt.s32.totalorder %v3869_v46, 16 }
 0x109   :  { %666 = vmatpush.msra.mxu3 %v100_v33  ;;  %v88_v33 = vld [vmem:[%s7297_s3 + $0x150] sm:$0xff]  ;;  %v4541_v40 = vsel %vm467_vm0, 1, %v7616_v60  ;;  %vm4565_vm6 = vmand %vm4526_vm3, %vm7624_vm7  ;;  %vm7422_vm0 = vcmp.lt.s32.totalorder %v3910_v56, 113 }
 0x10a   :  { %v4432_v59 = vld.sshfl [vmem:[#allocation1 + $0x8] sm:$0xff pattern:$0x75316420]  ;;  %v4434_v7 = vld.sshfl [vmem:[#allocation1] sm:$0xff pattern:$0x75316420]  ;;  %641 = vmatpush.msra.mxu2 %v89_v16  ;;  %v440_v18 = vsel %vm7422_vm0, %v4351_v22, %v4377_v31 }
 0x10b   :  { %1602 = vst [vmem:[#allocation1] ss:$2 sm:$0xff] %v3782_v2  ;;  %667 = vmatpush.msra.mxu3 %v99_v13  ;;  %v97_v16 = vld [vmem:[%s7297_s3 + $0x198] sm:$0xff]  ;;  %v87_v2 = vld [vmem:[%s7297_s3 + $0x148] sm:$0xff]  ;;  %v496_v46 = vperm.slane %v4541_v40, 3  ;;  %v4595_v36 = vsel %vm4565_vm6, 1, %v7616_v60 }
 0x10c   :  { %642 = vmatpush.msra.mxu2 %v88_v33  ;;  %v74_v33 = vld [vmem:[%s7297_s3 + $0xe0] sm:$0xff]  ;;  %v83_v13 = vld [vmem:[%s7297_s3 + $0x128] sm:$0xff]  ;;  %vm7416_vm6 = vcmp.lt.s32.totalorder %v3910_v56, 111 }
 0x10d   :  { %668 = vmatpush.msra.mxu3 %v98_v17  ;;  %v59_v17 = vld [vmem:[%s7297_s3 + $0x68] sm:$0xff]  ;;  %v4495_v20 = vpop.permute.xlu1 %432  ;;  %v4497_v58 = vpop.permute.xlu2 %479  ;;  %vm4619_vm7 = vcmp.eq.s32.totalorder %v496_v46, 1  ;;  %v52_v46 = vld [vmem:[%s7297_s3 + $0x30] sm:$0xff] }
 0x10e   :  { %599 = vmatpush.msra.mxu0 %v59_v17  ;;  %643 = vmatpush.msra.mxu2 %v87_v2  ;;  %v4520_v17 = vsel %vm4451_vm13, 1, %v7616_v60  ;;  %v73_v2 = vld [vmem:[%s7297_s3 + $0xd8] sm:$0xff]  ;;  %vm4552_vm13 = vcmp.eq.s32.totalorder %v390_v50, 1  ;;  %v55_v50 = vld [vmem:[%s7297_s3 + $0x48] sm:$0xff]  ;;  %v7631_v60 = vmov 0 }
 0x10f   :  { %669 = vmatpush.msra.mxu3 %v97_v16  ;;  %v86_v16 = vld [vmem:[%s7297_s3 + $0x140] sm:$0xff]  ;;  %v445_v23 = vperm.slane %v4520_v17, 3  ;;  %v7632_v60 = vsel %vm4619_vm7, 4294967295, %v7631_v60 }
 0x110   :  { %1460 = vrot.lane.b32.xlu0 %v1452_v27, %s3676_s15  ;;  %v76_v27 = vld [vmem:[%s7297_s3 + $0xf0] sm:$0xff]  ;;  %644 = vmatpush.msra.mxu2 %v86_v16  ;;  %v7621_v16 = vmov 0  ;;  %7633 = vst [vmem:[#allocation59_spill] sm:$0xff] %v7632_v60  ;;  %v78_v60 = vld [vmem:[%s7297_s3 + $0x100] sm:$0xff] }
 0x111   :  { %3479 = vset.pattern.permute.xlu0 %v7615_v0  ;;  %618 = vmatpush.msra.mxu1 %v76_v27  ;;  %v75_v0 = vld [vmem:[%s7297_s3 + $0xe8] sm:$0xff]  ;;  %v58_v27 = vld [vmem:[%s7297_s3 + $0x60] sm:$0xff]  ;;  %v7622_v16 = vsel %vm4552_vm13, 4294967295, %v7621_v16  ;;  %vm4603_vm3 = vcmp.eq.s32.totalorder %v445_v23, 1 }
 0x112   :  { %670 = vmatpush.msra.mxu3 %v96_v32  ;;  %600 = vmatpush.msra.mxu0 %v58_v27  ;;  %v94_v32 = vld [vmem:[%s7297_s3 + $0x180] sm:$0xff]  ;;  %v56_v27 = vld [vmem:[%s7297_s3 + $0x50] sm:$0xff]  ;;  %7623 = vst [vmem:[#allocation56_spill] sm:$0xff] %v7622_v16  ;;  %v69_v16 = vld [vmem:[%s7297_s3 + $0xb8] sm:$0xff] }
 0x113   :  { %619 = vmatpush.msra.mxu1 %v75_v0  ;;  %v57_v0 = vld [vmem:[%s7297_s3 + $0x58] sm:$0xff]  ;;  %645 = vmatpush.msra.mxu2 %v85_v63 }
 0x114   :  { %671 = vmatpush.msra.mxu3 %v95_v51  ;;  %601 = vmatpush.msra.mxu0 %v57_v0  ;;  %v84_v51 = vld [vmem:[%s7297_s3 + $0x130] sm:$0xff]  ;;  %v385_v0 = vsel %vm7418_vm4, %v4375_v21, %v4337_v45 }
 0x115   :  { %620 = vmatpush.msra.mxu1 %v74_v33  ;;  %v72_v33 = vld [vmem:[%s7297_s3 + $0xd0] sm:$0xff]  ;;  %646 = vmatpush.msra.mxu2 %v84_v51  ;;  %v4585_v63 = vsel %vm4552_vm13, %v385_v0, 0.0  ;;  %v82_v51 = vld [vmem:[%s7297_s3 + $0x120] sm:$0xff]  ;;  %v7628_v0 = vmov 0 }
 0x116   :  { %672 = vmatpush.msra.mxu3 %v94_v32  ;;  %602 = vmatpush.msra.mxu0 %v56_v27  ;;  %7627 = vst [vmem:[#allocation57_spill] sm:$0xff] %v4585_v63  ;;  %v4588_v32 = vpop.permute.xlu1 %430  ;;  %v4590_v27 = vpop.permute.xlu2 %536  ;;  %v7629_v0 = vsel %vm4603_vm3, 4294967295, %v7628_v0  ;;  %v406_v23 = vmul.f32 %v4260_v29, %v4585_v63  ;;  %v4636_v63 = vsel %vm4603_vm3, %v440_v18, 0.0  ;;  %v80_v18 = vld [vmem:[%s7297_s3 + $0x110] sm:$0xff]  ;;  %vm7654_vm3 = vcmp.lt.s32.totalorder %v3910_v56, 127 }
 0x117   :  { %621 = vmatpush.msra.mxu1 %v73_v2  ;;  %v54_v2 = vld [vmem:[%s7297_s3 + $0x40] sm:$0xff]  ;;  %7630 = vst [vmem:[#allocation58_spill] sm:$0xff] %v7629_v0  ;;  %647 = vmatpush.msra.mxu2 %v83_v13  ;;  %v547_v13 = vperm.slane %v4595_v36, 3  ;;  %v51_v0 = vld [vmem:[%s7297_s3 + $0x28] sm:$0xff] }
 0x118   :  { %1487 = vperm.xlu0 %3479, %v3843_v35   ;;  %603 = vmatpush.msra.mxu0 %v55_v50  ;;  %v53_v50 = vld [vmem:[%s7297_s3 + $0x38] sm:$0xff]  ;;  %7634 = vst [vmem:[#allocation60_spill] sm:$0xff] %v4636_v63 }
 0x119   :  { %622 = vmatpush.msra.mxu1 %v72_v33  ;;  %v70_v33 = vld [vmem:[%s7297_s3 + $0xc0] sm:$0xff]  ;;  %648 = vmatpush.msra.mxu2 %v82_v51  ;;  %v359_v51 = vadd.f32 %v3905_v55, %v4092_v38  ;;  %v461_v55 = vmul.f32 %v4279_v62, %v4636_v63 }
 0x11a   :  { %604 = vmatpush.msra.mxu0 %v54_v2  ;;  %v81_v2 = vld [vmem:[%s7297_s3 + $0x118] sm:$0xff] }
 0x11b   :  { %623 = vmatpush.msra.mxu1 %v71_v43  ;;  %v491_v43 = vsel %vm7410_vm15, %v4430_v10, %v4497_v58  ;;  %649 = vmatpush.msra.mxu2 %v81_v2  ;;  %v410_v38 = vadd.f32 %v406_v23, %v359_v51  ;;  %vm4661_vm15 = vcmp.eq.s32.totalorder %v547_v13, 1  ;;  %v389_v2 = vperm.slane %v4475_v25, 2  ;;  %v66_v13 = vld [vmem:[%s7297_s3 + $0xa0] sm:$0xff] }
 0x11c   :  { %605 = vmatpush.msra.mxu0 %v53_v50  ;;  %v79_v50 = vld [vmem:[%s7297_s3 + $0x108] sm:$0xff] }
 0x11d   :  { %624 = vmatpush.msra.mxu1 %v70_v33  ;;  %v68_v33 = vld [vmem:[%s7297_s3 + $0xb0] sm:$0xff]  ;;  %650 = vmatpush.msra.mxu2 %v80_v18  ;;  %v49_v18 = vld [vmem:[%s7297_s3 + $0x18] sm:$0xff]  ;;  %v465_v63 = vadd.f32 %v461_v55, %v410_v38 }
 0x11e   :  { %606 = vmatpush.msra.mxu0 %v52_v46  ;;  %v4672_v46 = vpop.permute.xlu1 %483  ;;  %v4674_v23 = vpop.permute.xlu2 %530  ;;  %v48_v38 = vld [vmem:[%s7297_s3 + $0x10] sm:$0xff] }
 0x11f   :  { %625 = vmatpush.msra.mxu1 %v69_v16  ;;  %v7636_v16 = vmov 0  ;;  %v542_v51 = vsel %vm7416_vm6, %v4590_v27, %v4674_v23  ;;  %651 = vmatpush.msra.mxu2 %v79_v50  ;;  %vm4701_vm6 = vcmp.eq.s32.totalorder %v389_v2, 1  ;;  %v382_v50 = vsel %vm7418_vm4, %v4323_v3, %v4375_v21  ;;  %v64_v55 = vld [vmem:[%s7297_s3 + $0x90] sm:$0xff] }
 0x120   :  { %1564 = vrot.lane.b32.xlu0 %v4432_v59, %s3677_s14  ;;  %v4653_v59 = vsel %vm4619_vm7, %v491_v43, 0.0  ;;  %v7637_v16 = vsel %vm4661_vm15, 4294967295, %v7636_v16  ;;  %v50_v43 = vld [vmem:[%s7297_s3 + $0x20] sm:$0xff]  ;;  %607 = vmatpush.msra.mxu0 %v51_v0  ;;  %v4690_v0 = vsel %vm4661_vm15, %v542_v51, 0.0  ;;  %v7640_v51 = vmov 0 }
 0x121   :  { %3482 = vset.pattern.permute.xlu0 %v3678_v1  ;;  %7635 = vst [vmem:[#allocation61_spill] sm:$0xff] %v4653_v59  ;;  %v67_v1 = vld [vmem:[%s7297_s3 + $0xa8] sm:$0xff]  ;;  %626 = vmatpush.msra.mxu1 %v68_v33  ;;  %v512_v33 = vmul.f32 %v4296_v47, %v4653_v59  ;;  %v65_v59 = vld [vmem:[%s7297_s3 + $0x98] sm:$0xff]  ;;  %v563_v39 = vmul.f32 %v4308_v14, %v4690_v0  ;;  %v7641_v51 = vsel %vm4701_vm6, 4294967295, %v7640_v51  ;;  %v388_v21 = vperm.slane %v4475_v25, 1 }
 0x122   :  { %7638 = vst [vmem:[#allocation62_spill] sm:$0xff] %v7637_v16  ;;  %608 = vmatpush.msra.mxu0 %v50_v43  ;;  %v387_v43 = vperm.slane %v4475_v25, 0  ;;  %652 = vmatpush.msra.mxu2 %v78_v60  ;;  %v63_v60 = vld [vmem:[%s7297_s3 + $0x88] sm:$0xff]  ;;  %v4727_v16 = vsel %vm4701_vm6, %v382_v50, 0.0  ;;  %v437_v25 = vsel %vm7422_vm0, %v4495_v20, %v4351_v22  ;;  %v443_v22 = vperm.slane %v4520_v17, 1 }
 0x123   :  { %627 = vmatpush.msra.mxu1 %v67_v1  ;;  %7639 = vst [vmem:[#allocation63_spill] sm:$0xff] %v4690_v0  ;;  %v444_v1 = vperm.slane %v4520_v17, 2  ;;  %v516_v2 = vadd.f32 %v512_v33, %v465_v63  ;;  %v7643_v63 = vmov 0  ;;  %v358_v33 = vadd.f32 %v3903_v54, %v4180_v5  ;;  %v46_v0 = vld [vmem:[%s7297_s3] sm:$0xff] }
 0x124   :  { %7642 = vst [vmem:[#allocation64_spill] sm:$0xff] %v7641_v51  ;;  %609 = vmatpush.msra.mxu0 %v49_v18  ;;  %vm4739_vm15 = vcmp.eq.s32.totalorder %v387_v43, 1  ;;  %v7646_v18 = vmov 0  ;;  %v7649_v54 = vmov 0  ;;  %vm7652_vm7 = vcmp.lt.s32.totalorder %v3910_v56, 112 }
 0x125   :  { %628 = vmatpush.msra.mxu1 %v66_v13  ;;  %v495_v13 = vperm.slane %v4541_v40, 2  ;;  %vm4729_vm4 = vcmp.eq.s32.totalorder %v444_v1, 1  ;;  %v7647_v18 = vsel %vm4739_vm15, 4294967295, %v7646_v18  ;;  %v442_v1 = vperm.slane %v4520_v17, 0 }
 0x126   :  { %v7644_v63 = vsel %vm4729_vm4, 4294967295, %v7643_v63  ;;  %610 = vmatpush.msra.mxu0 %v48_v38  ;;  %7648 = vst [vmem:[#allocation66_spill] sm:$0xff] %v7647_v18  ;;  %v482_v50 = vpop.permute.xlu1 %481  ;;  %v4744_v51 = vpop.permute.xlu2 %569  ;;  %v488_v5 = vsel %vm7652_vm7, %v4672_v46, %v4430_v10  ;;  %v405_v38 = vmul.f32 %v4260_v29, %v4727_v16  ;;  %v384_v17 = vsel %vm7654_vm3, %v4337_v45, %v4428_v34  ;;  %vm7658_vm7 = vmmov %vm7654_vm3 }
 0x127   :  { %629 = vmatpush.msra.mxu1 %v65_v59  ;;  %7645 = vst [vmem:[#allocation65_spill] sm:$0xff] %v7644_v63  ;;  %v567_v59 = vadd.f32 %v563_v39, %v516_v2  ;;  %v62_v39 = vld [vmem:[%s7297_s3 + $0x80] sm:$0xff]  ;;  %vm4753_vm0 = vcmp.eq.s32.totalorder %v495_v13, 1  ;;  %vm4774_vm6 = vcmp.eq.s32.totalorder %v388_v21, 1  ;;  %v7655_v2 = vmov 0 }
 0x128   :  { %1589 = vperm.xlu0 %3482, %v3843_v35   ;;  %v47_v35 = vld [vmem:[%s7297_s3 + $0x8] sm:$0xff]  ;;  %v7650_v54 = vsel %vm4753_vm0, 4294967295, %v7649_v54  ;;  %v7656_v2 = vsel %vm4774_vm6, 4294967295, %v7655_v2  ;;  %v383_v10 = vsel %vm7658_vm7, %v4428_v34, %v4323_v3  ;;  %v546_v13 = vperm.slane %v4595_v36, 2 }
 0x129   :  { %630 = vmatpush.msra.mxu1 %v64_v55  ;;  %7651 = vst [vmem:[#allocation67_spill] sm:$0xff] %v7650_v54  ;;  %v4762_v43 = vadd.f32 %v4744_v51, %v567_v59  ;;  %611 = vmatpush.msra.mxu0 %v47_v35  ;;  %v4772_v55 = vsel %vm4729_vm4, %v437_v25, 0.0  ;;  %v4787_v45 = vsel %vm4753_vm0, %v488_v5, 0.0  ;;  %v493_v21 = vperm.slane %v4541_v40, 0 }
 0x12a   :  { %7657 = vst [vmem:[#allocation69_spill] sm:$0xff] %v7656_v2  ;;  %v4795_v3 = vsel %vm4739_vm15, %v384_v17, 0.0  ;;  %v460_v34 = vmul.f32 %v4279_v62, %v4772_v55  ;;  %vm4799_vm7 = vcmp.eq.s32.totalorder %v442_v1, 1  ;;  %v3679_v25 = vmov 17  }
 0x12b   :  { %7653 = vst [vmem:[#allocation68_spill] sm:$0xff] %v4762_v43  ;;  %631 = vmatpush.msra.mxu1 %v63_v60  ;;  %v579_v35 = vmul.f32 %v4762_v43, %v4762_v43  ;;  %612 = vmatpush.msra.mxu0 %v46_v0  ;;  %v494_v60 = vperm.slane %v4541_v40, 1  ;;  %v7660_v0 = vmov 0  ;;  %vm4807_vm3 = vcmp.eq.s32.totalorder %v443_v22, 1 }
 0x12c   :  { %7659 = vst [vmem:[#allocation70_spill] sm:$0xff] %v4787_v45  ;;  %v7661_v0 = vsel %vm4799_vm7, 4294967295, %v7660_v0  ;;  %v7663_v40 = vmov 0  ;;  %vm7666_vm0 = vcmp.lt.s32.totalorder %v3910_v56, 113  ;;  %vm4821_vm4 = vcmp.eq.s32.totalorder %v546_v13, 1 }
 0x12d   :  { %632 = vmatpush.msra.mxu1 %v62_v39  ;;  %7662 = vst [vmem:[#allocation71_spill] sm:$0xff] %v7661_v0  ;;  %v587_v59 = vrot.slane %v579_v35, 4  ;;  %v4805_v39 = vsel %vm4774_vm6, %v383_v10, 0.0  ;;  %v7664_v40 = vsel %vm4807_vm3, 4294967295, %v7663_v40  ;;  %v439_v1 = vsel %vm7666_vm0, %v4377_v31, %v4588_v32  ;;  %vm7667_vm15 = vmmov %vm7666_vm0 }
 0x12e   :  { %7665 = vst [vmem:[#allocation72_spill] sm:$0xff] %v7664_v40  ;;  %v438_v5 = vsel %vm7667_vm15, %v4588_v32, %v4495_v20  ;;  %vm7671_vm6 = vcmask 1043456   ;;  %v403_v17 = vmul.f32 %v4260_v29, %v4795_v3  ;;  %vm4829_vm13 = vcmp.eq.s32.totalorder %v493_v21, 1  ;;  %v535_v32 = vpop.permute.xlu1 %534 }
 0x12f   :  { %v596_v22 = vsel %vm7671_vm6, %v4762_v43, %v587_v59  ;;  %v7672_v31 = vmov 0  ;;  %vm4833_vm0 = vcmp.eq.s32.totalorder %v494_v60, 1  ;;  %v7675_v10 = vmov 0 }
 0x130   :  { %1562 = vrot.lane.b32.xlu0 %v4434_v7, %s3677_s14  ;;  %v409_v7 = vadd.f32 %v405_v38, %v358_v33  ;;  %v511_v33 = vmul.f32 %v4296_v47, %v4787_v45  ;;  %v7668_v38 = vmov 0  ;;  %v7673_v31 = vsel %vm4829_vm13, 4294967295, %v7672_v31  ;;  %673 = vmatmul.f32.vlgmr.msra.gmra.mxu3 %v596_v22  ;;  %v4881_v22 = vld [vmem:[%s7302_s8] sm:$0xf] }
 0x131   :  { %3485 = vset.pattern.permute.xlu0 %v3679_v25  ;;  %v7669_v38 = vsel %vm4821_vm4, 4294967295, %v7668_v38  ;;  %7674 = vst [vmem:[#allocation74_spill] sm:$0xff] %v7673_v31  ;;  %v7676_v10 = vsel %vm4833_vm0, 4294967295, %v7675_v10  ;;  %vm7678_vm15 = vcmp.lt.s32.totalorder %v3910_v56, 112  ;;  %v4842_v35 = vsel %vm4799_vm7, %v439_v1, 0.0 }
 0x132   :  { %7670 = vst [vmem:[#allocation73_spill] sm:$0xff] %v7669_v38  ;;  %v490_v20 = vsel %vm7678_vm15, %v4497_v58, %v482_v50  ;;  %v464_v13 = vadd.f32 %v460_v34, %v409_v7  ;;  %vm7680_vm6 = vmmov %vm7678_vm15  ;;  %v539_v60 = vsel %vm7681_vm8, %v535_v32, %v4590_v27  ;;  %v404_v25 = vmul.f32 %v4260_v29, %v4805_v39 }
 0x133   :  { %7677 = vst [vmem:[#allocation75_spill] sm:$0xff] %v7676_v10  ;;  %v489_v21 = vsel %vm7680_vm6, %v482_v50, %v4672_v46  ;;  %v4854_v58 = vsel %vm4807_vm3, %v438_v5, 0.0  ;;  %v4858_v34 = vsel %vm4821_vm4, %v539_v60, 0.0  ;;  %v544_v59 = vperm.slane %v4595_v36, 0 }
 0x134   :  { %7679 = vst [vmem:[#allocation76_spill] sm:$0xff] %v4842_v35  ;;  %v515_v7 = vadd.f32 %v511_v33, %v464_v13  ;;  %v4863_v46 = vsel %vm4829_vm13, %v490_v20, 0.0  ;;  %v562_v27 = vmul.f32 %v4308_v14, %v4858_v34  ;;  %v545_v29 = vperm.slane %v4595_v36, 1 }
 0x135   :  { %7682 = vst [vmem:[#allocation77_spill] sm:$0xff] %v4858_v34  ;;  %v357_v50 = vadd.f32 %v3901_v53, %v4264_v15  ;;  %v356_v1 = vadd.f32 %v3899_v52, %v4262_v30  ;;  %v458_v5 = vmul.f32 %v4279_v62, %v4842_v35  ;;  %v4876_v33 = vsel %vm4833_vm0, %v489_v21, 0.0 }
 0x136   :  { %7683 = vst [vmem:[#allocation78_spill] sm:$0xff] %v4863_v46  ;;  %v459_v36 = vmul.f32 %v4279_v62, %v4854_v58  ;;  %v566_v53 = vadd.f32 %v562_v27, %v515_v7  ;;  %v509_v30 = vmul.f32 %v4296_v47, %v4863_v46  ;;  %v510_v20 = vmul.f32 %v4296_v47, %v4876_v33 }
 0x137   :  { %7684 = vst [vmem:[#allocation79_spill] sm:$0xff] %v4876_v33  ;;  %v407_v15 = vadd.f32 %v403_v17, %v356_v1  ;;  %v408_v52 = vadd.f32 %v404_v25, %v357_v50  ;;  %vm4890_vm8 = vcmp.eq.s32.totalorder %v544_v59, 1  ;;  %v7685_v13 = vmov 0  ;;  %v533_v17 = vpop.permute.xlu1 %532 }
 0x138   :  { %1664 = vperm.xlu0 %3485, %v4881_v22   ;;  %v7686_v13 = vsel %vm4890_vm8, 4294967295, %v7685_v13  ;;  %vm4894_vm15 = vcmp.eq.s32.totalorder %v545_v29, 1  ;;  %v7688_v21 = vmov 0  ;;  %v4899_v60 = vadd.f32 %v4744_v51, %v566_v53 }
 0x139   :  { %7687 = vst [vmem:[#allocation80_spill] sm:$0xff] %v7686_v13  ;;  %v7689_v21 = vsel %vm4894_vm15, 4294967295, %v7688_v21  ;;  %v462_v62 = vadd.f32 %v458_v5, %v407_v15  ;;  %v463_v25 = vadd.f32 %v459_v36, %v408_v52  ;;  %vm7692_vm6 = vcmp.lt.s32.totalorder %v3910_v56, 111 }
 0x13a   :  { %7690 = vst [vmem:[#allocation81_spill] sm:$0xff] %v7689_v21  ;;  %v540_v7 = vsel %vm7692_vm6, %v533_v17, %v535_v32  ;;  %vm7693_vm4 = vmmov %vm7692_vm6  ;;  %v578_v59 = vmul.f32 %v4899_v60, %v4899_v60  ;;  %v7714_v21 = vld [vmem:[#allocation7_spill] sm:$0xff] }
 0x13b   :  { %7691 = vst [vmem:[#allocation82_spill] sm:$0xff] %v4899_v60  ;;  %v541_v47 = vsel %vm7693_vm4, %v4674_v23, %v533_v17  ;;  %v513_v27 = vadd.f32 %v509_v30, %v462_v62  ;;  %v4914_v50 = vsel %vm4894_vm15, %v540_v7, 0.0  ;;  %v514_v1 = vadd.f32 %v510_v20, %v463_v25 }
 0x13c   :  { %v4910_v29 = vsel %vm4890_vm8, %v541_v47, 0.0  ;;  %7695 = vst [vmem:[#allocation84_spill] sm:$0xff] %v4914_v50  ;;  %v561_v5 = vmul.f32 %v4308_v14, %v4914_v50  ;;  %v586_v23 = vrot.slane %v578_v59, 4  ;;  %vm7696_vm4 = vcmask 1043456  }
 0x13d   :  { %7694 = vst [vmem:[#allocation83_spill] sm:$0xff] %v4910_v29  ;;  %v560_v32 = vmul.f32 %v4308_v14, %v4910_v29  ;;  %vm7699_vm6 = vmmov %vm7696_vm4  ;;  %vm7701_vm15 = vcmask 1043456   ;;  %vm7715_vm12 = vcmp.ge.s32.totalorder %v7714_v21, 0 }
 0x13e   :  { %v595_v36 = vsel %vm7696_vm4, %v4899_v60, %v586_v23  ;;  %v565_v15 = vadd.f32 %v561_v5, %v514_v1 }
 0x13f   :  { %v564_v53 = vadd.f32 %v560_v32, %v513_v27  ;;  %653 = vmatmul.f32.vlgmr.msra.gmra.mxu2 %v595_v36  ;;  %v7700_v36 = vmov 4  }
 0x140   :  { %v4926_v30 = vadd.f32 %v4744_v51, %v565_v15  ;;  %v111_v15 = vld [vmem:[%s7299_s5] sm:$0xf] }
 0x141   :  { %v4923_v52 = vadd.f32 %v4744_v51, %v564_v53 }
 0x142   :  { %7698 = vst [vmem:[#allocation86_spill] sm:$0xff] %v4926_v30  ;;  %v577_v62 = vmul.f32 %v4926_v30, %v4926_v30 }
 0x143   :  { %7697 = vst [vmem:[#allocation85_spill] sm:$0xff] %v4923_v52  ;;  %v576_v20 = vmul.f32 %v4923_v52, %v4923_v52 }
 0x144   :  { %v585_v17 = vrot.slane %v577_v62, 4 }
 0x145   :  { %v584_v14 = vrot.slane %v576_v20, 4 }
 0x146   :  { %v594_v7 = vsel %vm7696_vm4, %v4926_v30, %v585_v17  ;;  %vm7434_vm4 = vcmask 31744  }
 0x147   :  { %v593_v25 = vsel %vm7699_vm6, %v4923_v52, %v584_v14  ;;  %633 = vmatmul.f32.vlgmr.msra.gmra.mxu1 %v594_v7  ;;  %vm7435_vm6 = vcmask 15360   ;;  %v7705_v7 = vmov 7  }
 0x148   :  { %613 = vmatmul.f32.vlgmr.msra.gmra.mxu0 %v593_v25 }
 0x1b3   :  { %v674_v32 = vpop.f32.mrf.mxu3 }
 0x1c2   :  { %v654_v27 = vpop.f32.mrf.mxu2 }
 0x1c4   :  { %v634_v59 = vpop.f32.mrf.mxu1 }
 0x1c5   :  { %v614_v47 = vpop.f32.mrf.mxu0 }
 0x1c6   :  { %v635_v51 = vadd.f32 %v634_v59, %v614_v47 }
 0x1c8   :  { %v655_v1 = vadd.f32 %v654_v27, %v635_v51  ;;  %v7706_v27 = vmov 9  }
 0x1ca   :  { %v675_v5 = vadd.f32 %v674_v32, %v655_v1 }
 0x1cc   :  { %v678_v23 = vrot.slane %v675_v5, 4 }
 0x1ce   :  { %679 = vrot.lane.b32.xlu1 %v678_v23, %s3676_s15  ;;  %v5015_v23 = vpop.permute.xlu0 %1071 }
 0x1d6   :  { %1067 = vrot.lane.b32.xlu1 %v4255_v24, %s3670_s22  ;;  %v7442_v24 = vmov 11  }
 0x1d7   :  { %3467 = vset.pattern.permute.xlu2 %v7442_v24 }
 0x1de   :  { %1115 = vrot.lane.b32.xlu1 %v4274_v11, %s3673_s25 }
 0x1e6   :  { %1095 = vperm.xlu1 %3469, %v4881_v22  }
 0x1ee   :  { %3473 = vset.pattern.permute.xlu1 %v7700_v36 }
 0x1ef   :  { %1166 = vrot.lane.b32.xlu1 %v4291_v26, %s3680_s16  ;;  %v7703_v26 = vmov 3  }
 0x1f7   :  { %1170 = vrot.lane.b32.xlu1 %v4285_v42, %s3680_s16  ;;  %v3552_v42 = vld [vmem:[%s7300_s6] sm:$0xf]  ;;  %s3682_s6 = smov 14  }
 0x1ff   :  { %1219 = vrot.lane.b32.xlu1 %v4304_v6, %s3672_s24  ;;  %v7702_v6 = vmov 2  }
 0x207   :  { %1221 = vrot.lane.b32.xlu1 %v4299_v37, %s3672_s24 }
 0x240   :  { %v680_v53 = vpop.permute.xlu1 %679 }
 0x241   :  { %v683_v20 = vsel %vm7435_vm6, %v675_v5, %v680_v53 }
 0x242   :  { %3336 = vmatpush.msk.msrb.mxu0 %vm7701_vm15, %v683_v20 }
 0x243   :  { %3337 = vmatmul.msk.f32.vlgmr.msrb.gmra.mxu0 %vm7434_vm4, %v111_v15 }
 0x2c0   :  { %v708_v11 = vpop.f32.mrf.mxu0 }
 0x2c1   :  { %v4956_v62 = vmul.f32 0.00390625, %v708_v11 }
 0x2c3   :  { %v712_v14 = vmul.f32 %v4956_v62, %v4956_v62 }
 0x2c5   :  { %714 = vrot.lane.b32.xlu2 %v712_v14, %s3676_s15 }
 0x2cd   :  { %740 = vperm.xlu2 %3467, %v3552_v42   ;;  %v3553_v42 = vld [vmem:[%s7295_s1] sm:$0xf] }
 0x2d5   :  { %1069 = vrot.lane.b32.xlu2 %v4257_v57, %s3670_s22  ;;  %v7704_v57 = vmov 6  }
 0x2d6   :  { %3471 = vset.pattern.permute.xlu2 %v7702_v6 }
 0x2dd   :  { %1117 = vrot.lane.b32.xlu2 %v4276_v61, %s3673_s25  ;;  %v1316_v61 = vld.sshfl [vmem:[#allocation1 + $0x10] sm:$0xff pattern:$0x75316420] }
 0x2e5   :  { %1119 = vrot.lane.b32.xlu2 %v4270_v8, %s3673_s25 }
 0x2ed   :  { %1168 = vrot.lane.b32.xlu2 %v4293_v19, %s3680_s16 }
 0x2f5   :  { %1193 = vperm.xlu2 %3471, %v4881_v22  }
 0x2fd   :  { %1073 = vrot.lane.b32.xlu2 %v4239_v12, %s3670_s22  ;;  %s7993_s22 = smov 111  }
 0x2fe   :  { %3472 = vset.pattern.permute.xlu2 %v7703_v26  ;;  %v7721_v26 = vld [vmem:[#allocation10_spill] sm:$0xff] }
 0x305   :  { %1244 = vperm.xlu2 %3472, %v4881_v22  }
 0x30d   :  { %1172 = vrot.lane.b32.xlu2 %v4287_v4, %s3680_s16 }
 0x30e   :  { %3475 = vset.pattern.permute.xlu2 %v7704_v57 }
 0x315   :  { %1322 = vrot.lane.b32.xlu2 %v4319_v28, %s3675_s30 }
 0x31d   :  { %1326 = vrot.lane.b32.xlu2 %v1316_v61, %s3675_s30  ;;  %v1047_v61 = vadd.s32 4294967294, %v3553_v42 }
 0x31f   :  { %v715_v19 = vpop.permute.xlu2 %714 }
 0x320   :  { %v717_v8 = vsub.f32 %v4956_v62, %v715_v19 }
 0x322   :  { %v718_v37 = vadd.f32 1e-05, %v717_v8 }
 0x324   :  { %3513 = vrsqrt.f32 %v718_v37  ;;  %vm725_vm4 = vweird.f32 %v718_v37 }
 0x325   :  { %1361 = vperm.xlu2 %3475, %v4881_v22  }
 0x327   :  { %v4996_v1 = vpop.permute.xlu2 %740 }
 0x32a   :  { %v3514_v12 = vpop.eup %3513 }
 0x32b   :  { %v720_v17 = vmul.f32 %v3514_v12, %v718_v37  ;;  %vm726_vm15 = vweird.f32 %v3514_v12  ;;  %v3554_v37 = vld [vmem:[%s7296_s2] sm:$0xf]  ;;  %s3684_s2 = smov 114  }
 0x32c   :  { %vm727_vm6 = vmor %vm725_vm4, %vm726_vm15  ;;  %vm1049_vm4 = vcmp.lt.s32.totalorder %v1047_v61, 16  ;;  %v5080_v54 = vadd.s32 2, %v3554_v37 }
 0x32d   :  { %v721_v25 = vmul.f32 %v3514_v12, %v720_v17  ;;  %3476 = vset.pattern.permute.xlu2 %v7705_v7 }
 0x32e   :  { %1373 = vperm.xlu2 %3476, %v4881_v22  }
 0x32f   :  { %v722_v4 = vmul.f32 0.5, %v721_v25 }
 0x331   :  { %v723_v47 = vsub.f32 1.5, %v722_v4  ;;  %v5055_v4 = vld.sshfl [vmem:[#allocation1 + $0x18] sm:$0xff pattern:$0x75316420] }
 0x333   :  { %v724_v28 = vmul.f32 %v3514_v12, %v723_v47  ;;  %v7709_v47 = vld [vmem:[#allocation8_spill] sm:$0xff] }
 0x334   :  { %vm7710_vm3 = vcmp.ge.s32.totalorder %v7709_v47, 0 }
 0x335   :  { %v728_v59 = vsel %vm727_vm6, %v3514_v12, %v724_v28  ;;  %v5041_v12 = vadd.s32 4294967294, %v3554_v37  ;;  %vm1048_vm6 = vcmp.ge.s32.totalorder %v1047_v61, 0  ;;  %v7713_v61 = vmov 0  }
 0x336   :  { %v4987_v51 = vmul.f32 %v4317_v49, %v728_v59  ;;  %3478 = vset.pattern.permute.xlu2 %v7706_v27  ;;  %v5000_v49 = vpop.permute.xlu2 %1069  ;;  %vm5045_vm15 = vmand %vm1048_vm6, %vm1049_vm4  ;;  %v7711_v59 = vld [vmem:[#allocation5_spill] sm:$0xff]  ;;  %vm7712_vm4 = vcmp.lt.s32.totalorder %v7709_v47, 16 }
 0x337   :  { %1411 = vrot.lane.b32.xlu2 %v4327_v48, %s3682_s6  ;;  %v5011_v48 = vpop.permute.xlu1 %1067  ;;  %vm7441_vm8 = vcmp.ge.s32.totalorder %v5041_v12, 0  ;;  %vm7459_vm0 = vcmp.lt.s32.totalorder %v5041_v12, 16  ;;  %vm1102_vm7 = vmand %vm5045_vm15, %vm7710_vm3  ;;  %1400 = vst [vmem:[#allocation1 + $0x10] ss:$2 sm:$0xff] %v7711_v59  ;;  %vm7716_vm3 = vcmp.lt.s32.totalorder %v7714_v21, 16 }
 0x338   :  { %735 = vrot.lane.b32.xlu1 %v4987_v51, %s3677_s14  ;;  %vm1053_vm13 = vmand %vm5045_vm15, %vm7441_vm8 }
 0x339   :  { %vm1055_vm6 = vmand %vm1053_vm13, %vm7459_vm0  ;;  %vm7466_vm13 = vcmp.lt.s32.totalorder %v3910_v56, 34 }
 0x33a   :  { %vm1103_vm8 = vmand %vm1102_vm7, %vm7712_vm4  ;;  %vm7460_vm7 = vcmp.lt.s32.totalorder %v3910_v56, 33  ;;  %v1078_v37 = vsel %vm7466_vm13, %v5011_v48, %v5000_v49  ;;  %vm7731_vm4 = vcmp.lt.s32.totalorder %v7721_v26, 16  ;;  %v1077_v29 = vsel %vm7466_vm13, %v5000_v49, %v5015_v23 }
 0x33b   :  { %vm1153_vm5 = vmand %vm5045_vm15, %vm7715_vm12  ;;  %v1128_v38 = vsel %vm1103_vm8, 1, %v7713_v61  ;;  %vm7739_vm13 = vcmp.ge.s32.totalorder %v5080_v54, 0 }
 0x33c   :  { %vm1154_vm9 = vmand %vm1153_vm5, %vm7716_vm3  ;;  %v1130_v10 = vperm.slane %v1128_v38, 1  ;;  %v1131_v63 = vperm.slane %v1128_v38, 2  ;;  %v1129_v7 = vperm.slane %v1128_v38, 0  ;;  %v1132_v30 = vperm.slane %v1128_v38, 3 }
 0x33d   :  { %v5087_v40 = vsel %vm1154_vm9, 1, %v7713_v61  ;;  %vm7722_vm9 = vcmp.ge.s32.totalorder %v7721_v26, 0 }
 0x33e   :  { %vm5099_vm5 = vcmp.eq.s32.totalorder %v1130_v10, 1  ;;  %vm1204_vm8 = vmand %vm5045_vm15, %vm7722_vm9  ;;  %v1181_v60 = vperm.slane %v5087_v40, 1  ;;  %v1182_v49 = vperm.slane %v5087_v40, 2  ;;  %v1180_v10 = vperm.slane %v5087_v40, 0 }
 0x33f   :  { %1436 = vperm.xlu2 %3478, %v4881_v22   ;;  %v5017_v53 = vpop.permute.xlu1 %1115  ;;  %vm1205_vm0 = vmand %vm1204_vm8, %vm7731_vm4  ;;  %vm7738_vm4 = vcmp.lt.s32.totalorder %v3910_v56, 32 }
 0x340   :  { %1273 = vrot.lane.b32.xlu1 %v4313_v9, %s3674_s26  ;;  %v5007_v9 = vpop.permute.xlu2 %1117  ;;  %vm5155_vm8 = vcmp.eq.s32.totalorder %v1181_v60, 1  ;;  %v5187_v25 = vsel %vm1205_vm0, 1, %v7713_v61  ;;  %vm7750_vm0 = vcmp.lt.s32.totalorder %v3910_v56, 32 }
 0x341   :  { %v1126_v6 = vsel %vm7460_vm7, %v5017_v53, %v5007_v9  ;;  %vm7725_vm7 = vcmp.ge.s32.totalorder %v5041_v12, 0  ;;  %v1234_v52 = vperm.slane %v5187_v25, 3 }
 0x342   :  { %vm5125_vm9 = vmand %vm3860_vm2, %vm7725_vm7  ;;  %v1138_v38 = vsel %vm5099_vm5, %v1126_v6, 0.0  ;;  %vm5143_vm7 = vcmp.eq.s32.totalorder %v1129_v7, 1 }
 0x347   :  { %3480 = vset.pattern.permute.xlu2 %v7442_v24  ;;  %v5023_v20 = vpop.permute.xlu1 %1095  ;;  %v1080_v24 = vsel %vm1055_vm6, 1, %v7713_v61  ;;  %vm5129_vm6 = vcmp.eq.s32.totalorder %v1131_v63, 1 }
 0x348   :  { %1298 = vperm.xlu1 %3473, %v4881_v22   ;;  %v5009_v32 = vpop.permute.xlu2 %1119  ;;  %v1082_v31 = vperm.slane %v1080_v24, 1  ;;  %v1083_v18 = vperm.slane %v1080_v24, 2  ;;  %v1081_v47 = vperm.slane %v1080_v24, 0  ;;  %v1084_v57 = vperm.slane %v1080_v24, 3 }
 0x34a   :  { %vm5091_vm12 = vcmp.eq.s32.totalorder %v1082_v31, 1  ;;  %vm5116_vm3 = vcmp.eq.s32.totalorder %v1083_v18, 1 }
 0x34b   :  { %v1090_v18 = vsel %vm5091_vm12, %v1078_v37, 0.0  ;;  %vm7734_vm12 = vcmp.lt.s32.totalorder %v3910_v56, 33 }
 0x34c   :  { %vm7735_vm5 = vmmov %vm7734_vm12 }
 0x34d   :  { %v1125_v6 = vsel %vm7735_vm5, %v5007_v9, %v5009_v32  ;;  %vm5172_vm5 = vcmp.eq.s32.totalorder %v1132_v30, 1  ;;  %v1091_v30 = vsel %vm5116_vm3, %v1077_v29, 0.0  ;;  %vm7751_vm3 = vcmp.lt.s32.totalorder %v5080_v54, 16 }
 0x34e   :  { %v1139_v35 = vsel %vm5129_vm6, %v1125_v6, 0.0  ;;  %vm5222_vm6 = vcmp.eq.s32.totalorder %v1182_v49, 1  ;;  %v1100_v37 = vmul.f32 %v5023_v20, %v1091_v30 }
 0x34f   :  { %v5029_v14 = vpop.permute.xlu1 %1166 }
 0x350   :  { %1223 = vrot.lane.b32.xlu1 %v4301_v41, %s3672_s24  ;;  %v5013_v5 = vpop.permute.xlu2 %1168  ;;  %v5021_v41 = vpop.permute.xlu0 %1142 }
 0x351   :  { %v1177_v7 = vsel %vm7738_vm4, %v5029_v14, %v5013_v5  ;;  %v1146_v9 = vmul.f32 %v5021_v41, %v1138_v38  ;;  %vm7744_vm4 = vcmp.lt.s32.totalorder %v5041_v12, 16  ;;  %v1147_v24 = vmul.f32 %v5021_v41, %v1139_v35 }
 0x352   :  { %vm5182_vm10 = vmand %vm5125_vm9, %vm7744_vm4  ;;  %v1189_v29 = vsel %vm5155_vm8, %v1177_v7, 0.0  ;;  %vm1225_vm8 = vcmp.lt.s32.totalorder %v3910_v56, 31 }
 0x357   :  { %v5043_v17 = vpop.permute.xlu1 %1170 }
 0x358   :  { %1277 = vrot.lane.b32.xlu1 %v4310_v44, %s3674_s26  ;;  %v5019_v15 = vpop.permute.xlu2 %1193  ;;  %v5027_v44 = vpop.permute.xlu0 %1217 }
 0x35f   :  { %v5075_v13 = vpop.permute.xlu1 %1219 }
 0x360   :  { %v5025_v11 = vpop.permute.xlu2 %1073  ;;  %v5036_v8 = vpop.permute.xlu0 %1121 }
 0x361   :  { %v1127_v27 = vsel %vm7734_vm12, %v5036_v8, %v5017_v53  ;;  %vm5168_vm12 = vmand %vm5045_vm15, %vm7739_vm13  ;;  %v1099_v53 = vmul.f32 %v5023_v20, %v1090_v18  ;;  %vm7747_vm15 = vcmp.lt.s32.totalorder %v3910_v56, 33  ;;  %vm5199_vm13 = vcmp.eq.s32.totalorder %v1081_v47, 1 }
 0x362   :  { %v5195_v38 = vsel %vm7747_vm15, %v5009_v32, %v5036_v8  ;;  %v1137_v18 = vsel %vm5143_vm7, %v1127_v27, 0.0  ;;  %v1176_v32 = vsel %vm7750_vm0, %v5013_v5, %v5043_v17  ;;  %vm1259_vm9 = vmand %vm5168_vm12, %vm7751_vm3  ;;  %vm5218_vm7 = vcmp.eq.s32.totalorder %v1084_v57, 1 }
 0x363   :  { %v5229_v27 = vsel %vm5182_vm10, 1, %v7713_v61  ;;  %v1232_v5 = vperm.slane %v5187_v25, 1  ;;  %v1150_v7 = vadd.f32 %v1146_v9, %v1099_v53  ;;  %v1233_v57 = vperm.slane %v5187_v25, 2 }
 0x364   :  { %v1140_v49 = vsel %vm5172_vm5, %v5195_v38, 0.0  ;;  %v5242_v34 = vsel %vm1259_vm9, 1, %v7713_v61  ;;  %v1190_v9 = vsel %vm5222_vm6, %v1176_v32, 0.0  ;;  %vm1330_vm10 = vcmp.lt.s32.totalorder %v3910_v56, 18 }
 0x365   :  { %v1337_v53 = vperm.slane %v5229_v27, 1  ;;  %vm5249_vm12 = vcmp.eq.s32.totalorder %v1180_v10, 1  ;;  %vm5253_vm5 = vcmp.eq.s32.totalorder %v1232_v5, 1  ;;  %v1338_v60 = vperm.slane %v5229_v27, 2 }
 0x366   :  { %vm5262_vm4 = vcmp.eq.s32.totalorder %v1233_v57, 1  ;;  %v1286_v32 = vperm.slane %v5242_v34, 1  ;;  %v1145_v63 = vmul.f32 %v5021_v41, %v1137_v18  ;;  %vm7762_vm15 = vcmp.lt.s32.totalorder %v3910_v56, 34  ;;  %v5278_v57 = vld.sshfl [vmem:[#allocation1 + $0x10] sm:$0xff pattern:$0x75316420] }
 0x367   :  { %v5111_v31 = vpop.permute.xlu1 %1221  ;;  %v1079_v5 = vsel %vm7762_vm15, %v5025_v11, %v5011_v48  ;;  %v1198_v50 = vmul.f32 %v5019_v15, %v1190_v9  ;;  %vm5284_vm0 = vcmp.eq.s32.totalorder %v1337_v53, 1  ;;  %vm1279_vm3 = vcmp.lt.s32.totalorder %v3910_v56, 30  ;;  %vm7765_vm9 = vmmov %vm7762_vm15 }
 0x368   :  { %v5034_v19 = vpop.permute.xlu2 %1244  ;;  %v5064_v42 = vpop.permute.xlu0 %1271  ;;  %v1227_v10 = vsel %vm1225_vm8, %v5075_v13, %v5111_v31  ;;  %v1076_v48 = vsel %vm7765_vm9, %v5015_v23, %v5025_v11  ;;  %v1089_v53 = vsel %vm5199_vm13, %v1079_v5, 0.0  ;;  %vm5305_vm6 = vcmp.eq.s32.totalorder %v1338_v60, 1 }
 0x369   :  { %v1241_v9 = vsel %vm5262_vm4, %v1227_v10, 0.0  ;;  %v1098_v10 = vmul.f32 %v5023_v20, %v1089_v53  ;;  %vm7772_vm13 = vcmp.lt.s32.totalorder %v3910_v56, 32 }
 0x370   :  { %v5061_v28 = vpop.permute.xlu2 %1172  ;;  %v5089_v0 = vpop.permute.xlu0 %1275 }
 0x378   :  { %v5084_v2 = vpop.permute.xlu2 %1322  ;;  %v1325_v47 = vpop.permute.xlu0 %1324 }
 0x380   :  { %v5203_v46 = vpop.permute.xlu2 %1326  ;;  %v5312_v11 = vpop.permute.xlu0 %1349 }
 0x381   :  { %v1332_v23 = vsel %vm1330_vm10, %v1325_v47, %v5203_v46 }
 0x382   :  { %v1346_v5 = vsel %vm5305_vm6, %v1332_v23, 0.0  ;;  %vm7791_vm6 = vcmp.ge.s32.totalorder %v5080_v54, 0 }
 0x3aa   :  { %v736_v8 = vpop.permute.xlu1 %735 }
 0x3ab   :  { %v738_v6 = vmul.f32 %v736_v8, %v4956_v62  ;;  %v1197_v62 = vmul.f32 %v5019_v15, %v1189_v29  ;;  %v1287_v8 = vperm.slane %v5242_v34, 2  ;;  %v1249_v29 = vmul.f32 %v5034_v19, %v1241_v9 }
 0x3ad   :  { %v743_v26 = vsub.f32 %v4996_v1, %v738_v6  ;;  %v1228_v1 = vsel %vm1225_vm8, %v5027_v44, %v5075_v13  ;;  %v1151_v6 = vadd.f32 %v1147_v24, %v1100_v37  ;;  %v1183_v13 = vperm.slane %v5087_v40, 3  ;;  %v5296_v24 = vpop.permute.xlu2 %1361 }
 0x3ae   :  { %v1201_v37 = vadd.f32 %v1197_v62, %v1150_v7  ;;  %v1240_v40 = vsel %vm5253_vm5, %v1228_v1, 0.0  ;;  %vm5314_vm5 = vcmp.eq.s32.totalorder %v1286_v32, 1  ;;  %vm5318_vm4 = vcmp.eq.s32.totalorder %v1287_v8, 1 }
 0x3af   :  { %v745_v38 = vrot.slane %v743_v26, 4  ;;  %v5280_v26 = vld.sshfl [vmem:[#allocation1 + $0x18] sm:$0xff pattern:$0x75316420]  ;;  %v1202_v1 = vadd.f32 %v1198_v50, %v1151_v6  ;;  %v1248_v60 = vmul.f32 %v5034_v19, %v1240_v40  ;;  %v1178_v32 = vsel %vm7772_vm13, %v5061_v28, %v5029_v14 }
 0x3b0   :  { %1451 = vst [vmem:[#allocation1 + $0x10] ss:$2 sm:$0xff] %v7711_v59  ;;  %vm5337_vm15 = vcmp.eq.s32.totalorder %v1183_v13, 1  ;;  %v7776_v13 = vld [vmem:[#allocation51_spill] sm:$0xff]  ;;  %v1188_v45 = vsel %vm5249_vm12, %v1178_v32, 0.0 }
 0x3b1   :  { %746 = vrot.lane.b32.xlu1 %v745_v38, %s3676_s15  ;;  %v1333_v38 = vsel %vm1330_vm10, %v5084_v2, %v1325_v47  ;;  %v1092_v47 = vsel %vm5218_vm7, %v1076_v48, 0.0  ;;  %vm7775_vm7 = vmmov %vm7772_vm13  ;;  %v1148_v48 = vmul.f32 %v5021_v41, %v1140_v49 }
 0x3b2   :  { %v1274_v18 = vpop.permute.xlu1 %1273  ;;  %v1175_v50 = vsel %vm7775_vm7, %v5043_v17, %v5061_v28  ;;  %v1345_v21 = vsel %vm5284_vm0, %v1333_v38, 0.0  ;;  %v1101_v40 = vmul.f32 %v5023_v20, %v1092_v47  ;;  %v1252_v17 = vadd.f32 %v1248_v60, %v1201_v37  ;;  %v5378_v60 = vpop.permute.xlu0 %1385 }
 0x3b3   :  { %v1281_v62 = vsel %vm1279_vm3, %v1274_v18, %v5089_v0  ;;  %v1282_v35 = vsel %vm1279_vm3, %v5064_v42, %v1274_v18  ;;  %v1519_v18 = vmul.f32 %v7776_v13, %v7711_v59  ;;  %v1191_v33 = vsel %vm5337_vm15, %v1175_v50, 0.0  ;;  %v7789_v13 = vld [vmem:[#allocation52_spill] sm:$0xff] }
 0x3b4   :  { %v1294_v6 = vsel %vm5314_vm5, %v1282_v35, 0.0  ;;  %v1295_v14 = vsel %vm5318_vm4, %v1281_v62, 0.0  ;;  %v1253_v28 = vadd.f32 %v1249_v29, %v1202_v1  ;;  %v1353_v53 = vmul.f32 %v5312_v11, %v1345_v21  ;;  %vm1396_vm5 = vmand %vm3860_vm2, %vm7791_vm6 }
 0x3b5   :  { %v1354_v38 = vmul.f32 %v5312_v11, %v1346_v5  ;;  %v5371_v30 = vpop.permute.xlu2 %1373  ;;  %v1231_v37 = vperm.slane %v5187_v25, 0  ;;  %v1196_v35 = vmul.f32 %v5019_v15, %v1188_v45  ;;  %v1152_v47 = vadd.f32 %v1148_v48, %v1101_v40  ;;  %v7779_v25 = vld [vmem:[#allocation36_spill] sm:$0xff]  ;;  %v7786_v40 = vld [vmem:[#allocation43_spill] sm:$0xff] }
 0x3b6   :  { %v1199_v1 = vmul.f32 %v5019_v15, %v1191_v33  ;;  %v1377_v21 = vmul.f32 %v5371_v30, %v7779_v25  ;;  %v7780_v5 = vld [vmem:[#allocation20_spill] sm:$0xff]  ;;  %vm5394_vm0 = vcmp.eq.s32.totalorder %v1234_v52, 1  ;;  %v1389_v45 = vmul.f32 %v5378_v60, %v7786_v40 }
 0x3b7   :  { %v5369_v49 = vld.sshfl [vmem:[#allocation1 + $0x18] sm:$0xff pattern:$0x75316420]  ;;  %v1454_v62 = vld.sshfl [vmem:[#allocation1 + $0x10] sm:$0xff pattern:$0x75316420] }
 0x3b8   :  { %1524 = vst [vmem:[#allocation1 + $0x10] ss:$2 sm:$0xff] %v1519_v18  ;;  %1464 = vrot.lane.b32.xlu2 %v1454_v62, %s3676_s15  ;;  %vm5390_vm12 = vcmp.eq.s32.totalorder %v1231_v37, 1  ;;  %v7787_v33 = vld [vmem:[#allocation24_spill] sm:$0xff]  ;;  %v1288_v62 = vperm.slane %v5242_v34, 3  ;;  %vm7792_vm4 = vcmp.lt.s32.totalorder %v5080_v54, 16 }
 0x3b9   :  { %1328 = vrot.lane.b32.xlu1 %v5055_v4, %s3675_s30  ;;  %v1149_v4 = vadd.f32 %v1145_v63, %v1098_v10  ;;  %v7777_v63 = vld [vmem:[#allocation34_spill] sm:$0xff]  ;;  %v7778_v10 = vld [vmem:[#allocation19_spill] sm:$0xff]  ;;  %s3686_s30 = smov 110   ;;  %vm1397_vm13 = vmand %vm1396_vm5, %vm7792_vm4  ;;  %vm1417_vm2 = vcmp.lt.s32.totalorder %v3910_v56, 14  ;;  %vm1468_vm6 = vcmp.lt.s32.totalorder %v3910_v56, 2 }
 0x3ba   :  { %v5363_v9 = vpop.permute.xlu1 %1298  ;;  %v1365_v29 = vmul.f32 %v5296_v24, %v7777_v63  ;;  %v1366_v32 = vmul.f32 %v5296_v24, %v7778_v10  ;;  %vm1292_vm9 = vcmp.eq.s32.totalorder %v1288_v62, 1 }
 0x3bb   :  { %v1302_v41 = vmul.f32 %v5363_v9, %v1294_v6  ;;  %v1303_v20 = vmul.f32 %v5363_v9, %v1295_v14  ;;  %v1378_v6 = vmul.f32 %v5371_v30, %v7780_v5  ;;  %v7781_v14 = vld [vmem:[#allocation50_spill] sm:$0xff] }
 0x3bd   :  { %v1306_v23 = vadd.f32 %v1302_v41, %v1252_v17  ;;  %v1307_v7 = vadd.f32 %v1303_v20, %v1253_v28  ;;  %v1390_v17 = vmul.f32 %v5378_v60, %v7787_v33  ;;  %v1200_v28 = vadd.f32 %v1196_v35, %v1149_v4 }
 0x3be   :  { %v1285_v4 = vperm.slane %v5242_v34, 0  ;;  %v5427_v34 = vld.sshfl [vmem:[#allocation1] sm:$0xff pattern:$0x75316420] }
 0x3bf   :  { %v1357_v8 = vadd.f32 %v1353_v53, %v1306_v23  ;;  %v1358_v50 = vadd.f32 %v1354_v38, %v1307_v7  ;;  %v1203_v53 = vadd.f32 %v1199_v1, %v1152_v47  ;;  %v5416_v47 = vld.sshfl [vmem:[#allocation1 + $0x10] sm:$0xff pattern:$0x75316420]  ;;  %v5418_v1 = vld.sshfl [vmem:[#allocation1 + $0x18] sm:$0xff pattern:$0x75316420] }
 0x3c0   :  { %1553 = vst [vmem:[#allocation1 + $0x10] ss:$2 sm:$0xff] %v7711_v59 }
 0x3c1   :  { %v1369_v15 = vadd.f32 %v1365_v29, %v1357_v8  ;;  %1409 = vrot.lane.b32.xlu1 %v7781_v14, %s3682_s6  ;;  %v1370_v48 = vadd.f32 %v1366_v32, %v1358_v50  ;;  %v7788_v8 = vld [vmem:[#allocation6_spill] sm:$0xff] }
 0x3c2   :  { %v1224_v38 = vpop.permute.xlu1 %1223 }
 0x3c3   :  { %v1226_v41 = vsel %vm1225_vm8, %v5111_v31, %v1224_v38  ;;  %v1229_v20 = vsel %vm1225_vm8, %v1224_v38, %v5027_v44  ;;  %v1382_v23 = vadd.f32 %v1378_v6, %v1370_v48  ;;  %v1381_v7 = vadd.f32 %v1377_v21, %v1369_v15 }
 0x3c4   :  { %v1239_v37 = vsel %vm5390_vm12, %v1229_v20, 0.0  ;;  %v1242_v52 = vsel %vm5394_vm0, %v1226_v41, 0.0  ;;  %vm1289_vm8 = vcmp.eq.s32.totalorder %v1285_v4, 1  ;;  %v3688_v41 = vmov 21  }
 0x3c5   :  { %v1247_v35 = vmul.f32 %v5034_v19, %v1239_v37  ;;  %v1250_v31 = vmul.f32 %v5034_v19, %v1242_v52  ;;  %v5420_v44 = vadd.f32 %v1390_v17, %v1382_v23  ;;  %v5422_v63 = vadd.f32 %v1389_v45, %v1381_v7  ;;  %v1606_v19 = vld.sshfl [vmem:[#allocation1 + $0x8] sm:$0xff pattern:$0x75316420] }
 0x3c6   :  { %1689 = vst [vmem:[#allocation1] ss:$2 sm:$0xff] %v7788_v8  ;;  %v1336_v52 = vperm.slane %v5229_v27, 0  ;;  %v1339_v4 = vperm.slane %v5229_v27, 3  ;;  %vm7799_vm12 = vcmp.ge.s32.totalorder %v5041_v12, 0 }
 0x3c7   :  { %v1251_v29 = vadd.f32 %v1247_v35, %v1200_v28  ;;  %v1254_v10 = vadd.f32 %v1250_v31, %v1203_v53  ;;  %v1556_v18 = vld.sshfl [vmem:[#allocation1 + $0x10] sm:$0xff pattern:$0x75316420]  ;;  %v5444_v48 = vld.sshfl [vmem:[#allocation1 + $0x18] sm:$0xff pattern:$0x75316420]  ;;  %vm1447_vm0 = vmand %vm3930_vm1, %vm7799_vm12 }
 0x3c8   :  { %1604 = vst [vmem:[#allocation1 + $0x10] ss:$2 sm:$0xff] %v7711_v59  ;;  %v3689_v35 = vmov 19   ;;  %vm1340_vm15 = vcmp.eq.s32.totalorder %v1336_v52, 1  ;;  %vm1343_vm7 = vcmp.eq.s32.totalorder %v1339_v4, 1  ;;  %v5493_v31 = vsel %vm1397_vm13, 1, %v7713_v61 }
 0x3c9   :  { %1413 = vrot.lane.b32.xlu1 %v5278_v57, %s3682_s6  ;;  %3487 = vset.pattern.permute.xlu0 %v3689_v35  ;;  %vm761_vm12 = vcmask 1041408  }
 0x3ca   :  { %v1278_v32 = vpop.permute.xlu1 %1277  ;;  %1727 = vperm.xlu0 %3487, %v4881_v22  }
 0x3cb   :  { %v1280_v50 = vsel %vm1279_vm3, %v5089_v0, %v1278_v32  ;;  %v1283_v25 = vsel %vm1279_vm3, %v1278_v32, %v5064_v42  ;;  %v3683_v0 = vmov 16   ;;  %vm7790_vm3 = vcmask 1043456  }
 0x3cc   :  { %v1293_v21 = vsel %vm1289_vm8, %v1283_v25, 0.0  ;;  %v1296_v5 = vsel %vm1292_vm9, %v1280_v50, 0.0  ;;  %3484 = vset.pattern.permute.xlu1 %v3683_v0  ;;  %v7795_v0 = vld [vmem:[#allocation35_spill] sm:$0xff]  ;;  %vm7801_vm8 = vcmp.lt.s32.totalorder %v5041_v12, 16 }
 0x3cd   :  { %v1301_v6 = vmul.f32 %v5363_v9, %v1293_v21  ;;  %v1304_v57 = vmul.f32 %v5363_v9, %v1296_v5  ;;  %v5460_v40 = vld.sshfl [vmem:[#allocation1 + $0x8] sm:$0xff pattern:$0x75316420]  ;;  %vm1448_vm9 = vmand %vm1447_vm0, %vm7801_vm8  ;;  %vm7806_vm0 = vcmp.ge.s32.totalorder %v5080_v54, 0 }
 0x3ce   :  { %v7793_v5 = vld [vmem:[#allocation33_spill] sm:$0xff]  ;;  %vm1549_vm8 = vmand %vm3930_vm1, %vm7806_vm0 }
 0x3cf   :  { %v5438_v15 = vadd.f32 %v1301_v6, %v1251_v29  ;;  %v5440_v14 = vadd.f32 %v1304_v57, %v1254_v10  ;;  %v1608_v42 = vld.sshfl [vmem:[#allocation1 + $0x18] sm:$0xff pattern:$0x75316420]  ;;  %v5452_v9 = vld.sshfl [vmem:[#allocation1 + $0x10] sm:$0xff pattern:$0x75316420]  ;;  %v1364_v6 = vmul.f32 %v5296_v24, %v7793_v5 }
 0x3d0   :  { %1691 = vst [vmem:[#allocation1 + $0x10] ss:$2 sm:$0xff] %v7711_v59 }
 0x3d1   :  { %1462 = vrot.lane.b32.xlu1 %v7789_v13, %s3676_s15 }
 0x3d7   :  { %v1694_v45 = vld.sshfl [vmem:[#allocation1 + $0x10] sm:$0xff pattern:$0x75316420]  ;;  %v5464_v33 = vld.sshfl [vmem:[#allocation1 + $0x18] sm:$0xff pattern:$0x75316420] }
 0x3d8   :  { %1746 = vst [vmem:[#allocation1 + $0x10] ss:$2 sm:$0xff] %v7711_v59 }
 0x3d9   :  { %1415 = vrot.lane.b32.xlu1 %v5280_v26, %s3682_s6  ;;  %v5458_v26 = vld.sshfl [vmem:[#allocation1] sm:$0xff pattern:$0x75316420]  ;;  %s7992_s6 = smov 112  }
 0x3da   :  { %1744 = vst [vmem:[#allocation1] ss:$2 sm:$0xff] %v7788_v8 }
 0x3df   :  { %v1750_v17 = vld.sshfl [vmem:[#allocation1 + $0x18] sm:$0xff pattern:$0x75316420]  ;;  %v5468_v28 = vld.sshfl [vmem:[#allocation1 + $0x10] sm:$0xff pattern:$0x75316420] }
 0x3e0   :  { %1797 = vst [vmem:[#allocation1 + $0x10] ss:$2 sm:$0xff] %v7711_v59 }
 0x3e1   :  { %1466 = vrot.lane.b32.xlu1 %v5369_v49, %s3676_s15  ;;  %v3685_v49 = vmov 18   ;;  %v1748_v53 = vld.sshfl [vmem:[#allocation1 + $0x8] sm:$0xff pattern:$0x75316420] }
 0x3e2   :  { %v5472_v38 = vld.sshfl [vmem:[#allocation1] sm:$0xff pattern:$0x75316420] }
 0x3e3   :  { %1795 = vst [vmem:[#allocation1] ss:$2 sm:$0xff] %v7788_v8 }
 0x3e7   :  { %v1800_v62 = vld.sshfl [vmem:[#allocation1 + $0x10] sm:$0xff pattern:$0x75316420] }
 0x3e9   :  { %1566 = vrot.lane.b32.xlu1 %v1556_v18, %s3677_s14 }
 0x3ea   :  { %v5478_v7 = vld.sshfl [vmem:[#allocation1] sm:$0xff pattern:$0x75316420]  ;;  %v1799_v37 = vld.sshfl [vmem:[#allocation1 + $0x8] sm:$0xff pattern:$0x75316420] }
 0x3eb   :  { %1846 = vst [vmem:[#allocation1] ss:$2 sm:$0xff] %v7788_v8  ;;  %1808 = vrot.lane.b32.xlu0 %v1799_v37, %s3690_s20 }
 0x3f1   :  { %1615 = vrot.lane.b32.xlu1 %v1606_v19, %s3684_s2 }
 0x3f2   :  { %v5501_v10 = vld.sshfl [vmem:[#allocation1] sm:$0xff pattern:$0x75316420]  ;;  %v5503_v19 = vld.sshfl [vmem:[#allocation1 + $0x8] sm:$0xff pattern:$0x75316420] }
 0x3f3   :  { %1897 = vst [vmem:[#allocation1] ss:$2 sm:$0xff] %v7788_v8 }
 0x3f9   :  { %1619 = vrot.lane.b32.xlu1 %v1608_v42, %s3684_s2  ;;  %v1376_v42 = vmul.f32 %v5371_v30, %v7795_v0 }
 0x3fa   :  { %v5557_v5 = vld.sshfl [vmem:[#allocation1] sm:$0xff pattern:$0x75316420] }
 0x401   :  { %1652 = vperm.xlu1 %3484, %v4881_v22  }
 0x409   :  { %3486 = vset.pattern.permute.xlu1 %v3685_v49  ;;  %v7796_v49 = vld [vmem:[#allocation21_spill] sm:$0xff] }
 0x40a   :  { %1676 = vperm.xlu1 %3486, %v4881_v22  }
 0x412   :  { %1704 = vrot.lane.b32.xlu1 %v1694_v45, %s3686_s30  ;;  %v1379_v45 = vmul.f32 %v5371_v30, %v7796_v49 }
 0x413   :  { %3489 = vset.pattern.permute.xlu1 %v3688_v41  ;;  %v7798_v41 = vld [vmem:[#allocation23_spill] sm:$0xff] }
 0x41a   :  { %1757 = vrot.lane.b32.xlu1 %v1748_v53, %s3687_s18 }
 0x422   :  { %1761 = vrot.lane.b32.xlu1 %v1750_v17, %s3687_s18 }
 0x423   :  { %v747_v20 = vpop.permute.xlu1 %746 }
 0x424   :  { %v749_v23 = vsel %vm7790_vm3, %v4987_v51, %v747_v20  ;;  %v1412_v51 = vpop.permute.xlu2 %1411  ;;  %v1391_v20 = vmul.f32 %v5378_v60, %v7798_v41  ;;  %v1426_v41 = vperm.slane %v5493_v31, 3 }
 0x425   :  { %751 = vrot.lane.b32.xlu2 %v749_v23, %s3677_s14 }
 0x42a   :  { %1810 = vrot.lane.b32.xlu1 %v1800_v62, %s3690_s20  ;;  %v3691_v62 = vmov 13  }
 0x42b   :  { %v1329_v43 = vpop.permute.xlu1 %1328 }
 0x42c   :  { %v1331_v27 = vsel %vm1330_vm10, %v5203_v46, %v1329_v43  ;;  %v1334_v29 = vsel %vm1330_vm10, %v1329_v43, %v5084_v2  ;;  %v1424_v46 = vperm.slane %v5493_v31, 1  ;;  %v7794_v2 = vld [vmem:[#allocation17_spill] sm:$0xff] }
 0x42d   :  { %v1344_v32 = vsel %vm1340_vm15, %v1334_v29, 0.0  ;;  %v1347_v50 = vsel %vm1343_vm7, %v1331_v27, 0.0  ;;  %1499 = vperm.xlu2 %3480, %v4881_v22   ;;  %v1367_v57 = vmul.f32 %v5296_v24, %v7794_v2  ;;  %v7797_v24 = vld [vmem:[#allocation42_spill] sm:$0xff]  ;;  %vm1430_vm15 = vcmp.eq.s32.totalorder %v1426_v41, 1 }
 0x42e   :  { %v1352_v25 = vmul.f32 %v5312_v11, %v1344_v32  ;;  %v1355_v21 = vmul.f32 %v5312_v11, %v1347_v50  ;;  %vm1428_vm10 = vcmp.eq.s32.totalorder %v1424_v46, 1  ;;  %v1801_v32 = vld.sshfl [vmem:[#allocation1 + $0x18] sm:$0xff pattern:$0x75316420]  ;;  %v5552_v50 = vpop.permute.xlu0 %1460 }
 0x42f   :  { %1848 = vst [vmem:[#allocation1 + $0x10] ss:$2 sm:$0xff] %v7711_v59  ;;  %1812 = vrot.lane.b32.xlu0 %v1801_v32, %s3690_s20  ;;  %v1901_v46 = vld.sshfl [vmem:[#allocation1 + $0x8] sm:$0xff pattern:$0x75316420] }
 0x430   :  { %v1356_v13 = vadd.f32 %v1352_v25, %v5438_v15  ;;  %v1359_v18 = vadd.f32 %v1355_v21, %v5440_v14  ;;  %v1388_v15 = vmul.f32 %v5378_v60, %v7797_v24  ;;  %v5527_v14 = vpop.permute.xlu2 %1436  ;;  %v1425_v60 = vperm.slane %v5493_v31, 2  ;;  %1948 = vst [vmem:[#allocation1] ss:$2 sm:$0xff] %v7788_v8  ;;  %v6438_v8 = vld [vmem:[%s7297_s3 + $0x190] sm:$0xff] }
 0x431   :  { %v1473_v21 = vsel %vm1448_vm9, 1, %v7713_v61  ;;  %vm7807_vm9 = vcmp.lt.s32.totalorder %v5080_v54, 16  ;;  %7909 = vst [vmem:[#allocation52_spill] sm:$0xff] %v6438_v8 }
 0x432   :  { %v1368_v11 = vadd.f32 %v1364_v6, %v1356_v13  ;;  %v1371_v17 = vadd.f32 %v1367_v57, %v1359_v18  ;;  %1833 = vperm.xlu1 %3489, %v4881_v22   ;;  %vm1429_vm3 = vcmp.eq.s32.totalorder %v1425_v60, 1  ;;  %v1476_v57 = vperm.slane %v1473_v21, 2 }
 0x433   :  { %v5525_v53 = vpop.permute.xlu1 %1409  ;;  %v3692_v13 = vmov 15  }
 0x434   :  { %v1420_v30 = vsel %vm1417_vm2, %v5525_v53, %v1412_v51  ;;  %v1380_v23 = vadd.f32 %v1376_v42, %v1368_v11  ;;  %v1383_v52 = vadd.f32 %v1379_v45, %v1371_v17  ;;  %vm1480_vm4 = vcmp.eq.s32.totalorder %v1476_v57, 1 }
 0x435   :  { %v1432_v4 = vsel %vm1428_vm10, %v1420_v30, 0.0  ;;  %3481 = vset.pattern.permute.xlu2 %v3691_v62  ;;  %v1423_v17 = vperm.slane %v5493_v31, 0 }
 0x436   :  { %v1440_v35 = vmul.f32 %v5527_v14, %v1432_v4  ;;  %1538 = vperm.xlu2 %3481, %v4881_v22   ;;  %v5541_v43 = vadd.f32 %v1388_v15, %v1380_v23  ;;  %v5543_v27 = vadd.f32 %v1391_v20, %v1383_v52  ;;  %v1851_v0 = vld.sshfl [vmem:[#allocation1 + $0x10] sm:$0xff pattern:$0x75316420]  ;;  %v1488_v49 = vpop.permute.xlu0 %1487  ;;  %v3695_v20 = vmov 22  }
 0x437   :  { %1861 = vrot.lane.b32.xlu0 %v1851_v0, %s3694_s19  ;;  %vm1427_vm13 = vcmp.eq.s32.totalorder %v1423_v17, 1  ;;  %v1952_v32 = vld.sshfl [vmem:[#allocation1 + $0x8] sm:$0xff pattern:$0x75316420]  ;;  %v7812_v17 = vld [vmem:[#allocation48_spill] sm:$0xff] }
 0x438   :  { %v1444_v29 = vadd.f32 %v1440_v35, %v5422_v63  ;;  %v1465_v42 = vpop.permute.xlu2 %1464  ;;  %3490 = vset.pattern.permute.xlu0 %v3695_v20  ;;  %v7803_v0 = vld [vmem:[#allocation45_spill] sm:$0xff] }
 0x439   :  { %3340 = vmatpush.msk.msrb.mxu2 %vm761_vm12, %v7803_v0  ;;  %v7814_v20 = vld [vmem:[#allocation37_spill] sm:$0xff] }
 0x43a   :  { %1755 = vrot.lane.b32.xlu1 %v5472_v38, %s3687_s18  ;;  %v1475_v38 = vperm.slane %v1473_v21, 1 }
 0x43b   :  { %v1414_v25 = vpop.permute.xlu1 %1413 }
 0x43c   :  { %v1419_v63 = vsel %vm1417_vm2, %v1412_v51, %v1414_v25  ;;  %vm1479_vm5 = vcmp.eq.s32.totalorder %v1475_v38, 1  ;;  %v3698_v38 = vmov 20  }
 0x43d   :  { %v1433_v6 = vsel %vm1429_vm3, %v1419_v63, 0.0  ;;  %vm1550_vm3 = vmand %vm1549_vm8, %vm7807_vm9  ;;  %vm7822_vm8 = vcmp.lt.s32.totalorder %v5041_v12, 16 }
 0x43e   :  { %v1441_v2 = vmul.f32 %v5527_v14, %v1433_v6  ;;  %1568 = vrot.lane.b32.xlu2 %v5444_v48, %s3677_s14 }
 0x43f   :  { %3483 = vset.pattern.permute.xlu2 %v3692_v13  ;;  %1884 = vperm.xlu0 %3490, %v4881_v22  }
 0x440   :  { %v1445_v18 = vadd.f32 %v1441_v2, %v5420_v44 }
 0x442   :  { %1910 = vrot.lane.b32.xlu1 %v1901_v46, %s3693_s21 }
 0x443   :  { %v1463_v51 = vpop.permute.xlu1 %1462 }
 0x444   :  { %v1470_v48 = vsel %vm1468_vm6, %v1463_v51, %v1465_v42  ;;  %v1471_v44 = vsel %vm1468_vm6, %v5552_v50, %v1463_v51  ;;  %v3699_v51 = vmov 24  }
 0x445   :  { %v1483_v45 = vsel %vm1479_vm5, %v1471_v44, 0.0  ;;  %v1484_v11 = vsel %vm1480_vm4, %v1470_v48, 0.0  ;;  %v5633_v48 = vld [vmem:[%s7302_s8] sm:$0xf]  ;;  %v3700_v44 = vmov 25  }
 0x446   :  { %v1491_v24 = vmul.f32 %v1488_v49, %v1483_v45  ;;  %v1492_v15 = vmul.f32 %v1488_v49, %v1484_v11  ;;  %1617 = vrot.lane.b32.xlu2 %v5452_v9, %s3684_s2  ;;  %3493 = vset.pattern.permute.xlu1 %v3700_v44 }
 0x448   :  { %v5576_v30 = vadd.f32 %v1491_v24, %v1444_v29  ;;  %v5578_v23 = vadd.f32 %v1492_v15, %v1445_v18  ;;  %v1474_v29 = vperm.slane %v1473_v21, 0  ;;  %v7813_v15 = vld [vmem:[#allocation49_spill] sm:$0xff] }
 0x44a   :  { %1806 = vrot.lane.b32.xlu1 %v5478_v7, %s3690_s20  ;;  %v1477_v7 = vperm.slane %v1473_v21, 3  ;;  %vm1478_vm7 = vcmp.eq.s32.totalorder %v1474_v29, 1 }
 0x44b   :  { %v1416_v52 = vpop.permute.xlu1 %1415 }
 0x44c   :  { %v1418_v4 = vsel %vm1417_vm2, %v1414_v25, %v1416_v52  ;;  %v1421_v9 = vsel %vm1417_vm2, %v1416_v52, %v5525_v53  ;;  %vm1481_vm10 = vcmp.eq.s32.totalorder %v1477_v7, 1  ;;  %v3697_v53 = vmov 23  }
 0x44d   :  { %v1431_v31 = vsel %vm1427_vm13, %v1421_v9, 0.0  ;;  %v1434_v62 = vsel %vm1430_vm15, %v1418_v4, 0.0  ;;  %3491 = vset.pattern.permute.xlu0 %v3697_v53  ;;  %vm1570_vm2 = vcmp.lt.s32.totalorder %v3910_v56, 126  ;;  %v7815_v4 = vld [vmem:[#allocation26_spill] sm:$0xff] }
 0x44e   :  { %v1439_v35 = vmul.f32 %v5527_v14, %v1431_v31  ;;  %v1442_v60 = vmul.f32 %v5527_v14, %v1434_v62  ;;  %1640 = vperm.xlu2 %3483, %v4881_v22   ;;  %1935 = vperm.xlu0 %3491, %v4881_v22   ;;  %v5605_v22 = vpop.permute.xlu0 %1564 }
 0x450   :  { %v1443_v63 = vadd.f32 %v1439_v35, %v5541_v43  ;;  %v1446_v46 = vadd.f32 %v1442_v60, %v5543_v27 }
 0x452   :  { %1961 = vrot.lane.b32.xlu1 %v1952_v32, %s3696_s4 }
 0x453   :  { %v1467_v25 = vpop.permute.xlu1 %1466 }
 0x454   :  { %v1469_v14 = vsel %vm1468_vm6, %v1465_v42, %v1467_v25  ;;  %v1472_v21 = vsel %vm1468_vm6, %v1467_v25, %v5552_v50  ;;  %v7805_v42 = vld [vmem:[#allocation41_spill] sm:$0xff]  ;;  %vm7808_vm6 = vcmask 15360   ;;  %v7817_v25 = vld [vmem:[#allocation54_spill] sm:$0xff] }
 0x455   :  { %v1482_v43 = vsel %vm1478_vm7, %v1472_v21, 0.0  ;;  %v1485_v6 = vsel %vm1481_vm10, %v1469_v14, 0.0  ;;  %3344 = vmatpush.msk.msra.mxu0 %vm761_vm12, %v7805_v42  ;;  %vm7809_vm5 = vmmov %vm7808_vm6  ;;  %vm7819_vm10 = vcmp.ge.s32.totalorder %v5041_v12, 0 }
 0x456   :  { %v1490_v27 = vmul.f32 %v1488_v49, %v1482_v43  ;;  %v1493_v2 = vmul.f32 %v1488_v49, %v1485_v6  ;;  %1613 = vrot.lane.b32.xlu2 %v5427_v34, %s3684_s2  ;;  %v7802_v34 = vld [vmem:[#allocation44_spill] sm:$0xff]  ;;  %3492 = vset.pattern.permute.xlu0 %v3699_v51  ;;  %vm7810_vm1 = vmmov %vm7809_vm5  ;;  %s3327_s2 = sshll.u32 %s7306_s12, 4  ;;  %s3328_s2 = int_to_ptr.hbm [resolvable:$true] %s3327_s2 }
 0x457   :  { %3488 = vset.pattern.permute.xlu2 %v3698_v38  ;;  %3338 = vmatpush.msk.msrb.mxu1 %vm761_vm12, %v7802_v34  ;;  %vm7811_vm4 = vmmov %vm7810_vm1  ;;  %v7821_v51 = vld [vmem:[#allocation32_spill] sm:$0xff] }
 0x458   :  { %v1494_v57 = vadd.f32 %v1490_v27, %v1443_v63  ;;  %v1497_v13 = vadd.f32 %v1493_v2, %v1446_v46  ;;  %1986 = vperm.xlu0 %3492, %v5633_v48   ;;  %v7816_v46 = vld [vmem:[#allocation53_spill] sm:$0xff]  ;;  %vm1600_vm0 = vmand %vm4384_vm14, %vm7819_vm10  ;;  %vm1708_vm10 = vcmp.lt.s32.totalorder %v3910_v56, 110 }
 0x459   :  { %v7818_v27 = vld [vmem:[#allocation57_spill] sm:$0xff]  ;;  %vm1601_vm9 = vmand %vm1600_vm0, %vm7822_vm8 }
 0x45a   :  { %1857 = vrot.lane.b32.xlu1 %v5501_v10, %s3694_s19  ;;  %v7804_v10 = vld [vmem:[#allocation40_spill] sm:$0xff] }
 0x45b   :  { %v5607_v18 = vpop.permute.xlu1 %1566  ;;  %3342 = vmatpush.msk.msrb.mxu3 %vm761_vm12, %v7804_v10  ;;  %v5695_v10 = vld.sshfl [vmem:[#allocation1] sm:$0xff pattern:$0x75316420] }
 0x45c   :  { %v1572_v50 = vsel %vm1570_vm2, %v5605_v22, %v5607_v18 }
 0x45e   :  { %1702 = vrot.lane.b32.xlu2 %v5460_v40, %s3686_s30  ;;  %v1852_v40 = vld.sshfl [vmem:[#allocation1 + $0x18] sm:$0xff pattern:$0x75316420] }
 0x45f   :  { %1899 = vst [vmem:[#allocation1 + $0x10] ss:$2 sm:$0xff] %v7711_v59 }
 0x462   :  { %1908 = vrot.lane.b32.xlu1 %v5557_v5, %s3693_s21 }
 0x466   :  { %1706 = vrot.lane.b32.xlu2 %v5464_v33, %s3686_s30  ;;  %v5637_v33 = vpop.permute.xlu1 %1615  ;;  %v5644_v5 = vld.sshfl [vmem:[#allocation1 + $0x18] sm:$0xff pattern:$0x75316420] }
 0x46a   :  { %1998 = vperm.xlu1 %3493, %v5633_v48  }
 0x46e   :  { %1759 = vrot.lane.b32.xlu2 %v5468_v28, %s3687_s18  ;;  %v1902_v28 = vld.sshfl [vmem:[#allocation1 + $0x10] sm:$0xff pattern:$0x75316420]  ;;  %v5652_v45 = vpop.permute.xlu1 %1619 }
 0x46f   :  { %1950 = vst [vmem:[#allocation1 + $0x10] ss:$2 sm:$0xff] %v7711_v59  ;;  %v6432_v59 = vld [vmem:[%s7297_s3 + $0x128] sm:$0xff] }
 0x476   :  { %1782 = vperm.xlu2 %3488, %v5633_v48   ;;  %v5668_v31 = vpop.permute.xlu1 %1652 }
 0x47e   :  { %1700 = vrot.lane.b32.xlu2 %v5458_v26, %s3686_s30  ;;  %v5659_v26 = vsel %vm1550_vm3, 1, %v7713_v61  ;;  %vm1621_vm3 = vcmp.lt.s32.totalorder %v3910_v56, 114 }
 0x47f   :  { %v752_v49 = vpop.permute.xlu2 %751  ;;  %3497 = vset.pattern.permute.xlu2 %v7700_v36  ;;  %v1577_v37 = vperm.slane %v5659_v26, 1  ;;  %v1578_v38 = vperm.slane %v5659_v26, 2 }
 0x480   :  { %3339 = vmatmul.msk.f32.vlgmr.msrb.gmra.mxu1 %vm7808_vm6, %v752_v49  ;;  %3341 = vmatmul.msk.f32.vlgmr.msrb.gmra.mxu2 %vm7809_vm5, %v752_v49 }
 0x481   :  { %3343 = vmatmul.msk.f32.vlgmr.msrb.gmra.mxu3 %vm7810_vm1, %v752_v49  ;;  %3345 = vmatmul.msk.f32.vlgmr.msra.gmra.mxu0 %vm7811_vm4, %v752_v49  ;;  %vm1581_vm13 = vcmp.eq.s32.totalorder %v1577_v37, 1  ;;  %vm1582_vm15 = vcmp.eq.s32.totalorder %v1578_v38, 1  ;;  %vm7825_vm4 = vcmp.ge.s32.totalorder %v5080_v54, 0 }
 0x482   :  { %v1585_v7 = vsel %vm1581_vm13, %v1572_v50, 0.0  ;;  %vm1687_vm13 = vmand %vm4384_vm14, %vm7825_vm4  ;;  %vm7840_vm4 = vcmp.lt.s32.totalorder %v5041_v12, 16 }
 0x486   :  { %1859 = vrot.lane.b32.xlu2 %v5503_v19, %s3694_s19  ;;  %v5672_v19 = vpop.permute.xlu0 %1589 }
 0x487   :  { %v1500_v11 = vpop.permute.xlu2 %1499  ;;  %v1593_v32 = vmul.f32 %v5672_v19, %v1585_v7 }
 0x488   :  { %v1502_v24 = vmul.f32 %v1500_v11, %v7812_v17  ;;  %v1503_v41 = vmul.f32 %v1500_v11, %v7813_v15  ;;  %v1504_v52 = vmul.f32 %v1500_v11, %v7814_v20  ;;  %v1505_v9 = vmul.f32 %v1500_v11, %v7815_v4 }
 0x489   :  { %v1626_v15 = vsel %vm1601_vm9, 1, %v7713_v61 }
 0x48a   :  { %v1506_v62 = vadd.f32 %v1502_v24, %v1494_v57  ;;  %v1507_v35 = vadd.f32 %v1503_v41, %v5576_v30  ;;  %v1508_v60 = vadd.f32 %v1504_v52, %v5578_v23  ;;  %v1509_v29 = vadd.f32 %v1505_v9, %v1497_v13 }
 0x48b   :  { %v1579_v57 = vperm.slane %v5659_v26, 3  ;;  %v1629_v52 = vperm.slane %v1626_v15, 2 }
 0x48c   :  { %v1533_v53 = vadd.f32 %v7816_v46, %v1506_v62  ;;  %v1534_v14 = vadd.f32 %v7817_v25, %v1507_v35  ;;  %v1535_v21 = vadd.f32 %v5416_v47, %v1508_v60  ;;  %v1536_v43 = vadd.f32 %v5418_v1, %v1509_v29  ;;  %v5688_v47 = vpop.permute.xlu1 %1676 }
 0x48d   :  { %vm1583_vm7 = vcmp.eq.s32.totalorder %v1579_v57, 1  ;;  %v1576_v62 = vperm.slane %v5659_v26, 0  ;;  %vm1633_vm5 = vcmp.eq.s32.totalorder %v1629_v52, 1  ;;  %v3556_v52 = vld [vmem:[%s7295_s1] sm:$0xf] }
 0x48e   :  { %1863 = vrot.lane.b32.xlu2 %v1852_v40, %s3694_s19  ;;  %v1563_v42 = vpop.permute.xlu0 %1562 }
 0x48f   :  { %vm5723_vm1 = vcmp.eq.s32.totalorder %v1576_v62, 1  ;;  %v1573_v26 = vsel %vm1570_vm2, %v1563_v42, %v5605_v22  ;;  %v7832_v62 = vld [vmem:[#allocation60_spill] sm:$0xff] }
 0x490   :  { %v1539_v63 = vpop.permute.xlu2 %1538 }
 0x491   :  { %v1541_v30 = vmul.f32 %v1539_v63, %v4795_v3  ;;  %v1542_v23 = vmul.f32 %v1539_v63, %v4805_v39  ;;  %v1543_v6 = vmul.f32 %v1539_v63, %v4727_v16  ;;  %v1544_v2 = vmul.f32 %v1539_v63, %v7818_v27  ;;  %v1953_v3 = vld.sshfl [vmem:[#allocation1 + $0x10] sm:$0xff pattern:$0x75316420]  ;;  %v1954_v39 = vld.sshfl [vmem:[#allocation1 + $0x18] sm:$0xff pattern:$0x75316420] }
 0x492   :  { %2176 = vst [vmem:[#allocation1] ss:$4 sm:$0xff] %v7821_v51 }
 0x493   :  { %v5686_v13 = vadd.f32 %v1541_v30, %v1533_v53  ;;  %v1546_v50 = vadd.f32 %v1542_v23, %v1534_v14  ;;  %v1547_v34 = vadd.f32 %v1543_v6, %v1535_v21  ;;  %v1548_v0 = vadd.f32 %v1544_v2, %v1536_v43  ;;  %v7826_v6 = vld [vmem:[#allocation79_spill] sm:$0xff]  ;;  %v7827_v2 = vld [vmem:[#allocation70_spill] sm:$0xff] }
 0x494   :  { %v5707_v24 = vpop.permute.xlu1 %1704  ;;  %v1584_v53 = vsel %vm5723_vm1, %v1573_v26, 0.0  ;;  %v1656_v14 = vmul.f32 %v5668_v31, %v4854_v58  ;;  %v1657_v21 = vmul.f32 %v5668_v31, %v4772_v55  ;;  %v1627_v30 = vperm.slane %v1626_v15, 0  ;;  %v7829_v58 = vld [vmem:[#allocation84_spill] sm:$0xff] }
 0x495   :  { %v1597_v1 = vadd.f32 %v1593_v32, %v1546_v50  ;;  %v1630_v23 = vperm.slane %v1626_v15, 3  ;;  %v1592_v55 = vmul.f32 %v5672_v19, %v1584_v53 }
 0x496   :  { %1912 = vrot.lane.b32.xlu2 %v1902_v28, %s3693_s21  ;;  %v1665_v25 = vpop.permute.xlu0 %1664  ;;  %vm1631_vm14 = vcmp.eq.s32.totalorder %v1627_v30, 1 }
 0x497   :  { %v1668_v27 = vmul.f32 %v1665_v25, %v7826_v6  ;;  %v1669_v38 = vmul.f32 %v1665_v25, %v7827_v2 }
 0x498   :  { %v1569_v40 = vpop.permute.xlu2 %1568 }
 0x499   :  { %v1571_v44 = vsel %vm1570_vm2, %v5607_v18, %v1569_v40  ;;  %v1574_v28 = vsel %vm1570_vm2, %v1569_v40, %v1563_v42  ;;  %v1628_v18 = vperm.slane %v1626_v15, 1  ;;  %vm7828_vm2 = vcmp.lt.s32.totalorder %v5080_v54, 16 }
 0x49a   :  { %v1586_v49 = vsel %vm1582_vm15, %v1571_v44, 0.0  ;;  %v1587_v37 = vsel %vm1583_vm7, %v1574_v28, 0.0  ;;  %vm1688_vm15 = vmand %vm1687_vm13, %vm7828_vm2  ;;  %vm1634_vm7 = vcmp.eq.s32.totalorder %v1630_v23, 1  ;;  %vm1763_vm2 = vcmp.lt.s32.totalorder %v3910_v56, 98 }
 0x49b   :  { %v1594_v11 = vmul.f32 %v5672_v19, %v1586_v49  ;;  %v1595_v17 = vmul.f32 %v5672_v19, %v1587_v37  ;;  %vm1632_vm6 = vcmp.eq.s32.totalorder %v1628_v18, 1  ;;  %v5753_v44 = vsel %vm1688_vm15, 1, %v7713_v61 }
 0x49c   :  { %v5720_v60 = vpop.permute.xlu1 %1757  ;;  %v1715_v18 = vperm.slane %v5753_v44, 1 }
 0x49d   :  { %v1598_v41 = vadd.f32 %v1594_v11, %v1547_v34  ;;  %v1599_v20 = vadd.f32 %v1595_v17, %v1548_v0  ;;  %v1680_v34 = vmul.f32 %v5688_v47, %v7829_v58  ;;  %v7830_v0 = vld [vmem:[#allocation77_spill] sm:$0xff]  ;;  %v1596_v17 = vadd.f32 %v1592_v55, %v5686_v13 }
 0x49e   :  { %1914 = vrot.lane.b32.xlu2 %v5644_v5, %s3693_s21  ;;  %v7834_v13 = vld [vmem:[#allocation61_spill] sm:$0xff]  ;;  %vm1719_vm0 = vcmp.eq.s32.totalorder %v1715_v18, 1  ;;  %v1714_v18 = vperm.slane %v5753_v44, 0 }
 0x49f   :  { %v1670_v26 = vmul.f32 %v1665_v25, %v7834_v13 }
 0x4a0   :  { %v1618_v4 = vpop.permute.xlu2 %1617 }
 0x4a1   :  { %v1622_v9 = vsel %vm1621_vm3, %v1618_v4, %v5652_v45  ;;  %v1623_v35 = vsel %vm1621_vm3, %v5637_v33, %v1618_v4  ;;  %v1738_v4 = vadd.s32 2, %v3556_v52  ;;  %v1717_v52 = vperm.slane %v5753_v44, 3 }
 0x4a2   :  { %v1636_v5 = vsel %vm1632_vm6, %v1623_v35, 0.0  ;;  %v1637_v29 = vsel %vm1633_vm5, %v1622_v9, 0.0  ;;  %vm7839_vm6 = vcmp.ge.s32.totalorder %v5041_v12, 0 }
 0x4a3   :  { %vm1739_vm8 = vcmp.ge.s32.totalorder %v1738_v4, 0  ;;  %vm1740_vm9 = vcmp.lt.s32.totalorder %v1738_v4, 16 }
 0x4a4   :  { %v5750_v42 = vpop.permute.xlu1 %1761 }
 0x4a6   :  { %1963 = vrot.lane.b32.xlu2 %v1953_v3, %s3696_s4 }
 0x4a8   :  { %v1641_v32 = vpop.permute.xlu2 %1640 }
 0x4a9   :  { %v1644_v63 = vmul.f32 %v1641_v32, %v1636_v5  ;;  %v1645_v46 = vmul.f32 %v1641_v32, %v1637_v29  ;;  %v7833_v29 = vld [vmem:[#allocation78_spill] sm:$0xff] }
 0x4aa   :  { %v1667_v7 = vmul.f32 %v1665_v25, %v7833_v29 }
 0x4ab   :  { %v1648_v43 = vadd.f32 %v1644_v63, %v1597_v1  ;;  %v1649_v22 = vadd.f32 %v1645_v46, %v1598_v41  ;;  %v1681_v1 = vmul.f32 %v5688_v47, %v7830_v0  ;;  %v7835_v46 = vld [vmem:[#allocation83_spill] sm:$0xff] }
 0x4ac   :  { %v1679_v53 = vmul.f32 %v5688_v47, %v7835_v46  ;;  %v5782_v25 = vpop.permute.xlu1 %1810 }
 0x4ad   :  { %v1660_v57 = vadd.f32 %v1656_v14, %v1648_v43  ;;  %v1661_v50 = vadd.f32 %v1657_v21, %v1649_v22  ;;  %v1728_v21 = vpop.permute.xlu0 %1727 }
 0x4ae   :  { %1965 = vrot.lane.b32.xlu2 %v1954_v39, %s3696_s4 }
 0x4af   :  { %v1672_v16 = vadd.f32 %v1668_v27, %v1660_v57  ;;  %v1673_v3 = vadd.f32 %v1669_v38, %v1661_v50  ;;  %v1716_v27 = vperm.slane %v5753_v44, 2 }
 0x4b0   :  { %v1614_v40 = vpop.permute.xlu2 %1613 }
 0x4b1   :  { %v1624_v19 = vsel %vm1621_vm3, %v1614_v40, %v5637_v33  ;;  %v1625_v28 = vsel %vm1621_vm3, %v5652_v45, %v1614_v40  ;;  %v1684_v49 = vadd.f32 %v1680_v34, %v1672_v16  ;;  %v1685_v39 = vadd.f32 %v1681_v1, %v1673_v3  ;;  %v7831_v33 = vld [vmem:[#allocation76_spill] sm:$0xff]  ;;  %vm5784_vm3 = vmand %vm1739_vm8, %vm1740_vm9 }
 0x4b2   :  { %v1635_v37 = vsel %vm1631_vm14, %v1624_v19, 0.0  ;;  %v1638_v11 = vsel %vm1634_vm7, %v1625_v28, 0.0  ;;  %v1655_v9 = vmul.f32 %v5668_v31, %v7831_v33  ;;  %v1658_v45 = vmul.f32 %v5668_v31, %v7832_v62  ;;  %v7836_v31 = vld [vmem:[#allocation63_spill] sm:$0xff]  ;;  %vm1742_vm5 = vmand %vm5784_vm3, %vm7839_vm6 }
 0x4b3   :  { %v1643_v15 = vmul.f32 %v1641_v32, %v1635_v37  ;;  %v1646_v41 = vmul.f32 %v1641_v32, %v1638_v11  ;;  %vm1720_vm1 = vcmp.eq.s32.totalorder %v1716_v27, 1  ;;  %vm1743_vm13 = vmand %vm1742_vm5, %vm7840_vm4  ;;  %vm1721_vm8 = vcmp.eq.s32.totalorder %v1717_v52, 1 }
 0x4b4   :  { %v5798_v34 = vpop.permute.xlu1 %1833  ;;  %v5801_v0 = vsel %vm1743_vm13, 1, %v7713_v61  ;;  %vm1814_vm13 = vcmp.lt.s32.totalorder %v3910_v56, 97 }
 0x4b5   :  { %v1647_v35 = vadd.f32 %v1643_v15, %v1596_v17  ;;  %v1650_v5 = vadd.f32 %v1646_v41, %v1599_v20  ;;  %v1682_v20 = vmul.f32 %v5688_v47, %v7836_v31  ;;  %v1770_v16 = vperm.slane %v5801_v0, 1 }
 0x4b6   :  { %1959 = vrot.lane.b32.xlu2 %v5695_v10, %s3696_s4  ;;  %v1771_v3 = vperm.slane %v5801_v0, 2  ;;  %v1769_v17 = vperm.slane %v5801_v0, 0 }
 0x4b7   :  { %v1659_v32 = vadd.f32 %v1655_v9, %v1647_v35  ;;  %v1662_v63 = vadd.f32 %v1658_v45, %v1650_v5  ;;  %vm1774_vm15 = vcmp.eq.s32.totalorder %v1770_v16, 1 }
 0x4b8   :  { %v1703_v14 = vpop.permute.xlu2 %1702  ;;  %vm1775_vm14 = vcmp.eq.s32.totalorder %v1771_v3, 1  ;;  %vm1773_vm7 = vcmp.eq.s32.totalorder %v1769_v17, 1 }
 0x4b9   :  { %v1710_v10 = vsel %vm1708_vm10, %v1703_v14, %v5707_v24  ;;  %v1671_v43 = vadd.f32 %v1667_v7, %v1659_v32  ;;  %v1674_v22 = vadd.f32 %v1670_v26, %v1662_v63  ;;  %v1809_v32 = vpop.permute.xlu0 %1808 }
 0x4ba   :  { %v1723_v30 = vsel %vm1719_vm0, %v1710_v10, 0.0  ;;  %vm1718_vm0 = vcmp.eq.s32.totalorder %v1714_v18, 1 }
 0x4bb   :  { %v1731_v23 = vmul.f32 %v1728_v21, %v1723_v30  ;;  %v1683_v2 = vadd.f32 %v1679_v53, %v1671_v43  ;;  %v1686_v38 = vadd.f32 %v1682_v20, %v1674_v22  ;;  %v7841_v20 = vld [vmem:[#allocation8_spill] sm:$0xff] }
 0x4bc   :  { %v5812_v19 = vpop.permute.xlu1 %1755  ;;  %vm7843_vm6 = vcmp.lt.s32.totalorder %v7841_v20, 16 }
 0x4bd   :  { %v1735_v57 = vadd.f32 %v1731_v23, %v1684_v49  ;;  %v1766_v4 = vsel %vm1763_vm2, %v5812_v19, %v5720_v60  ;;  %v7844_v23 = vld [vmem:[#allocation7_spill] sm:$0xff] }
 0x4be   :  { %v1777_v35 = vsel %vm1773_vm7, %v1766_v4, 0.0  ;;  %vm7848_vm7 = vcmp.lt.s32.totalorder %v7844_v23, 16 }
 0x4c0   :  { %v1707_v47 = vpop.permute.xlu2 %1706 }
 0x4c1   :  { %v1709_v50 = vsel %vm1708_vm10, %v5707_v24, %v1707_v47 }
 0x4c2   :  { %v1724_v55 = vsel %vm1720_vm1, %v1709_v50, 0.0  ;;  %vm7845_vm1 = vcmp.ge.s32.totalorder %v7844_v23, 0  ;;  %v1772_v50 = vperm.slane %v5801_v0, 3 }
 0x4c3   :  { %v1732_v58 = vmul.f32 %v1728_v21, %v1724_v55  ;;  %vm1844_vm4 = vmand %vm5784_vm3, %vm7845_vm1 }
 0x4c4   :  { %v5829_v33 = vpop.permute.xlu1 %1910 }
 0x4c5   :  { %v1736_v1 = vadd.f32 %v1732_v58, %v1685_v39 }
 0x4c8   :  { %v1760_v12 = vpop.permute.xlu2 %1759 }
 0x4c9   :  { %v1764_v40 = vsel %vm1763_vm2, %v1760_v12, %v5750_v42  ;;  %v1765_v24 = vsel %vm1763_vm2, %v5720_v60, %v1760_v12 }
 0x4ca   :  { %v1778_v28 = vsel %vm1774_vm15, %v1765_v24, 0.0  ;;  %v1779_v49 = vsel %vm1775_vm14, %v1764_v40, 0.0 }
 0x4cc   :  { %v1807_v53 = vpop.permute.xlu1 %1806 }
 0x4cd   :  { %v1817_v0 = vsel %vm1814_vm13, %v1807_v53, %v1809_v32 }
 0x4d0   :  { %v5814_v39 = vpop.permute.xlu2 %1782 }
 0x4d1   :  { %v1786_v37 = vmul.f32 %v5814_v39, %v1778_v28  ;;  %v1787_v11 = vmul.f32 %v5814_v39, %v1779_v49  ;;  %v1785_v13 = vmul.f32 %v5814_v39, %v1777_v35 }
 0x4d3   :  { %v5819_v15 = vadd.f32 %v1786_v37, %v1735_v57  ;;  %v5821_v41 = vadd.f32 %v1787_v11, %v1736_v1  ;;  %v7846_v57 = vld [vmem:[#allocation10_spill] sm:$0xff]  ;;  %v1816_v1 = vsel %vm1814_vm13, %v1809_v32, %v5782_v25 }
 0x4d4   :  { %vm7847_vm15 = vcmp.ge.s32.totalorder %v7846_v57, 0 }
 0x4d5   :  { %vm1895_vm14 = vmand %vm5784_vm3, %vm7847_vm15  ;;  %vm7862_vm15 = vcmp.ge.s32.totalorder %v5080_v54, 0 }
 0x4d8   :  { %v1701_v9 = vpop.permute.xlu2 %1700 }
 0x4d9   :  { %v1711_v62 = vsel %vm1708_vm10, %v1701_v9, %v1703_v14  ;;  %v1712_v45 = vsel %vm1708_vm10, %v1707_v47, %v1701_v9  ;;  %v1813_v14 = vpop.permute.xlu0 %1812  ;;  %vm7842_vm10 = vcmp.ge.s32.totalorder %v7841_v20, 0 }
 0x4da   :  { %v1722_v5 = vsel %vm1718_vm0, %v1711_v62, 0.0  ;;  %v1725_v44 = vsel %vm1721_vm8, %v1712_v45, 0.0  ;;  %vm1793_vm9 = vmand %vm5784_vm3, %vm7842_vm10  ;;  %vm7851_vm10 = vcmp.lt.s32.totalorder %v7846_v57, 16  ;;  %v1815_v12 = vsel %vm1814_vm13, %v5782_v25, %v1813_v14  ;;  %v7860_v45 = vld [vmem:[#allocation85_spill] sm:$0xff] }
 0x4db   :  { %v1730_v29 = vmul.f32 %v1728_v21, %v1722_v5  ;;  %v1733_v7 = vmul.f32 %v1728_v21, %v1725_v44  ;;  %v5848_v21 = vpop.permute.xlu1 %1961  ;;  %vm1794_vm5 = vmand %vm1793_vm9, %vm7843_vm6  ;;  %v1818_v24 = vsel %vm1814_vm13, %v1813_v14, %v1807_v53  ;;  %v5915_v25 = vsel %vm1763_vm2, %v5750_v42, %v5812_v19  ;;  %v7861_v19 = vld [vmem:[#allocation68_spill] sm:$0xff]  ;;  %v6066_v57 = vld [vmem:[%s7297_s3 + $0x1e8] sm:$0xff] }
 0x4dc   :  { %v1819_v43 = vsel %vm1794_vm5, 1, %v7713_v61  ;;  %vm1845_vm0 = vmand %vm1844_vm4, %vm7848_vm7  ;;  %vm5902_vm4 = vcmp.eq.s32.totalorder %v1772_v50, 1  ;;  %vm1865_vm2 = vcmp.lt.s32.totalorder %v3910_v56, 96  ;;  %vm1916_vm13 = vcmp.lt.s32.totalorder %v3910_v56, 95 }
 0x4dd   :  { %v1734_v26 = vadd.f32 %v1730_v29, %v1683_v2  ;;  %v5836_v60 = vadd.f32 %v1733_v7, %v1686_v38  ;;  %v1821_v30 = vperm.slane %v1819_v43, 1  ;;  %v1820_v27 = vperm.slane %v1819_v43, 0  ;;  %vm1896_vm9 = vmand %vm1895_vm14, %vm7851_vm10 }
 0x4de   :  { %v1822_v2 = vperm.slane %v1819_v43, 2  ;;  %v1823_v47 = vperm.slane %v1819_v43, 3  ;;  %v1870_v28 = vsel %vm1845_vm0, 1, %v7713_v61  ;;  %v5909_v11 = vsel %vm1896_vm9, 1, %v7713_v61  ;;  %vm5945_vm14 = vmand %vm5784_vm3, %vm7862_vm15 }
 0x4df   :  { %v5838_v63 = vadd.f32 %v1785_v13, %v1734_v26  ;;  %vm5873_vm8 = vcmp.eq.s32.totalorder %v1821_v30, 1  ;;  %vm5882_vm6 = vcmp.eq.s32.totalorder %v1820_v27, 1  ;;  %v1871_v62 = vperm.slane %v1870_v28, 0 }
 0x4e0   :  { %v5840_v46 = vpop.permute.xlu2 %1859  ;;  %vm5888_vm5 = vcmp.eq.s32.totalorder %v1822_v2, 1  ;;  %vm5895_vm1 = vcmp.eq.s32.totalorder %v1823_v47, 1  ;;  %v1829_v17 = vsel %vm5873_vm8, %v1816_v1, 0.0  ;;  %v1828_v18 = vsel %vm5882_vm6, %v1817_v0, 0.0  ;;  %v5952_v2 = vld [vmem:[%s7301_s7] sm:$0xf] }
 0x4e1   :  { %v5855_v22 = vpop.permute.xlu0 %1861  ;;  %v1830_v52 = vsel %vm5888_vm5, %v1815_v12, 0.0  ;;  %v1831_v9 = vsel %vm5895_vm1, %v1818_v24, 0.0  ;;  %v1922_v42 = vperm.slane %v5909_v11, 0  ;;  %v1872_v13 = vperm.slane %v1870_v28, 1  ;;  %v5980_v12 = vld [vmem:[%s7297_s3 + $0x78] sm:$0xff]  ;;  %s7991_s7 = smov 113  }
 0x4e2   :  { %v1873_v32 = vperm.slane %v1870_v28, 2  ;;  %v1780_v20 = vsel %vm5902_vm4, %v5915_v25, 0.0  ;;  %v1837_v43 = vmul.f32 %v5798_v34, %v1829_v17  ;;  %v5939_v30 = vmul.f32 %v5798_v34, %v1830_v52 }
 0x4e3   :  { %v5862_v38 = vpop.permute.xlu1 %1857  ;;  %vm5954_vm7 = vcmp.eq.s32.totalorder %v1871_v62, 1  ;;  %v1874_v50 = vperm.slane %v1870_v28, 3  ;;  %v1923_v6 = vperm.slane %v5909_v11, 1  ;;  %vm7867_vm3 = vcmask 1043456   ;;  %v7878_v28 = vld [vmem:[#allocation86_spill] sm:$0xff] }
 0x4e4   :  { %v1868_v47 = vsel %vm1865_vm2, %v5862_v38, %v5840_v46  ;;  %v1836_v58 = vmul.f32 %v5798_v34, %v1828_v18  ;;  %v5966_v1 = vmul.f32 %v5798_v34, %v1831_v9  ;;  %vm5968_vm0 = vcmp.eq.s32.totalorder %v1922_v42, 1  ;;  %vm7870_vm8 = vmmov %vm7867_vm3  ;;  %v6003_v18 = vld [vmem:[%s7297_s3 + $0x1f8] sm:$0xff]  ;;  %v6185_v42 = vld [vmem:[%s7297_s3 + $0x168] sm:$0xff] }
 0x4e5   :  { %vm5983_vm10 = vcmp.eq.s32.totalorder %v1872_v13, 1  ;;  %vm5987_vm9 = vcmp.eq.s32.totalorder %v1873_v32, 1  ;;  %vm7875_vm6 = vcmp.lt.s32.totalorder %v5080_v54, 16  ;;  %vm7879_vm1 = vcmask 31744  }
 0x4e6   :  { %vm5995_vm5 = vmand %vm5945_vm14, %vm7875_vm6  ;;  %v1879_v54 = vsel %vm5954_vm7, %v1868_v47, 0.0  ;;  %v1925_v52 = vperm.slane %v5909_v11, 3  ;;  %vm6024_vm15 = vcmp.eq.s32.totalorder %v1874_v50, 1  ;;  %vm6028_vm14 = vcmp.eq.s32.totalorder %v1923_v6, 1  ;;  %v6086_v50 = vld [vmem:[%s7297_s3 + $0x60] sm:$0xff] }
 0x4e7   :  { %vm7881_vm4 = vmmov %vm7879_vm1  ;;  %v6046_v32 = vsel %vm5995_vm5, 1, %v7713_v61  ;;  %v1924_v27 = vperm.slane %v5909_v11, 2 }
 0x4e8   :  { %v5842_v31 = vpop.permute.xlu2 %1863  ;;  %vm7886_vm7 = vmmov %vm7867_vm3  ;;  %v1973_v34 = vperm.slane %v6046_v32, 0  ;;  %v1976_v24 = vperm.slane %v6046_v32, 3 }
 0x4e9   :  { %v5906_v37 = vpop.permute.xlu0 %1884  ;;  %v1869_v13 = vsel %vm1865_vm2, %v5842_v31, %v5862_v38  ;;  %v1867_v38 = vsel %vm1865_vm2, %v5840_v46, %v5855_v22  ;;  %v1866_v6 = vsel %vm1865_vm2, %v5855_v22, %v5842_v31  ;;  %vm1967_vm2 = vcmp.lt.s32.totalorder %v3910_v56, 94  ;;  %v6225_v46 = vld [vmem:[%s7297_s3 + $0xe0] sm:$0xff]  ;;  %vm7914_vm5 = vmmov %vm7879_vm1 }
 0x4ea   :  { %v1882_v16 = vsel %vm6024_vm15, %v1869_v13, 0.0  ;;  %v1880_v31 = vsel %vm5983_vm10, %v1867_v38, 0.0  ;;  %v6196_v13 = vld [vmem:[%s7297_s3 + $0x1d0] sm:$0xff]  ;;  %v6450_v56 = vld [vmem:[%s7297_s3 + $0xa0] sm:$0xff] }
 0x4eb   :  { %v5930_v26 = vpop.permute.xlu1 %1908  ;;  %v1888_v40 = vmul.f32 %v5906_v37, %v1880_v31  ;;  %7911 = vst [vmem:[#allocation17_spill] sm:$0xff] %v6450_v56 }
 0x4ec   :  { %v1919_v0 = vsel %vm1916_vm13, %v5930_v26, %v5829_v33 }
 0x4f0   :  { %v5852_v10 = vpop.permute.xlu2 %1912 }
 0x4f1   :  { %v1918_v22 = vsel %vm1916_vm13, %v5829_v33, %v5852_v10 }
 0x4f8   :  { %v5871_v55 = vpop.permute.xlu2 %1914 }
 0x4f9   :  { %v1920_v11 = vsel %vm1916_vm13, %v5871_v55, %v5930_v26  ;;  %v1974_v26 = vperm.slane %v6046_v32, 1 }
 0x4fb   :  { %vm6172_vm10 = vcmp.eq.s32.totalorder %v1974_v26, 1 }
 0x4fd   :  { %v787_v4 = vpop.f32.mrf.mxu1 }
 0x4fe   :  { %v850_v35 = vmul.f32 %v787_v4, %v7860_v45  ;;  %v858_v5 = vrot.slane %v787_v4, 4  ;;  %v847_v44 = vpop.f32.mrf.mxu0  ;;  %v7880_v4 = vld [vmem:[#allocation82_spill] sm:$0xff] }
 0x4ff   :  { %v853_v29 = vmul.f32 %v847_v44, %v7861_v19  ;;  %v861_v7 = vrot.slane %v847_v44, 4  ;;  %v6015_v45 = vld [vmem:[%s7297_s3 + $0x70] sm:$0xff]  ;;  %v1917_v44 = vsel %vm1916_vm13, %v5852_v10, %v5871_v55  ;;  %vm6205_vm13 = vcmp.eq.s32.totalorder %v1973_v34, 1 }
 0x500   :  { %v866_v53 = vadd.f32 %v858_v5, %v850_v35  ;;  %v5932_v14 = vpop.permute.xlu2 %1963  ;;  %v1930_v35 = vsel %vm5968_vm0, %v1919_v0, 0.0  ;;  %v6022_v5 = vpop.permute.xlu0 %1935  ;;  %vm7889_vm0 = vmmov %vm7886_vm7  ;;  %v6100_v0 = vld [vmem:[%s7297_s3 + $0xf8] sm:$0xff] }
 0x501   :  { %v869_v23 = vadd.f32 %v861_v7, %v853_v29  ;;  %v6035_v29 = vld [vmem:[%s7297_s3 + $0x1f0] sm:$0xff]  ;;  %v1788_v7 = vmul.f32 %v5814_v39, %v1780_v20  ;;  %v6055_v39 = vadd.f32 %v1837_v43, %v5819_v15  ;;  %v1887_v20 = vmul.f32 %v5906_v37, %v1879_v54  ;;  %vm7920_vm15 = vmmov %vm7889_vm0 }
 0x502   :  { %3346 = vmatpush.msk.msra.mxu1 %vm7867_vm3, %v866_v53  ;;  %v1938_v47 = vmul.f32 %v6022_v5, %v1930_v35  ;;  %vm6074_vm3 = vcmp.eq.s32.totalorder %v1925_v52, 1  ;;  %v1881_v52 = vsel %vm5987_vm9, %v1866_v6, 0.0  ;;  %v1931_v35 = vsel %vm6028_vm14, %v1918_v22, 0.0  ;;  %vm7926_vm14 = vmmov %vm7889_vm0 }
 0x503   :  { %3352 = vmatpush.msk.msrb.mxu0 %vm7870_vm8, %v869_v23  ;;  %v807_v3 = vpop.f32.mrf.mxu2  ;;  %3347 = vmatmul.msk.f32.vlgmr.msra.gmra.mxu1 %vm7879_vm1, %v5952_v2  ;;  %v6051_v23 = vld [vmem:[%s7297_s3 + $0x68] sm:$0xff]  ;;  %v1792_v43 = vadd.f32 %v1788_v7, %v5836_v60  ;;  %v1840_v60 = vadd.f32 %v1836_v58, %v5838_v63  ;;  %v6106_v63 = vld [vmem:[%s7297_s3 + $0x178] sm:$0xff]  ;;  %v6118_v58 = vld [vmem:[%s7297_s3 + $0x1e0] sm:$0xff]  ;;  %v1933_v33 = vsel %vm6074_vm3, %v1920_v11, 0.0  ;;  %vm6149_vm8 = vcmp.eq.s32.totalorder %v1924_v27, 1  ;;  %v1999_v27 = vpop.permute.xlu1 %1998 }
 0x504   :  { %2025 = vmatpush.msrb.mxu1 %v5980_v12  ;;  %v851_v49 = vmul.f32 %v807_v3, %v7878_v28  ;;  %v859_v25 = vrot.slane %v807_v3, 4  ;;  %v827_v17 = vpop.f32.mrf.mxu3  ;;  %3353 = vmatmul.msk.f32.vlgmr.msrb.gmra.mxu0 %vm7881_vm4, %v5952_v2  ;;  %v6124_v3 = vld [vmem:[%s7297_s3 + $0x58] sm:$0xff]  ;;  %v6179_v7 = vld [vmem:[%s7297_s3 + $0xe8] sm:$0xff]  ;;  %v1941_v10 = vmul.f32 %v6022_v5, %v1933_v33  ;;  %v1969_v55 = vsel %vm1967_vm2, %v5848_v21, %v5932_v14  ;;  %vm7918_vm4 = vmmov %vm7889_vm0 }
 0x505   :  { %2085 = vmatpush.msra.mxu0 %v6003_v18  ;;  %v852_v9 = vmul.f32 %v827_v17, %v7880_v4  ;;  %v860_v62 = vrot.slane %v827_v17, 4  ;;  %v1891_v28 = vadd.f32 %v1887_v20, %v1840_v60  ;;  %v6142_v17 = vld [vmem:[%s7297_s3 + $0x170] sm:$0xff]  ;;  %v1843_v54 = vadd.f32 %v5966_v1, %v1792_v43  ;;  %v6270_v33 = vld [vmem:[%s7297_s3 + $0x158] sm:$0xff] }
 0x506   :  { %2026 = vmatpush.msrb.mxu1 %v6015_v45  ;;  %v867_v19 = vadd.f32 %v859_v25, %v851_v49  ;;  %v1975_v49 = vperm.slane %v6046_v32, 2  ;;  %v6136_v25 = vld [vmem:[%s7297_s3 + $0xf0] sm:$0xff]  ;;  %v1890_v4 = vmul.f32 %v5906_v37, %v1882_v16  ;;  %v6202_v32 = vld [vmem:[%s7297_s3 + $0x48] sm:$0xff]  ;;  %vm6209_vm9 = vcmp.eq.s32.totalorder %v1976_v24, 1 }
 0x507   :  { %2086 = vmatpush.msra.mxu0 %v6035_v29  ;;  %v868_v53 = vadd.f32 %v860_v62, %v852_v9  ;;  %v6156_v62 = vld [vmem:[%s7297_s3 + $0x1d8] sm:$0xff]  ;;  %v6162_v1 = vld [vmem:[%s7297_s3 + $0x50] sm:$0xff]  ;;  %v1889_v20 = vmul.f32 %v5906_v37, %v1881_v52  ;;  %v6231_v37 = vld [vmem:[%s7297_s3 + $0x160] sm:$0xff]  ;;  %v1942_v60 = vadd.f32 %v1938_v47, %v1891_v28  ;;  %v1939_v22 = vmul.f32 %v6022_v5, %v1931_v35 }
 0x508   :  { %2027 = vmatpush.msrb.mxu1 %v6051_v23  ;;  %3348 = vmatpush.msk.msra.mxu2 %vm7886_vm7, %v867_v19  ;;  %v6070_v15 = vpop.permute.xlu2 %1965  ;;  %vm6214_vm6 = vcmp.eq.s32.totalorder %v1975_v49, 1  ;;  %v1894_v6 = vadd.f32 %v1890_v4, %v1843_v54  ;;  %v6239_v16 = vld [vmem:[%s7297_s3 + $0x1c8] sm:$0xff]  ;;  %v6251_v47 = vld [vmem:[%s7297_s3 + $0x40] sm:$0xff]  ;;  %v1982_v34 = vsel %vm6172_vm10, %v1969_v55, 0.0  ;;  %v1987_v24 = vpop.permute.xlu0 %1986  ;;  %v6284_v35 = vld [vmem:[%s7297_s3 + $0x38] sm:$0xff]  ;;  %v1842_v19 = vadd.f32 %v5939_v30, %v5821_v41 }
 0x509   :  { %2087 = vmatpush.msra.mxu0 %v6066_v57  ;;  %3350 = vmatpush.msk.msra.mxu3 %vm7889_vm0, %v868_v53  ;;  %v1968_v43 = vsel %vm1967_vm2, %v5932_v14, %v6070_v15  ;;  %v1932_v14 = vsel %vm6149_vm8, %v1917_v44, 0.0  ;;  %v6278_v9 = vld [vmem:[%s7297_s3 + $0x1c0] sm:$0xff]  ;;  %v1892_v44 = vadd.f32 %v1888_v40, %v6055_v39  ;;  %v6294_v55 = vld [vmem:[%s7297_s3 + $0xd0] sm:$0xff]  ;;  %v1990_v39 = vmul.f32 %v1987_v24, %v1982_v34  ;;  %v6306_v41 = vld [vmem:[%s7297_s3 + $0x1b8] sm:$0xff] }
 0x50a   :  { %2028 = vmatpush.msrb.mxu1 %v6086_v50  ;;  %2045 = vmatpush.msrb.mxu2 %v6100_v0  ;;  %v1945_v49 = vadd.f32 %v1941_v10, %v1894_v6  ;;  %v1983_v54 = vsel %vm6214_vm6, %v1968_v43, 0.0  ;;  %v1940_v10 = vmul.f32 %v6022_v5, %v1932_v14  ;;  %v6300_v53 = vld [vmem:[%s7297_s3 + $0x150] sm:$0xff]  ;;  %v1893_v5 = vadd.f32 %v1889_v20, %v1842_v19  ;;  %v6388_v19 = vld [vmem:[%s7297_s3 + $0x18] sm:$0xff]  ;;  %vm7928_vm7 = vmmov %vm7889_vm0 }
 0x50b   :  { %2065 = vmatpush.msrb.mxu3 %v6106_v63  ;;  %2088 = vmatpush.msra.mxu0 %v6118_v58  ;;  %v6312_v30 = vld [vmem:[%s7297_s3 + $0x30] sm:$0xff]  ;;  %v1991_v43 = vmul.f32 %v1987_v24, %v1983_v54  ;;  %v1943_v6 = vadd.f32 %v1939_v22, %v1892_v44  ;;  %v6346_v22 = vld [vmem:[%s7297_s3 + $0xc0] sm:$0xff]  ;;  %7904 = vst [vmem:[#allocation36_spill] sm:$0xff] %v6388_v19  ;;  %vm7933_vm3 = vcmask 15360  }
 0x50c   :  { %2029 = vmatpush.msrb.mxu1 %v6124_v3  ;;  %2046 = vmatpush.msrb.mxu2 %v6136_v25  ;;  %v6332_v20 = vld [vmem:[%s7297_s3 + $0x1b0] sm:$0xff]  ;;  %v6382_v44 = vld [vmem:[%s7297_s3 + $0x1a0] sm:$0xff]  ;;  %vm7937_vm6 = vmmov %vm7933_vm3 }
 0x50d   :  { %2066 = vmatpush.msrb.mxu3 %v6142_v17  ;;  %2089 = vmatpush.msra.mxu0 %v6156_v62  ;;  %7903 = vst [vmem:[#allocation19_spill] sm:$0xff] %v6382_v44 }
 0x50e   :  { %2030 = vmatpush.msrb.mxu1 %v6162_v1  ;;  %2047 = vmatpush.msrb.mxu2 %v6179_v7 }
 0x50f   :  { %2067 = vmatpush.msrb.mxu3 %v6185_v42  ;;  %2090 = vmatpush.msra.mxu0 %v6196_v13 }
 0x510   :  { %2031 = vmatpush.msrb.mxu1 %v6202_v32  ;;  %2048 = vmatpush.msrb.mxu2 %v6225_v46  ;;  %v1960_v11 = vpop.permute.xlu2 %1959 }
 0x511   :  { %2068 = vmatpush.msrb.mxu3 %v6231_v37  ;;  %2091 = vmatpush.msra.mxu0 %v6239_v16  ;;  %v1970_v26 = vsel %vm1967_vm2, %v1960_v11, %v5848_v21  ;;  %v1971_v31 = vsel %vm1967_vm2, %v6070_v15, %v1960_v11  ;;  %v6264_v15 = vld [vmem:[%s7297_s3 + $0xd8] sm:$0xff]  ;;  %v6318_v11 = vld [vmem:[%s7297_s3 + $0xc8] sm:$0xff]  ;;  %vm7934_vm2 = vmmov %vm7879_vm1 }
 0x512   :  { %2032 = vmatpush.msrb.mxu1 %v6251_v47  ;;  %v1981_v21 = vsel %vm6205_vm13, %v1970_v26, 0.0  ;;  %v1984_v28 = vsel %vm6209_vm9, %v1971_v31, 0.0  ;;  %2049 = vmatpush.msrb.mxu2 %v6264_v15  ;;  %v6338_v26 = vld [vmem:[%s7297_s3 + $0x28] sm:$0xff]  ;;  %v1944_v31 = vadd.f32 %v1940_v10, %v1893_v5  ;;  %vm7935_vm9 = vmmov %vm7889_vm0 }
 0x513   :  { %2069 = vmatpush.msrb.mxu3 %v6270_v33  ;;  %v1989_v52 = vmul.f32 %v1987_v24, %v1981_v21  ;;  %v1992_v4 = vmul.f32 %v1987_v24, %v1984_v28  ;;  %2092 = vmatpush.msra.mxu0 %v6278_v9  ;;  %7900 = vst [vmem:[#allocation9_spill] sm:$0xff] %v6338_v26  ;;  %v6352_v24 = vld [vmem:[%s7297_s3 + $0x140] sm:$0xff]  ;;  %v6358_v28 = vld [vmem:[%s7297_s3 + $0x1a8] sm:$0xff] }
 0x514   :  { %2033 = vmatpush.msrb.mxu1 %v6284_v35  ;;  %2050 = vmatpush.msrb.mxu2 %v6294_v55  ;;  %v1994_v21 = vadd.f32 %v1990_v39, %v1943_v6  ;;  %7901 = vst [vmem:[#allocation51_spill] sm:$0xff] %v6358_v28  ;;  %v1995_v54 = vadd.f32 %v1991_v43, %v1944_v31  ;;  %v6396_v39 = vld [vmem:[%s7297_s3 + $0xb0] sm:$0xff]  ;;  %v6412_v43 = vld [vmem:[%s7297_s3 + $0x198] sm:$0xff] }
 0x515   :  { %2070 = vmatpush.msrb.mxu3 %v6300_v53  ;;  %v1993_v40 = vadd.f32 %v1989_v52, %v1942_v60  ;;  %v1996_v38 = vadd.f32 %v1992_v4, %v1945_v49  ;;  %2093 = vmatpush.msra.mxu0 %v6306_v41  ;;  %v6324_v60 = vld [vmem:[%s7297_s3 + $0x148] sm:$0xff]  ;;  %v6364_v49 = vld [vmem:[%s7297_s3 + $0x20] sm:$0xff]  ;;  %v6370_v52 = vld [vmem:[%s7297_s3 + $0xb8] sm:$0xff]  ;;  %7905 = vst [vmem:[#allocation20_spill] sm:$0xff] %v6396_v39 }
 0x516   :  { %2034 = vmatpush.msrb.mxu1 %v6312_v30  ;;  %2051 = vmatpush.msrb.mxu2 %v6318_v11  ;;  %7902 = vst [vmem:[#allocation34_spill] sm:$0xff] %v6364_v49  ;;  %v6376_v4 = vld [vmem:[%s7297_s3 + $0x138] sm:$0xff]  ;;  %v6407_v5 = vadd.f32 %v1999_v27, %v1994_v21  ;;  %v6418_v6 = vld [vmem:[%s7297_s3 + $0x10] sm:$0xff]  ;;  %v6421_v31 = vadd.f32 %v1999_v27, %v1995_v54  ;;  %v6426_v21 = vld [vmem:[%s7297_s3 + $0xa8] sm:$0xff] }
 0x517   :  { %2071 = vmatpush.msrb.mxu3 %v6324_v60  ;;  %v6327_v14 = vadd.f32 %v1999_v27, %v1993_v40  ;;  %2094 = vmatpush.msra.mxu0 %v6332_v20  ;;  %v6341_v34 = vadd.f32 %v1999_v27, %v1996_v38  ;;  %v6402_v40 = vld [vmem:[%s7297_s3 + $0x130] sm:$0xff]  ;;  %7906 = vst [vmem:[#allocation50_spill] sm:$0xff] %v6412_v43  ;;  %v6444_v27 = vld [vmem:[%s7297_s3 + $0x8] sm:$0xff] }
 0x518   :  { %2035 = vmatpush.msrb.mxu1 %v6338_v26  ;;  %2052 = vmatpush.msrb.mxu2 %v6346_v22  ;;  %7907 = vst [vmem:[#allocation43_spill] sm:$0xff] %v6418_v6 }
 0x519   :  { %2072 = vmatpush.msrb.mxu3 %v6352_v24  ;;  %2095 = vmatpush.msra.mxu0 %v6358_v28  ;;  %v2005_v10 = vmul.f32 %v6327_v14, %v6327_v14  ;;  %v2008_v38 = vmul.f32 %v6341_v34, %v6341_v34  ;;  %7908 = vst [vmem:[#allocation24_spill] sm:$0xff] %v6426_v21  ;;  %v2177_v28 = vld.sshfl [vmem:[#allocation1] sm:$0xff pattern:$0x73625140] }
 0x51a   :  { %2036 = vmatpush.msrb.mxu1 %v6364_v49  ;;  %2053 = vmatpush.msrb.mxu2 %v6370_v52  ;;  %7910 = vst [vmem:[#allocation33_spill] sm:$0xff] %v6444_v27  ;;  %v6504_v49 = vld [vmem:[%s7297_s3 + $0x90] sm:$0xff] }
 0x51b   :  { %2073 = vmatpush.msrb.mxu3 %v6376_v4  ;;  %2096 = vmatpush.msra.mxu0 %v6382_v44  ;;  %v2013_v54 = vrot.slane %v2005_v10, 4  ;;  %v2006_v10 = vmul.f32 %v6407_v5, %v6407_v5  ;;  %7921 = vst [vmem:[#allocation45_spill] sm:$0xff] %v6504_v49 }
 0x51c   :  { %2037 = vmatpush.msrb.mxu1 %v6388_v19  ;;  %2054 = vmatpush.msrb.mxu2 %v6396_v39  ;;  %v2007_v19 = vmul.f32 %v6421_v31, %v6421_v31 }
 0x51d   :  { %2074 = vmatpush.msrb.mxu3 %v6402_v40  ;;  %2097 = vmatpush.msra.mxu0 %v6412_v43  ;;  %v6496_v43 = vld [vmem:[%s7297_s3 + $0x180] sm:$0xff] }
 0x51e   :  { %2038 = vmatpush.msrb.mxu1 %v6418_v6  ;;  %2055 = vmatpush.msrb.mxu2 %v6426_v21  ;;  %v6456_v6 = vld [vmem:[%s7297_s3 + $0x120] sm:$0xff]  ;;  %7919 = vst [vmem:[#allocation44_spill] sm:$0xff] %v6496_v43 }
 0x51f   :  { %2075 = vmatpush.msrb.mxu3 %v6432_v59  ;;  %2098 = vmatpush.msra.mxu0 %v6438_v8  ;;  %7912 = vst [vmem:[#allocation35_spill] sm:$0xff] %v6456_v6  ;;  %v2016_v8 = vrot.slane %v2008_v38, 4  ;;  %v6474_v38 = vld [vmem:[%s7297_s3] sm:$0xff] }
 0x520   :  { %2039 = vmatpush.msrb.mxu1 %v6444_v27  ;;  %2056 = vmatpush.msrb.mxu2 %v6450_v56  ;;  %v6462_v27 = vld [vmem:[%s7297_s3 + $0x188] sm:$0xff]  ;;  %7915 = vst [vmem:[#allocation42_spill] sm:$0xff] %v6474_v38  ;;  %v6488_v56 = vld [vmem:[%s7297_s3 + $0x118] sm:$0xff] }
 0x521   :  { %2076 = vmatpush.msrb.mxu3 %v6456_v6  ;;  %7913 = vst [vmem:[#allocation21_spill] sm:$0xff] %v6462_v27  ;;  %2099 = vmatpush.msra.mxu0 %v6462_v27  ;;  %v6482_v27 = vld [vmem:[%s7297_s3 + $0x98] sm:$0xff] }
 0x522   :  { %3349 = vmatmul.msk.f32.vlgmr.msra.gmra.mxu2 %vm7914_vm5, %v5952_v2  ;;  %3351 = vmatmul.msk.f32.vlgmr.msra.gmra.mxu3 %vm7879_vm1, %v5952_v2  ;;  %7916 = vst [vmem:[#allocation23_spill] sm:$0xff] %v6482_v27  ;;  %vm7938_vm5 = vmmov %vm7933_vm3 }
 0x523   :  { %2040 = vmatpush.msrb.mxu1 %v6474_v38  ;;  %2057 = vmatpush.msrb.mxu2 %v6482_v27  ;;  %7917 = vst [vmem:[#allocation12_spill] sm:$0xff] %v6488_v56  ;;  %v2021_v38 = vsel %vm7918_vm4, %v6327_v14, %v2013_v54  ;;  %v2024_v27 = vsel %vm7920_vm15, %v6341_v34, %v2016_v8  ;;  %v2014_v54 = vrot.slane %v2006_v10, 4  ;;  %v6516_v8 = vld [vmem:[%s7297_s3 + $0x88] sm:$0xff]  ;;  %v6528_v10 = vld [vmem:[%s7297_s3 + $0x80] sm:$0xff]  ;;  %vm7939_vm1 = vmmov %vm7933_vm3 }
 0x524   :  { %2077 = vmatpush.msrb.mxu3 %v6488_v56  ;;  %2100 = vmatpush.msra.mxu0 %v6496_v43  ;;  %v6510_v56 = vld [vmem:[%s7297_s3 + $0x110] sm:$0xff]  ;;  %7923 = vst [vmem:[#allocation41_spill] sm:$0xff] %v6516_v8  ;;  %vm7940_vm4 = vmmov %vm7939_vm1 }
 0x525   :  { %2041 = vmatmul.f32.vlgmr.msrb.gmra.mxu1 %v2021_v38  ;;  %2101 = vmatmul.f32.vlgmr.msra.gmra.mxu0 %v2024_v27  ;;  %7922 = vst [vmem:[#allocation40_spill] sm:$0xff] %v6510_v56  ;;  %v2015_v38 = vrot.slane %v2007_v19, 4  ;;  %v6522_v27 = vld [vmem:[%s7297_s3 + $0x108] sm:$0xff]  ;;  %v2022_v19 = vsel %vm7926_vm14, %v6407_v5, %v2014_v54  ;;  %vm7947_vm15 = vmmov %vm7889_vm0 }
 0x526   :  { %2058 = vmatpush.msrb.mxu2 %v6504_v49  ;;  %2078 = vmatpush.msrb.mxu3 %v6510_v56  ;;  %7924 = vst [vmem:[#allocation48_spill] sm:$0xff] %v6522_v27  ;;  %vm7948_vm14 = vmmov %vm7889_vm0 }
 0x527   :  { %7925 = vst [vmem:[#allocation49_spill] sm:$0xff] %v6528_v10  ;;  %v2023_v43 = vsel %vm7928_vm7, %v6421_v31, %v2015_v38  ;;  %vm7949_vm7 = vmmov %vm7934_vm2 }
 0x528   :  { %2059 = vmatpush.msrb.mxu2 %v6516_v8  ;;  %2079 = vmatpush.msrb.mxu3 %v6522_v27  ;;  %v6536_v8 = vld [vmem:[%s7297_s3 + $0x100] sm:$0xff] }
 0x529   :  { %7927 = vst [vmem:[#allocation37_spill] sm:$0xff] %v6536_v8 }
 0x52a   :  { %2060 = vmatpush.msrb.mxu2 %v6528_v10  ;;  %2080 = vmatpush.msrb.mxu3 %v6536_v8 }
 0x52b   :  { %2061 = vmatmul.f32.vlgmr.msrb.gmra.mxu2 %v2022_v19  ;;  %2081 = vmatmul.f32.vlgmr.msrb.gmra.mxu3 %v2023_v43 }
 0x52c   :  { %3360 = vmatpush.msk.msra.mxu2 %vm761_vm12, %v2177_v28 }
 0x580   :  { %v6541_v49 = vpop.f32.mrf.mxu1 }
 0x581   :  { %7929 = vst [vmem:[#allocation26_spill] sm:$0xff] %v6541_v49  ;;  %v6547_v56 = vpop.f32.mrf.mxu0  ;;  %v3701_v49 = vmov 26  }
 0x582   :  { %7932 = vst [vmem:[#allocation57_spill] sm:$0xff] %v6547_v56  ;;  %3494 = vset.pattern.permute.xlu1 %v3701_v49 }
 0x583   :  { %2153 = vperm.xlu1 %3494, %v5633_v48  }
 0x58b   :  { %3496 = vset.pattern.permute.xlu1 %v7700_v36 }
 0x5a2   :  { %v2042_v54 = vpop.f32.mrf.mxu1  ;;  %v2102_v39 = vpop.f32.mrf.mxu0 }
 0x5a5   :  { %v6543_v27 = vpop.f32.mrf.mxu2  ;;  %v6545_v10 = vpop.f32.mrf.mxu3 }
 0x5a6   :  { %7930 = vst [vmem:[#allocation53_spill] sm:$0xff] %v6543_v27  ;;  %v3621_v27 = vld [vmem:[%s7299_s5] sm:$0xf] }
 0x5a7   :  { %7931 = vst [vmem:[#allocation54_spill] sm:$0xff] %v6545_v10 }
 0x5ae   :  { %v2062_v21 = vpop.f32.mrf.mxu2  ;;  %v2082_v26 = vpop.f32.mrf.mxu3 }
 0x5af   :  { %v2063_v44 = vadd.f32 %v2062_v21, %v2042_v54 }
 0x5b1   :  { %v2083_v6 = vadd.f32 %v2082_v26, %v2063_v44 }
 0x5b3   :  { %v2103_v8 = vadd.f32 %v2102_v39, %v2083_v6  ;;  %v3702_v6 = vmov 27  }
 0x5b4   :  { %3495 = vset.pattern.permute.xlu0 %v3702_v6 }
 0x5b5   :  { %v2106_v19 = vrot.slane %v2103_v8, 4 }
 0x5b7   :  { %2107 = vrot.lane.b32.xlu2 %v2106_v19, %s3676_s15 }
 0x5f5   :  { %v2154_v56 = vpop.permute.xlu1 %2153 }
 0x611   :  { %v2108_v38 = vpop.permute.xlu2 %2107 }
 0x612   :  { %v2110_v43 = vsel %vm7933_vm3, %v2103_v8, %v2108_v38  ;;  %vm7950_vm3 = vmmov %vm7934_vm2 }
 0x613   :  { %3358 = vmatpush.msk.msra.mxu1 %vm7889_vm0, %v2110_v43 }
 0x614   :  { %3359 = vmatmul.msk.f32.vlgmr.msra.gmra.mxu1 %vm7934_vm2, %v3621_v27  ;;  %vm7952_vm2 = vmmov %vm7889_vm0 }
 0x691   :  { %v2131_v26 = vpop.f32.mrf.mxu1 }
 0x692   :  { %v2134_v44 = vmul.f32 0.00390625, %v2131_v26 }
 0x694   :  { %v2135_v39 = vmul.f32 %v2134_v44, %v2134_v44 }
 0x696   :  { %2137 = vrot.lane.b32.xlu0 %v2135_v39, %s3676_s15 }
 0x69e   :  { %2163 = vperm.xlu0 %3495, %v5633_v48  }
 0x6a6   :  { %3498 = vset.pattern.permute.xlu0 %v7713_v61 }
 0x708   :  { %v2138_v21 = vpop.permute.xlu0 %2137 }
 0x709   :  { %v2140_v8 = vsub.f32 %v2134_v44, %v2138_v21 }
 0x70b   :  { %v2141_v27 = vadd.f32 1e-05, %v2140_v8 }
 0x70d   :  { %3515 = vrsqrt.f32 %v2141_v27  ;;  %vm2148_vm10 = vweird.f32 %v2141_v27 }
 0x710   :  { %v2164_v61 = vpop.permute.xlu0 %2163 }
 0x713   :  { %v3516_v49 = vpop.eup %3515 }
 0x714   :  { %v2143_v54 = vmul.f32 %v3516_v49, %v2141_v27  ;;  %vm2149_vm8 = vweird.f32 %v3516_v49  ;;  %v2179_v27 = vld.sshfl [vmem:[#allocation1 + $0x10] sm:$0xff pattern:$0x73625140] }
 0x715   :  { %vm2150_vm13 = vmor %vm2148_vm10, %vm2149_vm8  ;;  %3364 = vmatpush.msk.msrb.mxu0 %vm761_vm12, %v2179_v27 }
 0x716   :  { %v2144_v19 = vmul.f32 %v3516_v49, %v2143_v54  ;;  %v2178_v54 = vld.sshfl [vmem:[#allocation1 + $0x8] sm:$0xff pattern:$0x73625140]  ;;  %vm7953_vm8 = vmmov %vm7950_vm3 }
 0x717   :  { %3362 = vmatpush.msk.msra.mxu3 %vm761_vm12, %v2178_v54  ;;  %v7946_v54 = vmov 8   ;;  %vm7954_vm10 = vmmov %vm7950_vm3 }
 0x718   :  { %v2145_v38 = vmul.f32 0.5, %v2144_v19  ;;  %v2180_v19 = vld.sshfl [vmem:[#allocation1 + $0x18] sm:$0xff pattern:$0x73625140] }
 0x719   :  { %3366 = vmatpush.msk.msrb.mxu1 %vm761_vm12, %v2180_v19  ;;  %2940 = vst [vmem:[#allocation1] ss:$4 sm:$0xff] %v7821_v51  ;;  %v2291_v51 = vld [vmem:[%s7303_s9] sm:$0xf]  ;;  %s7990_s9 = smov 127  }
 0x71a   :  { %v2146_v43 = vsub.f32 1.5, %v2145_v38  ;;  %v7942_v38 = vmov 2  }
 0x71c   :  { %v2147_v26 = vmul.f32 %v3516_v49, %v2146_v43  ;;  %v7943_v43 = vmov 5  }
 0x71e   :  { %v2151_v39 = vsel %vm2150_vm13, %v3516_v49, %v2147_v26  ;;  %v7941_v49 = vmov 1   ;;  %v7944_v26 = vmov 6  }
 0x71f   :  { %v2156_v6 = vmul.f32 %v2154_v56, %v2151_v39  ;;  %v7945_v39 = vmov 7  }
 0x721   :  { %2158 = vrot.lane.b32.xlu2 %v2156_v6, %s3677_s14 }
 0x77b   :  { %v2159_v48 = vpop.permute.xlu2 %2158 }
 0x77c   :  { %v2161_v10 = vmul.f32 %v2159_v48, %v2134_v44  ;;  %v7936_v44 = vmov 3  }
 0x77e   :  { %v2166_v21 = vsub.f32 %v2164_v61, %v2161_v10 }
 0x780   :  { %v2168_v8 = vrot.slane %v2166_v21, 4 }
 0x782   :  { %2169 = vrot.lane.b32.xlu1 %v2168_v8, %s3676_s15 }
 0x78a   :  { %2294 = vperm.xlu1 %3496, %v2291_v51  }
 0x792   :  { %3499 = vset.pattern.permute.xlu1 %v7941_v49 }
 0x7f4   :  { %v2170_v56 = vpop.permute.xlu1 %2169 }
 0x7f5   :  { %v2172_v10 = vsel %vm7935_vm9, %v2156_v6, %v2170_v56 }
 0x7f6   :  { %2174 = vrot.lane.b32.xlu2 %v2172_v10, %s3677_s14 }
 0x7fe   :  { %873 = vperm.xlu2 %3497, %v5952_v2   ;;  %v6582_v2 = vld [vmem:[%s7304_s10] sm:$0xf] }
 0x7ff   :  { %2546 = vperm.xlu0 %3498, %v6582_v2   ;;  %2570 = vperm.xlu1 %3499, %v6582_v2  }
 0x806   :  { %3501 = vset.pattern.permute.xlu2 %v7936_v44 }
 0x807   :  { %2626 = vperm.xlu2 %3501, %v6582_v2   ;;  %3500 = vset.pattern.permute.xlu0 %v7942_v38 }
 0x808   :  { %2598 = vperm.xlu0 %3500, %v6582_v2   ;;  %3503 = vset.pattern.permute.xlu1 %v7943_v43  ;;  %v7951_v43 = vmov 10  }
 0x809   :  { %2666 = vperm.xlu1 %3503, %v6582_v2  }
 0x80f   :  { %3502 = vset.pattern.permute.xlu2 %v7700_v36 }
 0x810   :  { %2638 = vperm.xlu2 %3502, %v6582_v2   ;;  %3504 = vset.pattern.permute.xlu0 %v7944_v26 }
 0x811   :  { %2694 = vperm.xlu0 %3504, %v6582_v2   ;;  %3506 = vset.pattern.permute.xlu1 %v7946_v54 }
 0x812   :  { %2750 = vperm.xlu1 %3506, %v6582_v2  }
 0x818   :  { %3505 = vset.pattern.permute.xlu2 %v7945_v39 }
 0x819   :  { %2722 = vperm.xlu2 %3505, %v6582_v2   ;;  %3512 = vset.pattern.permute.xlu0 %v7946_v54 }
 0x821   :  { %3508 = vset.pattern.permute.xlu2 %v7951_v43 }
 0x850   :  { %v2175_v28 = vpop.permute.xlu2 %2174 }
 0x851   :  { %3361 = vmatmul.msk.f32.vlgmr.msra.gmra.mxu2 %vm7937_vm6, %v2175_v28  ;;  %3363 = vmatmul.msk.f32.vlgmr.msra.gmra.mxu3 %vm7938_vm5, %v2175_v28 }
 0x852   :  { %3365 = vmatmul.msk.f32.vlgmr.msrb.gmra.mxu0 %vm7939_vm1, %v2175_v28  ;;  %3367 = vmatmul.msk.f32.vlgmr.msrb.gmra.mxu1 %vm7940_vm4, %v2175_v28 }
 0x8cf   :  { %v2248_v6 = vpop.f32.mrf.mxu0  ;;  %v2268_v36 = vpop.f32.mrf.mxu1 }
 0x8d0   :  { %v2273_v48 = vmul.f32 %v2248_v6, %v6421_v31  ;;  %v2281_v61 = vrot.slane %v2248_v6, 4  ;;  %v2274_v21 = vmul.f32 %v2268_v36, %v6341_v34  ;;  %v2282_v8 = vrot.slane %v2268_v36, 4 }
 0x8d2   :  { %v2289_v27 = vadd.f32 %v2281_v61, %v2273_v48  ;;  %v2290_v19 = vadd.f32 %v2282_v8, %v2274_v21  ;;  %v7983_v21 = vld [vmem:[#allocation53_spill] sm:$0xff] }
 0x8d4   :  { %3372 = vmatpush.msk.msra.mxu0 %vm7947_vm15, %v2289_v27  ;;  %3374 = vmatpush.msk.msra.mxu1 %vm7948_vm14, %v2290_v19  ;;  %v2208_v56 = vpop.f32.mrf.mxu2  ;;  %v2228_v10 = vpop.f32.mrf.mxu3 }
 0x8d5   :  { %v2271_v44 = vmul.f32 %v2208_v56, %v6327_v14  ;;  %v2279_v28 = vrot.slane %v2208_v56, 4  ;;  %v2272_v31 = vmul.f32 %v2228_v10, %v6407_v5  ;;  %v2280_v49 = vrot.slane %v2228_v10, 4  ;;  %3373 = vmatmul.msk.f32.vlgmr.msra.gmra.mxu0 %vm7949_vm7, %v2291_v51  ;;  %3375 = vmatmul.msk.f32.vlgmr.msra.gmra.mxu1 %vm7950_vm3, %v2291_v51  ;;  %v2295_v14 = vpop.permute.xlu1 %2294 }
 0x8d6   :  { %2829 = vmatpush.msrb.mxu0 %v6106_v63  ;;  %2849 = vmatpush.msrb.mxu1 %v6003_v18  ;;  %v7955_v63 = vmov 9   ;;  %v7957_v18 = vld [vmem:[#allocation20_spill] sm:$0xff] }
 0x8d7   :  { %v2287_v34 = vadd.f32 %v2279_v28, %v2271_v44  ;;  %v2288_v38 = vadd.f32 %v2280_v49, %v2272_v31  ;;  %3507 = vset.pattern.permute.xlu1 %v7955_v63 }
 0x8d8   :  { %2830 = vmatpush.msrb.mxu0 %v6142_v17  ;;  %2850 = vmatpush.msrb.mxu1 %v6035_v29  ;;  %v7959_v29 = vld [vmem:[#allocation9_spill] sm:$0xff]  ;;  %v7968_v17 = vld [vmem:[#allocation52_spill] sm:$0xff] }
 0x8d9   :  { %3368 = vmatpush.msk.msrb.mxu2 %vm7889_vm0, %v2287_v34  ;;  %3370 = vmatpush.msk.msrb.mxu3 %vm7952_vm2, %v2288_v38 }
 0x8da   :  { %3369 = vmatmul.msk.f32.vlgmr.msrb.gmra.mxu2 %vm7953_vm8, %v2291_v51  ;;  %3371 = vmatmul.msk.f32.vlgmr.msrb.gmra.mxu3 %vm7954_vm10, %v2291_v51 }
 0x8db   :  { %2789 = vmatpush.msra.mxu2 %v5980_v12  ;;  %2809 = vmatpush.msra.mxu3 %v6100_v0  ;;  %v7956_v12 = vld [vmem:[#allocation51_spill] sm:$0xff]  ;;  %v7963_v0 = vld [vmem:[#allocation34_spill] sm:$0xff] }
 0x8dc   :  { %2831 = vmatpush.msrb.mxu0 %v6185_v42  ;;  %2851 = vmatpush.msrb.mxu1 %v6066_v57  ;;  %v7961_v57 = vld [vmem:[#allocation24_spill] sm:$0xff]  ;;  %v7972_v42 = vld [vmem:[#allocation21_spill] sm:$0xff] }
 0x8dd   :  { %2790 = vmatpush.msra.mxu2 %v6015_v45  ;;  %2810 = vmatpush.msra.mxu3 %v6136_v25  ;;  %v7958_v45 = vld [vmem:[#allocation35_spill] sm:$0xff]  ;;  %v7967_v25 = vld [vmem:[#allocation36_spill] sm:$0xff] }
 0x8de   :  { %2832 = vmatpush.msrb.mxu0 %v6231_v37  ;;  %2852 = vmatpush.msrb.mxu1 %v6118_v58  ;;  %v7964_v58 = vld [vmem:[#allocation50_spill] sm:$0xff]  ;;  %v7976_v37 = vld [vmem:[#allocation44_spill] sm:$0xff] }
 0x8df   :  { %2791 = vmatpush.msra.mxu2 %v6051_v23  ;;  %2811 = vmatpush.msra.mxu3 %v6179_v7  ;;  %v7960_v23 = vld [vmem:[#allocation19_spill] sm:$0xff] }
 0x8e0   :  { %2833 = vmatpush.msrb.mxu0 %v6270_v33  ;;  %2853 = vmatpush.msrb.mxu1 %v6156_v62  ;;  %v7969_v62 = vld [vmem:[#allocation23_spill] sm:$0xff]  ;;  %v874_v33 = vpop.permute.xlu2 %873 }
 0x8e1   :  { %2792 = vmatpush.msra.mxu2 %v6086_v50  ;;  %2812 = vmatpush.msra.mxu3 %v6225_v46  ;;  %v7962_v50 = vld [vmem:[#allocation12_spill] sm:$0xff]  ;;  %v7971_v7 = vld [vmem:[#allocation43_spill] sm:$0xff]  ;;  %v7975_v46 = vld [vmem:[#allocation33_spill] sm:$0xff]  ;;  %v928_v8 = vadd.f32 %v7983_v21, %v874_v33 }
 0x8e2   :  { %2834 = vmatpush.msrb.mxu0 %v6300_v53  ;;  %2854 = vmatpush.msrb.mxu1 %v6196_v13  ;;  %v7973_v13 = vld [vmem:[#allocation45_spill] sm:$0xff] }
 0x8e3   :  { %2793 = vmatpush.msra.mxu2 %v6124_v3  ;;  %2813 = vmatpush.msra.mxu3 %v6264_v15  ;;  %v7966_v3 = vld [vmem:[#allocation40_spill] sm:$0xff]  ;;  %v7979_v15 = vld [vmem:[#allocation49_spill] sm:$0xff]  ;;  %v3355_v63 = vmul.f32 -1.442695, %v928_v8 }
 0x8e4   :  { %2835 = vmatpush.msrb.mxu0 %v6324_v60  ;;  %2855 = vmatpush.msrb.mxu1 %v6239_v16  ;;  %v7977_v16 = vld [vmem:[#allocation41_spill] sm:$0xff] }
 0x8e5   :  { %2794 = vmatpush.msra.mxu2 %v6162_v1  ;;  %2814 = vmatpush.msra.mxu3 %v6294_v55  ;;  %v7970_v1 = vld [vmem:[#allocation48_spill] sm:$0xff]  ;;  %v7981_v53 = vld [vmem:[#allocation57_spill] sm:$0xff] }
 0x8e6   :  { %2836 = vmatpush.msrb.mxu0 %v6352_v24  ;;  %2856 = vmatpush.msrb.mxu1 %v6278_v9  ;;  %v7980_v9 = vld [vmem:[#allocation54_spill] sm:$0xff] }
 0x8e7   :  { %2795 = vmatpush.msra.mxu2 %v6202_v32  ;;  %2815 = vmatpush.msra.mxu3 %v6318_v11  ;;  %v7974_v32 = vld [vmem:[#allocation37_spill] sm:$0xff] }
 0x8e8   :  { %2837 = vmatpush.msrb.mxu0 %v6376_v4  ;;  %2857 = vmatpush.msrb.mxu1 %v6306_v41  ;;  %v968_v41 = vadd.f32 %v7981_v53, %v874_v33 }
 0x8e9   :  { %2796 = vmatpush.msra.mxu2 %v6251_v47  ;;  %2816 = vmatpush.msra.mxu3 %v6346_v22  ;;  %v7978_v47 = vld [vmem:[#allocation42_spill] sm:$0xff] }
 0x8ea   :  { %2838 = vmatpush.msrb.mxu0 %v6402_v40  ;;  %2858 = vmatpush.msrb.mxu1 %v6332_v20  ;;  %v3357_v60 = vmul.f32 -1.442695, %v968_v41 }
 0x8eb   :  { %2797 = vmatpush.msra.mxu2 %v6284_v35  ;;  %2817 = vmatpush.msra.mxu3 %v6370_v52  ;;  %v948_v35 = vadd.f32 %v7980_v9, %v874_v33 }
 0x8ec   :  { %2839 = vmatpush.msrb.mxu0 %v6432_v59  ;;  %2859 = vmatpush.msrb.mxu1 %v7956_v12  ;;  %v7965_v59 = vld [vmem:[#allocation17_spill] sm:$0xff] }
 0x8ed   :  { %2798 = vmatpush.msra.mxu2 %v6312_v30  ;;  %2818 = vmatpush.msra.mxu3 %v7957_v18  ;;  %v3356_v55 = vmul.f32 -1.442695, %v948_v35  ;;  %v7982_v30 = vld [vmem:[#allocation26_spill] sm:$0xff] }
 0x8ee   :  { %2840 = vmatpush.msrb.mxu0 %v7958_v45  ;;  %2860 = vmatpush.msrb.mxu1 %v7960_v23  ;;  %v908_v11 = vadd.f32 %v7982_v30, %v874_v33 }
 0x8ef   :  { %2799 = vmatpush.msra.mxu2 %v7959_v29  ;;  %2819 = vmatpush.msra.mxu3 %v7961_v57  ;;  %3517 = vpow2.f32 %v3356_v55 }
 0x8f0   :  { %2841 = vmatpush.msrb.mxu0 %v7962_v50  ;;  %2861 = vmatpush.msrb.mxu1 %v7964_v58  ;;  %v3354_v20 = vmul.f32 -1.442695, %v908_v11  ;;  %3519 = vpow2.f32 %v3357_v60 }
 0x8f1   :  { %2800 = vmatpush.msra.mxu2 %v7963_v0  ;;  %2820 = vmatpush.msra.mxu3 %v7965_v59 }
 0x8f2   :  { %2842 = vmatpush.msrb.mxu0 %v7966_v3  ;;  %2862 = vmatpush.msrb.mxu1 %v7968_v17  ;;  %3521 = vpow2.f32 %v3354_v20 }
 0x8f3   :  { %2801 = vmatpush.msra.mxu2 %v7967_v25  ;;  %2821 = vmatpush.msra.mxu3 %v7969_v62 }
 0x8f4   :  { %2843 = vmatpush.msrb.mxu0 %v7970_v1  ;;  %2863 = vmatpush.msrb.mxu1 %v7972_v42 }
 0x8f5   :  { %2802 = vmatpush.msra.mxu2 %v7971_v7  ;;  %2822 = vmatpush.msra.mxu3 %v7973_v13  ;;  %v3518_v52 = vpop.eup %3517 }
 0x8f6   :  { %2844 = vmatpush.msrb.mxu0 %v7974_v32  ;;  %2864 = vmatpush.msrb.mxu1 %v7976_v37  ;;  %v6688_v26 = vadd.f32 1.0, %v3518_v52  ;;  %v3520_v36 = vpop.eup %3519 }
 0x8f7   :  { %2803 = vmatpush.msra.mxu2 %v7975_v46  ;;  %2823 = vmatpush.msra.mxu3 %v7977_v16  ;;  %v6707_v44 = vadd.f32 1.0, %v3520_v36 }
 0x8f8   :  { %3523 = vrcp.f32 %v6688_v26  ;;  %v3522_v10 = vpop.eup %3521  ;;  %v1025_v58 = vand.u32 2147483647, %v6688_v26  ;;  %v1027_v16 = vand.u32 2147483648, %v6688_v26  ;;  %vm1021_vm13 = vweird.f32 %v6688_v26 }
 0x8f9   :  { %2804 = vmatpush.msra.mxu2 %v7978_v47  ;;  %2824 = vmatpush.msra.mxu3 %v7979_v15  ;;  %v6714_v29 = vadd.f32 1.0, %v3522_v10  ;;  %3525 = vrcp.f32 %v6707_v44  ;;  %vm1036_vm6 = vweird.f32 %v6707_v44 }
 0x8fa   :  { %vm6802_vm4 = vcmp.eq.f32.partialorder %v1025_v58, 8.507059e+37 }
 0x8fb   :  { %3527 = vrcp.f32 %v6714_v29  ;;  %vm991_vm3 = vweird.f32 %v6714_v29 }
 0x8fe   :  { %v6719_v0 = vpop.eup %3523 }
 0x8ff   :  { %v1017_v13 = vmul.f32 %v6719_v0, %v6688_v26  ;;  %v6742_v53 = vpop.eup %3525  ;;  %vm1022_vm9 = vweird.f32 %v6719_v0 }
 0x900   :  { %v1032_v21 = vmul.f32 %v6742_v53, %v6707_v44  ;;  %vm1037_vm5 = vweird.f32 %v6742_v53  ;;  %vm6796_vm1 = vmor %vm1021_vm13, %vm1022_vm9 }
 0x901   :  { %vm6816_vm15 = vmor %vm1036_vm6, %vm1037_vm5 }
 0x952   :  { %v2368_v22 = vpop.f32.mrf.mxu0  ;;  %v2388_v24 = vpop.f32.mrf.mxu1 }
 0x953   :  { %v6682_v4 = vadd.f32 %v2368_v22, %v2295_v14  ;;  %v6684_v40 = vadd.f32 %v2388_v24, %v2295_v14 }
 0x955   :  { %v2397_v5 = vmul.f32 0.70710677, %v6682_v4  ;;  %v2398_v51 = vmul.f32 0.70710677, %v6684_v40 }
 0x957   :  { %v6690_v39 = vclamps-f32 %v2397_v5, 4.0  ;;  %v6692_v6 = vclamps-f32 %v2398_v51, 4.0 }
 0x959   :  { %v6696_v48 = vmul.f32 %v6690_v39, %v6690_v39  ;;  %v6700_v61 = vmul.f32 %v6692_v6, %v6692_v6 }
 0x95b   :  { %v2413_v27 = vmul.f32 -2.7261424e-10, %v6696_v48  ;;  %v2414_v19 = vmul.f32 -2.7261424e-10, %v6700_v61  ;;  %v2461_v56 = vmul.f32 -1.45660715e-05, %v6696_v48 }
 0x95c   :  { %v2462_v28 = vmul.f32 -1.45660715e-05, %v6700_v61 }
 0x95d   :  { %v2417_v31 = vadd.f32 2.7706815e-08, %v2413_v27  ;;  %v2418_v49 = vadd.f32 2.7706815e-08, %v2414_v19  ;;  %v2465_v34 = vadd.f32 -0.00021337405, %v2461_v56  ;;  %v2328_v38 = vpop.f32.mrf.mxu2  ;;  %v2348_v43 = vpop.f32.mrf.mxu3 }
 0x95e   :  { %v2466_v12 = vadd.f32 -0.00021337405, %v2462_v28  ;;  %v6710_v18 = vadd.f32 %v2328_v38, %v2295_v14  ;;  %v6712_v45 = vadd.f32 %v2348_v43, %v2295_v14  ;;  %v1018_v14 = vsub.f32 1.0, %v1017_v13 }
 0x95f   :  { %v2421_v23 = vmul.f32 %v2417_v31, %v6696_v48  ;;  %v2422_v57 = vmul.f32 %v2418_v49, %v6700_v61  ;;  %v2469_v50 = vmul.f32 %v2465_v34, %v6696_v48  ;;  %v6759_v49 = vpop.eup %3527 }
 0x960   :  { %v2470_v59 = vmul.f32 %v2466_v12, %v6700_v61  ;;  %v2395_v3 = vmul.f32 0.70710677, %v6710_v18  ;;  %v2396_v42 = vmul.f32 0.70710677, %v6712_v45  ;;  %vm992_vm7 = vweird.f32 %v6759_v49 }
 0x961   :  { %v2425_v25 = vadd.f32 -2.101024e-06, %v2421_v23  ;;  %v2426_v17 = vadd.f32 -2.101024e-06, %v2422_v57  ;;  %v2473_v62 = vadd.f32 -0.001682827, %v2469_v50  ;;  %vm993_vm0 = vmor %vm991_vm3, %vm992_vm7 }
 0x962   :  { %v2474_v1 = vadd.f32 -0.001682827, %v2470_v59  ;;  %v6725_v7 = vclamps-f32 %v2395_v3, 4.0  ;;  %v6739_v33 = vclamps-f32 %v2396_v42, 4.0  ;;  %v1033_v42 = vsub.f32 1.0, %v1032_v21 }
 0x963   :  { %v2429_v32 = vmul.f32 %v2425_v25, %v6696_v48  ;;  %v2430_v46 = vmul.f32 %v2426_v17, %v6700_v61  ;;  %v2477_v37 = vmul.f32 %v2473_v62, %v6696_v48  ;;  %v1040_v25 = vand.u32 2147483647, %v6707_v44 }
 0x964   :  { %v2478_v47 = vmul.f32 %v2474_v1, %v6700_v61  ;;  %v6737_v15 = vmul.f32 %v6725_v7, %v6725_v7  ;;  %v6748_v60 = vmul.f32 %v6739_v33, %v6739_v33 }
 0x965   :  { %v2433_v9 = vadd.f32 -5.6925062e-05, %v2429_v32  ;;  %v2434_v35 = vadd.f32 -5.6925062e-05, %v2430_v46  ;;  %v2481_v55 = vadd.f32 -0.0073733293, %v2477_v37  ;;  %v987_v37 = vmul.f32 %v6759_v49, %v6714_v29 }
 0x966   :  { %v2482_v41 = vadd.f32 -0.0073733293, %v2478_v47  ;;  %v2411_v30 = vmul.f32 -2.7261424e-10, %v6737_v15  ;;  %v2459_v11 = vmul.f32 -1.45660715e-05, %v6737_v15 }
 0x967   :  { %v2437_v20 = vmul.f32 %v2433_v9, %v6696_v48  ;;  %v2438_v22 = vmul.f32 %v2434_v35, %v6700_v61  ;;  %v2485_v24 = vmul.f32 %v2481_v55, %v6696_v48  ;;  %v2412_v36 = vmul.f32 -2.7261424e-10, %v6748_v60 }
 0x968   :  { %v2486_v52 = vmul.f32 %v2482_v41, %v6700_v61  ;;  %v2415_v5 = vadd.f32 2.7706815e-08, %v2411_v30  ;;  %v2463_v51 = vadd.f32 -0.00021337405, %v2459_v11  ;;  %v2460_v43 = vmul.f32 -1.45660715e-05, %v6748_v60 }
 0x969   :  { %v2441_v8 = vadd.f32 -0.00073499064, %v2437_v20  ;;  %v2442_v27 = vadd.f32 -0.00073499064, %v2438_v22  ;;  %v2489_v19 = vadd.f32 -0.014264739, %v2485_v24  ;;  %v1019_v55 = vmul.f32 %v6719_v0, %v1018_v14 }
 0x96a   :  { %v2490_v56 = vadd.f32 -0.014264739, %v2486_v52  ;;  %v2419_v10 = vmul.f32 %v2415_v5, %v6737_v15  ;;  %v2467_v28 = vmul.f32 %v2463_v51, %v6737_v15  ;;  %v2416_v31 = vadd.f32 2.7706815e-08, %v2412_v36  ;;  %v6783_v36 = vpop.permute.xlu2 %2626 }
 0x96b   :  { %v2445_v34 = vmul.f32 %v2441_v8, %v6696_v48  ;;  %v2446_v38 = vmul.f32 %v2442_v27, %v6700_v61  ;;  %3529 = vrcp.f32 %v2489_v19  ;;  %v2464_v3 = vadd.f32 -0.00021337405, %v2460_v43 }
 0x96c   :  { %3531 = vrcp.f32 %v2490_v56  ;;  %v2423_v12 = vadd.f32 -2.101024e-06, %v2419_v10  ;;  %v2471_v23 = vadd.f32 -0.001682827, %v2467_v28  ;;  %v2420_v57 = vmul.f32 %v2416_v31, %v6748_v60 }
 0x96d   :  { %3533 = vpow2.f32 %v3355_v63  ;;  %v2449_v50 = vadd.f32 -0.0029546, %v2445_v34  ;;  %v2450_v59 = vadd.f32 -0.0029546, %v2446_v38  ;;  %v2468_v46 = vmul.f32 %v2464_v3, %v6748_v60 }
 0x96e   :  { %v2427_v17 = vmul.f32 %v2423_v12, %v6737_v15  ;;  %v2475_v62 = vmul.f32 %v2471_v23, %v6737_v15  ;;  %v2424_v1 = vadd.f32 -2.101024e-06, %v2420_v57  ;;  %v1042_v63 = vand.u32 2147483648, %v6707_v44 }
 0x96f   :  { %v2453_v13 = vmul.f32 %v2449_v50, %v6696_v48  ;;  %v2454_v32 = vmul.f32 %v2450_v59, %v6700_v61  ;;  %v2472_v41 = vadd.f32 -0.001682827, %v2468_v46  ;;  %v1034_v52 = vmul.f32 %v6742_v53, %v1033_v42 }
 0x970   :  { %v2431_v47 = vadd.f32 -5.6925062e-05, %v2427_v17  ;;  %v2479_v9 = vadd.f32 -0.0073733293, %v2475_v62  ;;  %v2428_v48 = vmul.f32 %v2424_v1, %v6748_v60  ;;  %v988_v3 = vsub.f32 1.0, %v987_v37 }
 0x971   :  { %v3530_v35 = vpop.eup %3529  ;;  %v2457_v30 = vadd.f32 -0.016096033, %v2453_v13  ;;  %v2458_v5 = vadd.f32 -0.016096033, %v2454_v32  ;;  %v2476_v14 = vmul.f32 %v2472_v41, %v6748_v60  ;;  %v1028_v62 = vor.u32 1.1754944e-38, %v1027_v16 }
 0x972   :  { %v3532_v61 = vpop.eup %3531  ;;  %v2497_v11 = vmul.f32 %v3530_v35, %v2489_v19  ;;  %v2435_v20 = vmul.f32 %v2431_v47, %v6737_v15  ;;  %v2483_v22 = vmul.f32 %v2479_v9, %v6737_v15  ;;  %v1020_v19 = vadd.f32 %v6719_v0, %v1019_v55 }
 0x973   :  { %v3534_v24 = vpop.eup %3533  ;;  %v2498_v51 = vmul.f32 %v3532_v61, %v2490_v56  ;;  %v2432_v28 = vadd.f32 -5.6925062e-05, %v2428_v48  ;;  %v2480_v31 = vadd.f32 -0.0073733293, %v2476_v14  ;;  %v2509_v38 = vmul.f32 %v6690_v39, %v2457_v30 }
 0x974   :  { %v2501_v21 = vsub.f32 2.0, %v2497_v11  ;;  %v2439_v8 = vadd.f32 -0.00073499064, %v2435_v20  ;;  %v2487_v27 = vadd.f32 -0.014264739, %v2483_v22  ;;  %v1035_v56 = vadd.f32 %v6742_v53, %v1034_v52 }
 0x975   :  { %v2502_v10 = vsub.f32 2.0, %v2498_v51  ;;  %v2510_v23 = vmul.f32 %v6692_v6, %v2458_v5  ;;  %v2484_v57 = vmul.f32 %v2480_v31, %v6748_v60  ;;  %v1024_v6 = vsel %vm6796_vm1, %v6719_v0, %v1020_v19 }
 0x976   :  { %v2505_v34 = vmul.f32 %v3530_v35, %v2501_v21  ;;  %v2443_v43 = vmul.f32 %v2439_v8, %v6737_v15  ;;  %3535 = vrcp.f32 %v2487_v27  ;;  %v2436_v42 = vmul.f32 %v2432_v28, %v6748_v60 }
 0x977   :  { %v2506_v12 = vmul.f32 %v3532_v61, %v2502_v10  ;;  %v2393_v13 = vmul.f32 0.5, %v6682_v4  ;;  %v2488_v0 = vadd.f32 -0.014264739, %v2484_v57  ;;  %v1039_v26 = vsel %vm6816_vm15, %v6742_v53, %v1035_v56  ;;  %v6829_v61 = vpop.permute.xlu2 %2638 }
 0x978   :  { %v2513_v59 = vmul.f32 %v2509_v38, %v2505_v34  ;;  %v2447_v17 = vadd.f32 -0.0029546, %v2443_v43  ;;  %vm1041_vm14 = vcmp.eq.f32.partialorder %v1040_v25, 8.507059e+37  ;;  %v2394_v16 = vmul.f32 0.5, %v6684_v40 }
 0x979   :  { %v2514_v1 = vmul.f32 %v2510_v23, %v2506_v12  ;;  %v1029_v44 = vsel %vm6802_vm4, %v1028_v62, %v1024_v6  ;;  %v1043_v9 = vor.u32 1.1754944e-38, %v1042_v63  ;;  %v989_v4 = vmul.f32 %v6759_v49, %v988_v3 }
 0x97a   :  { %v2517_v32 = vadd.f32 1.0, %v2513_v59  ;;  %v2451_v46 = vmul.f32 %v2447_v17, %v6737_v15  ;;  %v2440_v41 = vadd.f32 -0.00073499064, %v2436_v42  ;;  %v6831_v30 = vadd.f32 1.0, %v3534_v24 }
 0x97b   :  { %v2518_v37 = vadd.f32 1.0, %v2514_v1  ;;  %v1044_v53 = vsel %vm1041_vm14, %v1043_v9, %v1039_v26  ;;  %3537 = vrcp.f32 %v2488_v0  ;;  %v990_v63 = vadd.f32 %v6759_v49, %v989_v4 }
 0x97c   :  { %v3536_v47 = vpop.eup %3535  ;;  %v2521_v35 = vmul.f32 %v2517_v32, %v2393_v13  ;;  %v2455_v48 = vadd.f32 -0.016096033, %v2451_v46  ;;  %v2444_v52 = vmul.f32 %v2440_v41, %v6748_v60  ;;  %3539 = vrcp.f32 %v6831_v30  ;;  %v6919_v32 = vpop.permute.xlu0 %2546 }
 0x97d   :  { %v2522_v55 = vmul.f32 %v2518_v37, %v2394_v16  ;;  %v2495_v15 = vmul.f32 %v3536_v47, %v2487_v27  ;;  %v997_v5 = vand.u32 2147483648, %v6714_v29  ;;  %v995_v51 = vand.u32 2147483647, %v6714_v29  ;;  %v6921_v46 = vpop.permute.xlu1 %2570 }
 0x97e   :  { %v6833_v25 = vmul.f32 %v2521_v35, %v1029_v44  ;;  %v2507_v24 = vmul.f32 %v6725_v7, %v2455_v48  ;;  %v994_v7 = vsel %vm993_vm0, %v6759_v49, %v990_v63  ;;  %v2391_v8 = vmul.f32 0.5, %v6710_v18 }
 0x97f   :  { %v6835_v40 = vmul.f32 %v2522_v55, %v1044_v53  ;;  %v2499_v11 = vsub.f32 2.0, %v2495_v15  ;;  %v2448_v19 = vadd.f32 -0.0029546, %v2444_v52  ;;  %v998_v10 = vor.u32 1.1754944e-38, %v997_v5  ;;  %v7995_v15 = vld [vmem:[#allocation11_spill] sm:$0xff]  ;;  %v8001_v52 = vld [vmem:[#allocation18_spill] sm:$0xff] }
 0x980   :  { %v6840_v20 = vmul.f32 %v6829_v61, %v6833_v25  ;;  %2532 = vrot.lane.b32.xlu0 %v6833_v25, %s3653_s0  ;;  %vm996_vm2 = vcmp.eq.f32.partialorder %v995_v51, 8.507059e+37  ;;  %v1012_v17 = vand.u32 2147483648, %v6831_v30  ;;  %vm1006_vm10 = vweird.f32 %v6831_v30  ;;  %v8003_v51 = vld [vmem:[#allocation16_spill] sm:$0xff] }
 0x981   :  { %v2503_v22 = vmul.f32 %v3536_v47, %v2499_v11  ;;  %2615 = vrot.lane.b32.xlu1 %v6835_v40, %s3658_s29  ;;  %2534 = vrot.lane.b32.xlu2 %v6835_v40, %s3653_s0  ;;  %v3538_v21 = vpop.eup %3537  ;;  %v999_v38 = vsel %vm996_vm2, %v998_v10, %v994_v7  ;;  %v2452_v29 = vmul.f32 %v2448_v19, %v6748_v60  ;;  %v1010_v6 = vand.u32 2147483647, %v6831_v30 }
 0x982   :  { %v2496_v31 = vmul.f32 %v3538_v21, %v2488_v0  ;;  %v3540_v34 = vpop.eup %3539  ;;  %v1013_v42 = vor.u32 1.1754944e-38, %v1012_v17  ;;  %v7994_v37 = vmov 11   ;;  %vm7996_vm6 = vcmp.lt.s32.totalorder %v7995_v15, 17 }
 0x983   :  { %v2511_v14 = vmul.f32 %v2507_v24, %v2503_v22  ;;  %v1002_v18 = vmul.f32 %v3540_v34, %v6831_v30  ;;  %v2456_v12 = vadd.f32 -0.016096033, %v2452_v29  ;;  %vm1007_vm8 = vweird.f32 %v3540_v34  ;;  %vm8007_vm7 = vmmov %vm7996_vm6 }
 0x984   :  { %v2500_v49 = vsub.f32 2.0, %v2496_v31  ;;  %vm1008_vm13 = vmor %vm1006_vm10, %vm1007_vm8  ;;  %vm1011_vm9 = vcmp.eq.f32.partialorder %v1010_v6, 8.507059e+37  ;;  %v6926_v26 = vpop.permute.xlu0 %2598  ;;  %vm7998_vm5 = vcmp.lt.s32.totalorder %v7995_v15, 15  ;;  %vm7999_vm1 = vcmp.lt.s32.totalorder %v7995_v15, 1 }
 0x985   :  { %v2515_v27 = vadd.f32 1.0, %v2511_v14  ;;  %v1003_v23 = vsub.f32 1.0, %v1002_v18  ;;  %v2508_v60 = vmul.f32 %v6739_v33, %v2456_v12  ;;  %v2392_v33 = vmul.f32 0.5, %v6712_v45  ;;  %v6917_v45 = vpop.permute.xlu2 %2722  ;;  %v6928_v16 = vpop.permute.xlu1 %2666  ;;  %vm8014_vm10 = vmmov %vm7996_vm6 }
 0x986   :  { %v2504_v57 = vmul.f32 %v3538_v21, %v2500_v49  ;;  %vm8000_vm4 = vcmp.lt.s32.totalorder %v7995_v15, 16  ;;  %vm8002_vm15 = vnez %v8001_v52  ;;  %vm8004_vm14 = vnez %v8003_v51 }
 0x987   :  { %v2519_v28 = vmul.f32 %v2515_v27, %v2391_v8  ;;  %v1004_v50 = vmul.f32 %v3540_v34, %v1003_v23  ;;  %v8005_v8 = vld [vmem:[#allocation25_spill] sm:$0xff]  ;;  %v2644_v29 = vmul.f32 %v6829_v61, %v6835_v40  ;;  %vm8010_vm0 = vmmov %vm8000_vm4 }
 0x988   :  { %2585 = vrot.lane.b32.xlu0 %v6833_v25, %s3656_s28  ;;  %v2512_v39 = vmul.f32 %v2508_v60, %v2504_v57  ;;  %vm8013_vm8 = vmmov %vm8010_vm0 }
 0x989   :  { %v2523_v43 = vmul.f32 %v2519_v28, %v999_v38  ;;  %2559 = vrot.lane.b32.xlu2 %v6835_v40, %s3654_s27  ;;  %2557 = vrot.lane.b32.xlu1 %v6833_v25, %s3654_s27  ;;  %v1005_v59 = vadd.f32 %v3540_v34, %v1004_v50  ;;  %v8008_v50 = vld [vmem:[#allocation27_spill] sm:$0xff] }
 0x98a   :  { %v2516_v3 = vadd.f32 1.0, %v2512_v39  ;;  %vm8009_vm3 = vnez %v8008_v50  ;;  %v8037_v50 = vld [vmem:[#allocation28_spill] sm:$0xff] }
 0x98b   :  { %v6866_v56 = vmul.f32 %v6829_v61, %v2523_v43  ;;  %v1009_v62 = vsel %vm1008_vm13, %v3540_v34, %v1005_v59 }
 0x98c   :  { %v2520_v1 = vmul.f32 %v2516_v3, %v2392_v33  ;;  %v1014_v58 = vsel %vm1011_vm9, %v1013_v42, %v1009_v62  ;;  %v6932_v44 = vpop.permute.xlu0 %2694  ;;  %v8011_v33 = vld [vmem:[#allocation29_spill] sm:$0xff]  ;;  %vm8017_vm9 = vcmp.lt.s32.totalorder %v7995_v15, 127 }
 0x98d   :  { %v6934_v9 = vpop.permute.xlu1 %2750  ;;  %vm8012_vm2 = vnez %v8011_v33 }
 0x98e   :  { %v6884_v13 = vmul.f32 %v2520_v1, %v1014_v58 }
 0x990   :  { %2655 = vrot.lane.b32.xlu0 %v6835_v40, %s7990_s9 }
 0x991   :  { %2587 = vrot.lane.b32.xlu2 %v6835_v40, %s3656_s28  ;;  %2681 = vrot.lane.b32.xlu1 %v6833_v25, %s7991_s7 }
 0x998   :  { %2528 = vrot.lane.b32.xlu0 %v2523_v43, %s3653_s0 }
 0x999   :  { %2653 = vrot.lane.b32.xlu2 %v6833_v25, %s7990_s9  ;;  %2709 = vrot.lane.b32.xlu1 %v6833_v25, %s7992_s6 }
 0x9a0   :  { %2553 = vrot.lane.b32.xlu0 %v2523_v43, %s3654_s27 }
 0x9a1   :  { %2613 = vrot.lane.b32.xlu2 %v6833_v25, %s3658_s29  ;;  %2530 = vrot.lane.b32.xlu1 %v6884_v13, %s3653_s0 }
 0x9a8   :  { %2649 = vrot.lane.b32.xlu0 %v2523_v43, %s7990_s9 }
 0x9a9   :  { %2737 = vrot.lane.b32.xlu2 %v6833_v25, %s7993_s22  ;;  %2555 = vrot.lane.b32.xlu1 %v6884_v13, %s3654_s27 }
 0x9b0   :  { %2679 = vrot.lane.b32.xlu0 %v6884_v13, %s7991_s7 }
 0x9b1   :  { %2583 = vrot.lane.b32.xlu1 %v6884_v13, %s3656_s28  ;;  %2581 = vrot.lane.b32.xlu2 %v2523_v43, %s3656_s28 }
 0x9b8   :  { %2733 = vrot.lane.b32.xlu0 %v2523_v43, %s7993_s22 }
 0x9b9   :  { %2609 = vrot.lane.b32.xlu1 %v2523_v43, %s3658_s29  ;;  %2611 = vrot.lane.b32.xlu2 %v6884_v13, %s3658_s29 }
 0x9c0   :  { %2711 = vrot.lane.b32.xlu0 %v6835_v40, %s7992_s6 }
 0x9c1   :  { %2651 = vrot.lane.b32.xlu1 %v6884_v13, %s7990_s9  ;;  %2677 = vrot.lane.b32.xlu2 %v2523_v43, %s7991_s7 }
 0x9c9   :  { %2705 = vrot.lane.b32.xlu1 %v2523_v43, %s7992_s6  ;;  %2707 = vrot.lane.b32.xlu2 %v6884_v13, %s7992_s6 }
 0x9d1   :  { %2735 = vrot.lane.b32.xlu1 %v6884_v13, %s7993_s22  ;;  %2683 = vrot.lane.b32.xlu2 %v6835_v40, %s7991_s7 }
 0x9d9   :  { %2762 = vperm.xlu1 %3507, %v6582_v2   ;;  %2739 = vrot.lane.b32.xlu2 %v6835_v40, %s7993_s22 }
 0x9db   :  { %v2535_v0 = vpop.permute.xlu2 %2534 }
 0x9e1   :  { %2917 = vperm.xlu2 %3508, %v6582_v2   ;;  %3509 = vset.pattern.permute.xlu1 %v7994_v37  ;;  %v8015_v2 = vld [vmem:[#allocation15_spill] sm:$0xff] }
 0x9e2   :  { %vm8016_vm13 = vnez %v8015_v2 }
 0x9e3   :  { %v2560_v47 = vpop.permute.xlu2 %2559 }
 0x9e9   :  { %3511 = vset.pattern.permute.xlu2 %v7946_v54 }
 0x9eb   :  { %v2588_v35 = vpop.permute.xlu2 %2587 }
 0x9f2   :  { %v2533_v4 = vpop.permute.xlu0 %2532 }
 0x9f3   :  { %v6937_v55 = vpop.permute.xlu2 %2653  ;;  %v6939_v48 = vpop.permute.xlu1 %2615  ;;  %v2536_v41 = vsel %vm7996_vm6, %v2533_v4, %v2535_v0  ;;  %vm8018_vm6 = vmmov %vm7998_vm5 }
 0x9f4   :  { %v2543_v53 = vsel %vm3945_vm11, %v2536_v41, 0.0  ;;  %vm8006_vm11 = vnez %v8005_v8 }
 0x9f5   :  { %v2552_v21 = vmul.f32 %v6919_v32, %v2543_v53 }
 0x9fa   :  { %v2586_v30 = vpop.permute.xlu0 %2585 }
 0x9fb   :  { %v2614_v25 = vpop.permute.xlu2 %2613  ;;  %v2589_v11 = vsel %vm7998_vm5, %v2586_v30, %v2588_v35  ;;  %v2558_v63 = vpop.permute.xlu1 %2557 }
 0x9fc   :  { %v2617_v22 = vsel %vm7999_vm1, %v2614_v25, %v6939_v48  ;;  %v2561_v24 = vsel %vm8000_vm4, %v2558_v63, %v2560_v47  ;;  %v2596_v5 = vsel %vm8002_vm15, %v2589_v11, 0.0  ;;  %vm8021_vm1 = vmmov %vm8017_vm9  ;;  %vm8022_vm4 = vcmp.lt.s32.totalorder %v7995_v15, 1 }
 0x9fd   :  { %v2568_v14 = vsel %vm8004_vm14, %v2561_v24, 0.0  ;;  %v2624_v27 = vsel %vm8006_vm11, %v2617_v22, 0.0  ;;  %v2604_v19 = vmul.f32 %v6926_v26, %v2596_v5  ;;  %v8019_v24 = vld [vmem:[#allocation14_spill] sm:$0xff]  ;;  %vm8023_vm15 = vmmov %vm8007_vm7 }
 0x9fe   :  { %v2576_v7 = vmul.f32 %v6921_v46, %v2568_v14  ;;  %v2632_v28 = vmul.f32 %v6783_v36, %v2624_v27  ;;  %vm8020_vm5 = vnez %v8019_v24  ;;  %vm8026_vm11 = vmmov %vm8018_vm6  ;;  %v8027_v27 = vld [vmem:[#allocation38_spill] sm:$0xff] }
 0xa00   :  { %v2580_v10 = vadd.f32 %v2576_v7, %v2552_v21  ;;  %v8024_v7 = vld [vmem:[#allocation56_spill] sm:$0xff] }
 0xa01   :  { %vm8025_vm14 = vnez %v8024_v7 }
 0xa02   :  { %v2608_v31 = vadd.f32 %v2604_v19, %v2580_v10  ;;  %v2656_v34 = vpop.permute.xlu0 %2655 }
 0xa03   :  { %v6962_v38 = vpop.permute.xlu2 %2737  ;;  %v6964_v43 = vpop.permute.xlu1 %2681 }
 0xa04   :  { %v2636_v18 = vadd.f32 %v2632_v28, %v2608_v31 }
 0xa06   :  { %v2648_v49 = vadd.f32 %v2644_v29, %v2636_v18  ;;  %v8033_v18 = vld [vmem:[#allocation31_spill] sm:$0xff] }
 0xa0a   :  { %v2529_v12 = vpop.permute.xlu0 %2528 }
 0xa0b   :  { %v2582_v23 = vpop.permute.xlu2 %2581  ;;  %v6968_v57 = vpop.permute.xlu1 %2709  ;;  %v2539_v60 = vsel %vm8007_vm7, %v2535_v0, %v2529_v12  ;;  %vm8028_vm7 = vnez %v8027_v27 }
 0xa0c   :  { %v2540_v39 = vsel %vm8009_vm3, %v2539_v60, 0.0  ;;  %v2592_v22 = vsel %vm8018_vm6, %v2588_v35, %v2582_v23  ;;  %vm8029_vm3 = vmmov %vm8010_vm0  ;;  %v8035_v60 = vld [vmem:[#allocation22_spill] sm:$0xff] }
 0xa0d   :  { %v2549_v62 = vmul.f32 %v6919_v32, %v2540_v39  ;;  %v2593_v19 = vsel %vm8028_vm7, %v2592_v22, 0.0 }
 0xa0e   :  { %v2601_v33 = vmul.f32 %v6926_v26, %v2593_v19 }
 0xa12   :  { %v2554_v59 = vpop.permute.xlu0 %2553 }
 0xa13   :  { %v2612_v3 = vpop.permute.xlu2 %2611  ;;  %v2564_v17 = vsel %vm8010_vm0, %v2560_v47, %v2554_v59  ;;  %v2531_v6 = vpop.permute.xlu1 %2530  ;;  %vm8030_vm0 = vmmov %vm8018_vm6 }
 0xa14   :  { %v2565_v40 = vsel %vm8012_vm2, %v2564_v17, 0.0  ;;  %v2537_v47 = vsel %vm8014_vm10, %v2531_v6, %v2533_v4  ;;  %v2618_v4 = vsel %vm8022_vm4, %v2612_v3, %v2614_v25  ;;  %v2538_v21 = vsel %vm8023_vm15, %v2529_v12, %v2531_v6  ;;  %vm8045_vm15 = vmmov %vm8022_vm4 }
 0xa15   :  { %v2573_v1 = vmul.f32 %v6921_v46, %v2565_v40  ;;  %v2542_v52 = vsel %vm8020_vm5, %v2537_v47, 0.0  ;;  %vm8036_vm10 = vnez %v8035_v60  ;;  %vm8043_vm5 = vcmp.lt.s32.totalorder %v7995_v15, 113 }
 0xa16   :  { %v2551_v10 = vmul.f32 %v6919_v32, %v2542_v52 }
 0xa17   :  { %v2577_v42 = vadd.f32 %v2573_v1, %v2549_v62  ;;  %v8041_v62 = vld [vmem:[#allocation39_spill] sm:$0xff] }
 0xa18   :  { %vm8042_vm6 = vnez %v8041_v62  ;;  %v8064_v62 = vld [vmem:[#allocation69_spill] sm:$0xff] }
 0xa1a   :  { %v6980_v58 = vpop.permute.xlu0 %2649 }
 0xa1b   :  { %v6982_v0 = vpop.permute.xlu2 %2677  ;;  %v2556_v37 = vpop.permute.xlu1 %2555  ;;  %v2660_v11 = vsel %vm8017_vm9, %v2656_v34, %v6980_v58 }
 0xa1c   :  { %v2562_v41 = vsel %vm8013_vm8, %v2556_v37, %v2558_v63  ;;  %v2657_v63 = vsel %vm8021_vm1, %v6937_v55, %v2656_v34  ;;  %v2664_v35 = vsel %vm8025_vm14, %v2660_v11, 0.0  ;;  %v2563_v25 = vsel %vm8029_vm3, %v2554_v59, %v2556_v37  ;;  %v8031_v34 = vld [vmem:[#allocation64_spill] sm:$0xff]  ;;  %vm8044_vm1 = vmmov %vm8043_vm5 }
 0xa1d   :  { %v2567_v53 = vsel %vm8016_vm13, %v2562_v41, 0.0  ;;  %vm8032_vm2 = vnez %v8031_v34  ;;  %vm8034_vm8 = vnez %v8033_v18  ;;  %vm8038_vm13 = vnez %v8037_v50 }
 0xa1e   :  { %v2575_v5 = vmul.f32 %v6921_v46, %v2567_v53  ;;  %v2663_v29 = vsel %vm8032_vm2, %v2657_v63, 0.0  ;;  %v2623_v12 = vsel %vm8034_vm8, %v2618_v4, 0.0  ;;  %v2541_v39 = vsel %vm8038_vm13, %v2538_v21, 0.0  ;;  %v8048_v21 = vld [vmem:[#allocation58_spill] sm:$0xff] }
 0xa1f   :  { %v2672_v17 = vmul.f32 %v6928_v16, %v2664_v35  ;;  %v2631_v37 = vmul.f32 %v6783_v36, %v2623_v12  ;;  %v2671_v47 = vmul.f32 %v6928_v16, %v2663_v29  ;;  %v2550_v2 = vmul.f32 %v6919_v32, %v2541_v39  ;;  %v8050_v35 = vld [vmem:[#allocation46_spill] sm:$0xff] }
 0xa20   :  { %v2579_v6 = vadd.f32 %v2575_v5, %v2551_v10  ;;  %v2605_v53 = vadd.f32 %v2601_v33, %v2577_v42  ;;  %vm8051_vm7 = vnez %v8050_v35  ;;  %vm8056_vm8 = vcmp.lt.s32.totalorder %v7995_v15, 127  ;;  %v8058_v33 = vld [vmem:[#allocation71_spill] sm:$0xff] }
 0xa21   :  { %v2676_v11 = vadd.f32 %v2672_v17, %v2648_v49  ;;  %v8046_v49 = vld [vmem:[#allocation65_spill] sm:$0xff]  ;;  %vm8059_vm13 = vnez %v8058_v33 }
 0xa22   :  { %v2680_v28 = vpop.permute.xlu0 %2679  ;;  %vm8047_vm14 = vnez %v8046_v49  ;;  %v8076_v49 = vld [vmem:[#allocation74_spill] sm:$0xff] }
 0xa23   :  { %v7003_v51 = vpop.permute.xlu2 %2707  ;;  %v2584_v14 = vpop.permute.xlu1 %2583 }
 0xa24   :  { %v2590_v8 = vsel %vm8026_vm11, %v2584_v14, %v2586_v30  ;;  %v2591_v31 = vsel %vm8030_vm0, %v2582_v23, %v2584_v14  ;;  %v8039_v23 = vld [vmem:[#allocation30_spill] sm:$0xff]  ;;  %vm8049_vm11 = vnez %v8048_v21  ;;  %vm8054_vm0 = vmmov %vm8044_vm1 }
 0xa25   :  { %v2595_v30 = vsel %vm8036_vm10, %v2590_v8, 0.0  ;;  %vm8040_vm9 = vnez %v8039_v23  ;;  %v2594_v1 = vsel %vm8042_vm6, %v2591_v31, 0.0  ;;  %v2686_v50 = vsel %vm8054_vm0, %v2680_v28, %v6964_v43  ;;  %vm8055_vm2 = vmmov %vm8054_vm0  ;;  %v8060_v23 = vld [vmem:[#allocation72_spill] sm:$0xff] }
 0xa26   :  { %v2603_v59 = vmul.f32 %v6926_v26, %v2595_v30  ;;  %v2566_v40 = vsel %vm8040_vm9, %v2563_v25, 0.0  ;;  %v2602_v24 = vmul.f32 %v6926_v26, %v2594_v1  ;;  %v2687_v39 = vsel %vm8055_vm2, %v6982_v0, %v2680_v28  ;;  %vm8057_vm10 = vmmov %vm8056_vm8 }
 0xa27   :  { %v2574_v22 = vmul.f32 %v6921_v46, %v2566_v40  ;;  %vm8061_vm9 = vnez %v8060_v23  ;;  %vm8077_vm0 = vnez %v8076_v49  ;;  %vm8078_vm2 = vcmp.lt.s32.totalorder %v7995_v15, 111 }
 0xa28   :  { %v2607_v41 = vadd.f32 %v2603_v59, %v2579_v6  ;;  %v2642_v59 = vmul.f32 %v6829_v61, %v6884_v13  ;;  %v2690_v40 = vsel %vm8061_vm9, %v2686_v50, 0.0 }
 0xa29   :  { %v2578_v25 = vadd.f32 %v2574_v22, %v2550_v2 }
 0xa2a   :  { %v2635_v52 = vadd.f32 %v2631_v37, %v2607_v41  ;;  %v2734_v31 = vpop.permute.xlu0 %2733 }
 0xa2b   :  { %v2684_v63 = vpop.permute.xlu2 %2683  ;;  %v2610_v4 = vpop.permute.xlu1 %2609  ;;  %v2606_v12 = vadd.f32 %v2602_v24, %v2578_v25  ;;  %v8084_v25 = vld [vmem:[#allocation62_spill] sm:$0xff] }
 0xa2c   :  { %v2685_v5 = vsel %vm8043_vm5, %v6964_v43, %v2684_v63  ;;  %v2688_v14 = vsel %vm8044_vm1, %v2684_v63, %v6982_v0  ;;  %v2619_v32 = vsel %vm8022_vm4, %v2610_v4, %v2612_v3  ;;  %v2620_v46 = vsel %vm8045_vm15, %v6939_v48, %v2610_v4  ;;  %v8052_v3 = vld [vmem:[#allocation47_spill] sm:$0xff]  ;;  %v8062_v0 = vld [vmem:[#allocation66_spill] sm:$0xff] }
 0xa2d   :  { %v2647_v26 = vadd.f32 %v6840_v20, %v2635_v52  ;;  %v2691_v42 = vsel %vm8047_vm14, %v2685_v5, 0.0  ;;  %v2692_v7 = vsel %vm8049_vm11, %v2688_v14, 0.0  ;;  %v2621_v8 = vsel %vm8051_vm7, %v2620_v46, 0.0  ;;  %v8070_v4 = vld [vmem:[#allocation67_spill] sm:$0xff] }
 0xa2e   :  { %v2699_v27 = vmul.f32 %v6932_v44, %v2691_v42  ;;  %v2700_v19 = vmul.f32 %v6932_v44, %v2692_v7  ;;  %vm8053_vm3 = vnez %v8052_v3  ;;  %v2629_v48 = vmul.f32 %v6783_v36, %v2621_v8  ;;  %v8072_v14 = vld [vmem:[#allocation59_spill] sm:$0xff] }
 0xa2f   :  { %v2622_v10 = vsel %vm8053_vm3, %v2619_v32, 0.0  ;;  %v2675_v20 = vadd.f32 %v2671_v47, %v2647_v26  ;;  %v2689_v43 = vsel %vm8059_vm13, %v2687_v39, 0.0  ;;  %vm8063_vm6 = vnez %v8062_v0  ;;  %v8074_v46 = vld [vmem:[#allocation75_spill] sm:$0xff]  ;;  %vm8081_vm13 = vmmov %vm8078_vm2 }
 0xa30   :  { %v2630_v34 = vmul.f32 %v6783_v36, %v2622_v10  ;;  %v2704_v29 = vadd.f32 %v2700_v19, %v2676_v11  ;;  %v2633_v18 = vadd.f32 %v2629_v48, %v2605_v53  ;;  %vm8065_vm5 = vnez %v8064_v62  ;;  %v8082_v10 = vld [vmem:[#allocation73_spill] sm:$0xff] }
 0xa31   :  { %v2703_v60 = vadd.f32 %v2699_v27, %v2675_v20  ;;  %v2697_v13 = vmul.f32 %v6932_v44, %v2689_v43  ;;  %vm8066_vm1 = vcmp.lt.s32.totalorder %v7995_v15, 112  ;;  %vm8071_vm11 = vnez %v8070_v4 }
 0xa32   :  { %v2645_v30 = vadd.f32 %v6866_v56, %v2633_v18  ;;  %v2634_v17 = vadd.f32 %v2630_v34, %v2606_v12  ;;  %v2712_v41 = vpop.permute.xlu0 %2711  ;;  %vm8067_vm4 = vmmov %vm8066_vm1  ;;  %vm8073_vm7 = vnez %v8072_v14  ;;  %vm8075_vm3 = vnez %v8074_v46  ;;  %v8086_v34 = vld [vmem:[#allocation80_spill] sm:$0xff]  ;;  %v8088_v12 = vld [vmem:[#allocation81_spill] sm:$0xff] }
 0xa33   :  { %v2652_v6 = vpop.permute.xlu1 %2651  ;;  %v2713_v24 = vsel %vm8066_vm1, %v6968_v57, %v2712_v41  ;;  %vm8068_vm15 = vmmov %vm8066_vm1  ;;  %v2740_v63 = vpop.permute.xlu2 %2739  ;;  %vm8083_vm9 = vnez %v8082_v10 }
 0xa34   :  { %v2658_v36 = vsel %vm8056_vm8, %v2652_v6, %v6937_v55  ;;  %v2659_v56 = vsel %vm8057_vm10, %v6980_v58, %v2652_v6  ;;  %v2646_v55 = vadd.f32 %v2642_v59, %v2634_v17  ;;  %v2698_v58 = vmul.f32 %v6932_v44, %v2690_v40  ;;  %vm8069_vm14 = vmmov %vm8066_vm1 }
 0xa35   :  { %v2661_v28 = vsel %vm8063_vm6, %v2659_v56, 0.0  ;;  %v2662_v1 = vsel %vm8065_vm5, %v2658_v36, 0.0  ;;  %v2719_v5 = vsel %vm8071_vm11, %v2713_v24, 0.0  ;;  %vm8079_vm8 = vmmov %vm8078_vm2  ;;  %vm8085_vm6 = vnez %v8084_v25 }
 0xa36   :  { %v2669_v37 = vmul.f32 %v6928_v16, %v2661_v28  ;;  %v2670_v61 = vmul.f32 %v6928_v16, %v2662_v1  ;;  %v2714_v16 = vsel %vm8068_vm15, %v7003_v51, %v6968_v57  ;;  %v2741_v57 = vsel %vm8078_vm2, %v6962_v38, %v2740_v63  ;;  %vm8080_vm10 = vmmov %vm8078_vm2 }
 0xa37   :  { %v2718_v26 = vsel %vm8075_vm3, %v2714_v16, 0.0  ;;  %v2727_v21 = vmul.f32 %v6917_v45, %v2719_v5  ;;  %v2747_v48 = vsel %vm8083_vm9, %v2741_v57, 0.0  ;;  %vm8087_vm5 = vnez %v8086_v34  ;;  %v3622_v5 = vld [vmem:[%s7299_s5] sm:$0xf] }
 0xa38   :  { %v2673_v47 = vadd.f32 %v2669_v37, %v2645_v30  ;;  %v2674_v2 = vadd.f32 %v2670_v61, %v2646_v55  ;;  %v2726_v8 = vmul.f32 %v6917_v45, %v2718_v26  ;;  %vm8089_vm1 = vnez %v8088_v12  ;;  %v3623_v26 = vld [vmem:[%s7304_s10] sm:$0xf]  ;;  %v2942_v12 = vld.sshfl [vmem:[#allocation1 + $0x8] sm:$0xff pattern:$0x73625140] }
 0xa39   :  { %v2755_v15 = vmul.f32 %v6934_v9, %v2747_v48  ;;  %3384 = vmatpush.msk.msra.mxu0 %vm761_vm12, %v2942_v12 }
 0xa3a   :  { %v2702_v53 = vadd.f32 %v2698_v58, %v2674_v2  ;;  %v2701_v11 = vadd.f32 %v2697_v13, %v2673_v47 }
 0xa3b   :  { %v2706_v22 = vpop.permute.xlu1 %2705 }
 0xa3c   :  { %v2716_v52 = vsel %vm8067_vm4, %v2712_v41, %v2706_v22  ;;  %v2715_v44 = vsel %vm8069_vm14, %v2706_v22, %v7003_v51  ;;  %v2744_v51 = vsel %vm8079_vm8, %v2740_v63, %v2734_v31  ;;  %v2730_v6 = vadd.f32 %v2726_v8, %v2702_v53 }
 0xa3d   :  { %v2720_v32 = vsel %vm8073_vm7, %v2716_v52, 0.0  ;;  %v2717_v42 = vsel %vm8077_vm0, %v2715_v44, 0.0  ;;  %v2748_v20 = vsel %vm8085_vm6, %v2744_v51, 0.0  ;;  %vm8090_vm4 = vcmask 1043456  }
 0xa3e   :  { %v2728_v7 = vmul.f32 %v6917_v45, %v2720_v32  ;;  %v2725_v27 = vmul.f32 %v6917_v45, %v2717_v42  ;;  %v2731_v45 = vadd.f32 %v2727_v21, %v2703_v60  ;;  %vm8091_vm15 = vmmov %vm8090_vm4  ;;  %vm8094_vm7 = vcmask 15360  }
 0xa3f   :  { %vm8092_vm14 = vmmov %vm8090_vm4  ;;  %vm8096_vm0 = vcmask 31744  }
 0xa40   :  { %v2732_v50 = vadd.f32 %v2728_v7, %v2704_v29  ;;  %v2729_v17 = vadd.f32 %v2725_v27, %v2701_v11  ;;  %v2759_v56 = vadd.f32 %v2755_v15, %v2731_v45  ;;  %vm8093_vm11 = vmmov %vm8090_vm4  ;;  %v2918_v27 = vpop.permute.xlu2 %2917  ;;  %v2943_v45 = vld.sshfl [vmem:[#allocation1 + $0x10] sm:$0xff pattern:$0x73625140] }
 0xa41   :  { %vm8095_vm3 = vmmov %vm8090_vm4  ;;  %3386 = vmatpush.msk.msra.mxu1 %vm761_vm12, %v2943_v45 }
 0xa42   :  { %vm8100_vm9 = vmmov %vm8094_vm7 }
 0xa43   :  { %v2736_v35 = vpop.permute.xlu1 %2735  ;;  %vm8101_vm6 = vmmov %vm8094_vm7 }
 0xa44   :  { %v2742_v19 = vsel %vm8080_vm10, %v2736_v35, %v6962_v38  ;;  %v2743_v3 = vsel %vm8081_vm13, %v2734_v31, %v2736_v35  ;;  %v2756_v31 = vmul.f32 %v6934_v9, %v2748_v20  ;;  %vm8099_vm13 = vmmov %vm8095_vm3 }
 0xa45   :  { %v2745_v18 = vsel %vm8087_vm5, %v2743_v3, 0.0  ;;  %v2746_v30 = vsel %vm8089_vm1, %v2742_v19, 0.0  ;;  %vm8102_vm5 = vmmov %vm8101_vm6 }
 0xa46   :  { %v2753_v39 = vmul.f32 %v6934_v9, %v2745_v18  ;;  %v2754_v38 = vmul.f32 %v6934_v9, %v2746_v30  ;;  %v2760_v33 = vadd.f32 %v2756_v31, %v2732_v50  ;;  %v2941_v18 = vld.sshfl [vmem:[#allocation1] sm:$0xff pattern:$0x73625140]  ;;  %v8097_v30 = vld [vmem:[#allocation6_spill] sm:$0xff]  ;;  %vm8103_vm1 = vmmov %vm8102_vm5 }
 0xa47   :  { %3382 = vmatpush.msk.msrb.mxu3 %vm761_vm12, %v2941_v18  ;;  %3056 = vst [vmem:[#allocation1 + $0x1] ss:$2 sm:$0xff] %v8097_v30  ;;  %v2944_v50 = vld.sshfl [vmem:[#allocation1 + $0x18] sm:$0xff pattern:$0x73625140] }
 0xa48   :  { %v2757_v36 = vadd.f32 %v2753_v39, %v2729_v17  ;;  %v2758_v59 = vadd.f32 %v2754_v38, %v2730_v6  ;;  %v8098_v39 = vld [vmem:[#allocation5_spill] sm:$0xff]  ;;  %v3071_v17 = vld [vmem:[%s7305_s11] sm:$0xff] }
 0xa49   :  { %3058 = vst [vmem:[#allocation1 + $0x11] ss:$2 sm:$0xff] %v8098_v39  ;;  %v3072_v6 = vld [vmem:[%s7305_s11 + $0x8] sm:$0xff]  ;;  %s3703_s11 = smov [#allocation2]  }
 0xa4b   :  { %v2763_v43 = vpop.permute.xlu1 %2762 }
 0xa4c   :  { %v7135_v23 = vadd.f32 %v2763_v43, %v2757_v36  ;;  %v7137_v40 = vadd.f32 %v2763_v43, %v2758_v59  ;;  %v7139_v29 = vadd.f32 %v2763_v43, %v2759_v56  ;;  %v7141_v60 = vadd.f32 %v2763_v43, %v2760_v33 }
 0xa4e   :  { %v2769_v0 = vmul.f32 %v7135_v23, %v7135_v23  ;;  %v2770_v9 = vmul.f32 %v7137_v40, %v7137_v40  ;;  %v2771_v28 = vmul.f32 %v7139_v29, %v7139_v29  ;;  %v2772_v62 = vmul.f32 %v7141_v60, %v7141_v60 }
 0xa50   :  { %v2777_v1 = vrot.slane %v2769_v0, 4  ;;  %v2778_v55 = vrot.slane %v2770_v9, 4  ;;  %v2779_v37 = vrot.slane %v2771_v28, 4  ;;  %v2780_v61 = vrot.slane %v2772_v62, 4 }
 0xa51   :  { %v3060_v9 = vld.sshfl [vmem:[#allocation1 + $0x8] sm:$0xff pattern:$0x75316420]  ;;  %v3061_v62 = vld.sshfl [vmem:[#allocation1 + $0x10] sm:$0xff pattern:$0x75316420] }
 0xa52   :  { %v2785_v13 = vsel %vm8090_vm4, %v7135_v23, %v2777_v1  ;;  %v2786_v58 = vsel %vm8091_vm15, %v7137_v40, %v2778_v55  ;;  %v2787_v41 = vsel %vm8092_vm14, %v7139_v29, %v2779_v37  ;;  %v2788_v47 = vsel %vm8093_vm11, %v7141_v60, %v2780_v61  ;;  %vm8104_vm4 = vmmov %vm8095_vm3 }
 0xa53   :  { %2805 = vmatmul.f32.vlgmr.msra.gmra.mxu2 %v2785_v13  ;;  %2825 = vmatmul.f32.vlgmr.msra.gmra.mxu3 %v2786_v58  ;;  %vm8105_vm15 = vmmov %vm8095_vm3 }
 0xa54   :  { %2845 = vmatmul.f32.vlgmr.msrb.gmra.mxu0 %v2787_v41  ;;  %2865 = vmatmul.f32.vlgmr.msrb.gmra.mxu1 %v2788_v47  ;;  %v3059_v47 = vld.sshfl [vmem:[#allocation1] sm:$0xff pattern:$0x75316420]  ;;  %vm8106_vm14 = vmmov %vm8095_vm3 }
 0xa55   :  { %vm8107_vm11 = vmmov %vm8095_vm3 }
 0xad1   :  { %v2846_v22 = vpop.f32.mrf.mxu0  ;;  %v2866_v52 = vpop.f32.mrf.mxu1 }
 0xad6   :  { %v2806_v2 = vpop.f32.mrf.mxu2  ;;  %v2826_v53 = vpop.f32.mrf.mxu3 }
 0xad7   :  { %v2827_v11 = vadd.f32 %v2826_v53, %v2806_v2  ;;  %v3062_v53 = vld.sshfl [vmem:[#allocation1 + $0x18] sm:$0xff pattern:$0x75316420] }
 0xad9   :  { %v2847_v24 = vadd.f32 %v2846_v22, %v2827_v11 }
 0xadb   :  { %v2867_v16 = vadd.f32 %v2866_v52, %v2847_v24 }
 0xadd   :  { %v2870_v44 = vrot.slane %v2867_v16, 4 }
 0xadf   :  { %2871 = vrot.lane.b32.xlu0 %v2870_v44, %s3676_s15 }
 0xb51   :  { %v2872_v63 = vpop.permute.xlu0 %2871 }
 0xb52   :  { %v2874_v4 = vsel %vm8094_vm7, %v2867_v16, %v2872_v63 }
 0xb53   :  { %3380 = vmatpush.msk.msrb.mxu2 %vm8095_vm3, %v2874_v4 }
 0xb54   :  { %3381 = vmatmul.msk.f32.vlgmr.msrb.gmra.mxu2 %vm8096_vm0, %v3622_v5 }
 0xb55   :  { %3388 = vmatpush.msk.msra.mxu2 %vm761_vm12, %v2944_v50  ;;  %vm3083_vm12 = vcmask 64512  }
 0xbd7   :  { %v2895_v14 = vpop.f32.mrf.mxu2 }
 0xbd8   :  { %v2898_v32 = vmul.f32 0.00390625, %v2895_v14 }
 0xbda   :  { %v2899_v46 = vmul.f32 %v2898_v32, %v2898_v32 }
 0xbdc   :  { %2901 = vrot.lane.b32.xlu1 %v2899_v46, %s3676_s15 }
 0xbe4   :  { %2927 = vperm.xlu1 %3509, %v3623_v26  }
 0xbec   :  { %3510 = vset.pattern.permute.xlu1 %v7946_v54 }
 0xbed   :  { %3075 = vperm.xlu1 %3510, %v3071_v17  }
 0xc4e   :  { %v2902_v49 = vpop.permute.xlu1 %2901 }
 0xc4f   :  { %v2904_v42 = vsub.f32 %v2898_v32, %v2902_v49 }
 0xc51   :  { %v2905_v57 = vadd.f32 1e-05, %v2904_v42 }
 0xc53   :  { %3541 = vrsqrt.f32 %v2905_v57  ;;  %vm2912_vm8 = vweird.f32 %v2905_v57 }
 0xc56   :  { %v2928_v54 = vpop.permute.xlu1 %2927 }
 0xc59   :  { %v3542_v51 = vpop.eup %3541 }
 0xc5a   :  { %v2907_v21 = vmul.f32 %v3542_v51, %v2905_v57  ;;  %vm2913_vm2 = vweird.f32 %v3542_v51 }
 0xc5b   :  { %vm2914_vm10 = vmor %vm2912_vm8, %vm2913_vm2 }
 0xc5c   :  { %v2908_v7 = vmul.f32 %v3542_v51, %v2907_v21 }
 0xc5e   :  { %v2909_v35 = vmul.f32 0.5, %v2908_v7 }
 0xc60   :  { %v2910_v8 = vsub.f32 1.5, %v2909_v35 }
 0xc62   :  { %v2911_v19 = vmul.f32 %v3542_v51, %v2910_v8 }
 0xc64   :  { %v2915_v3 = vsel %vm2914_vm10, %v3542_v51, %v2911_v19 }
 0xc65   :  { %v2920_v10 = vmul.f32 %v2918_v27, %v2915_v3 }
 0xc67   :  { %2922 = vrot.lane.b32.xlu0 %v2920_v10, %s3677_s14 }
 0xcd9   :  { %v2923_v48 = vpop.permute.xlu0 %2922 }
 0xcda   :  { %v2925_v25 = vmul.f32 %v2923_v48, %v2898_v32 }
 0xcdc   :  { %v2930_v20 = vsub.f32 %v2928_v54, %v2925_v25 }
 0xcde   :  { %v2932_v34 = vrot.slane %v2930_v20, 4 }
 0xce0   :  { %2933 = vrot.lane.b32.xlu2 %v2932_v34, %s3676_s15 }
 0xce8   :  { %3080 = vperm.xlu2 %3511, %v3072_v6  }
 0xd3a   :  { %v2934_v38 = vpop.permute.xlu2 %2933 }
 0xd3b   :  { %v2936_v15 = vsel %vm8099_vm13, %v2920_v10, %v2934_v38 }
 0xd3c   :  { %2938 = vrot.lane.b32.xlu0 %v2936_v15, %s3677_s14  ;;  %s3325_s14 = sshll.u32 %s3703_s11, 4  ;;  %s3326_s14 = int_to_ptr.vmem [resolvable:$true] %s3325_s14 }
 0xdae   :  { %v2939_v31 = vpop.permute.xlu0 %2938 }
 0xdaf   :  { %3383 = vmatmul.msk.f32.vlgmr.msrb.gmra.mxu3 %vm8100_vm9, %v2939_v31  ;;  %3385 = vmatmul.msk.f32.vlgmr.msra.gmra.mxu0 %vm8101_vm6, %v2939_v31 }
 0xdb0   :  { %3387 = vmatmul.msk.f32.vlgmr.msra.gmra.mxu1 %vm8102_vm5, %v2939_v31  ;;  %3389 = vmatmul.msk.f32.vlgmr.msra.gmra.mxu2 %vm8103_vm1, %v2939_v31 }
 0xe2c   :  { %v2992_v36 = vpop.f32.mrf.mxu0 }
 0xe2d   :  { %v3036_v59 = vmul.f32 %v2992_v36, %v7137_v40  ;;  %v3044_v56 = vrot.slane %v2992_v36, 4  ;;  %v3012_v33 = vpop.f32.mrf.mxu1 }
 0xe2e   :  { %v3037_v43 = vmul.f32 %v3012_v33, %v7139_v29  ;;  %v3045_v0 = vrot.slane %v3012_v33, 4 }
 0xe2f   :  { %v3052_v28 = vadd.f32 %v3044_v56, %v3036_v59 }
 0xe30   :  { %v3053_v1 = vadd.f32 %v3045_v0, %v3037_v43 }
 0xe31   :  { %v3068_v55 = vsel %vm8104_vm4, %v3052_v28, %v3060_v9 }
 0xe32   :  { %v2972_v37 = vpop.f32.mrf.mxu3  ;;  %3126 = vmatpush.msrb.mxu0 %v3068_v55  ;;  %v3069_v61 = vsel %vm8105_vm15, %v3053_v1, %v3061_v62 }
 0xe33   :  { %v3035_v13 = vmul.f32 %v2972_v37, %v7135_v23  ;;  %v3043_v58 = vrot.slane %v2972_v37, 4  ;;  %v3032_v40 = vpop.f32.mrf.mxu2  ;;  %3149 = vmatpush.msrb.mxu1 %v3069_v61  ;;  %3392 = vmatmul.msk.f32.vlgmr.msrb.gmra.mxu0 %vm3083_vm12, %v3071_v17  ;;  %v3076_v23 = vpop.permute.xlu1 %3075 }
 0xe34   :  { %v3038_v29 = vmul.f32 %v3032_v40, %v7141_v60  ;;  %v3046_v41 = vrot.slane %v3032_v40, 4  ;;  %3394 = vmatmul.msk.f32.vlgmr.msrb.gmra.mxu1 %vm3083_vm12, %v3071_v17 }
 0xe35   :  { %v3051_v2 = vadd.f32 %v3043_v58, %v3035_v13 }
 0xe36   :  { %v3054_v11 = vadd.f32 %v3046_v41, %v3038_v29 }
 0xe37   :  { %v3067_v22 = vsel %vm8106_vm14, %v3051_v2, %v3059_v47 }
 0xe38   :  { %3103 = vmatpush.msra.mxu3 %v3067_v22  ;;  %v3070_v24 = vsel %vm8107_vm11, %v3054_v11, %v3062_v53 }
 0xe39   :  { %3172 = vmatpush.msrb.mxu2 %v3070_v24  ;;  %3390 = vmatmul.msk.f32.vlgmr.msra.gmra.mxu3 %vm3083_vm12, %v3071_v17 }
 0xe3a   :  { %3396 = vmatmul.msk.f32.vlgmr.msrb.gmra.mxu2 %vm3083_vm12, %v3071_v17 }
 0xe3b   :  { %3393 = vmatmul.msk.f32.gmra.mxu0 %vm3083_vm12, %v3072_v6 }
 0xe3c   :  { %3395 = vmatmul.msk.f32.gmra.mxu1 %vm3083_vm12, %v3072_v6 }
 0xe41   :  { %3391 = vmatmul.msk.f32.gmra.mxu3 %vm3083_vm12, %v3072_v6 }
 0xe42   :  { %3397 = vmatmul.msk.f32.gmra.mxu2 %vm3083_vm12, %v3072_v6 }
 0xeb0   :  { %v3128_v60 = vpop.f32.mrf.mxu0 }
 0xeb1   :  { %v3151_v52 = vpop.f32.mrf.mxu1  ;;  %v7207_v16 = vadd.f32 %v3128_v60, %v3076_v23 }
 0xeb2   :  { %v7209_v44 = vadd.f32 %v3151_v52, %v3076_v23 }
 0xeb3   :  { %v3185_v63 = vmul.f32 0.70710677, %v7207_v16 }
 0xeb4   :  { %v3186_v4 = vmul.f32 0.70710677, %v7209_v44 }
 0xeb5   :  { %v7213_v5 = vclamps-f32 %v3185_v63, 4.0 }
 0xeb6   :  { %v7215_v14 = vclamps-f32 %v3186_v4, 4.0 }
 0xeb7   :  { %v7219_v32 = vmul.f32 %v7213_v5, %v7213_v5 }
 0xeb8   :  { %v7223_v46 = vmul.f32 %v7215_v14, %v7215_v14 }
 0xeb9   :  { %v3201_v26 = vmul.f32 -2.7261424e-10, %v7219_v32  ;;  %v3249_v49 = vmul.f32 -1.45660715e-05, %v7219_v32 }
 0xeba   :  { %v3202_v42 = vmul.f32 -2.7261424e-10, %v7223_v46  ;;  %v3250_v57 = vmul.f32 -1.45660715e-05, %v7223_v46 }
 0xebb   :  { %v3205_v51 = vadd.f32 2.7706815e-08, %v3201_v26  ;;  %v3253_v21 = vadd.f32 -0.00021337405, %v3249_v49 }
 0xebc   :  { %v3206_v7 = vadd.f32 2.7706815e-08, %v3202_v42  ;;  %v3105_v35 = vpop.f32.mrf.mxu3  ;;  %v3254_v8 = vadd.f32 -0.00021337405, %v3250_v57 }
 0xebd   :  { %v3209_v27 = vmul.f32 %v3205_v51, %v7219_v32  ;;  %v7230_v19 = vadd.f32 %v3105_v35, %v3076_v23  ;;  %v3174_v3 = vpop.f32.mrf.mxu2  ;;  %v3257_v10 = vmul.f32 %v3253_v21, %v7219_v32 }
 0xebe   :  { %v3210_v48 = vmul.f32 %v3206_v7, %v7223_v46  ;;  %v7234_v54 = vadd.f32 %v3174_v3, %v3076_v23  ;;  %v3258_v25 = vmul.f32 %v3254_v8, %v7223_v46 }
 0xebf   :  { %v3213_v20 = vadd.f32 -2.101024e-06, %v3209_v27  ;;  %v3184_v34 = vmul.f32 0.70710677, %v7230_v19  ;;  %v3261_v50 = vadd.f32 -0.001682827, %v3257_v10 }
 0xec0   :  { %v3214_v18 = vadd.f32 -2.101024e-06, %v3210_v48  ;;  %v3187_v12 = vmul.f32 0.70710677, %v7234_v54  ;;  %v3262_v39 = vadd.f32 -0.001682827, %v3258_v25 }
 0xec1   :  { %v3217_v30 = vmul.f32 %v3213_v20, %v7219_v32  ;;  %v7240_v45 = vclamps-f32 %v3184_v34, 4.0  ;;  %v3265_v6 = vmul.f32 %v3261_v50, %v7219_v32 }
 0xec2   :  { %v3218_v38 = vmul.f32 %v3214_v18, %v7223_v46  ;;  %v7243_v15 = vclamps-f32 %v3187_v12, 4.0  ;;  %v3266_v36 = vmul.f32 %v3262_v39, %v7223_v46 }
 0xec3   :  { %v3221_v31 = vadd.f32 -5.6925062e-05, %v3217_v30  ;;  %v7247_v17 = vmul.f32 %v7240_v45, %v7240_v45  ;;  %v3269_v0 = vadd.f32 -0.0073733293, %v3265_v6 }
 0xec4   :  { %v3222_v59 = vadd.f32 -5.6925062e-05, %v3218_v38  ;;  %v7253_v56 = vmul.f32 %v7243_v15, %v7243_v15  ;;  %v3270_v9 = vadd.f32 -0.0073733293, %v3266_v36 }
 0xec5   :  { %v3225_v33 = vmul.f32 %v3221_v31, %v7219_v32  ;;  %v3200_v43 = vmul.f32 -2.7261424e-10, %v7247_v17  ;;  %v3248_v1 = vmul.f32 -1.45660715e-05, %v7247_v17  ;;  %v3273_v61 = vmul.f32 %v3269_v0, %v7219_v32 }
 0xec6   :  { %v3226_v28 = vmul.f32 %v3222_v59, %v7223_v46  ;;  %v3203_v62 = vmul.f32 -2.7261424e-10, %v7253_v56  ;;  %v3274_v13 = vmul.f32 %v3270_v9, %v7223_v46  ;;  %v3251_v52 = vmul.f32 -1.45660715e-05, %v7253_v56 }
 0xec7   :  { %v3229_v55 = vadd.f32 -0.00073499064, %v3225_v33  ;;  %v3204_v37 = vadd.f32 2.7706815e-08, %v3200_v43  ;;  %v3252_v29 = vadd.f32 -0.00021337405, %v3248_v1  ;;  %v3131_v1 = vpop.f32.mrf.mxu0 }
 0xec8   :  { %v3230_v58 = vadd.f32 -0.00073499064, %v3226_v28  ;;  %v3207_v40 = vadd.f32 2.7706815e-08, %v3203_v62  ;;  %v3277_v2 = vadd.f32 -0.014264739, %v3273_v61 }
 0xec9   :  { %v3233_v41 = vmul.f32 %v3229_v55, %v7219_v32  ;;  %v3208_v47 = vmul.f32 %v3204_v37, %v7247_v17  ;;  %v3278_v53 = vadd.f32 -0.014264739, %v3274_v13  ;;  %v3256_v24 = vmul.f32 %v3252_v29, %v7247_v17  ;;  %v3081_v55 = vpop.permute.xlu2 %3080  ;;  %v3154_v13 = vpop.f32.mrf.mxu1 }
 0xeca   :  { %v3234_v11 = vmul.f32 %v3230_v58, %v7223_v46  ;;  %v3211_v22 = vmul.f32 %v3207_v40, %v7253_v56  ;;  %3543 = vrcp.f32 %v3277_v2  ;;  %v3255_v42 = vadd.f32 -0.00021337405, %v3251_v52 }
 0xecb   :  { %v3237_v23 = vadd.f32 -0.0029546, %v3233_v41  ;;  %v3212_v60 = vadd.f32 -2.101024e-06, %v3208_v47  ;;  %3545 = vrcp.f32 %v3278_v53  ;;  %v3260_v26 = vadd.f32 -0.001682827, %v3256_v24 }
 0xecc   :  { %v3238_v63 = vadd.f32 -0.0029546, %v3234_v11  ;;  %v3215_v4 = vadd.f32 -2.101024e-06, %v3211_v22  ;;  %v3259_v8 = vmul.f32 %v3255_v42, %v7253_v56  ;;  %v3182_v11 = vmul.f32 0.5, %v7209_v44 }
 0xecd   :  { %v3216_v49 = vmul.f32 %v3212_v60, %v7247_v17  ;;  %v3241_v57 = vmul.f32 %v3237_v23, %v7219_v32  ;;  %v3264_v21 = vmul.f32 %v3260_v26, %v7247_v17 }
 0xece   :  { %v3219_v51 = vmul.f32 %v3215_v4, %v7253_v56  ;;  %v3242_v7 = vmul.f32 %v3238_v63, %v7223_v46  ;;  %v3263_v25 = vadd.f32 -0.001682827, %v3259_v8  ;;  %v3180_v8 = vmul.f32 0.5, %v7230_v19 }
 0xecf   :  { %v3220_v35 = vadd.f32 -5.6925062e-05, %v3216_v49  ;;  %v3268_v3 = vadd.f32 -0.0073733293, %v3264_v21  ;;  %v3245_v34 = vadd.f32 -0.016096033, %v3241_v57 }
 0xed0   :  { %v3223_v27 = vadd.f32 -5.6925062e-05, %v3219_v51  ;;  %v3544_v10 = vpop.eup %3543  ;;  %v3246_v30 = vadd.f32 -0.016096033, %v3242_v7  ;;  %v3267_v46 = vmul.f32 %v3263_v25, %v7253_v56  ;;  %v3108_v51 = vpop.f32.mrf.mxu3 }
 0xed1   :  { %v3224_v48 = vmul.f32 %v3220_v35, %v7247_v17  ;;  %v3546_v20 = vpop.eup %3545  ;;  %v3285_v32 = vmul.f32 %v3544_v10, %v3277_v2  ;;  %v3272_v12 = vmul.f32 %v3268_v3, %v7247_v17  ;;  %v3297_v43 = vmul.f32 %v7213_v5, %v3245_v34  ;;  %v3177_v25 = vpop.f32.mrf.mxu2 }
 0xed2   :  { %v3227_v18 = vmul.f32 %v3223_v27, %v7253_v56  ;;  %v3286_v39 = vmul.f32 %v3546_v20, %v3278_v53  ;;  %v3271_v33 = vadd.f32 -0.0073733293, %v3267_v46  ;;  %v3298_v28 = vmul.f32 %v7215_v14, %v3246_v30 }
 0xed3   :  { %v3228_v50 = vadd.f32 -0.00073499064, %v3224_v48  ;;  %v3289_v31 = vsub.f32 2.0, %v3285_v32  ;;  %v3276_v6 = vadd.f32 -0.014264739, %v3272_v12  ;;  %v3181_v5 = vmul.f32 0.5, %v7207_v16 }
 0xed4   :  { %v3231_v38 = vadd.f32 -0.00073499064, %v3227_v18  ;;  %v3290_v59 = vsub.f32 2.0, %v3286_v39  ;;  %v3275_v61 = vmul.f32 %v3271_v33, %v7253_v56  ;;  %v3132_v2 = vadd.f32 %v3131_v1, %v3081_v55 }
 0xed5   :  { %v3232_v36 = vmul.f32 %v3228_v50, %v7247_v17  ;;  %v3293_v9 = vmul.f32 %v3544_v10, %v3289_v31  ;;  %3547 = vrcp.f32 %v3276_v6  ;;  %v3155_v14 = vadd.f32 %v3154_v13, %v3081_v55 }
 0xed6   :  { %v3235_v0 = vmul.f32 %v3231_v38, %v7253_v56  ;;  %v3294_v37 = vmul.f32 %v3546_v20, %v3290_v59  ;;  %v3279_v41 = vadd.f32 -0.014264739, %v3275_v61  ;;  %v3109_v27 = vadd.f32 %v3108_v51, %v3081_v55 }
 0xed7   :  { %v3236_v62 = vadd.f32 -0.0029546, %v3232_v36  ;;  %v3301_v58 = vmul.f32 %v3297_v43, %v3293_v9  ;;  %v3178_v18 = vadd.f32 %v3177_v25, %v3081_v55 }
 0xed8   :  { %v3302_v29 = vmul.f32 %v3298_v28, %v3294_v37  ;;  %v3239_v47 = vadd.f32 -0.0029546, %v3235_v0  ;;  %3549 = vrcp.f32 %v3279_v41 }
 0xed9   :  { %v3240_v40 = vmul.f32 %v3236_v62, %v7247_v17  ;;  %v3305_v53 = vadd.f32 1.0, %v3301_v58 }
 0xeda   :  { %v3306_v22 = vadd.f32 1.0, %v3302_v29  ;;  %v3243_v4 = vmul.f32 %v3239_v47, %v7253_v56 }
 0xedb   :  { %v3548_v24 = vpop.eup %3547  ;;  %v3309_v23 = vmul.f32 %v3305_v53, %v3181_v5  ;;  %v3244_v60 = vadd.f32 -0.016096033, %v3240_v40 }
 0xedc   :  { %v3310_v52 = vmul.f32 %v3306_v22, %v3182_v11  ;;  %v3284_v63 = vmul.f32 %v3548_v24, %v3276_v6  ;;  %v3247_v44 = vadd.f32 -0.016096033, %v3243_v4 }
 0xedd   :  { %v3313_v17 = vadd.f32 %v3309_v23, %v3132_v2  ;;  %v3296_v42 = vmul.f32 %v7240_v45, %v3244_v60  ;;  %v3183_v45 = vmul.f32 0.5, %v7234_v54 }
 0xede   :  { %v3314_v26 = vadd.f32 %v3310_v52, %v3155_v14  ;;  %v3288_v49 = vsub.f32 2.0, %v3284_v63  ;;  %v3550_v16 = vpop.eup %3549  ;;  %v3299_v56 = vmul.f32 %v7243_v15, %v3247_v44 }
 0xedf   :  { %3317 = vst [vmem:[#allocation2 + $0x8] sm:$0xff] %v3313_v17  ;;  %v3287_v21 = vmul.f32 %v3550_v16, %v3279_v41 }
 0xee0   :  { %3318 = vst [vmem:[#allocation2 + $0x10] sm:$0xff] %v3314_v26  ;;  %v3292_v57 = vmul.f32 %v3548_v24, %v3288_v49 }
 0xee1   :  { %v3291_v35 = vsub.f32 2.0, %v3287_v21 }
 0xee2   :  { %v3300_v7 = vmul.f32 %v3296_v42, %v3292_v57 }
 0xee3   :  { %v3295_v10 = vmul.f32 %v3550_v16, %v3291_v35 }
 0xee4   :  { %v3304_v3 = vadd.f32 1.0, %v3300_v7 }
 0xee5   :  { %v3303_v20 = vmul.f32 %v3299_v56, %v3295_v10 }
 0xee6   :  { %v3308_v48 = vmul.f32 %v3304_v3, %v3180_v8 }
 0xee7   :  { %v3307_v32 = vadd.f32 1.0, %v3303_v20 }
 0xee8   :  { %v3312_v34 = vadd.f32 %v3308_v48, %v3109_v27 }
 0xee9   :  { %v3311_v19 = vmul.f32 %v3307_v32, %v3183_v45 }
 0xeea   :  { %3316 = vst [vmem:[#allocation2] sm:$0xff] %v3312_v34 }
 0xeeb   :  { %v3315_v12 = vadd.f32 %v3311_v19, %v3178_v18 }
 0xeed   :  { %3319 = vst [vmem:[#allocation2 + $0x18] sm:$0xff] %v3315_v12 }
 0xeee   :  { %3330 = dma.vmem_to_hbm [thread:$0]  %s3326_s14, 512, %s3328_s2, [#allocation3]  }
 0xeef   :  { %3648 = dma.done.wait [#allocation3], 512  }
 0xef0   :  { %3649 = vsyncadd [#allocation3], 4294966784 }
 0xef1   :  { %3335 = vsyncpa [#allocation3], 1 }

</bundles_post_ra>
